<compile_context>
chip_gen: v7x
topology: tpu7x:2x2x1
jax: 0.10.0
libtpu: 0.0.40
codegen_flags: <defaults>
</compile_context>

<pallas_src>
import functools
import math

import jax
import jax.numpy as jnp
from jax.experimental import pallas as pl
from jax.experimental.pallas import tpu as pltpu

# Real BERT sizes from the reference module.
D_MODEL = 768
D_FF = 768 * 4


def _gelu_exact(x):
    # x * 0.5 * (1 + erf(x / sqrt(2)))  -- matches the torch reference exactly.
    return x * 0.5 * (1.0 + jax.lax.erf(x / math.sqrt(2.0)))


def ffn_kernel(x_ref, w1_ref, b1_ref, w2_ref, b2_ref, o_ref, *, approximate):
    # x_ref:  (tm, d_model)   native-dtype row tile (cast to bf16 in-kernel)
    # w1_ref: (d_model, d_ff) bf16, VMEM-resident (constant index_map)
    # b1_ref: (1, d_ff)       f32
    # w2_ref: (d_ff, d_model) bf16, VMEM-resident
    # b2_ref: (1, d_model)    f32
    # o_ref:  (tm, d_model)   output tile
    x = x_ref[...].astype(w1_ref.dtype)

    # fc1: bf16 operands, f32 accumulation on the MXU.
    h = jnp.dot(x, w1_ref[...], preferred_element_type=jnp.float32)
    h = h + b1_ref[...]
    if approximate:
        # tanh gelu -> transcendental goes to the EUP slot (fast path, not
        # bit-identical to torch's erf gelu).
        h = jax.nn.gelu(h, approximate=True)
    else:
        h = _gelu_exact(h)

    # fc2: f32 intermediate rounded to bf16 for full MXU rate, f32 accumulation.
    out = jnp.dot(h.astype(w2_ref.dtype), w2_ref[...],
                  preferred_element_type=jnp.float32)
    o_ref[...] = (out + b2_ref[...]).astype(o_ref.dtype)


def _round_up(a, b):
    return (a + b - 1) // b * b


def _pick_row_tile(m, tm_max):
    """Pick a sublane-aligned row tile <= tm_max minimizing padded rows."""
    m8 = _round_up(m, 8)
    if m8 <= tm_max:
        return m8, m8  # single tile, pad only to the next multiple of 8
    best_tm, best_pad_total = None, None
    cand = tm_max
    while cand >= 64:
        m_pad = _round_up(m, cand)
        if best_pad_total is None or m_pad < best_pad_total:
            best_tm, best_pad_total = cand, m_pad
        cand //= 2
    return best_tm, best_pad_total


def poswise_ffn(x, w1, b1, w2, b2, *, tm=512, compute_dtype=jnp.bfloat16,
                approximate_gelu=False):
    """x: [B, S, d_model] -> [B, S, d_model]; w1: [d_model, d_ff], w2: [d_ff, d_model]."""
    B, S, D = x.shape
    DF = w1.shape[1]
    assert w1.shape == (D, DF) and w2.shape == (DF, D)
    out_dtype = x.dtype

    M = B * S
    tm_eff, M_pad = _pick_row_tile(M, tm)

    x2d = x.reshape(M, D)          # no dtype cast here; kernel casts per tile
    if M_pad != M:
        x2d = jnp.pad(x2d, ((0, M_pad - M), (0, 0)))

    w1c = w1.astype(compute_dtype)
    w2c = w2.astype(compute_dtype)
    b1_2d = b1.reshape(1, DF).astype(jnp.float32)
    b2_2d = b2.reshape(1, D).astype(jnp.float32)

    grid = (M_pad // tm_eff,)

    kernel = functools.partial(ffn_kernel, approximate=approximate_gelu)

    out2d = pl.pallas_call(
        kernel,
        out_shape=jax.ShapeDtypeStruct((M_pad, D), out_dtype),
        grid_spec=pltpu.PrefetchScalarGridSpec(
            num_scalar_prefetch=0,
            grid=grid,
            in_specs=[
                pl.BlockSpec((tm_eff, D), lambda i: (i, 0)),   # x row tile
                pl.BlockSpec((D, DF), lambda i: (0, 0)),       # W1 (resident)
                pl.BlockSpec((1, DF), lambda i: (0, 0)),       # b1 (resident)
                pl.BlockSpec((DF, D), lambda i: (0, 0)),       # W2 (resident)
                pl.BlockSpec((1, D), lambda i: (0, 0)),        # b2 (resident)
            ],
            out_specs=pl.BlockSpec((tm_eff, D), lambda i: (i, 0)),
        ),
        compiler_params=pltpu.CompilerParams(
            dimension_semantics=("parallel",),                 # rows split across TCs
            vmem_limit_bytes=56 * 1024 * 1024,                 # < v7x's 64 MiB physical
        ),
    )(x2d, w1c, b1_2d, w2c, b2_2d)

    return out2d[:M].reshape(B, S, D)


def init_params(key, d_model=D_MODEL, d_ff=D_FF):
    # nn.Linear default init: U(-1/sqrt(fan_in), 1/sqrt(fan_in)).
    k1, k2, k3, k4 = jax.random.split(key, 4)
    bound1 = 1.0 / math.sqrt(d_model)
    bound2 = 1.0 / math.sqrt(d_ff)
    # Stored as [in, out] so the kernel computes x @ W  (== x @ W_torch.T).
    w1 = jax.random.uniform(k1, (d_model, d_ff), jnp.float32, -bound1, bound1)
    b1 = jax.random.uniform(k2, (d_ff,), jnp.float32, -bound1, bound1)
    w2 = jax.random.uniform(k3, (d_ff, d_model), jnp.float32, -bound2, bound2)
    b2 = jax.random.uniform(k4, (d_model,), jnp.float32, -bound2, bound2)
    return w1, b1, w2, b2


def reference_ffn(x, w1, b1, w2, b2):
    h = jnp.einsum("bsd,df->bsf", x, w1) + b1
    h = _gelu_exact(h)
    return jnp.einsum("bsf,fd->bsd", h, w2) + b2


if __name__ == "__main__":
    key = jax.random.PRNGKey(0)
    kx, kp = jax.random.split(key)
    B, S = 2, 8
    x = jax.random.normal(kx, (B, S, D_MODEL), jnp.float32)
    w1, b1, w2, b2 = init_params(kp)

    out = jax.block_until_ready(poswise_ffn(x, w1, b1, w2, b2))
    ref = reference_ffn(x, w1, b1, w2, b2)

    assert out.shape == (B, S, D_MODEL)
    # bf16 MXU operands with f32 accumulation -> ~1e-2 relative error vs pure-f32 ref.
    err = float(jnp.max(jnp.abs(out - ref)))
    assert jnp.allclose(out, ref, atol=5e-2, rtol=5e-2), f"max abs err {err}"
    print("KERNEL_OK")
</pallas_src>

<mosaic_0001>
module attributes {stable_mosaic.version = 11 : i64} {
  func.func @ffn_kernel(%arg0: i32, %arg1: memref<16x768xf32, #tpu.memory_space<vmem>>, %arg2: memref<768x3072xbf16, #tpu.memory_space<vmem>>, %arg3: memref<1x3072xf32, #tpu.memory_space<vmem>>, %arg4: memref<3072x768xbf16, #tpu.memory_space<vmem>>, %arg5: memref<1x768xf32, #tpu.memory_space<vmem>>, %arg6: memref<16x768xf32, #tpu.memory_space<vmem>>) attributes {dimension_semantics = [#tpu.dimension_semantics<parallel>], iteration_bounds = array<i64: 1>, scalar_prefetch = 0 : i64, scratch_operands = 0 : i64, tpu.core_type = #tpu.core_type<tc>, window_params = [{transform_indices = @transform_0, window_bounds = array<i64: 16, 768>}, {pipeline_mode = #tpu.pipeline_mode<synchronous>, transform_indices = @transform_1, window_bounds = array<i64: 768, 3072>}, {pipeline_mode = #tpu.pipeline_mode<synchronous>, transform_indices = @transform_2, window_bounds = array<i64: 1, 3072>}, {pipeline_mode = #tpu.pipeline_mode<synchronous>, transform_indices = @transform_3, window_bounds = array<i64: 3072, 768>}, {pipeline_mode = #tpu.pipeline_mode<synchronous>, transform_indices = @transform_4, window_bounds = array<i64: 1, 768>}, {transform_indices = @transform_5, window_bounds = array<i64: 16, 768>}]} {
    %c0 = arith.constant 0 : index
    %c0_0 = arith.constant 0 : index
    %0 = vector.load %arg1[%c0, %c0_0] : memref<16x768xf32, #tpu.memory_space<vmem>>, vector<16x768xf32>
    %1 = arith.truncf %0 : vector<16x768xf32> to vector<16x768xbf16>
    %c0_1 = arith.constant 0 : index
    %c0_2 = arith.constant 0 : index
    %2 = vector.load %arg2[%c0_1, %c0_2] : memref<768x3072xbf16, #tpu.memory_space<vmem>>, vector<768x3072xbf16>
    %cst = arith.constant dense<0.000000e+00> : vector<16x3072xf32>
    %3 = tpu.matmul %1, %2, %cst {dimension_numbers = #tpu.dot_dimension_numbers<[1], [0], [0], [1], [0, 0, 1, 1], [], []>} : vector<16x768xbf16>, vector<768x3072xbf16>, vector<16x3072xf32> -> vector<16x3072xf32>
    %c0_3 = arith.constant 0 : index
    %c0_4 = arith.constant 0 : index
    %4 = vector.load %arg3[%c0_3, %c0_4] : memref<1x3072xf32, #tpu.memory_space<vmem>>, vector<1x3072xf32>
    %5 = vector.broadcast %4 : vector<1x3072xf32> to vector<16x3072xf32>
    %6 = arith.addf %3, %5 : vector<16x3072xf32>
    %cst_5 = arith.constant 5.000000e-01 : f32
    %7 = vector.broadcast %cst_5 : f32 to vector<16x3072xf32>
    %8 = arith.mulf %6, %7 : vector<16x3072xf32>
    %cst_6 = arith.constant 1.41421354 : f32
    %9 = vector.broadcast %cst_6 : f32 to vector<16x3072xf32>
    %10 = arith.divf %6, %9 : vector<16x3072xf32>
    %11 = math.erf %10 : vector<16x3072xf32>
    %cst_7 = arith.constant 1.000000e+00 : f32
    %12 = vector.broadcast %cst_7 : f32 to vector<16x3072xf32>
    %13 = arith.addf %12, %11 : vector<16x3072xf32>
    %14 = arith.mulf %8, %13 : vector<16x3072xf32>
    %15 = arith.truncf %14 : vector<16x3072xf32> to vector<16x3072xbf16>
    %c0_8 = arith.constant 0 : index
    %c0_9 = arith.constant 0 : index
    %16 = vector.load %arg4[%c0_8, %c0_9] : memref<3072x768xbf16, #tpu.memory_space<vmem>>, vector<3072x768xbf16>
    %cst_10 = arith.constant dense<0.000000e+00> : vector<16x768xf32>
    %17 = tpu.matmul %15, %16, %cst_10 {dimension_numbers = #tpu.dot_dimension_numbers<[1], [0], [0], [1], [0, 0, 1, 1], [], []>} : vector<16x3072xbf16>, vector<3072x768xbf16>, vector<16x768xf32> -> vector<16x768xf32>
    %c0_11 = arith.constant 0 : index
    %c0_12 = arith.constant 0 : index
    %18 = vector.load %arg5[%c0_11, %c0_12] : memref<1x768xf32, #tpu.memory_space<vmem>>, vector<1x768xf32>
    %19 = vector.broadcast %18 : vector<1x768xf32> to vector<16x768xf32>
    %20 = arith.addf %17, %19 : vector<16x768xf32>
    %c0_13 = arith.constant 0 : index
    %c0_14 = arith.constant 0 : index
    %21 = vector.load %arg6[%c0_13, %c0_14] : memref<16x768xf32, #tpu.memory_space<vmem>>, vector<16x768xf32>
    tpu.vector_store %arg6[%c0_13, %c0_14], %20 {strides = array<i32>} : memref<16x768xf32, #tpu.memory_space<vmem>>, vector<16x768xf32>,
    return
  }
  func.func @transform_0(%arg0: i32) -> (i32, i32) {
    %c0_i32 = arith.constant 0 : i32
    %c0_i32_0 = arith.constant 0 : i32
    return %arg0, %c0_i32 : i32, i32
  }
  func.func @transform_1(%arg0: i32) -> (i32, i32) {
    %c0_i32 = arith.constant 0 : i32
    %c0_i32_0 = arith.constant 0 : i32
    %c0_i32_1 = arith.constant 0 : i32
    return %c0_i32, %c0_i32_0 : i32, i32
  }
  func.func @transform_2(%arg0: i32) -> (i32, i32) {
    %c0_i32 = arith.constant 0 : i32
    %c0_i32_0 = arith.constant 0 : i32
    %c0_i32_1 = arith.constant 0 : i32
    return %c0_i32, %c0_i32_0 : i32, i32
  }
  func.func @transform_3(%arg0: i32) -> (i32, i32) {
    %c0_i32 = arith.constant 0 : i32
    %c0_i32_0 = arith.constant 0 : i32
    %c0_i32_1 = arith.constant 0 : i32
    return %c0_i32, %c0_i32_0 : i32, i32
  }
  func.func @transform_4(%arg0: i32) -> (i32, i32) {
    %c0_i32 = arith.constant 0 : i32
    %c0_i32_0 = arith.constant 0 : i32
    %c0_i32_1 = arith.constant 0 : i32
    return %c0_i32, %c0_i32_0 : i32, i32
  }
  func.func @transform_5(%arg0: i32) -> (i32, i32) {
    %c0_i32 = arith.constant 0 : i32
    %c0_i32_0 = arith.constant 0 : i32
    return %arg0, %c0_i32 : i32, i32
  }
}

</mosaic_0001>

<bundles_post_ra>
// kernel: tpu_custom_call.1
= control target key start
LH: loop header
LB: loop body
LE: loop exit
PB: predicated region body
PF: predicated region fallthrough
CT: control target
= control target key end

     0   :  { %10 = vsyncpa [#allocation3], 0  ;;  %s22609_s0 = inlined_call_operand.hbm [shape: f32[16,768], index: 0, kind: input, shape index: {}]   ;;  %s22610_s1 = inlined_call_operand.hbm [shape: bf16[768,3072], index: 1, kind: input, shape index: {}]   ;;  %s22611_s2 = inlined_call_operand.hbm [shape: f32[1,3072], index: 2, kind: input, shape index: {}]   ;;  %s22612_s3 = inlined_call_operand.hbm [shape: bf16[3072,768], index: 3, kind: input, shape index: {}]   ;;  %s22613_s4 = inlined_call_operand.hbm [shape: f32[1,768], index: 4, kind: input, shape index: {}]   ;;  %s22614_s5 = inlined_call_operand.hbm [shape: f32[16,768], index: 5, kind: output, shape index: {}]  }
   0x1   :  { %11 = vsyncpa [#allocation6], 0 }
   0x2   :  { %12 = vsyncpa [#allocation9], 0 }
   0x3   :  { %13 = vsyncpa [#allocation4], 0  ;;  %s22053_s18 = smov [#allocation5]   ;;  %s21913_s22 = scalar_lea.hbm %s22610_s1, 147456 }
   0x4   :  { %s31_s19 = sshll.u32 %s22053_s18, 4  ;;  %p21914_p0 = scmp.ne.s32.totalorder %s22610_s1, %s21913_s22  ;;  %s32_s19 = int_to_ptr.vmem [resolvable:$true] %s31_s19 }
   0x5   :  { %p21917_p1 = scmp.lt.u32.totalorder %s21913_s22, %s22610_s1 }
   0x7   :  { %p21919_p2 = pnand %p21917_p1, %p21914_p0 }
   0x9   :  { %21922 = shalt.err (!%p21919_p2)
}
   0xa   :  { %s21923_s27 = scalar_lea.vmem %s32_s19, 147456  ;;  %p21928_p4 = scmp.lt.s32.totalorder %s32_s19, %s32_s19 }
   0xb   :  { %p21924_p3 = scmp.ne.s32.totalorder %s32_s19, %s21923_s27  ;;  %p21929_p5 = scmp.lt.s32.totalorder %s21923_s27, %s21923_s27 }
   0xd   :  { %p21930_p6 = por %p21929_p5, %p21928_p4 }
   0xf   :  { %p21931_p7 = pnand %p21930_p6, %p21924_p3 }
  0x11   :  { %21934 = shalt.err (!%p21931_p7)
}
  0x12   :  { %s22054_s28 = smov 1536   ;;  %s22055_s29 = smov 96  }
  0x13   :  { %37 = dma.hbm_to_vmem [thread:$0]  %s22610_s1, 147456, %s32_s19, [#allocation6], %s22054_s28, %s22054_s28, %s22055_s29  }
  0x14   :  { %s22056_s7 = smov [#allocation8]   ;;  %s21935_s11 = scalar_lea.hbm %s22612_s3, 147456 }
  0x15   :  { %s53_s8 = sshll.u32 %s22056_s7, 4  ;;  %p21936_p8 = scmp.ne.s32.totalorder %s22612_s3, %s21935_s11  ;;  %s54_s8 = int_to_ptr.vmem [resolvable:$true] %s53_s8 }
  0x16   :  { %p21939_p9 = scmp.lt.u32.totalorder %s21935_s11, %s22612_s3 }
  0x18   :  { %p21941_p10 = pnand %p21939_p9, %p21936_p8 }
  0x1a   :  { %21944 = shalt.err (!%p21941_p10)
}
  0x1b   :  { %s21945_s16 = scalar_lea.vmem %s54_s8, 147456  ;;  %p21950_p12 = scmp.lt.s32.totalorder %s54_s8, %s54_s8 }
  0x1c   :  { %p21946_p11 = scmp.ne.s32.totalorder %s54_s8, %s21945_s16  ;;  %p21951_p13 = scmp.lt.s32.totalorder %s21945_s16, %s21945_s16 }
  0x1e   :  { %p21952_p0 = por %p21951_p13, %p21950_p12 }
  0x20   :  { %p21953_p1 = pnand %p21952_p0, %p21946_p11 }
  0x22   :  { %21956 = shalt.err (!%p21953_p1)
}
  0x23   :  { %s22057_s1 = smov 384   ;;  %s22058_s17 = smov 24  }
  0x24   :  { %59 = dma.hbm_to_vmem [thread:$0]  %s22612_s3, 147456, %s54_s8, [#allocation9], %s22057_s1, %s22057_s1, %s22058_s17  }
  0x25   :  { %s22059_s20 = smov [#allocation2]   ;;  %s21957_s24 = scalar_lea.hbm %s22609_s0, 1536 }
  0x26   :  { %s19_s21 = sshll.u32 %s22059_s20, 4  ;;  %p21958_p2 = scmp.ne.s32.totalorder %s22609_s0, %s21957_s24  ;;  %s20_s21 = int_to_ptr.vmem [resolvable:$true] %s19_s21 }
  0x27   :  { %p21961_p3 = scmp.lt.u32.totalorder %s21957_s24, %s22609_s0 }
  0x29   :  { %p21963_p4 = pnand %p21961_p3, %p21958_p2 }
  0x2b   :  { %21966 = shalt.err (!%p21963_p4)
}
  0x2c   :  { %s21967_s29 = scalar_lea.vmem %s20_s21, 1536  ;;  %p21972_p6 = scmp.lt.s32.totalorder %s20_s21, %s20_s21 }
  0x2d   :  { %p21968_p5 = scmp.ne.s32.totalorder %s20_s21, %s21967_s29  ;;  %p21973_p7 = scmp.lt.s32.totalorder %s21967_s29, %s21967_s29 }
  0x2f   :  { %p21974_p8 = por %p21973_p7, %p21972_p6 }
  0x31   :  { %p21975_p9 = pnand %p21974_p8, %p21968_p5 }
  0x33   :  { %21978 = shalt.err (!%p21975_p9)
}
  0x34   :  { %s22060_s3 = smov 768   ;;  %s22061_s30 = smov 48  }
  0x35   :  { %25 = dma.hbm_to_vmem [thread:$0]  %s22609_s0, 1536, %s20_s21, [#allocation3], %s22060_s3, %s22060_s3, %s22061_s30  }
  0x36   :  { %s22062_s8 = smov [#allocation7]   ;;  %s22063_s10 = smov [#allocation10]  }
  0x37   :  { %s44_s9 = sshll.u32 %s22062_s8, 4  ;;  %s66_s11 = sshll.u32 %s22063_s10, 4  ;;  %s45_s9 = int_to_ptr.vmem [resolvable:$true] %s44_s9  ;;  %s67_s11 = int_to_ptr.vmem [resolvable:$true] %s66_s11 }
  0x38   :  { %s21979_s14 = scalar_lea.hbm %s22611_s2, 384 }
  0x39   :  { %p21980_p10 = scmp.ne.s32.totalorder %s22611_s2, %s21979_s14  ;;  %p21983_p11 = scmp.lt.u32.totalorder %s21979_s14, %s22611_s2 }
  0x3b   :  { %p21985_p12 = pnand %p21983_p11, %p21980_p10 }
  0x3d   :  { %21988 = shalt.err (!%p21985_p12)
}
  0x3e   :  { %s21989_s0 = scalar_lea.vmem %s45_s9, 384  ;;  %p21994_p0 = scmp.lt.s32.totalorder %s45_s9, %s45_s9 }
  0x3f   :  { %p21990_p13 = scmp.ne.s32.totalorder %s45_s9, %s21989_s0  ;;  %p21995_p1 = scmp.lt.s32.totalorder %s21989_s0, %s21989_s0 }
  0x41   :  { %p21996_p2 = por %p21995_p1, %p21994_p0 }
  0x43   :  { %p21997_p3 = pnand %p21996_p2, %p21990_p13 }
  0x45   :  { %22000 = shalt.err (!%p21997_p3)
}
  0x46   :  { %47 = dma.hbm_to_vmem [thread:$0]  %s22611_s2, 384, %s45_s9, [#allocation6]  }
  0x47   :  { %s22001_s22 = scalar_lea.hbm %s22613_s4, 96 }
  0x48   :  { %p22002_p4 = scmp.ne.s32.totalorder %s22613_s4, %s22001_s22  ;;  %p22005_p5 = scmp.lt.u32.totalorder %s22001_s22, %s22613_s4 }
  0x4a   :  { %p22007_p6 = pnand %p22005_p5, %p22002_p4 }
  0x4c   :  { %22010 = shalt.err (!%p22007_p6)
}
  0x4d   :  { %s22011_s27 = scalar_lea.vmem %s67_s11, 96  ;;  %p22016_p8 = scmp.lt.s32.totalorder %s67_s11, %s67_s11 }
  0x4e   :  { %p22012_p7 = scmp.ne.s32.totalorder %s67_s11, %s22011_s27  ;;  %p22017_p9 = scmp.lt.s32.totalorder %s22011_s27, %s22011_s27 }
  0x50   :  { %p22018_p10 = por %p22017_p9, %p22016_p8 }
  0x52   :  { %p22019_p11 = pnand %p22018_p10, %p22012_p7 }
  0x54   :  { %22022 = shalt.err (!%p22019_p11)
}
  0x55   :  { %69 = dma.hbm_to_vmem [thread:$0]  %s22613_s4, 96, %s67_s11, [#allocation9]  }
  0x56   :  { %22045 = dma.done.wait [#allocation3], 1536  }
  0x57   :  { %22046 = vsyncadd [#allocation3], 4294965760 }
  0x58   :  { %22047 = dma.done.wait [#allocation6], 147840  }
  0x59   :  { %22048 = vsyncadd [#allocation6], 4294819456 }
  0x5a   :  { %22049 = dma.done.wait [#allocation9], 147552  }
  0x5b   :  { %22050 = vsyncadd [#allocation9], 4294819744  ;;  %v103_v0 = vld [vmem:[#allocation5] sm:$0xff]  ;;  %v86_v53 = vld [vmem:[#allocation2 + $0x8] sm:$0xff]  ;;  %s22064_s4 = smov [#allocation11]  }
  0x5c   :  { %v115_v1 = vld [vmem:[#allocation5 + $0x60] sm:$0xff]  ;;  %v92_v54 = vld [vmem:[#allocation2 + $0x38] sm:$0xff]  ;;  %s17463_s29 = sshll.u32 %s22064_s4, 4  ;;  %s17464_s29 = int_to_ptr.vmem [resolvable:$true] %s17463_s29 }
  0x5d   :  { %v107_v2 = vld [vmem:[#allocation5 + $0x20] sm:$0xff]  ;;  %v17478_v3 = vcombine.high %v103_v0, %v115_v1  ;;  %v17477_v5 = vcombine.low %v103_v0, %v115_v1  ;;  %v22158_v58 = vpack.c.bf16 %v92_v54, %v86_v53  ;;  %s22023_s6 = scalar_lea.vmem %s17464_s29, 1536  ;;  %p22028_p13 = scmp.lt.s32.totalorder %s17464_s29, %s17464_s29 }
  0x5e   :  { %v119_v4 = vld [vmem:[#allocation5 + $0x80] sm:$0xff]  ;;  %p22024_p12 = scmp.ne.s32.totalorder %s17464_s29, %s22023_s6  ;;  %p22029_p0 = scmp.lt.s32.totalorder %s22023_s6, %s22023_s6 }
  0x5f   :  { %v127_v6 = vld [vmem:[#allocation5 + $0xc0] sm:$0xff]  ;;  %v17486_v8 = vcombine.high %v107_v2, %v119_v4  ;;  %v17485_v9 = vcombine.low %v107_v2, %v119_v4  ;;  %7141 = vmatprep.subr.bf16.mxu1 %v17478_v3  ;;  %7173 = vmatprep.mubr.bf16.mxu1 %v22158_v58 }
  0x60   :  { %v139_v7 = vld [vmem:[#allocation5 + $0x120] sm:$0xff]  ;;  %7142 = vmatpush1.bf16.msra.mxu1 %v17477_v5  ;;  %7689 = vmatprep.mubr.bf16.mxu0 %v22158_v58  ;;  %p22030_p1 = por %p22029_p0, %p22028_p13 }
  0x61   :  { %v17502_v10 = vcombine.high %v127_v6, %v139_v7  ;;  %v131_v11 = vld [vmem:[#allocation5 + $0xe0] sm:$0xff]  ;;  %7657 = vmatprep.subr.bf16.mxu0 %v17486_v8  ;;  %v17501_v18 = vcombine.low %v127_v6, %v139_v7 }
  0x62   :  { %v143_v12 = vld [vmem:[#allocation5 + $0x140] sm:$0xff]  ;;  %7658 = vmatpush1.bf16.msra.mxu0 %v17485_v9  ;;  %p22031_p2 = pnand %p22030_p1, %p22024_p12 }
  0x63   :  { %v151_v13 = vld [vmem:[#allocation5 + $0x180] sm:$0xff]  ;;  %v17510_v14 = vcombine.high %v131_v11, %v143_v12  ;;  %7143 = vmatprep.subr.bf16.mxu1 %v17502_v10  ;;  %v17509_v19 = vcombine.low %v131_v11, %v143_v12 }
  0x64   :  { %v163_v15 = vld [vmem:[#allocation5 + $0x1e0] sm:$0xff]  ;;  %7144 = vmatpush1.bf16.msra.mxu1 %v17501_v18 }
  0x65   :  { %v155_v16 = vld [vmem:[#allocation5 + $0x1a0] sm:$0xff]  ;;  %v17526_v20 = vcombine.high %v151_v13, %v163_v15  ;;  %7659 = vmatprep.subr.bf16.mxu0 %v17510_v14  ;;  %v17525_v26 = vcombine.low %v151_v13, %v163_v15 }
  0x66   :  { %v167_v17 = vld [vmem:[#allocation5 + $0x200] sm:$0xff]  ;;  %7660 = vmatpush1.bf16.msra.mxu0 %v17509_v19 }
  0x67   :  { %v17534_v21 = vcombine.high %v155_v16, %v167_v17  ;;  %v175_v22 = vld [vmem:[#allocation5 + $0x240] sm:$0xff]  ;;  %7145 = vmatprep.subr.bf16.mxu1 %v17526_v20  ;;  %v17533_v27 = vcombine.low %v155_v16, %v167_v17 }
  0x68   :  { %v187_v23 = vld [vmem:[#allocation5 + $0x2a0] sm:$0xff]  ;;  %7146 = vmatpush1.bf16.msra.mxu1 %v17525_v26 }
  0x69   :  { %v179_v24 = vld [vmem:[#allocation5 + $0x260] sm:$0xff]  ;;  %v17550_v28 = vcombine.high %v175_v22, %v187_v23  ;;  %7661 = vmatprep.subr.bf16.mxu0 %v17534_v21  ;;  %v17549_v34 = vcombine.low %v175_v22, %v187_v23 }
  0x6a   :  { %v191_v25 = vld [vmem:[#allocation5 + $0x2c0] sm:$0xff]  ;;  %7662 = vmatpush1.bf16.msra.mxu0 %v17533_v27 }
  0x6b   :  { %v17558_v29 = vcombine.high %v179_v24, %v191_v25  ;;  %v199_v30 = vld [vmem:[#allocation5 + $0x300] sm:$0xff]  ;;  %7147 = vmatprep.subr.bf16.mxu1 %v17550_v28  ;;  %v17557_v35 = vcombine.low %v179_v24, %v191_v25 }
  0x6c   :  { %v211_v31 = vld [vmem:[#allocation5 + $0x360] sm:$0xff]  ;;  %7148 = vmatpush1.bf16.msra.mxu1 %v17549_v34 }
  0x6d   :  { %v203_v32 = vld [vmem:[#allocation5 + $0x320] sm:$0xff]  ;;  %v17574_v36 = vcombine.high %v199_v30, %v211_v31  ;;  %7663 = vmatprep.subr.bf16.mxu0 %v17558_v29  ;;  %v17573_v42 = vcombine.low %v199_v30, %v211_v31 }
  0x6e   :  { %v215_v33 = vld [vmem:[#allocation5 + $0x380] sm:$0xff]  ;;  %7664 = vmatpush1.bf16.msra.mxu0 %v17557_v35 }
  0x6f   :  { %v17582_v37 = vcombine.high %v203_v32, %v215_v33  ;;  %v223_v38 = vld [vmem:[#allocation5 + $0x3c0] sm:$0xff]  ;;  %7149 = vmatprep.subr.bf16.mxu1 %v17574_v36  ;;  %v17581_v43 = vcombine.low %v203_v32, %v215_v33 }
  0x70   :  { %v235_v39 = vld [vmem:[#allocation5 + $0x420] sm:$0xff]  ;;  %7150 = vmatpush1.bf16.msra.mxu1 %v17573_v42 }
  0x71   :  { %v227_v40 = vld [vmem:[#allocation5 + $0x3e0] sm:$0xff]  ;;  %v17598_v44 = vcombine.high %v223_v38, %v235_v39  ;;  %7665 = vmatprep.subr.bf16.mxu0 %v17582_v37  ;;  %v17597_v50 = vcombine.low %v223_v38, %v235_v39 }
  0x72   :  { %v239_v41 = vld [vmem:[#allocation5 + $0x440] sm:$0xff]  ;;  %7666 = vmatpush1.bf16.msra.mxu0 %v17581_v43 }
  0x73   :  { %v17606_v45 = vcombine.high %v227_v40, %v239_v41  ;;  %v247_v46 = vld [vmem:[#allocation5 + $0x480] sm:$0xff]  ;;  %7151 = vmatprep.subr.bf16.mxu1 %v17598_v44  ;;  %v17605_v51 = vcombine.low %v227_v40, %v239_v41 }
  0x74   :  { %v259_v47 = vld [vmem:[#allocation5 + $0x4e0] sm:$0xff]  ;;  %7152 = vmatpush1.bf16.msra.mxu1 %v17597_v50 }
  0x75   :  { %v251_v48 = vld [vmem:[#allocation5 + $0x4a0] sm:$0xff]  ;;  %v17622_v52 = vcombine.high %v247_v46, %v259_v47  ;;  %7667 = vmatprep.subr.bf16.mxu0 %v17606_v45  ;;  %v17621_v61 = vcombine.low %v247_v46, %v259_v47 }
  0x76   :  { %v263_v49 = vld [vmem:[#allocation5 + $0x500] sm:$0xff]  ;;  %7668 = vmatpush1.bf16.msra.mxu0 %v17605_v51 }
  0x77   :  { %v17630_v55 = vcombine.high %v251_v48, %v263_v49  ;;  %v271_v56 = vld [vmem:[#allocation5 + $0x540] sm:$0xff]  ;;  %7153 = vmatprep.subr.bf16.mxu1 %v17622_v52  ;;  %v17629_v62 = vcombine.low %v251_v48, %v263_v49 }
  0x78   :  { %v283_v57 = vld [vmem:[#allocation5 + $0x5a0] sm:$0xff]  ;;  %7154 = vmatpush1.bf16.msra.mxu1 %v17621_v61 }
  0x79   :  { %v275_v59 = vld [vmem:[#allocation5 + $0x560] sm:$0xff]  ;;  %v17646_v63 = vcombine.high %v271_v56, %v283_v57  ;;  %7669 = vmatprep.subr.bf16.mxu0 %v17630_v55  ;;  %v17645_v5 = vcombine.low %v271_v56, %v283_v57 }
  0x7a   :  { %v287_v60 = vld [vmem:[#allocation5 + $0x5c0] sm:$0xff]  ;;  %7670 = vmatpush1.bf16.msra.mxu0 %v17629_v62 }
  0x7b   :  { %v17654_v0 = vcombine.high %v275_v59, %v287_v60  ;;  %v295_v1 = vld [vmem:[#allocation5 + $0x600] sm:$0xff]  ;;  %7155 = vmatprep.subr.bf16.mxu1 %v17646_v63  ;;  %v17653_v6 = vcombine.low %v275_v59, %v287_v60 }
  0x7c   :  { %v307_v2 = vld [vmem:[#allocation5 + $0x660] sm:$0xff]  ;;  %7156 = vmatpush1.bf16.msra.mxu1 %v17645_v5 }
  0x7d   :  { %v299_v3 = vld [vmem:[#allocation5 + $0x620] sm:$0xff]  ;;  %v17670_v7 = vcombine.high %v295_v1, %v307_v2  ;;  %7671 = vmatprep.subr.bf16.mxu0 %v17654_v0  ;;  %v17669_v13 = vcombine.low %v295_v1, %v307_v2 }
  0x7e   :  { %v311_v4 = vld [vmem:[#allocation5 + $0x680] sm:$0xff]  ;;  %7672 = vmatpush1.bf16.msra.mxu0 %v17653_v6 }
  0x7f   :  { %v17678_v8 = vcombine.high %v299_v3, %v311_v4  ;;  %v319_v9 = vld [vmem:[#allocation5 + $0x6c0] sm:$0xff]  ;;  %7157 = vmatprep.subr.bf16.mxu1 %v17670_v7  ;;  %v17677_v14 = vcombine.low %v299_v3, %v311_v4 }
  0x80   :  { %v331_v10 = vld [vmem:[#allocation5 + $0x720] sm:$0xff]  ;;  %7158 = vmatpush1.bf16.msra.mxu1 %v17669_v13 }
  0x81   :  { %v323_v11 = vld [vmem:[#allocation5 + $0x6e0] sm:$0xff]  ;;  %v17694_v15 = vcombine.high %v319_v9, %v331_v10  ;;  %7673 = vmatprep.subr.bf16.mxu0 %v17678_v8  ;;  %v17693_v21 = vcombine.low %v319_v9, %v331_v10  ;;  %v91_v8 = vld [vmem:[#allocation2 + $0x30] sm:$0xff] }
  0x82   :  { %v335_v12 = vld [vmem:[#allocation5 + $0x740] sm:$0xff]  ;;  %7674 = vmatpush1.bf16.msra.mxu0 %v17677_v14 }
  0x83   :  { %v17702_v16 = vcombine.high %v323_v11, %v335_v12  ;;  %v343_v17 = vld [vmem:[#allocation5 + $0x780] sm:$0xff]  ;;  %7159 = vmatprep.subr.bf16.mxu1 %v17694_v15  ;;  %v17701_v22 = vcombine.low %v323_v11, %v335_v12 }
  0x84   :  { %v355_v18 = vld [vmem:[#allocation5 + $0x7e0] sm:$0xff]  ;;  %7160 = vmatpush1.bf16.msra.mxu1 %v17693_v21 }
  0x85   :  { %v347_v19 = vld [vmem:[#allocation5 + $0x7a0] sm:$0xff]  ;;  %v17718_v23 = vcombine.high %v343_v17, %v355_v18  ;;  %7675 = vmatprep.subr.bf16.mxu0 %v17702_v16  ;;  %v17717_v29 = vcombine.low %v343_v17, %v355_v18  ;;  %v88_v17 = vld [vmem:[#allocation2 + $0x18] sm:$0xff]  ;;  %v94_v18 = vld [vmem:[#allocation2 + $0x48] sm:$0xff] }
  0x86   :  { %v359_v20 = vld [vmem:[#allocation5 + $0x800] sm:$0xff]  ;;  %7676 = vmatpush1.bf16.msra.mxu0 %v17701_v22 }
  0x87   :  { %v17726_v24 = vcombine.high %v347_v19, %v359_v20  ;;  %v367_v25 = vld [vmem:[#allocation5 + $0x840] sm:$0xff]  ;;  %7161 = vmatprep.subr.bf16.mxu1 %v17718_v23  ;;  %v17725_v30 = vcombine.low %v347_v19, %v359_v20 }
  0x88   :  { %v379_v26 = vld [vmem:[#allocation5 + $0x8a0] sm:$0xff]  ;;  %7162 = vmatpush1.bf16.msra.mxu1 %v17717_v29 }
  0x89   :  { %v371_v27 = vld [vmem:[#allocation5 + $0x860] sm:$0xff]  ;;  %v17742_v31 = vcombine.high %v367_v25, %v379_v26  ;;  %7677 = vmatprep.subr.bf16.mxu0 %v17726_v24  ;;  %v17741_v37 = vcombine.low %v367_v25, %v379_v26  ;;  %v22164_v25 = vpack.c.bf16 %v94_v18, %v88_v17 }
  0x8a   :  { %v383_v28 = vld [vmem:[#allocation5 + $0x8c0] sm:$0xff]  ;;  %7678 = vmatpush1.bf16.msra.mxu0 %v17725_v30 }
  0x8b   :  { %v17750_v32 = vcombine.high %v371_v27, %v383_v28  ;;  %v391_v33 = vld [vmem:[#allocation5 + $0x900] sm:$0xff]  ;;  %7163 = vmatprep.subr.bf16.mxu1 %v17742_v31  ;;  %v17749_v38 = vcombine.low %v371_v27, %v383_v28 }
  0x8c   :  { %v403_v34 = vld [vmem:[#allocation5 + $0x960] sm:$0xff]  ;;  %7164 = vmatpush1.bf16.msra.mxu1 %v17741_v37 }
  0x8d   :  { %v395_v35 = vld [vmem:[#allocation5 + $0x920] sm:$0xff]  ;;  %v17766_v39 = vcombine.high %v391_v33, %v403_v34  ;;  %7679 = vmatprep.subr.bf16.mxu0 %v17750_v32  ;;  %v17765_v45 = vcombine.low %v391_v33, %v403_v34 }
  0x8e   :  { %v407_v36 = vld [vmem:[#allocation5 + $0x980] sm:$0xff]  ;;  %7680 = vmatpush1.bf16.msra.mxu0 %v17749_v38 }
  0x8f   :  { %v17774_v40 = vcombine.high %v395_v35, %v407_v36  ;;  %v415_v41 = vld [vmem:[#allocation5 + $0x9c0] sm:$0xff]  ;;  %7165 = vmatprep.subr.bf16.mxu1 %v17766_v39  ;;  %v17773_v46 = vcombine.low %v395_v35, %v407_v36 }
  0x90   :  { %v427_v42 = vld [vmem:[#allocation5 + $0xa20] sm:$0xff]  ;;  %7166 = vmatpush1.bf16.msra.mxu1 %v17765_v45 }
  0x91   :  { %v419_v43 = vld [vmem:[#allocation5 + $0x9e0] sm:$0xff]  ;;  %v17790_v47 = vcombine.high %v415_v41, %v427_v42  ;;  %7681 = vmatprep.subr.bf16.mxu0 %v17774_v40  ;;  %v17789_v53 = vcombine.low %v415_v41, %v427_v42 }
  0x92   :  { %v431_v44 = vld [vmem:[#allocation5 + $0xa40] sm:$0xff]  ;;  %7682 = vmatpush1.bf16.msra.mxu0 %v17773_v46 }
  0x93   :  { %v17798_v48 = vcombine.high %v419_v43, %v431_v44  ;;  %v439_v49 = vld [vmem:[#allocation5 + $0xa80] sm:$0xff]  ;;  %7167 = vmatprep.subr.bf16.mxu1 %v17790_v47  ;;  %v17797_v54 = vcombine.low %v419_v43, %v431_v44 }
  0x94   :  { %v451_v50 = vld [vmem:[#allocation5 + $0xae0] sm:$0xff]  ;;  %7168 = vmatpush1.bf16.msra.mxu1 %v17789_v53 }
  0x95   :  { %v443_v51 = vld [vmem:[#allocation5 + $0xaa0] sm:$0xff]  ;;  %v17814_v55 = vcombine.high %v439_v49, %v451_v50  ;;  %7683 = vmatprep.subr.bf16.mxu0 %v17798_v48  ;;  %v17813_v62 = vcombine.low %v439_v49, %v451_v50 }
  0x96   :  { %v455_v52 = vld [vmem:[#allocation5 + $0xb00] sm:$0xff]  ;;  %7684 = vmatpush1.bf16.msra.mxu0 %v17797_v54 }
  0x97   :  { %v17822_v56 = vcombine.high %v443_v51, %v455_v52  ;;  %v463_v57 = vld [vmem:[#allocation5 + $0xb40] sm:$0xff]  ;;  %7169 = vmatprep.subr.bf16.mxu1 %v17814_v55  ;;  %v17821_v63 = vcombine.low %v443_v51, %v455_v52 }
  0x98   :  { %v475_v59 = vld [vmem:[#allocation5 + $0xba0] sm:$0xff]  ;;  %7170 = vmatpush1.bf16.msra.mxu1 %v17813_v62 }
  0x99   :  { %v467_v60 = vld [vmem:[#allocation5 + $0xb60] sm:$0xff]  ;;  %v17838_v0 = vcombine.high %v463_v57, %v475_v59  ;;  %7685 = vmatprep.subr.bf16.mxu0 %v17822_v56  ;;  %v17837_v6 = vcombine.low %v463_v57, %v475_v59 }
  0x9a   :  { %v479_v61 = vld [vmem:[#allocation5 + $0xbc0] sm:$0xff]  ;;  %7686 = vmatpush1.bf16.msra.mxu0 %v17821_v63 }
  0x9b   :  { %v17846_v1 = vcombine.high %v467_v60, %v479_v61  ;;  %v487_v2 = vld [vmem:[#allocation5 + $0xc00] sm:$0xff]  ;;  %7171 = vmatprep.subr.bf16.mxu1 %v17838_v0  ;;  %v17845_v9 = vcombine.low %v467_v60, %v479_v61 }
  0x9c   :  { %v499_v3 = vld [vmem:[#allocation5 + $0xc60] sm:$0xff]  ;;  %7172 = vmatpush1.bf16.msra.mxu1 %v17837_v6 }
  0x9d   :  { %v491_v4 = vld [vmem:[#allocation5 + $0xc20] sm:$0xff]  ;;  %v17862_v10 = vcombine.high %v487_v2, %v499_v3  ;;  %7687 = vmatprep.subr.bf16.mxu0 %v17846_v1  ;;  %v17861_v19 = vcombine.low %v487_v2, %v499_v3 }
  0x9e   :  { %v503_v5 = vld [vmem:[#allocation5 + $0xc80] sm:$0xff]  ;;  %7688 = vmatpush1.bf16.msra.mxu0 %v17845_v9 }
  0x9f   :  { %v85_v7 = vld [vmem:[#allocation2] sm:$0xff]  ;;  %v17870_v11 = vcombine.high %v491_v4, %v503_v5  ;;  %7184 = vmatprep.subr.bf16.mxu1 %v17862_v10  ;;  %v17869_v20 = vcombine.low %v491_v4, %v503_v5 }
  0xa0   :  { %v511_v12 = vld [vmem:[#allocation5 + $0xcc0] sm:$0xff]  ;;  %v22162_v15 = vpack.c.bf16 %v91_v8, %v85_v7 }
  0xa1   :  { %v523_v13 = vld [vmem:[#allocation5 + $0xd20] sm:$0xff]  ;;  %7700 = vmatprep.subr.bf16.mxu0 %v17870_v11 }
  0xa2   :  { %v515_v14 = vld [vmem:[#allocation5 + $0xce0] sm:$0xff]  ;;  %v17886_v21 = vcombine.high %v511_v12, %v523_v13  ;;  %7174 = vmatmul.mubr.bf16.vlgmr.msra.gmra.mrb[0].mxu1 %v22162_v15  ;;  %7690 = vmatmul.mubr.bf16.vlgmr.msra.gmra.mrb[0].mxu0 %v22162_v15  ;;  %v17885_v28 = vcombine.low %v511_v12, %v523_v13 }
  0xa3   :  { %v527_v16 = vld [vmem:[#allocation5 + $0xd40] sm:$0xff]  ;;  %7185 = vmatpush1.bf16.msra.mxu1 %v17861_v19  ;;  %7701 = vmatpush1.bf16.msra.mxu0 %v17869_v20 }
  0xa4   :  { %v17894_v22 = vcombine.high %v515_v14, %v527_v16  ;;  %v535_v23 = vld [vmem:[#allocation5 + $0xd80] sm:$0xff]  ;;  %7186 = vmatprep.subr.bf16.mxu1 %v17886_v21  ;;  %v17893_v29 = vcombine.low %v515_v14, %v527_v16  ;;  %7216 = vmatprep.mubr.bf16.mxu1 %v22164_v25 }
  0xa5   :  { %v547_v24 = vld [vmem:[#allocation5 + $0xde0] sm:$0xff]  ;;  %7732 = vmatprep.mubr.bf16.mxu0 %v22164_v25 }
  0xa6   :  { %v539_v26 = vld [vmem:[#allocation5 + $0xda0] sm:$0xff]  ;;  %v17910_v30 = vcombine.high %v535_v23, %v547_v24  ;;  %7702 = vmatprep.subr.bf16.mxu0 %v17894_v22  ;;  %v17909_v36 = vcombine.low %v535_v23, %v547_v24 }
  0xa7   :  { %v551_v27 = vld [vmem:[#allocation5 + $0xe00] sm:$0xff]  ;;  %7187 = vmatpush1.bf16.msra.mxu1 %v17885_v28  ;;  %7703 = vmatpush1.bf16.msra.mxu0 %v17893_v29 }
  0xa8   :  { %v559_v31 = vld [vmem:[#allocation5 + $0xe40] sm:$0xff]  ;;  %v17918_v33 = vcombine.high %v539_v26, %v551_v27  ;;  %7188 = vmatprep.subr.bf16.mxu1 %v17910_v30  ;;  %v17917_v37 = vcombine.low %v539_v26, %v551_v27 }
  0xa9   :  { %v571_v32 = vld [vmem:[#allocation5 + $0xea0] sm:$0xff] }
  0xaa   :  { %v563_v34 = vld [vmem:[#allocation5 + $0xe60] sm:$0xff]  ;;  %v17934_v38 = vcombine.high %v559_v31, %v571_v32  ;;  %7704 = vmatprep.subr.bf16.mxu0 %v17918_v33  ;;  %v17933_v44 = vcombine.low %v559_v31, %v571_v32 }
  0xab   :  { %v575_v35 = vld [vmem:[#allocation5 + $0xec0] sm:$0xff]  ;;  %7189 = vmatpush1.bf16.msra.mxu1 %v17909_v36  ;;  %7705 = vmatpush1.bf16.msra.mxu0 %v17917_v37 }
  0xac   :  { %v583_v39 = vld [vmem:[#allocation5 + $0xf00] sm:$0xff]  ;;  %v17942_v42 = vcombine.high %v563_v34, %v575_v35  ;;  %7190 = vmatprep.subr.bf16.mxu1 %v17934_v38  ;;  %v17941_v45 = vcombine.low %v563_v34, %v575_v35 }
  0xad   :  { %v595_v40 = vld [vmem:[#allocation5 + $0xf60] sm:$0xff] }
  0xae   :  { %v587_v41 = vld [vmem:[#allocation5 + $0xf20] sm:$0xff]  ;;  %v17958_v46 = vcombine.high %v583_v39, %v595_v40  ;;  %7706 = vmatprep.subr.bf16.mxu0 %v17942_v42  ;;  %v17957_v52 = vcombine.low %v583_v39, %v595_v40 }
  0xaf   :  { %v599_v43 = vld [vmem:[#allocation5 + $0xf80] sm:$0xff]  ;;  %7191 = vmatpush1.bf16.msra.mxu1 %v17933_v44  ;;  %7707 = vmatpush1.bf16.msra.mxu0 %v17941_v45 }
  0xb0   :  { %v607_v47 = vld [vmem:[#allocation5 + $0xfc0] sm:$0xff]  ;;  %v17966_v50 = vcombine.high %v587_v41, %v599_v43  ;;  %7192 = vmatprep.subr.bf16.mxu1 %v17958_v46  ;;  %v17965_v53 = vcombine.low %v587_v41, %v599_v43 }
  0xb1   :  { %v619_v48 = vld [vmem:[#allocation5 + $0x1020] sm:$0xff] }
  0xb2   :  { %v611_v49 = vld [vmem:[#allocation5 + $0xfe0] sm:$0xff]  ;;  %v17982_v54 = vcombine.high %v607_v47, %v619_v48  ;;  %7708 = vmatprep.subr.bf16.mxu0 %v17966_v50  ;;  %v17981_v61 = vcombine.low %v607_v47, %v619_v48 }
  0xb3   :  { %v623_v51 = vld [vmem:[#allocation5 + $0x1040] sm:$0xff]  ;;  %7193 = vmatpush1.bf16.msra.mxu1 %v17957_v52  ;;  %7709 = vmatpush1.bf16.msra.mxu0 %v17965_v53 }
  0xb4   :  { %v631_v55 = vld [vmem:[#allocation5 + $0x1080] sm:$0xff]  ;;  %v17990_v59 = vcombine.high %v611_v49, %v623_v51  ;;  %7194 = vmatprep.subr.bf16.mxu1 %v17982_v54  ;;  %v17989_v62 = vcombine.low %v611_v49, %v623_v51 }
  0xb5   :  { %v643_v56 = vld [vmem:[#allocation5 + $0x10e0] sm:$0xff] }
  0xb6   :  { %v635_v57 = vld [vmem:[#allocation5 + $0x10a0] sm:$0xff]  ;;  %v18006_v63 = vcombine.high %v631_v55, %v643_v56  ;;  %7710 = vmatprep.subr.bf16.mxu0 %v17990_v59  ;;  %v18005_v5 = vcombine.low %v631_v55, %v643_v56 }
  0xb7   :  { %v647_v60 = vld [vmem:[#allocation5 + $0x1100] sm:$0xff]  ;;  %7195 = vmatpush1.bf16.msra.mxu1 %v17981_v61  ;;  %7711 = vmatpush1.bf16.msra.mxu0 %v17989_v62 }
  0xb8   :  { %v655_v0 = vld [vmem:[#allocation5 + $0x1140] sm:$0xff]  ;;  %v18014_v3 = vcombine.high %v635_v57, %v647_v60  ;;  %7196 = vmatprep.subr.bf16.mxu1 %v18006_v63  ;;  %v18013_v6 = vcombine.low %v635_v57, %v647_v60 }
  0xb9   :  { %v667_v1 = vld [vmem:[#allocation5 + $0x11a0] sm:$0xff] }
  0xba   :  { %v659_v2 = vld [vmem:[#allocation5 + $0x1160] sm:$0xff]  ;;  %v18030_v7 = vcombine.high %v655_v0, %v667_v1  ;;  %7712 = vmatprep.subr.bf16.mxu0 %v18014_v3  ;;  %v18029_v13 = vcombine.low %v655_v0, %v667_v1 }
  0xbb   :  { %v671_v4 = vld [vmem:[#allocation5 + $0x11c0] sm:$0xff]  ;;  %7197 = vmatpush1.bf16.msra.mxu1 %v18005_v5  ;;  %7713 = vmatpush1.bf16.msra.mxu0 %v18013_v6 }
  0xbc   :  { %v679_v8 = vld [vmem:[#allocation5 + $0x1200] sm:$0xff]  ;;  %v18038_v11 = vcombine.high %v659_v2, %v671_v4  ;;  %7198 = vmatprep.subr.bf16.mxu1 %v18030_v7  ;;  %v18037_v14 = vcombine.low %v659_v2, %v671_v4 }
  0xbd   :  { %v691_v9 = vld [vmem:[#allocation5 + $0x1260] sm:$0xff] }
  0xbe   :  { %v683_v10 = vld [vmem:[#allocation5 + $0x1220] sm:$0xff]  ;;  %v18054_v16 = vcombine.high %v679_v8, %v691_v9  ;;  %7714 = vmatprep.subr.bf16.mxu0 %v18038_v11  ;;  %v18053_v22 = vcombine.low %v679_v8, %v691_v9 }
  0xbf   :  { %v695_v12 = vld [vmem:[#allocation5 + $0x1280] sm:$0xff]  ;;  %7199 = vmatpush1.bf16.msra.mxu1 %v18029_v13  ;;  %7715 = vmatpush1.bf16.msra.mxu0 %v18037_v14 }
  0xc0   :  { %v703_v17 = vld [vmem:[#allocation5 + $0x12c0] sm:$0xff]  ;;  %v18062_v20 = vcombine.high %v683_v10, %v695_v12  ;;  %7200 = vmatprep.subr.bf16.mxu1 %v18054_v16  ;;  %v18061_v23 = vcombine.low %v683_v10, %v695_v12 }
  0xc1   :  { %v715_v18 = vld [vmem:[#allocation5 + $0x1320] sm:$0xff] }
  0xc2   :  { %v707_v19 = vld [vmem:[#allocation5 + $0x12e0] sm:$0xff]  ;;  %v18078_v24 = vcombine.high %v703_v17, %v715_v18  ;;  %7716 = vmatprep.subr.bf16.mxu0 %v18062_v20  ;;  %v18077_v31 = vcombine.low %v703_v17, %v715_v18  ;;  %v87_v17 = vld [vmem:[#allocation2 + $0x10] sm:$0xff] }
  0xc3   :  { %v719_v21 = vld [vmem:[#allocation5 + $0x1340] sm:$0xff]  ;;  %7201 = vmatpush1.bf16.msra.mxu1 %v18053_v22  ;;  %7717 = vmatpush1.bf16.msra.mxu0 %v18061_v23 }
  0xc4   :  { %v727_v26 = vld [vmem:[#allocation5 + $0x1380] sm:$0xff]  ;;  %v18086_v29 = vcombine.high %v707_v19, %v719_v21  ;;  %7202 = vmatprep.subr.bf16.mxu1 %v18078_v24  ;;  %v18085_v32 = vcombine.low %v707_v19, %v719_v21 }
  0xc5   :  { %v739_v27 = vld [vmem:[#allocation5 + $0x13e0] sm:$0xff] }
  0xc6   :  { %v731_v28 = vld [vmem:[#allocation5 + $0x13a0] sm:$0xff]  ;;  %v18102_v33 = vcombine.high %v727_v26, %v739_v27  ;;  %7718 = vmatprep.subr.bf16.mxu0 %v18086_v29  ;;  %v18101_v39 = vcombine.low %v727_v26, %v739_v27  ;;  %v90_v27 = vld [vmem:[#allocation2 + $0x28] sm:$0xff]  ;;  %v96_v29 = vld [vmem:[#allocation2 + $0x58] sm:$0xff] }
  0xc7   :  { %v743_v30 = vld [vmem:[#allocation5 + $0x1400] sm:$0xff]  ;;  %7203 = vmatpush1.bf16.msra.mxu1 %v18077_v31  ;;  %7719 = vmatpush1.bf16.msra.mxu0 %v18085_v32 }
  0xc8   :  { %v751_v34 = vld [vmem:[#allocation5 + $0x1440] sm:$0xff]  ;;  %v18110_v37 = vcombine.high %v731_v28, %v743_v30  ;;  %7204 = vmatprep.subr.bf16.mxu1 %v18102_v33  ;;  %v18109_v40 = vcombine.low %v731_v28, %v743_v30 }
  0xc9   :  { %v763_v35 = vld [vmem:[#allocation5 + $0x14a0] sm:$0xff] }
  0xca   :  { %v755_v36 = vld [vmem:[#allocation5 + $0x1460] sm:$0xff]  ;;  %v18126_v41 = vcombine.high %v751_v34, %v763_v35  ;;  %7720 = vmatprep.subr.bf16.mxu0 %v18110_v37  ;;  %v18125_v47 = vcombine.low %v751_v34, %v763_v35 }
  0xcb   :  { %v767_v38 = vld [vmem:[#allocation5 + $0x14c0] sm:$0xff]  ;;  %7205 = vmatpush1.bf16.msra.mxu1 %v18101_v39  ;;  %7721 = vmatpush1.bf16.msra.mxu0 %v18109_v40  ;;  %v22172_v39 = vpack.c.bf16 %v96_v29, %v90_v27 }
  0xcc   :  { %v775_v42 = vld [vmem:[#allocation5 + $0x1500] sm:$0xff]  ;;  %v18134_v45 = vcombine.high %v755_v36, %v767_v38  ;;  %7206 = vmatprep.subr.bf16.mxu1 %v18126_v41  ;;  %v18133_v48 = vcombine.low %v755_v36, %v767_v38 }
  0xcd   :  { %v787_v43 = vld [vmem:[#allocation5 + $0x1560] sm:$0xff] }
  0xce   :  { %v779_v44 = vld [vmem:[#allocation5 + $0x1520] sm:$0xff]  ;;  %v18150_v49 = vcombine.high %v775_v42, %v787_v43  ;;  %7722 = vmatprep.subr.bf16.mxu0 %v18134_v45  ;;  %v18149_v55 = vcombine.low %v775_v42, %v787_v43 }
  0xcf   :  { %v791_v46 = vld [vmem:[#allocation5 + $0x1580] sm:$0xff]  ;;  %7207 = vmatpush1.bf16.msra.mxu1 %v18125_v47  ;;  %7723 = vmatpush1.bf16.msra.mxu0 %v18133_v48 }
  0xd0   :  { %v799_v50 = vld [vmem:[#allocation5 + $0x15c0] sm:$0xff]  ;;  %v18158_v53 = vcombine.high %v779_v44, %v791_v46  ;;  %7208 = vmatprep.subr.bf16.mxu1 %v18150_v49  ;;  %v18157_v56 = vcombine.low %v779_v44, %v791_v46 }
  0xd1   :  { %v811_v51 = vld [vmem:[#allocation5 + $0x1620] sm:$0xff] }
  0xd2   :  { %v803_v52 = vld [vmem:[#allocation5 + $0x15e0] sm:$0xff]  ;;  %v18174_v57 = vcombine.high %v799_v50, %v811_v51  ;;  %7724 = vmatprep.subr.bf16.mxu0 %v18158_v53  ;;  %v18173_v0 = vcombine.low %v799_v50, %v811_v51 }
  0xd3   :  { %v815_v54 = vld [vmem:[#allocation5 + $0x1640] sm:$0xff]  ;;  %7209 = vmatpush1.bf16.msra.mxu1 %v18149_v55  ;;  %7725 = vmatpush1.bf16.msra.mxu0 %v18157_v56 }
  0xd4   :  { %v823_v59 = vld [vmem:[#allocation5 + $0x1680] sm:$0xff]  ;;  %v18182_v62 = vcombine.high %v803_v52, %v815_v54  ;;  %7210 = vmatprep.subr.bf16.mxu1 %v18174_v57  ;;  %v18181_v1 = vcombine.low %v803_v52, %v815_v54 }
  0xd5   :  { %v835_v60 = vld [vmem:[#allocation5 + $0x16e0] sm:$0xff] }
  0xd6   :  { %v827_v61 = vld [vmem:[#allocation5 + $0x16a0] sm:$0xff]  ;;  %v18198_v2 = vcombine.high %v823_v59, %v835_v60  ;;  %7726 = vmatprep.subr.bf16.mxu0 %v18182_v62  ;;  %v18197_v8 = vcombine.low %v823_v59, %v835_v60 }
  0xd7   :  { %v839_v63 = vld [vmem:[#allocation5 + $0x1700] sm:$0xff]  ;;  %7211 = vmatpush1.bf16.msra.mxu1 %v18173_v0  ;;  %7727 = vmatpush1.bf16.msra.mxu0 %v18181_v1 }
  0xd8   :  { %v847_v3 = vld [vmem:[#allocation5 + $0x1740] sm:$0xff]  ;;  %v18206_v6 = vcombine.high %v827_v61, %v839_v63  ;;  %7212 = vmatprep.subr.bf16.mxu1 %v18198_v2  ;;  %v18205_v10 = vcombine.low %v827_v61, %v839_v63 }
  0xd9   :  { %v859_v4 = vld [vmem:[#allocation5 + $0x17a0] sm:$0xff] }
  0xda   :  { %v851_v5 = vld [vmem:[#allocation5 + $0x1760] sm:$0xff]  ;;  %v18222_v11 = vcombine.high %v847_v3, %v859_v4  ;;  %7728 = vmatprep.subr.bf16.mxu0 %v18206_v6  ;;  %v18221_v19 = vcombine.low %v847_v3, %v859_v4 }
  0xdb   :  { %v863_v7 = vld [vmem:[#allocation5 + $0x17c0] sm:$0xff]  ;;  %7213 = vmatpush1.bf16.msra.mxu1 %v18197_v8  ;;  %7729 = vmatpush1.bf16.msra.mxu0 %v18205_v10 }
  0xdc   :  { %v871_v9 = vld [vmem:[#allocation5 + $0x1800] sm:$0xff]  ;;  %v18230_v16 = vcombine.high %v851_v5, %v863_v7  ;;  %7214 = vmatprep.subr.bf16.mxu1 %v18222_v11  ;;  %v18229_v22 = vcombine.low %v851_v5, %v863_v7 }
  0xdd   :  { %v883_v12 = vld [vmem:[#allocation5 + $0x1860] sm:$0xff] }
  0xde   :  { %v875_v13 = vld [vmem:[#allocation5 + $0x1820] sm:$0xff]  ;;  %v18246_v23 = vcombine.high %v871_v9, %v883_v12  ;;  %7730 = vmatprep.subr.bf16.mxu0 %v18230_v16  ;;  %v18245_v31 = vcombine.low %v871_v9, %v883_v12 }
  0xdf   :  { %v887_v14 = vld [vmem:[#allocation5 + $0x1880] sm:$0xff]  ;;  %7215 = vmatpush1.bf16.msra.mxu1 %v18221_v19  ;;  %7731 = vmatpush1.bf16.msra.mxu0 %v18229_v22 }
  0xe0   :  { %v93_v18 = vld [vmem:[#allocation2 + $0x40] sm:$0xff]  ;;  %v18254_v28 = vcombine.high %v875_v13, %v887_v14  ;;  %7227 = vmatprep.subr.bf16.mxu1 %v18246_v23  ;;  %v18253_v32 = vcombine.low %v875_v13, %v887_v14 }
  0xe1   :  { %v895_v20 = vld [vmem:[#allocation5 + $0x18c0] sm:$0xff]  ;;  %v22170_v30 = vpack.c.bf16 %v93_v18, %v87_v17 }
  0xe2   :  { %v907_v21 = vld [vmem:[#allocation5 + $0x1920] sm:$0xff]  ;;  %7743 = vmatprep.subr.bf16.mxu0 %v18254_v28 }
  0xe3   :  { %v899_v24 = vld [vmem:[#allocation5 + $0x18e0] sm:$0xff]  ;;  %v18270_v33 = vcombine.high %v895_v20, %v907_v21  ;;  %7217 = vmatmul.mubr.bf16.vlgmr.msra.gmra.mrb[0].mxu1 %v22170_v30  ;;  %7733 = vmatmul.mubr.bf16.vlgmr.msra.gmra.mrb[0].mxu0 %v22170_v30  ;;  %v18269_v40 = vcombine.low %v895_v20, %v907_v21 }
  0xe4   :  { %v911_v26 = vld [vmem:[#allocation5 + $0x1940] sm:$0xff]  ;;  %7228 = vmatpush1.bf16.msra.mxu1 %v18245_v31  ;;  %7744 = vmatpush1.bf16.msra.mxu0 %v18253_v32 }
  0xe5   :  { %v919_v34 = vld [vmem:[#allocation5 + $0x1980] sm:$0xff]  ;;  %v18278_v37 = vcombine.high %v899_v24, %v911_v26  ;;  %7229 = vmatprep.subr.bf16.mxu1 %v18270_v33  ;;  %v18277_v41 = vcombine.low %v899_v24, %v911_v26  ;;  %7259 = vmatprep.mubr.bf16.mxu1 %v22172_v39 }
  0xe6   :  { %v931_v35 = vld [vmem:[#allocation5 + $0x19e0] sm:$0xff]  ;;  %7775 = vmatprep.mubr.bf16.mxu0 %v22172_v39 }
  0xe7   :  { %v923_v36 = vld [vmem:[#allocation5 + $0x19a0] sm:$0xff]  ;;  %v18294_v42 = vcombine.high %v919_v34, %v931_v35  ;;  %7745 = vmatprep.subr.bf16.mxu0 %v18278_v37  ;;  %v18293_v48 = vcombine.low %v919_v34, %v931_v35 }
  0xe8   :  { %v935_v38 = vld [vmem:[#allocation5 + $0x1a00] sm:$0xff]  ;;  %7230 = vmatpush1.bf16.msra.mxu1 %v18269_v40  ;;  %7746 = vmatpush1.bf16.msra.mxu0 %v18277_v41 }
  0xe9   :  { %v943_v43 = vld [vmem:[#allocation5 + $0x1a40] sm:$0xff]  ;;  %v18302_v46 = vcombine.high %v923_v36, %v935_v38  ;;  %7231 = vmatprep.subr.bf16.mxu1 %v18294_v42  ;;  %v18301_v49 = vcombine.low %v923_v36, %v935_v38 }
  0xea   :  { %v955_v44 = vld [vmem:[#allocation5 + $0x1aa0] sm:$0xff] }
  0xeb   :  { %v947_v45 = vld [vmem:[#allocation5 + $0x1a60] sm:$0xff]  ;;  %v18318_v50 = vcombine.high %v943_v43, %v955_v44  ;;  %7747 = vmatprep.subr.bf16.mxu0 %v18302_v46  ;;  %v18317_v56 = vcombine.low %v943_v43, %v955_v44 }
  0xec   :  { %v959_v47 = vld [vmem:[#allocation5 + $0x1ac0] sm:$0xff]  ;;  %7232 = vmatpush1.bf16.msra.mxu1 %v18293_v48  ;;  %7748 = vmatpush1.bf16.msra.mxu0 %v18301_v49 }
  0xed   :  { %v967_v51 = vld [vmem:[#allocation5 + $0x1b00] sm:$0xff]  ;;  %v18326_v54 = vcombine.high %v947_v45, %v959_v47  ;;  %7233 = vmatprep.subr.bf16.mxu1 %v18318_v50  ;;  %v18325_v57 = vcombine.low %v947_v45, %v959_v47 }
  0xee   :  { %v979_v52 = vld [vmem:[#allocation5 + $0x1b60] sm:$0xff] }
  0xef   :  { %v971_v53 = vld [vmem:[#allocation5 + $0x1b20] sm:$0xff]  ;;  %v18342_v59 = vcombine.high %v967_v51, %v979_v52  ;;  %7749 = vmatprep.subr.bf16.mxu0 %v18326_v54  ;;  %v18341_v1 = vcombine.low %v967_v51, %v979_v52 }
  0xf0   :  { %v983_v55 = vld [vmem:[#allocation5 + $0x1b80] sm:$0xff]  ;;  %7234 = vmatpush1.bf16.msra.mxu1 %v18317_v56  ;;  %7750 = vmatpush1.bf16.msra.mxu0 %v18325_v57 }
  0xf1   :  { %v991_v60 = vld [vmem:[#allocation5 + $0x1bc0] sm:$0xff]  ;;  %v18350_v63 = vcombine.high %v971_v53, %v983_v55  ;;  %7235 = vmatprep.subr.bf16.mxu1 %v18342_v59  ;;  %v18349_v2 = vcombine.low %v971_v53, %v983_v55 }
  0xf2   :  { %v1003_v61 = vld [vmem:[#allocation5 + $0x1c20] sm:$0xff] }
  0xf3   :  { %v995_v62 = vld [vmem:[#allocation5 + $0x1be0] sm:$0xff]  ;;  %v18366_v3 = vcombine.high %v991_v60, %v1003_v61  ;;  %7751 = vmatprep.subr.bf16.mxu0 %v18350_v63  ;;  %v18365_v9 = vcombine.low %v991_v60, %v1003_v61 }
  0xf4   :  { %v1007_v0 = vld [vmem:[#allocation5 + $0x1c40] sm:$0xff]  ;;  %7236 = vmatpush1.bf16.msra.mxu1 %v18341_v1  ;;  %7752 = vmatpush1.bf16.msra.mxu0 %v18349_v2 }
  0xf5   :  { %v1015_v4 = vld [vmem:[#allocation5 + $0x1c80] sm:$0xff]  ;;  %v18374_v7 = vcombine.high %v995_v62, %v1007_v0  ;;  %7237 = vmatprep.subr.bf16.mxu1 %v18366_v3  ;;  %v18373_v10 = vcombine.low %v995_v62, %v1007_v0 }
  0xf6   :  { %v1027_v5 = vld [vmem:[#allocation5 + $0x1ce0] sm:$0xff] }
  0xf7   :  { %v1019_v6 = vld [vmem:[#allocation5 + $0x1ca0] sm:$0xff]  ;;  %v18390_v11 = vcombine.high %v1015_v4, %v1027_v5  ;;  %7753 = vmatprep.subr.bf16.mxu0 %v18374_v7  ;;  %v18389_v18 = vcombine.low %v1015_v4, %v1027_v5 }
  0xf8   :  { %v1031_v8 = vld [vmem:[#allocation5 + $0x1d00] sm:$0xff]  ;;  %7238 = vmatpush1.bf16.msra.mxu1 %v18365_v9  ;;  %7754 = vmatpush1.bf16.msra.mxu0 %v18373_v10 }
  0xf9   :  { %v1039_v12 = vld [vmem:[#allocation5 + $0x1d40] sm:$0xff]  ;;  %v18398_v16 = vcombine.high %v1019_v6, %v1031_v8  ;;  %7239 = vmatprep.subr.bf16.mxu1 %v18390_v11  ;;  %v18397_v19 = vcombine.low %v1019_v6, %v1031_v8 }
  0xfa   :  { %v1051_v13 = vld [vmem:[#allocation5 + $0x1da0] sm:$0xff] }
  0xfb   :  { %v1043_v14 = vld [vmem:[#allocation5 + $0x1d60] sm:$0xff]  ;;  %v18414_v20 = vcombine.high %v1039_v12, %v1051_v13  ;;  %7755 = vmatprep.subr.bf16.mxu0 %v18398_v16  ;;  %v18413_v27 = vcombine.low %v1039_v12, %v1051_v13 }
  0xfc   :  { %v1055_v17 = vld [vmem:[#allocation5 + $0x1dc0] sm:$0xff]  ;;  %7240 = vmatpush1.bf16.msra.mxu1 %v18389_v18  ;;  %7756 = vmatpush1.bf16.msra.mxu0 %v18397_v19 }
  0xfd   :  { %v1063_v21 = vld [vmem:[#allocation5 + $0x1e00] sm:$0xff]  ;;  %v18422_v24 = vcombine.high %v1043_v14, %v1055_v17  ;;  %7241 = vmatprep.subr.bf16.mxu1 %v18414_v20  ;;  %v18421_v28 = vcombine.low %v1043_v14, %v1055_v17 }
  0xfe   :  { %v1075_v22 = vld [vmem:[#allocation5 + $0x1e60] sm:$0xff] }
  0xff   :  { %v1067_v23 = vld [vmem:[#allocation5 + $0x1e20] sm:$0xff]  ;;  %v18438_v29 = vcombine.high %v1063_v21, %v1075_v22  ;;  %7757 = vmatprep.subr.bf16.mxu0 %v18422_v24  ;;  %v18437_v36 = vcombine.low %v1063_v21, %v1075_v22 }
 0x100   :  { %v1079_v26 = vld [vmem:[#allocation5 + $0x1e80] sm:$0xff]  ;;  %7242 = vmatpush1.bf16.msra.mxu1 %v18413_v27  ;;  %7758 = vmatpush1.bf16.msra.mxu0 %v18421_v28  ;;  %v104_v27 = vld [vmem:[#allocation5 + $0x8] sm:$0xff] }
 0x101   :  { %v1087_v31 = vld [vmem:[#allocation5 + $0x1ec0] sm:$0xff]  ;;  %v18446_v34 = vcombine.high %v1067_v23, %v1079_v26  ;;  %7243 = vmatprep.subr.bf16.mxu1 %v18438_v29  ;;  %v18445_v37 = vcombine.low %v1067_v23, %v1079_v26  ;;  %v116_v28 = vld [vmem:[#allocation5 + $0x68] sm:$0xff]  ;;  %v109_v29 = vld [vmem:[#allocation5 + $0x30] sm:$0xff] }
 0x102   :  { %v1099_v32 = vld [vmem:[#allocation5 + $0x1f20] sm:$0xff] }
 0x103   :  { %v1091_v33 = vld [vmem:[#allocation5 + $0x1ee0] sm:$0xff]  ;;  %v18462_v38 = vcombine.high %v1087_v31, %v1099_v32  ;;  %7759 = vmatprep.subr.bf16.mxu0 %v18446_v34  ;;  %v18461_v45 = vcombine.low %v1087_v31, %v1099_v32  ;;  %v121_v34 = vld [vmem:[#allocation5 + $0x90] sm:$0xff] }
 0x104   :  { %v1103_v35 = vld [vmem:[#allocation5 + $0x1f40] sm:$0xff]  ;;  %7244 = vmatpush1.bf16.msra.mxu1 %v18437_v36  ;;  %7760 = vmatpush1.bf16.msra.mxu0 %v18445_v37  ;;  %v17480_v37 = vcombine.high %v104_v27, %v116_v28 }
 0x105   :  { %v1111_v40 = vld [vmem:[#allocation5 + $0x1f80] sm:$0xff]  ;;  %v18470_v43 = vcombine.high %v1091_v33, %v1103_v35  ;;  %7245 = vmatprep.subr.bf16.mxu1 %v18462_v38  ;;  %v18469_v46 = vcombine.low %v1091_v33, %v1103_v35  ;;  %v95_v33 = vld [vmem:[#allocation2 + $0x50] sm:$0xff]  ;;  %v128_v38 = vld [vmem:[#allocation5 + $0xc8] sm:$0xff] }
 0x106   :  { %v1123_v41 = vld [vmem:[#allocation5 + $0x1fe0] sm:$0xff] }
 0x107   :  { %v1115_v42 = vld [vmem:[#allocation5 + $0x1fa0] sm:$0xff]  ;;  %v18486_v47 = vcombine.high %v1111_v40, %v1123_v41  ;;  %7761 = vmatprep.subr.bf16.mxu0 %v18470_v43  ;;  %v18485_v53 = vcombine.low %v1111_v40, %v1123_v41  ;;  %v140_v40 = vld [vmem:[#allocation5 + $0x128] sm:$0xff]  ;;  %v133_v41 = vld [vmem:[#allocation5 + $0xf0] sm:$0xff] }
 0x108   :  { %v1127_v44 = vld [vmem:[#allocation5 + $0x2000] sm:$0xff]  ;;  %7246 = vmatpush1.bf16.msra.mxu1 %v18461_v45  ;;  %7762 = vmatpush1.bf16.msra.mxu0 %v18469_v46  ;;  %v145_v43 = vld [vmem:[#allocation5 + $0x150] sm:$0xff]  ;;  %v17479_v45 = vcombine.low %v104_v27, %v116_v28  ;;  %v17489_v46 = vcombine.low %v109_v29, %v121_v34  ;;  %v272_v27 = vld [vmem:[#allocation5 + $0x548] sm:$0xff] }
 0x109   :  { %v1135_v48 = vld [vmem:[#allocation5 + $0x2040] sm:$0xff]  ;;  %v18494_v51 = vcombine.high %v1115_v42, %v1127_v44  ;;  %7247 = vmatprep.subr.bf16.mxu1 %v18486_v47  ;;  %v18493_v54 = vcombine.low %v1115_v42, %v1127_v44  ;;  %v17490_v42 = vcombine.high %v109_v29, %v121_v34  ;;  %v17504_v47 = vcombine.high %v128_v38, %v140_v40  ;;  %v284_v28 = vld [vmem:[#allocation5 + $0x5a8] sm:$0xff]  ;;  %v277_v29 = vld [vmem:[#allocation5 + $0x570] sm:$0xff] }
 0x10a   :  { %v1147_v49 = vld [vmem:[#allocation5 + $0x20a0] sm:$0xff] }
 0x10b   :  { %v1139_v50 = vld [vmem:[#allocation5 + $0x2060] sm:$0xff]  ;;  %v18510_v55 = vcombine.high %v1135_v48, %v1147_v49  ;;  %7763 = vmatprep.subr.bf16.mxu0 %v18494_v51  ;;  %v18509_v62 = vcombine.low %v1135_v48, %v1147_v49  ;;  %v152_v48 = vld [vmem:[#allocation5 + $0x188] sm:$0xff]  ;;  %v17514_v51 = vcombine.high %v133_v41, %v145_v43 }
 0x10c   :  { %v1151_v52 = vld [vmem:[#allocation5 + $0x20c0] sm:$0xff]  ;;  %7248 = vmatpush1.bf16.msra.mxu1 %v18485_v53  ;;  %7764 = vmatpush1.bf16.msra.mxu0 %v18493_v54  ;;  %v164_v49 = vld [vmem:[#allocation5 + $0x1e8] sm:$0xff]  ;;  %v17503_v53 = vcombine.low %v128_v38, %v140_v40  ;;  %v17513_v54 = vcombine.low %v133_v41, %v145_v43  ;;  %v301_v38 = vld [vmem:[#allocation5 + $0x630] sm:$0xff] }
 0x10d   :  { %v1159_v56 = vld [vmem:[#allocation5 + $0x2100] sm:$0xff]  ;;  %v18518_v60 = vcombine.high %v1139_v50, %v1151_v52  ;;  %7249 = vmatprep.subr.bf16.mxu1 %v18510_v55  ;;  %v18517_v63 = vcombine.low %v1139_v50, %v1151_v52  ;;  %v157_v50 = vld [vmem:[#allocation5 + $0x1b0] sm:$0xff]  ;;  %v17528_v55 = vcombine.high %v152_v48, %v164_v49 }
 0x10e   :  { %v1171_v57 = vld [vmem:[#allocation5 + $0x2160] sm:$0xff]  ;;  %v169_v52 = vld [vmem:[#allocation5 + $0x210] sm:$0xff] }
 0x10f   :  { %v1163_v59 = vld [vmem:[#allocation5 + $0x2120] sm:$0xff]  ;;  %v18534_v0 = vcombine.high %v1159_v56, %v1171_v57  ;;  %7765 = vmatprep.subr.bf16.mxu0 %v18518_v60  ;;  %v18533_v6 = vcombine.low %v1159_v56, %v1171_v57  ;;  %v176_v56 = vld [vmem:[#allocation5 + $0x248] sm:$0xff]  ;;  %v17538_v60 = vcombine.high %v157_v50, %v169_v52  ;;  %v313_v41 = vld [vmem:[#allocation5 + $0x690] sm:$0xff] }
 0x110   :  { %v1175_v61 = vld [vmem:[#allocation5 + $0x2180] sm:$0xff]  ;;  %7250 = vmatpush1.bf16.msra.mxu1 %v18509_v62  ;;  %7766 = vmatpush1.bf16.msra.mxu0 %v18517_v63  ;;  %v188_v57 = vld [vmem:[#allocation5 + $0x2a8] sm:$0xff]  ;;  %v17527_v62 = vcombine.low %v152_v48, %v164_v49  ;;  %v17537_v63 = vcombine.low %v157_v50, %v169_v52  ;;  %v325_v48 = vld [vmem:[#allocation5 + $0x6f0] sm:$0xff]  ;;  %v17682_v49 = vcombine.high %v301_v38, %v313_v41 }
 0x111   :  { %v1183_v1 = vld [vmem:[#allocation5 + $0x21c0] sm:$0xff]  ;;  %v18542_v4 = vcombine.high %v1163_v59, %v1175_v61  ;;  %7251 = vmatprep.subr.bf16.mxu1 %v18534_v0  ;;  %v18541_v7 = vcombine.low %v1163_v59, %v1175_v61  ;;  %v181_v59 = vld [vmem:[#allocation5 + $0x270] sm:$0xff]  ;;  %v17552_v0 = vcombine.high %v176_v56, %v188_v57  ;;  %v17681_v52 = vcombine.low %v301_v38, %v313_v41 }
 0x112   :  { %v1195_v2 = vld [vmem:[#allocation5 + $0x2220] sm:$0xff]  ;;  %v193_v61 = vld [vmem:[#allocation5 + $0x2d0] sm:$0xff] }
 0x113   :  { %v1187_v3 = vld [vmem:[#allocation5 + $0x21e0] sm:$0xff]  ;;  %v18558_v8 = vcombine.high %v1183_v1, %v1195_v2  ;;  %7767 = vmatprep.subr.bf16.mxu0 %v18542_v4  ;;  %v18557_v14 = vcombine.low %v1183_v1, %v1195_v2  ;;  %v200_v1 = vld [vmem:[#allocation5 + $0x308] sm:$0xff]  ;;  %v17562_v4 = vcombine.high %v181_v59, %v193_v61  ;;  %v337_v50 = vld [vmem:[#allocation5 + $0x750] sm:$0xff] }
 0x114   :  { %v1199_v5 = vld [vmem:[#allocation5 + $0x2240] sm:$0xff]  ;;  %7252 = vmatpush1.bf16.msra.mxu1 %v18533_v6  ;;  %7768 = vmatpush1.bf16.msra.mxu0 %v18541_v7  ;;  %v212_v2 = vld [vmem:[#allocation5 + $0x368] sm:$0xff]  ;;  %v17551_v6 = vcombine.low %v176_v56, %v188_v57  ;;  %v17561_v7 = vcombine.low %v181_v59, %v193_v61  ;;  %v349_v56 = vld [vmem:[#allocation5 + $0x7b0] sm:$0xff]  ;;  %v17706_v57 = vcombine.high %v325_v48, %v337_v50 }
 0x115   :  { %v1207_v9 = vld [vmem:[#allocation5 + $0x2280] sm:$0xff]  ;;  %v18566_v12 = vcombine.high %v1187_v3, %v1199_v5  ;;  %7253 = vmatprep.subr.bf16.mxu1 %v18558_v8  ;;  %v18565_v16 = vcombine.low %v1187_v3, %v1199_v5  ;;  %v205_v3 = vld [vmem:[#allocation5 + $0x330] sm:$0xff]  ;;  %v17576_v8 = vcombine.high %v200_v1, %v212_v2  ;;  %v17705_v61 = vcombine.low %v325_v48, %v337_v50 }
 0x116   :  { %v1219_v10 = vld [vmem:[#allocation5 + $0x22e0] sm:$0xff]  ;;  %v217_v5 = vld [vmem:[#allocation5 + $0x390] sm:$0xff] }
 0x117   :  { %v1211_v11 = vld [vmem:[#allocation5 + $0x22a0] sm:$0xff]  ;;  %v18582_v17 = vcombine.high %v1207_v9, %v1219_v10  ;;  %7769 = vmatprep.subr.bf16.mxu0 %v18566_v12  ;;  %v18581_v23 = vcombine.low %v1207_v9, %v1219_v10  ;;  %v224_v9 = vld [vmem:[#allocation5 + $0x3c8] sm:$0xff]  ;;  %v17586_v12 = vcombine.high %v205_v3, %v217_v5  ;;  %v361_v59 = vld [vmem:[#allocation5 + $0x810] sm:$0xff] }
 0x118   :  { %v1223_v13 = vld [vmem:[#allocation5 + $0x2300] sm:$0xff]  ;;  %7254 = vmatpush1.bf16.msra.mxu1 %v18557_v14  ;;  %7770 = vmatpush1.bf16.msra.mxu0 %v18565_v16  ;;  %v236_v10 = vld [vmem:[#allocation5 + $0x428] sm:$0xff]  ;;  %v17575_v14 = vcombine.low %v200_v1, %v212_v2  ;;  %v17585_v16 = vcombine.low %v205_v3, %v217_v5  ;;  %v373_v1 = vld [vmem:[#allocation5 + $0x870] sm:$0xff]  ;;  %v17730_v2 = vcombine.high %v349_v56, %v361_v59 }
 0x119   :  { %v1231_v18 = vld [vmem:[#allocation5 + $0x2340] sm:$0xff]  ;;  %v18590_v21 = vcombine.high %v1211_v11, %v1223_v13  ;;  %7255 = vmatprep.subr.bf16.mxu1 %v18582_v17  ;;  %v18589_v24 = vcombine.low %v1211_v11, %v1223_v13  ;;  %v229_v11 = vld [vmem:[#allocation5 + $0x3f0] sm:$0xff]  ;;  %v17600_v17 = vcombine.high %v224_v9, %v236_v10  ;;  %v17729_v5 = vcombine.low %v349_v56, %v361_v59 }
 0x11a   :  { %v1243_v19 = vld [vmem:[#allocation5 + $0x23a0] sm:$0xff]  ;;  %v241_v13 = vld [vmem:[#allocation5 + $0x450] sm:$0xff] }
 0x11b   :  { %v1235_v20 = vld [vmem:[#allocation5 + $0x2360] sm:$0xff]  ;;  %v18606_v26 = vcombine.high %v1231_v18, %v1243_v19  ;;  %7771 = vmatprep.subr.bf16.mxu0 %v18590_v21  ;;  %v18605_v35 = vcombine.low %v1231_v18, %v1243_v19  ;;  %v248_v18 = vld [vmem:[#allocation5 + $0x488] sm:$0xff]  ;;  %v17610_v21 = vcombine.high %v229_v11, %v241_v13  ;;  %v385_v3 = vld [vmem:[#allocation5 + $0x8d0] sm:$0xff] }
 0x11c   :  { %v1247_v22 = vld [vmem:[#allocation5 + $0x23c0] sm:$0xff]  ;;  %7256 = vmatpush1.bf16.msra.mxu1 %v18581_v23  ;;  %7772 = vmatpush1.bf16.msra.mxu0 %v18589_v24  ;;  %v260_v19 = vld [vmem:[#allocation5 + $0x4e8] sm:$0xff]  ;;  %v17599_v23 = vcombine.low %v224_v9, %v236_v10  ;;  %v17609_v24 = vcombine.low %v229_v11, %v241_v13  ;;  %v397_v9 = vld [vmem:[#allocation5 + $0x930] sm:$0xff]  ;;  %v17754_v10 = vcombine.high %v373_v1, %v385_v3 }
 0x11d   :  { %v18614_v31 = vcombine.high %v1235_v20, %v1247_v22  ;;  %v89_v32 = vld [vmem:[#allocation2 + $0x20] sm:$0xff]  ;;  %7257 = vmatprep.subr.bf16.mxu1 %v18606_v26  ;;  %v18613_v36 = vcombine.low %v1235_v20, %v1247_v22  ;;  %v253_v20 = vld [vmem:[#allocation5 + $0x4b0] sm:$0xff]  ;;  %v17624_v26 = vcombine.high %v248_v18, %v260_v19  ;;  %v17753_v13 = vcombine.low %v373_v1, %v385_v3 }
 0x11e   :  { %v22178_v44 = vpack.c.bf16 %v95_v33, %v89_v32  ;;  %v265_v22 = vld [vmem:[#allocation5 + $0x510] sm:$0xff]  ;;  %v17623_v33 = vcombine.low %v248_v18, %v260_v19 }
 0x11f   :  { %7773 = vmatprep.subr.bf16.mxu0 %v18614_v31  ;;  %v17634_v31 = vcombine.high %v253_v20, %v265_v22  ;;  %v289_v32 = vld [vmem:[#allocation5 + $0x5d0] sm:$0xff]  ;;  %v17633_v34 = vcombine.low %v253_v20, %v265_v22 }
 0x120   :  { %7258 = vmatpush1.bf16.msra.mxu1 %v18605_v35  ;;  %7774 = vmatpush1.bf16.msra.mxu0 %v18613_v36  ;;  %v17648_v35 = vcombine.high %v272_v27, %v284_v28  ;;  %v296_v36 = vld [vmem:[#allocation5 + $0x608] sm:$0xff]  ;;  %v17658_v40 = vcombine.high %v277_v29, %v289_v32  ;;  %v17657_v43 = vcombine.low %v277_v29, %v289_v32  ;;  %v409_v11 = vld [vmem:[#allocation5 + $0x990] sm:$0xff] }
 0x121   :  { %7270 = vmatprep.subr.bf16.mxu1 %v17480_v37  ;;  %7915 = vmatprep.subr.bf16.mxu0 %v17490_v42  ;;  %v308_v37 = vld [vmem:[#allocation5 + $0x668] sm:$0xff]  ;;  %v17647_v42 = vcombine.low %v272_v27, %v284_v28  ;;  %v421_v18 = vld [vmem:[#allocation5 + $0x9f0] sm:$0xff]  ;;  %v17778_v19 = vcombine.high %v397_v9, %v409_v11  ;;  %v17777_v22 = vcombine.low %v397_v9, %v409_v11 }
 0x122   :  { %v433_v20 = vld [vmem:[#allocation5 + $0xa50] sm:$0xff] }
 0x123   :  { %7260 = vmatmul.mubr.bf16.vlgmr.msra.gmra.mrb[0].mxu1 %v22178_v44  ;;  %7776 = vmatmul.mubr.bf16.vlgmr.msra.gmra.mrb[0].mxu0 %v22178_v44  ;;  %v445_v27 = vld [vmem:[#allocation5 + $0xab0] sm:$0xff]  ;;  %v17802_v28 = vcombine.high %v421_v18, %v433_v20  ;;  %v17801_v32 = vcombine.low %v421_v18, %v433_v20 }
 0x124   :  { %7271 = vmatpush1.bf16.msra.mxu1 %v17479_v45  ;;  %7916 = vmatpush1.bf16.msra.mxu0 %v17489_v46  ;;  %v17672_v45 = vcombine.high %v296_v36, %v308_v37  ;;  %v320_v46 = vld [vmem:[#allocation5 + $0x6c8] sm:$0xff]  ;;  %v457_v29 = vld [vmem:[#allocation5 + $0xb10] sm:$0xff] }
 0x125   :  { %7272 = vmatprep.subr.bf16.mxu1 %v17504_v47  ;;  %7917 = vmatprep.subr.bf16.mxu0 %v17514_v51  ;;  %v332_v47 = vld [vmem:[#allocation5 + $0x728] sm:$0xff]  ;;  %v17671_v51 = vcombine.low %v296_v36, %v308_v37  ;;  %v469_v36 = vld [vmem:[#allocation5 + $0xb70] sm:$0xff]  ;;  %v17826_v37 = vcombine.high %v445_v27, %v457_v29  ;;  %v17825_v41 = vcombine.low %v445_v27, %v457_v29 }
 0x126   :  { %7302 = vmatprep.mubr.bf16.mxu1 %v22158_v58  ;;  %7947 = vmatprep.mubr.bf16.mxu0 %v22158_v58  ;;  %v481_v38 = vld [vmem:[#allocation5 + $0xbd0] sm:$0xff] }
 0x127   :  { %v505_v48 = vld [vmem:[#allocation5 + $0xc90] sm:$0xff]  ;;  %v17849_v50 = vcombine.low %v469_v36, %v481_v38 }
 0x128   :  { %7273 = vmatpush1.bf16.msra.mxu1 %v17503_v53  ;;  %7918 = vmatpush1.bf16.msra.mxu0 %v17513_v54  ;;  %v17696_v53 = vcombine.high %v320_v46, %v332_v47  ;;  %v344_v54 = vld [vmem:[#allocation5 + $0x788] sm:$0xff]  ;;  %v529_v56 = vld [vmem:[#allocation5 + $0xd50] sm:$0xff] }
 0x129   :  { %7274 = vmatprep.subr.bf16.mxu1 %v17528_v55  ;;  %7919 = vmatprep.subr.bf16.mxu0 %v17538_v60  ;;  %v356_v55 = vld [vmem:[#allocation5 + $0x7e8] sm:$0xff]  ;;  %v17695_v60 = vcombine.low %v320_v46, %v332_v47  ;;  %v493_v46 = vld [vmem:[#allocation5 + $0xc30] sm:$0xff]  ;;  %v17850_v47 = vcombine.high %v469_v36, %v481_v38 }
 0x12a   :  { %v17873_v59 = vcombine.low %v493_v46, %v505_v48  ;;  %v553_v1 = vld [vmem:[#allocation5 + $0xe10] sm:$0xff] }
 0x12b   :  { %v577_v9 = vld [vmem:[#allocation5 + $0xed0] sm:$0xff] }
 0x12c   :  { %7275 = vmatpush1.bf16.msra.mxu1 %v17527_v62  ;;  %7920 = vmatpush1.bf16.msra.mxu0 %v17537_v63  ;;  %v17720_v62 = vcombine.high %v344_v54, %v356_v55  ;;  %v368_v63 = vld [vmem:[#allocation5 + $0x848] sm:$0xff]  ;;  %v601_v18 = vld [vmem:[#allocation5 + $0xf90] sm:$0xff] }
 0x12d   :  { %7276 = vmatprep.subr.bf16.mxu1 %v17552_v0  ;;  %7921 = vmatprep.subr.bf16.mxu0 %v17562_v4  ;;  %v380_v0 = vld [vmem:[#allocation5 + $0x8a8] sm:$0xff]  ;;  %v17719_v4 = vcombine.low %v344_v54, %v356_v55  ;;  %v517_v54 = vld [vmem:[#allocation5 + $0xcf0] sm:$0xff]  ;;  %v17874_v55 = vcombine.high %v493_v46, %v505_v48 }
 0x12e   :  { %v17897_v3 = vcombine.low %v517_v54, %v529_v56  ;;  %v625_v27 = vld [vmem:[#allocation5 + $0x1050] sm:$0xff] }
 0x12f   :  { %v649_v36 = vld [vmem:[#allocation5 + $0x1110] sm:$0xff] }
 0x130   :  { %7277 = vmatpush1.bf16.msra.mxu1 %v17551_v6  ;;  %7922 = vmatpush1.bf16.msra.mxu0 %v17561_v7  ;;  %v17744_v6 = vcombine.high %v368_v63, %v380_v0  ;;  %v392_v7 = vld [vmem:[#allocation5 + $0x908] sm:$0xff]  ;;  %v673_v46 = vld [vmem:[#allocation5 + $0x11d0] sm:$0xff] }
 0x131   :  { %7278 = vmatprep.subr.bf16.mxu1 %v17576_v8  ;;  %7923 = vmatprep.subr.bf16.mxu0 %v17586_v12  ;;  %v404_v8 = vld [vmem:[#allocation5 + $0x968] sm:$0xff]  ;;  %v17743_v12 = vcombine.low %v368_v63, %v380_v0  ;;  %v541_v63 = vld [vmem:[#allocation5 + $0xdb0] sm:$0xff]  ;;  %v17898_v0 = vcombine.high %v517_v54, %v529_v56 }
 0x132   :  { %v17921_v11 = vcombine.low %v541_v63, %v553_v1  ;;  %v697_v54 = vld [vmem:[#allocation5 + $0x1290] sm:$0xff] }
 0x134   :  { %7279 = vmatpush1.bf16.msra.mxu1 %v17575_v14  ;;  %7924 = vmatpush1.bf16.msra.mxu0 %v17585_v16  ;;  %v17768_v14 = vcombine.high %v392_v7, %v404_v8  ;;  %v416_v16 = vld [vmem:[#allocation5 + $0x9c8] sm:$0xff] }
 0x135   :  { %7280 = vmatprep.subr.bf16.mxu1 %v17600_v17  ;;  %7925 = vmatprep.subr.bf16.mxu0 %v17610_v21  ;;  %v428_v17 = vld [vmem:[#allocation5 + $0xa28] sm:$0xff]  ;;  %v17767_v21 = vcombine.low %v392_v7, %v404_v8  ;;  %v565_v7 = vld [vmem:[#allocation5 + $0xe70] sm:$0xff]  ;;  %v17922_v8 = vcombine.high %v541_v63, %v553_v1 }
 0x136   :  { %v17945_v20 = vcombine.low %v565_v7, %v577_v9  ;;  %v721_v63 = vld [vmem:[#allocation5 + $0x1350] sm:$0xff] }
 0x138   :  { %7281 = vmatpush1.bf16.msra.mxu1 %v17599_v23  ;;  %7926 = vmatpush1.bf16.msra.mxu0 %v17609_v24  ;;  %v17792_v23 = vcombine.high %v416_v16, %v428_v17  ;;  %v440_v24 = vld [vmem:[#allocation5 + $0xa88] sm:$0xff] }
 0x139   :  { %7282 = vmatprep.subr.bf16.mxu1 %v17624_v26  ;;  %7927 = vmatprep.subr.bf16.mxu0 %v17634_v31  ;;  %v452_v26 = vld [vmem:[#allocation5 + $0xae8] sm:$0xff]  ;;  %v17791_v31 = vcombine.low %v416_v16, %v428_v17  ;;  %v589_v16 = vld [vmem:[#allocation5 + $0xf30] sm:$0xff]  ;;  %v17946_v17 = vcombine.high %v565_v7, %v577_v9 }
 0x13a   :  { %v17969_v29 = vcombine.low %v589_v16, %v601_v18  ;;  %v745_v7 = vld [vmem:[#allocation5 + $0x1410] sm:$0xff] }
 0x13c   :  { %7283 = vmatpush1.bf16.msra.mxu1 %v17623_v33  ;;  %7928 = vmatpush1.bf16.msra.mxu0 %v17633_v34  ;;  %v17816_v33 = vcombine.high %v440_v24, %v452_v26  ;;  %v464_v34 = vld [vmem:[#allocation5 + $0xb48] sm:$0xff] }
 0x13d   :  { %7284 = vmatprep.subr.bf16.mxu1 %v17648_v35  ;;  %7929 = vmatprep.subr.bf16.mxu0 %v17658_v40  ;;  %v476_v35 = vld [vmem:[#allocation5 + $0xba8] sm:$0xff]  ;;  %v17815_v40 = vcombine.low %v440_v24, %v452_v26  ;;  %v613_v24 = vld [vmem:[#allocation5 + $0xff0] sm:$0xff]  ;;  %v17970_v26 = vcombine.high %v589_v16, %v601_v18 }
 0x13e   :  { %v17993_v38 = vcombine.low %v613_v24, %v625_v27  ;;  %v769_v16 = vld [vmem:[#allocation5 + $0x14d0] sm:$0xff] }
 0x140   :  { %7285 = vmatpush1.bf16.msra.mxu1 %v17647_v42  ;;  %7930 = vmatpush1.bf16.msra.mxu0 %v17657_v43  ;;  %v17840_v42 = vcombine.high %v464_v34, %v476_v35  ;;  %v488_v43 = vld [vmem:[#allocation5 + $0xc08] sm:$0xff] }
 0x141   :  { %7286 = vmatprep.subr.bf16.mxu1 %v17672_v45  ;;  %7931 = vmatprep.subr.bf16.mxu0 %v17682_v49  ;;  %v500_v45 = vld [vmem:[#allocation5 + $0xc68] sm:$0xff]  ;;  %v17839_v49 = vcombine.low %v464_v34, %v476_v35  ;;  %v637_v34 = vld [vmem:[#allocation5 + $0x10b0] sm:$0xff]  ;;  %v17994_v35 = vcombine.high %v613_v24, %v625_v27 }
 0x142   :  { %v18017_v48 = vcombine.low %v637_v34, %v649_v36  ;;  %v793_v24 = vld [vmem:[#allocation5 + $0x1590] sm:$0xff] }
 0x144   :  { %7287 = vmatpush1.bf16.msra.mxu1 %v17671_v51  ;;  %7932 = vmatpush1.bf16.msra.mxu0 %v17681_v52  ;;  %v17864_v51 = vcombine.high %v488_v43, %v500_v45  ;;  %v512_v52 = vld [vmem:[#allocation5 + $0xcc8] sm:$0xff] }
 0x145   :  { %7288 = vmatprep.subr.bf16.mxu1 %v17696_v53  ;;  %7933 = vmatprep.subr.bf16.mxu0 %v17706_v57  ;;  %v524_v53 = vld [vmem:[#allocation5 + $0xd28] sm:$0xff]  ;;  %v17863_v57 = vcombine.low %v488_v43, %v500_v45  ;;  %v18018_v43 = vcombine.high %v637_v34, %v649_v36  ;;  %v661_v45 = vld [vmem:[#allocation5 + $0x1170] sm:$0xff] }
 0x146   :  { %v18041_v56 = vcombine.low %v661_v45, %v673_v46  ;;  %v817_v34 = vld [vmem:[#allocation5 + $0x1650] sm:$0xff] }
 0x148   :  { %7289 = vmatpush1.bf16.msra.mxu1 %v17695_v60  ;;  %7934 = vmatpush1.bf16.msra.mxu0 %v17705_v61  ;;  %v17888_v60 = vcombine.high %v512_v52, %v524_v53  ;;  %v536_v61 = vld [vmem:[#allocation5 + $0xd88] sm:$0xff] }
 0x149   :  { %7290 = vmatprep.subr.bf16.mxu1 %v17720_v62  ;;  %7935 = vmatprep.subr.bf16.mxu0 %v17730_v2  ;;  %v548_v62 = vld [vmem:[#allocation5 + $0xde8] sm:$0xff]  ;;  %v17887_v2 = vcombine.low %v512_v52, %v524_v53  ;;  %v685_v52 = vld [vmem:[#allocation5 + $0x1230] sm:$0xff]  ;;  %v18042_v53 = vcombine.high %v661_v45, %v673_v46 }
 0x14a   :  { %v18065_v1 = vcombine.low %v685_v52, %v697_v54 }
 0x14c   :  { %7291 = vmatpush1.bf16.msra.mxu1 %v17719_v4  ;;  %7936 = vmatpush1.bf16.msra.mxu0 %v17729_v5  ;;  %v17912_v4 = vcombine.high %v536_v61, %v548_v62  ;;  %v560_v5 = vld [vmem:[#allocation5 + $0xe48] sm:$0xff] }
 0x14d   :  { %7292 = vmatprep.subr.bf16.mxu1 %v17744_v6  ;;  %7937 = vmatprep.subr.bf16.mxu0 %v17754_v10  ;;  %v572_v6 = vld [vmem:[#allocation5 + $0xea8] sm:$0xff]  ;;  %v17911_v10 = vcombine.low %v536_v61, %v548_v62  ;;  %v709_v61 = vld [vmem:[#allocation5 + $0x12f0] sm:$0xff]  ;;  %v18066_v62 = vcombine.high %v685_v52, %v697_v54 }
 0x14e   :  { %v18089_v9 = vcombine.low %v709_v61, %v721_v63  ;;  %v865_v52 = vld [vmem:[#allocation5 + $0x17d0] sm:$0xff] }
 0x150   :  { %7293 = vmatpush1.bf16.msra.mxu1 %v17743_v12  ;;  %7938 = vmatpush1.bf16.msra.mxu0 %v17753_v13  ;;  %v17936_v12 = vcombine.high %v560_v5, %v572_v6  ;;  %v584_v13 = vld [vmem:[#allocation5 + $0xf08] sm:$0xff] }
 0x151   :  { %7294 = vmatprep.subr.bf16.mxu1 %v17768_v14  ;;  %7939 = vmatprep.subr.bf16.mxu0 %v17778_v19  ;;  %v596_v14 = vld [vmem:[#allocation5 + $0xf68] sm:$0xff]  ;;  %v17935_v19 = vcombine.low %v560_v5, %v572_v6  ;;  %v733_v5 = vld [vmem:[#allocation5 + $0x13b0] sm:$0xff]  ;;  %v18090_v6 = vcombine.high %v709_v61, %v721_v63 }
 0x152   :  { %v18113_v18 = vcombine.low %v733_v5, %v745_v7  ;;  %v889_v61 = vld [vmem:[#allocation5 + $0x1890] sm:$0xff] }
 0x154   :  { %7295 = vmatpush1.bf16.msra.mxu1 %v17767_v21  ;;  %7940 = vmatpush1.bf16.msra.mxu0 %v17777_v22  ;;  %v17960_v21 = vcombine.high %v584_v13, %v596_v14  ;;  %v608_v22 = vld [vmem:[#allocation5 + $0xfc8] sm:$0xff] }
 0x155   :  { %7296 = vmatprep.subr.bf16.mxu1 %v17792_v23  ;;  %7941 = vmatprep.subr.bf16.mxu0 %v17802_v28  ;;  %v620_v23 = vld [vmem:[#allocation5 + $0x1028] sm:$0xff]  ;;  %v17959_v28 = vcombine.low %v584_v13, %v596_v14  ;;  %v757_v13 = vld [vmem:[#allocation5 + $0x1470] sm:$0xff]  ;;  %v18114_v14 = vcombine.high %v733_v5, %v745_v7 }
 0x156   :  { %v18137_v27 = vcombine.low %v757_v13, %v769_v16  ;;  %v913_v5 = vld [vmem:[#allocation5 + $0x1950] sm:$0xff] }
 0x158   :  { %7297 = vmatpush1.bf16.msra.mxu1 %v17791_v31  ;;  %7942 = vmatpush1.bf16.msra.mxu0 %v17801_v32  ;;  %v17984_v31 = vcombine.high %v608_v22, %v620_v23  ;;  %v632_v32 = vld [vmem:[#allocation5 + $0x1088] sm:$0xff] }
 0x159   :  { %7298 = vmatprep.subr.bf16.mxu1 %v17816_v33  ;;  %7943 = vmatprep.subr.bf16.mxu0 %v17826_v37  ;;  %v644_v33 = vld [vmem:[#allocation5 + $0x10e8] sm:$0xff]  ;;  %v17983_v37 = vcombine.low %v608_v22, %v620_v23  ;;  %v781_v22 = vld [vmem:[#allocation5 + $0x1530] sm:$0xff]  ;;  %v18138_v23 = vcombine.high %v757_v13, %v769_v16 }
 0x15a   :  { %v18161_v36 = vcombine.low %v781_v22, %v793_v24  ;;  %v937_v13 = vld [vmem:[#allocation5 + $0x1a10] sm:$0xff] }
 0x15c   :  { %7299 = vmatpush1.bf16.msra.mxu1 %v17815_v40  ;;  %7944 = vmatpush1.bf16.msra.mxu0 %v17825_v41  ;;  %v18008_v40 = vcombine.high %v632_v32, %v644_v33  ;;  %v656_v41 = vld [vmem:[#allocation5 + $0x1148] sm:$0xff] }
 0x15d   :  { %7300 = vmatprep.subr.bf16.mxu1 %v17840_v42  ;;  %7945 = vmatprep.subr.bf16.mxu0 %v17850_v47  ;;  %v668_v42 = vld [vmem:[#allocation5 + $0x11a8] sm:$0xff]  ;;  %v18007_v47 = vcombine.low %v632_v32, %v644_v33  ;;  %v805_v32 = vld [vmem:[#allocation5 + $0x15f0] sm:$0xff]  ;;  %v18162_v33 = vcombine.high %v781_v22, %v793_v24 }
 0x15e   :  { %v18185_v46 = vcombine.low %v805_v32, %v817_v34  ;;  %v961_v22 = vld [vmem:[#allocation5 + $0x1ad0] sm:$0xff] }
 0x160   :  { %7301 = vmatpush1.bf16.msra.mxu1 %v17839_v49  ;;  %7946 = vmatpush1.bf16.msra.mxu0 %v17849_v50  ;;  %v18032_v49 = vcombine.high %v656_v41, %v668_v42  ;;  %v680_v50 = vld [vmem:[#allocation5 + $0x1208] sm:$0xff] }
 0x161   :  { %7313 = vmatprep.subr.bf16.mxu1 %v17864_v51  ;;  %7958 = vmatprep.subr.bf16.mxu0 %v17874_v55  ;;  %v692_v51 = vld [vmem:[#allocation5 + $0x1268] sm:$0xff]  ;;  %v18031_v55 = vcombine.low %v656_v41, %v668_v42  ;;  %v829_v41 = vld [vmem:[#allocation5 + $0x16b0] sm:$0xff]  ;;  %v18186_v42 = vcombine.high %v805_v32, %v817_v34 }
 0x162   :  { %v985_v32 = vld [vmem:[#allocation5 + $0x1b90] sm:$0xff] }
 0x163   :  { %7303 = vmatmul.mubr.bf16.vlgmr.msra.gmra.mrb[4].mxu1 %v22162_v15  ;;  %7948 = vmatmul.mubr.bf16.vlgmr.msra.gmra.mrb[4].mxu0 %v22162_v15 }
 0x164   :  { %7314 = vmatpush1.bf16.msra.mxu1 %v17863_v57  ;;  %7959 = vmatpush1.bf16.msra.mxu0 %v17873_v59  ;;  %v18056_v57 = vcombine.high %v680_v50, %v692_v51  ;;  %v704_v59 = vld [vmem:[#allocation5 + $0x12c8] sm:$0xff] }
 0x165   :  { %7315 = vmatprep.subr.bf16.mxu1 %v17888_v60  ;;  %7960 = vmatprep.subr.bf16.mxu0 %v17898_v0  ;;  %v716_v60 = vld [vmem:[#allocation5 + $0x1328] sm:$0xff]  ;;  %v18055_v0 = vcombine.low %v680_v50, %v692_v51  ;;  %v853_v50 = vld [vmem:[#allocation5 + $0x1770] sm:$0xff] }
 0x166   :  { %7345 = vmatprep.mubr.bf16.mxu1 %v22164_v25  ;;  %7990 = vmatprep.mubr.bf16.mxu0 %v22164_v25  ;;  %v18233_v63 = vcombine.low %v853_v50, %v865_v52 }
 0x168   :  { %7316 = vmatpush1.bf16.msra.mxu1 %v17887_v2  ;;  %7961 = vmatpush1.bf16.msra.mxu0 %v17897_v3  ;;  %v18080_v2 = vcombine.high %v704_v59, %v716_v60  ;;  %v728_v3 = vld [vmem:[#allocation5 + $0x1388] sm:$0xff] }
 0x169   :  { %7317 = vmatprep.subr.bf16.mxu1 %v17912_v4  ;;  %7962 = vmatprep.subr.bf16.mxu0 %v17922_v8  ;;  %v740_v4 = vld [vmem:[#allocation5 + $0x13e8] sm:$0xff]  ;;  %v18079_v8 = vcombine.low %v704_v59, %v716_v60  ;;  %v877_v59 = vld [vmem:[#allocation5 + $0x1830] sm:$0xff]  ;;  %v18234_v60 = vcombine.high %v853_v50, %v865_v52 }
 0x16a   :  { %v18257_v7 = vcombine.low %v877_v59, %v889_v61  ;;  %v1033_v50 = vld [vmem:[#allocation5 + $0x1d10] sm:$0xff] }
 0x16c   :  { %7318 = vmatpush1.bf16.msra.mxu1 %v17911_v10  ;;  %7963 = vmatpush1.bf16.msra.mxu0 %v17921_v11  ;;  %v18104_v10 = vcombine.high %v728_v3, %v740_v4  ;;  %v752_v11 = vld [vmem:[#allocation5 + $0x1448] sm:$0xff] }
 0x16d   :  { %7319 = vmatprep.subr.bf16.mxu1 %v17936_v12  ;;  %7964 = vmatprep.subr.bf16.mxu0 %v17946_v17  ;;  %v764_v12 = vld [vmem:[#allocation5 + $0x14a8] sm:$0xff]  ;;  %v18103_v17 = vcombine.low %v728_v3, %v740_v4  ;;  %v901_v3 = vld [vmem:[#allocation5 + $0x18f0] sm:$0xff]  ;;  %v18258_v4 = vcombine.high %v877_v59, %v889_v61 }
 0x16e   :  { %v18281_v16 = vcombine.low %v901_v3, %v913_v5  ;;  %v1057_v59 = vld [vmem:[#allocation5 + $0x1dd0] sm:$0xff] }
 0x170   :  { %7320 = vmatpush1.bf16.msra.mxu1 %v17935_v19  ;;  %7965 = vmatpush1.bf16.msra.mxu0 %v17945_v20  ;;  %v18128_v19 = vcombine.high %v752_v11, %v764_v12  ;;  %v776_v20 = vld [vmem:[#allocation5 + $0x1508] sm:$0xff] }
 0x171   :  { %7321 = vmatprep.subr.bf16.mxu1 %v17960_v21  ;;  %7966 = vmatprep.subr.bf16.mxu0 %v17970_v26  ;;  %v788_v21 = vld [vmem:[#allocation5 + $0x1568] sm:$0xff]  ;;  %v18127_v26 = vcombine.low %v752_v11, %v764_v12  ;;  %v925_v11 = vld [vmem:[#allocation5 + $0x19b0] sm:$0xff]  ;;  %v18282_v12 = vcombine.high %v901_v3, %v913_v5 }
 0x172   :  { %v18305_v24 = vcombine.low %v925_v11, %v937_v13  ;;  %v1081_v3 = vld [vmem:[#allocation5 + $0x1e90] sm:$0xff] }
 0x174   :  { %7322 = vmatpush1.bf16.msra.mxu1 %v17959_v28  ;;  %7967 = vmatpush1.bf16.msra.mxu0 %v17969_v29  ;;  %v18152_v28 = vcombine.high %v776_v20, %v788_v21  ;;  %v800_v29 = vld [vmem:[#allocation5 + $0x15c8] sm:$0xff] }
 0x175   :  { %7323 = vmatprep.subr.bf16.mxu1 %v17984_v31  ;;  %7968 = vmatprep.subr.bf16.mxu0 %v17994_v35  ;;  %v812_v31 = vld [vmem:[#allocation5 + $0x1628] sm:$0xff]  ;;  %v18151_v35 = vcombine.low %v776_v20, %v788_v21  ;;  %v949_v20 = vld [vmem:[#allocation5 + $0x1a70] sm:$0xff]  ;;  %v18306_v21 = vcombine.high %v925_v11, %v937_v13 }
 0x176   :  { %v18175_v45 = vcombine.low %v800_v29, %v812_v31  ;;  %v18329_v34 = vcombine.low %v949_v20, %v961_v22  ;;  %v1105_v11 = vld [vmem:[#allocation5 + $0x1f50] sm:$0xff] }
 0x178   :  { %7324 = vmatpush1.bf16.msra.mxu1 %v17983_v37  ;;  %7969 = vmatpush1.bf16.msra.mxu0 %v17993_v38  ;;  %v18176_v37 = vcombine.high %v800_v29, %v812_v31  ;;  %v824_v38 = vld [vmem:[#allocation5 + $0x1688] sm:$0xff]  ;;  %v973_v29 = vld [vmem:[#allocation5 + $0x1b30] sm:$0xff]  ;;  %v18330_v31 = vcombine.high %v949_v20, %v961_v22 }
 0x179   :  { %7325 = vmatprep.subr.bf16.mxu1 %v18008_v40  ;;  %7970 = vmatprep.subr.bf16.mxu0 %v18018_v43  ;;  %v836_v40 = vld [vmem:[#allocation5 + $0x16e8] sm:$0xff]  ;;  %v841_v43 = vld [vmem:[#allocation5 + $0x1710] sm:$0xff] }
 0x17a   :  { %v18210_v51 = vcombine.high %v829_v41, %v841_v43  ;;  %v18209_v54 = vcombine.low %v829_v41, %v841_v43  ;;  %v1009_v41 = vld [vmem:[#allocation5 + $0x1c50] sm:$0xff]  ;;  %v18353_v43 = vcombine.low %v973_v29, %v985_v32 }
 0x17b   :  { %v1129_v20 = vld [vmem:[#allocation5 + $0x2010] sm:$0xff] }
 0x17c   :  { %7326 = vmatpush1.bf16.msra.mxu1 %v18007_v47  ;;  %7971 = vmatpush1.bf16.msra.mxu0 %v18017_v48  ;;  %v18200_v47 = vcombine.high %v824_v38, %v836_v40  ;;  %v848_v48 = vld [vmem:[#allocation5 + $0x1748] sm:$0xff] }
 0x17d   :  { %7327 = vmatprep.subr.bf16.mxu1 %v18032_v49  ;;  %7972 = vmatprep.subr.bf16.mxu0 %v18042_v53  ;;  %v860_v49 = vld [vmem:[#allocation5 + $0x17a8] sm:$0xff]  ;;  %v18199_v53 = vcombine.low %v824_v38, %v836_v40  ;;  %v997_v38 = vld [vmem:[#allocation5 + $0x1bf0] sm:$0xff]  ;;  %v18354_v40 = vcombine.high %v973_v29, %v985_v32 }
 0x17e   :  { %v18377_v52 = vcombine.low %v997_v38, %v1009_v41  ;;  %v1153_v29 = vld [vmem:[#allocation5 + $0x20d0] sm:$0xff] }
 0x180   :  { %7328 = vmatpush1.bf16.msra.mxu1 %v18031_v55  ;;  %7973 = vmatpush1.bf16.msra.mxu0 %v18041_v56  ;;  %v18224_v55 = vcombine.high %v848_v48, %v860_v49  ;;  %v872_v56 = vld [vmem:[#allocation5 + $0x1808] sm:$0xff] }
 0x181   :  { %7329 = vmatprep.subr.bf16.mxu1 %v18056_v57  ;;  %7974 = vmatprep.subr.bf16.mxu0 %v18066_v62  ;;  %v884_v57 = vld [vmem:[#allocation5 + $0x1868] sm:$0xff]  ;;  %v18223_v62 = vcombine.low %v848_v48, %v860_v49  ;;  %v1021_v48 = vld [vmem:[#allocation5 + $0x1cb0] sm:$0xff]  ;;  %v18378_v49 = vcombine.high %v997_v38, %v1009_v41 }
 0x182   :  { %v18401_v61 = vcombine.low %v1021_v48, %v1033_v50  ;;  %v1177_v38 = vld [vmem:[#allocation5 + $0x2190] sm:$0xff] }
 0x184   :  { %7330 = vmatpush1.bf16.msra.mxu1 %v18055_v0  ;;  %7975 = vmatpush1.bf16.msra.mxu0 %v18065_v1  ;;  %v18248_v0 = vcombine.high %v872_v56, %v884_v57  ;;  %v896_v1 = vld [vmem:[#allocation5 + $0x18c8] sm:$0xff] }
 0x185   :  { %7331 = vmatprep.subr.bf16.mxu1 %v18080_v2  ;;  %7976 = vmatprep.subr.bf16.mxu0 %v18090_v6  ;;  %v908_v2 = vld [vmem:[#allocation5 + $0x1928] sm:$0xff]  ;;  %v18247_v6 = vcombine.low %v872_v56, %v884_v57  ;;  %v1045_v56 = vld [vmem:[#allocation5 + $0x1d70] sm:$0xff]  ;;  %v18402_v57 = vcombine.high %v1021_v48, %v1033_v50 }
 0x186   :  { %v18425_v5 = vcombine.low %v1045_v56, %v1057_v59  ;;  %v1201_v48 = vld [vmem:[#allocation5 + $0x2250] sm:$0xff] }
 0x188   :  { %7332 = vmatpush1.bf16.msra.mxu1 %v18079_v8  ;;  %7977 = vmatpush1.bf16.msra.mxu0 %v18089_v9  ;;  %v18272_v8 = vcombine.high %v896_v1, %v908_v2  ;;  %v920_v9 = vld [vmem:[#allocation5 + $0x1988] sm:$0xff] }
 0x189   :  { %7333 = vmatprep.subr.bf16.mxu1 %v18104_v10  ;;  %7978 = vmatprep.subr.bf16.mxu0 %v18114_v14  ;;  %v932_v10 = vld [vmem:[#allocation5 + $0x19e8] sm:$0xff]  ;;  %v18271_v14 = vcombine.low %v896_v1, %v908_v2  ;;  %v1069_v1 = vld [vmem:[#allocation5 + $0x1e30] sm:$0xff]  ;;  %v18426_v2 = vcombine.high %v1045_v56, %v1057_v59 }
 0x18a   :  { %v18449_v13 = vcombine.low %v1069_v1, %v1081_v3  ;;  %v1225_v56 = vld [vmem:[#allocation5 + $0x2310] sm:$0xff] }
 0x18c   :  { %7334 = vmatpush1.bf16.msra.mxu1 %v18103_v17  ;;  %7979 = vmatpush1.bf16.msra.mxu0 %v18113_v18  ;;  %v18296_v17 = vcombine.high %v920_v9, %v932_v10  ;;  %v944_v18 = vld [vmem:[#allocation5 + $0x1a48] sm:$0xff] }
 0x18d   :  { %7335 = vmatprep.subr.bf16.mxu1 %v18128_v19  ;;  %7980 = vmatprep.subr.bf16.mxu0 %v18138_v23  ;;  %v956_v19 = vld [vmem:[#allocation5 + $0x1aa8] sm:$0xff]  ;;  %v18295_v23 = vcombine.low %v920_v9, %v932_v10  ;;  %v1093_v9 = vld [vmem:[#allocation5 + $0x1ef0] sm:$0xff]  ;;  %v18450_v10 = vcombine.high %v1069_v1, %v1081_v3 }
 0x18e   :  { %v18473_v22 = vcombine.low %v1093_v9, %v1105_v11  ;;  %v1249_v1 = vld [vmem:[#allocation5 + $0x23d0] sm:$0xff] }
 0x190   :  { %7336 = vmatpush1.bf16.msra.mxu1 %v18127_v26  ;;  %7981 = vmatpush1.bf16.msra.mxu0 %v18137_v27  ;;  %v18320_v26 = vcombine.high %v944_v18, %v956_v19  ;;  %v968_v27 = vld [vmem:[#allocation5 + $0x1b08] sm:$0xff] }
 0x191   :  { %7337 = vmatprep.subr.bf16.mxu1 %v18152_v28  ;;  %7982 = vmatprep.subr.bf16.mxu0 %v18162_v33  ;;  %v980_v28 = vld [vmem:[#allocation5 + $0x1b68] sm:$0xff]  ;;  %v18319_v33 = vcombine.low %v944_v18, %v956_v19  ;;  %v1117_v18 = vld [vmem:[#allocation5 + $0x1fb0] sm:$0xff]  ;;  %v18474_v19 = vcombine.high %v1093_v9, %v1105_v11  ;;  %v123_v9 = vld [vmem:[#allocation5 + $0xa0] sm:$0xff] }
 0x192   :  { %v18497_v32 = vcombine.low %v1117_v18, %v1129_v20 }
 0x194   :  { %7338 = vmatpush1.bf16.msra.mxu1 %v18151_v35  ;;  %7983 = vmatpush1.bf16.msra.mxu0 %v18161_v36  ;;  %v18344_v35 = vcombine.high %v968_v27, %v980_v28  ;;  %v992_v36 = vld [vmem:[#allocation5 + $0x1bc8] sm:$0xff] }
 0x195   :  { %7339 = vmatprep.subr.bf16.mxu1 %v18176_v37  ;;  %7984 = vmatprep.subr.bf16.mxu0 %v18186_v42  ;;  %v1004_v37 = vld [vmem:[#allocation5 + $0x1c28] sm:$0xff]  ;;  %v18343_v42 = vcombine.low %v968_v27, %v980_v28  ;;  %v1141_v27 = vld [vmem:[#allocation5 + $0x2070] sm:$0xff]  ;;  %v18498_v28 = vcombine.high %v1117_v18, %v1129_v20  ;;  %v147_v18 = vld [vmem:[#allocation5 + $0x160] sm:$0xff] }
 0x196   :  { %v18521_v41 = vcombine.low %v1141_v27, %v1153_v29 }
 0x198   :  { %7340 = vmatpush1.bf16.msra.mxu1 %v18175_v45  ;;  %7985 = vmatpush1.bf16.msra.mxu0 %v18185_v46  ;;  %v18368_v45 = vcombine.high %v992_v36, %v1004_v37  ;;  %v1016_v46 = vld [vmem:[#allocation5 + $0x1c88] sm:$0xff] }
 0x199   :  { %7341 = vmatprep.subr.bf16.mxu1 %v18200_v47  ;;  %7986 = vmatprep.subr.bf16.mxu0 %v18210_v51  ;;  %v1028_v47 = vld [vmem:[#allocation5 + $0x1ce8] sm:$0xff]  ;;  %v18367_v51 = vcombine.low %v992_v36, %v1004_v37  ;;  %v1165_v36 = vld [vmem:[#allocation5 + $0x2130] sm:$0xff]  ;;  %v18522_v37 = vcombine.high %v1141_v27, %v1153_v29  ;;  %v171_v27 = vld [vmem:[#allocation5 + $0x220] sm:$0xff] }
 0x19a   :  { %v18545_v50 = vcombine.low %v1165_v36, %v1177_v38 }
 0x19c   :  { %7342 = vmatpush1.bf16.msra.mxu1 %v18199_v53  ;;  %7987 = vmatpush1.bf16.msra.mxu0 %v18209_v54  ;;  %v18392_v53 = vcombine.high %v1016_v46, %v1028_v47  ;;  %v1040_v54 = vld [vmem:[#allocation5 + $0x1d48] sm:$0xff] }
 0x19d   :  { %7343 = vmatprep.subr.bf16.mxu1 %v18224_v55  ;;  %7988 = vmatprep.subr.bf16.mxu0 %v18234_v60  ;;  %v1052_v55 = vld [vmem:[#allocation5 + $0x1da8] sm:$0xff]  ;;  %v18391_v60 = vcombine.low %v1016_v46, %v1028_v47  ;;  %v1189_v46 = vld [vmem:[#allocation5 + $0x21f0] sm:$0xff]  ;;  %v18546_v47 = vcombine.high %v1165_v36, %v1177_v38  ;;  %v195_v36 = vld [vmem:[#allocation5 + $0x2e0] sm:$0xff] }
 0x19e   :  { %v18569_v59 = vcombine.low %v1189_v46, %v1201_v48 }
 0x1a0   :  { %7344 = vmatpush1.bf16.msra.mxu1 %v18223_v62  ;;  %7989 = vmatpush1.bf16.msra.mxu0 %v18233_v63  ;;  %v18416_v62 = vcombine.high %v1040_v54, %v1052_v55  ;;  %v1064_v63 = vld [vmem:[#allocation5 + $0x1e08] sm:$0xff] }
 0x1a1   :  { %7356 = vmatprep.subr.bf16.mxu1 %v18248_v0  ;;  %8001 = vmatprep.subr.bf16.mxu0 %v18258_v4  ;;  %v1076_v0 = vld [vmem:[#allocation5 + $0x1e68] sm:$0xff]  ;;  %v18415_v4 = vcombine.low %v1040_v54, %v1052_v55  ;;  %v18570_v54 = vcombine.high %v1189_v46, %v1201_v48  ;;  %v1213_v55 = vld [vmem:[#allocation5 + $0x22b0] sm:$0xff] }
 0x1a2   :  { %v18593_v3 = vcombine.low %v1213_v55, %v1225_v56 }
 0x1a3   :  { %7346 = vmatmul.mubr.bf16.vlgmr.msra.gmra.mrb[4].mxu1 %v22170_v30  ;;  %7991 = vmatmul.mubr.bf16.vlgmr.msra.gmra.mrb[4].mxu0 %v22170_v30 }
 0x1a4   :  { %7357 = vmatpush1.bf16.msra.mxu1 %v18247_v6  ;;  %8002 = vmatpush1.bf16.msra.mxu0 %v18257_v7  ;;  %v18440_v6 = vcombine.high %v1064_v63, %v1076_v0  ;;  %v1088_v7 = vld [vmem:[#allocation5 + $0x1ec8] sm:$0xff] }
 0x1a5   :  { %7358 = vmatprep.subr.bf16.mxu1 %v18272_v8  ;;  %8003 = vmatprep.subr.bf16.mxu0 %v18282_v12  ;;  %v1100_v8 = vld [vmem:[#allocation5 + $0x1f28] sm:$0xff]  ;;  %v18439_v12 = vcombine.low %v1064_v63, %v1076_v0  ;;  %v1237_v63 = vld [vmem:[#allocation5 + $0x2370] sm:$0xff]  ;;  %v18594_v0 = vcombine.high %v1213_v55, %v1225_v56  ;;  %v1255_v56 = vld [vmem:[#allocation7] sm:$0xff] }
 0x1a6   :  { %7388 = vmatprep.mubr.bf16.mxu1 %v22172_v39  ;;  %8033 = vmatprep.mubr.bf16.mxu0 %v22172_v39  ;;  %v18617_v11 = vcombine.low %v1237_v63, %v1249_v1 }
 0x1a8   :  { %7359 = vmatpush1.bf16.msra.mxu1 %v18271_v14  ;;  %8004 = vmatpush1.bf16.msra.mxu0 %v18281_v16  ;;  %v18464_v14 = vcombine.high %v1088_v7, %v1100_v8  ;;  %v1112_v16 = vld [vmem:[#allocation5 + $0x1f88] sm:$0xff] }
 0x1a9   :  { %7360 = vmatprep.subr.bf16.mxu1 %v18296_v17  ;;  %8005 = vmatprep.subr.bf16.mxu0 %v18306_v21  ;;  %v1124_v17 = vld [vmem:[#allocation5 + $0x1fe8] sm:$0xff]  ;;  %v18463_v21 = vcombine.low %v1088_v7, %v1100_v8  ;;  %v111_v7 = vld [vmem:[#allocation5 + $0x40] sm:$0xff]  ;;  %v18618_v8 = vcombine.high %v1237_v63, %v1249_v1  ;;  %v261_v1 = vld [vmem:[#allocation5 + $0x4f0] sm:$0xff] }
 0x1aa   :  { %v17493_v20 = vcombine.low %v111_v7, %v123_v9 }
 0x1ac   :  { %7361 = vmatpush1.bf16.msra.mxu1 %v18295_v23  ;;  %8006 = vmatpush1.bf16.msra.mxu0 %v18305_v24  ;;  %v18488_v23 = vcombine.high %v1112_v16, %v1124_v17  ;;  %v1136_v24 = vld [vmem:[#allocation5 + $0x2048] sm:$0xff] }
 0x1ad   :  { %7362 = vmatprep.subr.bf16.mxu1 %v18320_v26  ;;  %8007 = vmatprep.subr.bf16.mxu0 %v18330_v31  ;;  %v1148_v26 = vld [vmem:[#allocation5 + $0x20a8] sm:$0xff]  ;;  %v18487_v31 = vcombine.low %v1112_v16, %v1124_v17  ;;  %v135_v16 = vld [vmem:[#allocation5 + $0x100] sm:$0xff]  ;;  %v17494_v17 = vcombine.high %v111_v7, %v123_v9 }
 0x1ae   :  { %v17517_v29 = vcombine.low %v135_v16, %v147_v18 }
 0x1b0   :  { %7363 = vmatpush1.bf16.msra.mxu1 %v18319_v33  ;;  %8008 = vmatpush1.bf16.msra.mxu0 %v18329_v34  ;;  %v18512_v33 = vcombine.high %v1136_v24, %v1148_v26  ;;  %v1160_v34 = vld [vmem:[#allocation5 + $0x2108] sm:$0xff] }
 0x1b1   :  { %7364 = vmatprep.subr.bf16.mxu1 %v18344_v35  ;;  %8009 = vmatprep.subr.bf16.mxu0 %v18354_v40  ;;  %v1172_v35 = vld [vmem:[#allocation5 + $0x2168] sm:$0xff]  ;;  %v18511_v40 = vcombine.low %v1136_v24, %v1148_v26  ;;  %v159_v24 = vld [vmem:[#allocation5 + $0x1c0] sm:$0xff]  ;;  %v17518_v26 = vcombine.high %v135_v16, %v147_v18 }
 0x1b4   :  { %7365 = vmatpush1.bf16.msra.mxu1 %v18343_v42  ;;  %8010 = vmatpush1.bf16.msra.mxu0 %v18353_v43  ;;  %v18536_v42 = vcombine.high %v1160_v34, %v1172_v35  ;;  %v1184_v43 = vld [vmem:[#allocation5 + $0x21c8] sm:$0xff] }
 0x1b5   :  { %7366 = vmatprep.subr.bf16.mxu1 %v18368_v45  ;;  %8011 = vmatprep.subr.bf16.mxu0 %v18378_v49  ;;  %v1196_v45 = vld [vmem:[#allocation5 + $0x2228] sm:$0xff]  ;;  %v18535_v49 = vcombine.low %v1160_v34, %v1172_v35  ;;  %v183_v34 = vld [vmem:[#allocation5 + $0x280] sm:$0xff]  ;;  %v17542_v35 = vcombine.high %v159_v24, %v171_v27 }
 0x1b6   :  { %v17566_v46 = vcombine.high %v183_v34, %v195_v36 }
 0x1b8   :  { %7367 = vmatpush1.bf16.msra.mxu1 %v18367_v51  ;;  %8012 = vmatpush1.bf16.msra.mxu0 %v18377_v52  ;;  %v18560_v51 = vcombine.high %v1184_v43, %v1196_v45  ;;  %v1208_v52 = vld [vmem:[#allocation5 + $0x2288] sm:$0xff] }
 0x1b9   :  { %7368 = vmatprep.subr.bf16.mxu1 %v18392_v53  ;;  %8013 = vmatprep.subr.bf16.mxu0 %v18402_v57  ;;  %v1220_v53 = vld [vmem:[#allocation5 + $0x22e8] sm:$0xff]  ;;  %v18559_v57 = vcombine.low %v1184_v43, %v1196_v45  ;;  %v213_v43 = vld [vmem:[#allocation5 + $0x370] sm:$0xff]  ;;  %v207_v45 = vld [vmem:[#allocation5 + $0x340] sm:$0xff] }
 0x1bc   :  { %7369 = vmatpush1.bf16.msra.mxu1 %v18391_v60  ;;  %8014 = vmatpush1.bf16.msra.mxu0 %v18401_v61  ;;  %v18584_v60 = vcombine.high %v1208_v52, %v1220_v53  ;;  %v1232_v61 = vld [vmem:[#allocation5 + $0x2348] sm:$0xff] }
 0x1bd   :  { %7370 = vmatprep.subr.bf16.mxu1 %v18416_v62  ;;  %8015 = vmatprep.subr.bf16.mxu0 %v18426_v2  ;;  %v1244_v62 = vld [vmem:[#allocation5 + $0x23a8] sm:$0xff]  ;;  %v18583_v2 = vcombine.low %v1208_v52, %v1220_v53  ;;  %v225_v52 = vld [vmem:[#allocation5 + $0x3d0] sm:$0xff] }
 0x1be   :  { %v237_v53 = vld [vmem:[#allocation5 + $0x430] sm:$0xff] }
 0x1c0   :  { %7371 = vmatpush1.bf16.msra.mxu1 %v18415_v4  ;;  %8016 = vmatpush1.bf16.msra.mxu0 %v18425_v5  ;;  %v18608_v4 = vcombine.high %v1232_v61, %v1244_v62  ;;  %v105_v5 = vld [vmem:[#allocation5 + $0x10] sm:$0xff] }
 0x1c1   :  { %7372 = vmatprep.subr.bf16.mxu1 %v18440_v6  ;;  %8017 = vmatprep.subr.bf16.mxu0 %v18450_v10  ;;  %v117_v6 = vld [vmem:[#allocation5 + $0x70] sm:$0xff]  ;;  %v18607_v10 = vcombine.low %v1232_v61, %v1244_v62 }
 0x1c2   :  { %v249_v62 = vld [vmem:[#allocation5 + $0x490] sm:$0xff] }
 0x1c4   :  { %7373 = vmatpush1.bf16.msra.mxu1 %v18439_v12  ;;  %8018 = vmatpush1.bf16.msra.mxu0 %v18449_v13  ;;  %v17482_v12 = vcombine.high %v105_v5, %v117_v6  ;;  %v129_v13 = vld [vmem:[#allocation5 + $0xd0] sm:$0xff] }
 0x1c5   :  { %7374 = vmatprep.subr.bf16.mxu1 %v18464_v14  ;;  %8019 = vmatprep.subr.bf16.mxu0 %v18474_v19  ;;  %v141_v14 = vld [vmem:[#allocation5 + $0x130] sm:$0xff]  ;;  %v17481_v19 = vcombine.low %v105_v5, %v117_v6  ;;  %v267_v5 = vld [vmem:[#allocation5 + $0x520] sm:$0xff] }
 0x1c8   :  { %7375 = vmatpush1.bf16.msra.mxu1 %v18463_v21  ;;  %8020 = vmatpush1.bf16.msra.mxu0 %v18473_v22  ;;  %v17506_v21 = vcombine.high %v129_v13, %v141_v14  ;;  %v153_v22 = vld [vmem:[#allocation5 + $0x190] sm:$0xff] }
 0x1c9   :  { %7376 = vmatprep.subr.bf16.mxu1 %v18488_v23  ;;  %8021 = vmatprep.subr.bf16.mxu0 %v18498_v28  ;;  %v165_v23 = vld [vmem:[#allocation5 + $0x1f0] sm:$0xff]  ;;  %v17505_v28 = vcombine.low %v129_v13, %v141_v14  ;;  %v279_v14 = vld [vmem:[#allocation5 + $0x580] sm:$0xff] }
 0x1ca   :  { %v17529_v38 = vcombine.low %v153_v22, %v165_v23  ;;  %v285_v13 = vld [vmem:[#allocation5 + $0x5b0] sm:$0xff] }
 0x1cc   :  { %7377 = vmatpush1.bf16.msra.mxu1 %v18487_v31  ;;  %8022 = vmatpush1.bf16.msra.mxu0 %v18497_v32  ;;  %v17530_v31 = vcombine.high %v153_v22, %v165_v23  ;;  %v177_v32 = vld [vmem:[#allocation5 + $0x250] sm:$0xff] }
 0x1cd   :  { %7378 = vmatprep.subr.bf16.mxu1 %v18512_v33  ;;  %8023 = vmatprep.subr.bf16.mxu0 %v18522_v37  ;;  %v189_v33 = vld [vmem:[#allocation5 + $0x2b0] sm:$0xff]  ;;  %v1261_v37 = vlaneseq }
 0x1cf   :  { %v22196_v48 = vshrl.u32 %v1261_v37, 7 }
 0x1d0   :  { %7379 = vmatpush1.bf16.msra.mxu1 %v18511_v40  ;;  %8024 = vmatpush1.bf16.msra.mxu0 %v18521_v41  ;;  %v17541_v40 = vcombine.low %v159_v24, %v171_v27  ;;  %v17554_v41 = vcombine.high %v177_v32, %v189_v33 }
 0x1d1   :  { %7380 = vmatprep.subr.bf16.mxu1 %v18536_v42  ;;  %8025 = vmatprep.subr.bf16.mxu0 %v18546_v47  ;;  %v201_v42 = vld [vmem:[#allocation5 + $0x310] sm:$0xff]  ;;  %v219_v47 = vld [vmem:[#allocation5 + $0x3a0] sm:$0xff]  ;;  %v22202_v61 = vsub.s32 1, %v22196_v48 }
 0x1d2   :  { %v17590_v55 = vcombine.high %v207_v45, %v219_v47  ;;  %v17589_v63 = vcombine.low %v207_v45, %v219_v47  ;;  %v303_v47 = vld [vmem:[#allocation5 + $0x640] sm:$0xff] }
 0x1d3   :  { %v1268_v7 = vrot.slane %v1255_v56, %v22202_v61 }
 0x1d4   :  { %7381 = vmatpush1.bf16.msra.mxu1 %v18535_v49  ;;  %8026 = vmatpush1.bf16.msra.mxu0 %v18545_v50  ;;  %v17553_v49 = vcombine.low %v177_v32, %v189_v33  ;;  %v17565_v50 = vcombine.low %v183_v34, %v195_v36  ;;  %v309_v36 = vld [vmem:[#allocation5 + $0x670] sm:$0xff] }
 0x1d5   :  { %7382 = vmatprep.subr.bf16.mxu1 %v18560_v51  ;;  %8027 = vmatprep.subr.bf16.mxu0 %v18570_v54  ;;  %v17578_v51 = vcombine.high %v201_v42, %v213_v43  ;;  %v231_v54 = vld [vmem:[#allocation5 + $0x400] sm:$0xff] }
 0x1d8   :  { %7383 = vmatpush1.bf16.msra.mxu1 %v18559_v57  ;;  %8028 = vmatpush1.bf16.msra.mxu0 %v18569_v59  ;;  %v243_v57 = vld [vmem:[#allocation5 + $0x460] sm:$0xff]  ;;  %v22199_v59 = vsub.s32 0, %v22196_v48 }
 0x1d9   :  { %7384 = vmatprep.subr.bf16.mxu1 %v18584_v60  ;;  %8029 = vmatprep.subr.bf16.mxu0 %v18594_v0  ;;  %v17577_v60 = vcombine.low %v201_v42, %v213_v43  ;;  %v17602_v0 = vcombine.high %v225_v52, %v237_v53 }
 0x1da   :  { %v1264_v6 = vrot.slane %v1255_v56, %v22199_v59 }
 0x1dc   :  { %7385 = vmatpush1.bf16.msra.mxu1 %v18583_v2  ;;  %8030 = vmatpush1.bf16.msra.mxu0 %v18593_v3  ;;  %v255_v2 = vld [vmem:[#allocation5 + $0x4c0] sm:$0xff]  ;;  %v1256_v3 = vld [vmem:[#allocation7 + $0x8] sm:$0xff] }
 0x1dd   :  { %7386 = vmatprep.subr.bf16.mxu1 %v18608_v4  ;;  %8031 = vmatprep.subr.bf16.mxu0 %v18618_v8  ;;  %v17614_v4 = vcombine.high %v231_v54, %v243_v57  ;;  %v17601_v8 = vcombine.low %v225_v52, %v237_v53  ;;  %v1296_v9 = vrot.slane %v1256_v3, %v22199_v59 }
 0x1de   :  { %v1300_v16 = vrot.slane %v1256_v3, %v22202_v61  ;;  %v17638_v18 = vcombine.high %v255_v2, %v267_v5  ;;  %v17637_v27 = vcombine.low %v255_v2, %v267_v5  ;;  %v22231_v3 = vld [vmem:[#allocation5 + $0x790] sm:$0xff] }
 0x1e0   :  { %7387 = vmatpush1.bf16.msra.mxu1 %v18607_v10  ;;  %8032 = vmatpush1.bf16.msra.mxu0 %v18617_v11  ;;  %v17613_v10 = vcombine.low %v231_v54, %v243_v57  ;;  %v17626_v11 = vcombine.high %v249_v62, %v261_v1  ;;  %v321_v54 = vld [vmem:[#allocation5 + $0x6d0] sm:$0xff] }
 0x1e1   :  { %7399 = vmatprep.subr.bf16.mxu1 %v17482_v12  ;;  %8173 = vmatprep.subr.bf16.mxu0 %v17494_v17  ;;  %v273_v12 = vld [vmem:[#allocation5 + $0x550] sm:$0xff] }
 0x1e2   :  { %v17650_v34 = vcombine.high %v273_v12, %v285_v13 }
 0x1e3   :  { %7389 = vmatmul.mubr.bf16.vlgmr.msra.gmra.mrb[4].mxu1 %v22178_v44  ;;  %8034 = vmatmul.mubr.bf16.vlgmr.msra.gmra.mrb[4].mxu0 %v22178_v44 }
 0x1e4   :  { %7400 = vmatpush1.bf16.msra.mxu1 %v17481_v19  ;;  %8174 = vmatpush1.bf16.msra.mxu0 %v17493_v20  ;;  %v291_v19 = vld [vmem:[#allocation5 + $0x5e0] sm:$0xff] }
 0x1e5   :  { %7401 = vmatprep.subr.bf16.mxu1 %v17506_v21  ;;  %8175 = vmatprep.subr.bf16.mxu0 %v17518_v26  ;;  %v17625_v26 = vcombine.low %v249_v62, %v261_v1  ;;  %v17662_v42 = vcombine.high %v279_v14, %v291_v19  ;;  %v17661_v52 = vcombine.low %v279_v14, %v291_v19  ;;  %v22241_v19 = vld [vmem:[#allocation5 + $0x8e0] sm:$0xff] }
 0x1e6   :  { %7431 = vmatprep.mubr.bf16.mxu1 %v22158_v58  ;;  %8205 = vmatprep.mubr.bf16.mxu0 %v22158_v58 }
 0x1e8   :  { %7402 = vmatpush1.bf16.msra.mxu1 %v17505_v28  ;;  %8176 = vmatpush1.bf16.msra.mxu0 %v17517_v29 }
 0x1e9   :  { %7403 = vmatprep.subr.bf16.mxu1 %v17530_v31  ;;  %8177 = vmatprep.subr.bf16.mxu0 %v17542_v35  ;;  %v297_v35 = vld [vmem:[#allocation5 + $0x610] sm:$0xff] }
 0x1ea   :  { %v17674_v53 = vcombine.high %v297_v35, %v309_v36  ;;  %v17673_v2 = vcombine.low %v297_v35, %v309_v36 }
 0x1ec   :  { %7404 = vmatpush1.bf16.msra.mxu1 %v17529_v38  ;;  %8178 = vmatpush1.bf16.msra.mxu0 %v17541_v40 }
 0x1ed   :  { %7405 = vmatprep.subr.bf16.mxu1 %v17554_v41  ;;  %8179 = vmatprep.subr.bf16.mxu0 %v17566_v46  ;;  %v17649_v46 = vcombine.low %v273_v12, %v285_v13  ;;  %v22236_v12 = vld [vmem:[#allocation5 + $0x8b0] sm:$0xff] }
 0x1f0   :  { %7406 = vmatpush1.bf16.msra.mxu1 %v17553_v49  ;;  %8180 = vmatpush1.bf16.msra.mxu0 %v17565_v50  ;;  %v315_v49 = vld [vmem:[#allocation5 + $0x6a0] sm:$0xff] }
 0x1f1   :  { %7407 = vmatprep.subr.bf16.mxu1 %v17578_v51  ;;  %8181 = vmatprep.subr.bf16.mxu0 %v17590_v55  ;;  %v333_v55 = vld [vmem:[#allocation5 + $0x730] sm:$0xff]  ;;  %v17686_v62 = vcombine.high %v303_v47, %v315_v49  ;;  %v17685_v5 = vcombine.low %v303_v47, %v315_v49 }
 0x1f2   :  { %v17697_v13 = vcombine.low %v321_v54, %v333_v55 }
 0x1f4   :  { %7408 = vmatpush1.bf16.msra.mxu1 %v17577_v60  ;;  %8182 = vmatpush1.bf16.msra.mxu0 %v17589_v63  ;;  %v327_v63 = vld [vmem:[#allocation5 + $0x700] sm:$0xff] }
 0x1f5   :  { %7409 = vmatprep.subr.bf16.mxu1 %v17602_v0  ;;  %8183 = vmatprep.subr.bf16.mxu0 %v17614_v4  ;;  %v339_v0 = vld [vmem:[#allocation5 + $0x760] sm:$0xff] }
 0x1f6   :  { %v7261_v17 = vpop.f32.mrb[0].mxu1  ;;  %v7777_v22 = vpop.f32.mrb[0].mxu0 }
 0x1f7   :  { %v22208_v20 = vadd.f32 %v7261_v17, %v1264_v6  ;;  %v7263_v21 = vpop.f32.mrb[1].mxu1  ;;  %v22212_v28 = vadd.f32 %v7777_v22, %v1296_v9  ;;  %v7779_v29 = vpop.f32.mrb[1].mxu0 }
 0x1f8   :  { %v22210_v23 = vadd.f32 %v7263_v21, %v1268_v7  ;;  %v7265_v24 = vpop.f32.mrb[2].mxu1  ;;  %7410 = vmatpush1.bf16.msra.mxu1 %v17601_v8  ;;  %8184 = vmatpush1.bf16.msra.mxu0 %v17613_v10  ;;  %v22217_v37 = vadd.f32 %v7779_v29, %v1300_v16  ;;  %v7781_v38 = vpop.f32.mrb[2].mxu0  ;;  %v351_v8 = vld [vmem:[#allocation5 + $0x7c0] sm:$0xff]  ;;  %v17710_v10 = vcombine.high %v327_v63, %v339_v0 }
 0x1f9   :  { %v8738_v31 = vmul.f32 0.70710677, %v22208_v20  ;;  %v22215_v32 = vadd.f32 %v7265_v24, %v1264_v6  ;;  %v7267_v33 = vpop.f32.mrb[3].mxu1  ;;  %7411 = vmatprep.subr.bf16.mxu1 %v17626_v11  ;;  %8185 = vmatprep.subr.bf16.mxu0 %v17638_v18  ;;  %v7783_v43 = vpop.f32.mrb[3].mxu0  ;;  %v8746_v50 = vmul.f32 0.70710677, %v22212_v28  ;;  %v22226_v57 = vadd.f32 %v7781_v38, %v1296_v9 }
 0x1fa   :  { %v8739_v40 = vmul.f32 0.70710677, %v22210_v23  ;;  %v22220_v41 = vadd.f32 %v7267_v33, %v1268_v7  ;;  %v8747_v56 = vmul.f32 0.70710677, %v22217_v37  ;;  %v22228_v60 = vadd.f32 %v7783_v43, %v1300_v16  ;;  %v357_v7 = vld [vmem:[#allocation5 + $0x7f0] sm:$0xff]  ;;  %v363_v9 = vld [vmem:[#allocation5 + $0x820] sm:$0xff] }
 0x1fb   :  { %21809 = verf.f32 %v8738_v31  ;;  %v8762_v45 = vmul.f32 0.70710677, %v22215_v32  ;;  %v8770_v1 = vmul.f32 0.70710677, %v22226_v57  ;;  %v17698_v6 = vcombine.high %v321_v54, %v333_v55  ;;  %v22234_v11 = vld [vmem:[#allocation5 + $0x850] sm:$0xff]  ;;  %v22239_v18 = vld [vmem:[#allocation5 + $0x880] sm:$0xff] }
 0x1fc   :  { %21811 = verf.f32 %v8739_v40  ;;  %v8763_v51 = vmul.f32 0.70710677, %v22220_v41  ;;  %7412 = vmatpush1.bf16.msra.mxu1 %v17625_v26  ;;  %8186 = vmatpush1.bf16.msra.mxu0 %v17637_v27  ;;  %v8771_v4 = vmul.f32 0.70710677, %v22228_v60  ;;  %v17709_v16 = vcombine.low %v327_v63, %v339_v0  ;;  %v393_v43 = vld [vmem:[#allocation5 + $0x910] sm:$0xff]  ;;  %v411_v55 = vld [vmem:[#allocation5 + $0x9a0] sm:$0xff] }
 0x1fd   :  { %21813 = verf.f32 %v8762_v45  ;;  %7413 = vmatprep.subr.bf16.mxu1 %v17650_v34  ;;  %8187 = vmatprep.subr.bf16.mxu0 %v17662_v42  ;;  %v17722_v17 = vcombine.high %v22231_v3, %v357_v7  ;;  %v17721_v24 = vcombine.low %v22231_v3, %v357_v7  ;;  %v17733_v26 = vcombine.low %v351_v8, %v363_v9  ;;  %v423_v7 = vld [vmem:[#allocation5 + $0xa00] sm:$0xff] }
 0x1fe   :  { %21815 = verf.f32 %v8763_v51  ;;  %v17734_v27 = vcombine.high %v351_v8, %v363_v9  ;;  %v8689_v31 = vmul.f32 0.5, %v22208_v20  ;;  %v17745_v34 = vcombine.low %v22234_v11, %v22236_v12  ;;  %v399_v51 = vld [vmem:[#allocation5 + $0x940] sm:$0xff] }
 0x1ff   :  { %21817 = verf.f32 %v8746_v50  ;;  %v17746_v35 = vcombine.high %v22234_v11, %v22236_v12  ;;  %v8713_v38 = vmul.f32 0.5, %v22215_v32  ;;  %v17758_v42 = vcombine.high %v22239_v18, %v22241_v19  ;;  %v405_v50 = vld [vmem:[#allocation5 + $0x970] sm:$0xff]  ;;  %v435_v11 = vld [vmem:[#allocation5 + $0xa60] sm:$0xff] }
 0x200   :  { %7414 = vmatpush1.bf16.msra.mxu1 %v17649_v46  ;;  %21819 = verf.f32 %v8747_v56  ;;  %8188 = vmatpush1.bf16.msra.mxu0 %v17661_v52  ;;  %v8697_v45 = vmul.f32 0.5, %v22212_v28  ;;  %v8690_v20 = vmul.f32 0.5, %v22210_v23  ;;  %v8714_v47 = vmul.f32 0.5, %v22220_v41 }
 0x201   :  { %7415 = vmatprep.subr.bf16.mxu1 %v17674_v53  ;;  %21821 = verf.f32 %v8770_v1  ;;  %8189 = vmatprep.subr.bf16.mxu0 %v17686_v62  ;;  %v8698_v32 = vmul.f32 0.5, %v22217_v37  ;;  %v8721_v28 = vmul.f32 0.5, %v22226_v57  ;;  %v8722_v41 = vmul.f32 0.5, %v22228_v60  ;;  %v429_v57 = vld [vmem:[#allocation5 + $0xa30] sm:$0xff] }
 0x202   :  { %21823 = verf.f32 %v8771_v4  ;;  %v17757_v37 = vcombine.low %v22239_v18, %v22241_v19  ;;  %v17782_v60 = vcombine.high %v399_v51, %v411_v55  ;;  %v441_v19 = vld [vmem:[#allocation5 + $0xa90] sm:$0xff] }
 0x204   :  { %7416 = vmatpush1.bf16.msra.mxu1 %v17673_v2  ;;  %8190 = vmatpush1.bf16.msra.mxu0 %v17685_v5  ;;  %v17770_v5 = vcombine.high %v393_v43, %v405_v50 }
 0x205   :  { %v21810_v14 = vpop.eup %21809  ;;  %7417 = vmatprep.subr.bf16.mxu1 %v17698_v6  ;;  %8191 = vmatprep.subr.bf16.mxu0 %v17710_v10  ;;  %v417_v6 = vld [vmem:[#allocation5 + $0x9d0] sm:$0xff] }
 0x206   :  { %v21812_v21 = vpop.eup %21811  ;;  %v8834_v22 = vadd.f32 1.0, %v21810_v14  ;;  %v17769_v14 = vcombine.low %v393_v43, %v405_v50  ;;  %v17794_v18 = vcombine.high %v417_v6, %v429_v57  ;;  %v507_v50 = vld [vmem:[#allocation5 + $0xca0] sm:$0xff] }
 0x207   :  { %v21814_v29 = vpop.eup %21813  ;;  %v8835_v33 = vadd.f32 1.0, %v21812_v21  ;;  %v453_v21 = vld [vmem:[#allocation5 + $0xaf0] sm:$0xff] }
 0x208   :  { %v21816_v36 = vpop.eup %21815  ;;  %v8858_v40 = vadd.f32 1.0, %v21814_v29  ;;  %7418 = vmatpush1.bf16.msra.mxu1 %v17697_v13  ;;  %8192 = vmatpush1.bf16.msra.mxu0 %v17709_v16  ;;  %v8882_v53 = vmul.f32 %v8834_v22, %v8689_v31  ;;  %v447_v22 = vld [vmem:[#allocation5 + $0xac0] sm:$0xff]  ;;  %v17793_v29 = vcombine.low %v417_v6, %v429_v57  ;;  %v17805_v31 = vcombine.low %v423_v7, %v435_v11  ;;  %v561_v57 = vld [vmem:[#allocation5 + $0xe50] sm:$0xff] }
 0x209   :  { %v21818_v46 = vpop.eup %21817  ;;  %v8859_v49 = vadd.f32 1.0, %v21816_v36  ;;  %7419 = vmatprep.subr.bf16.mxu1 %v17722_v17  ;;  %8193 = vmatprep.subr.bf16.mxu0 %v17734_v27  ;;  %v8883_v63 = vmul.f32 %v8835_v33, %v8690_v20  ;;  %v17781_v17 = vcombine.low %v399_v51, %v411_v55  ;;  %v459_v27 = vld [vmem:[#allocation5 + $0xb20] sm:$0xff]  ;;  %v17818_v33 = vcombine.high %v441_v19, %v453_v21  ;;  %v501_v20 = vld [vmem:[#allocation5 + $0xc70] sm:$0xff] }
 0x20a   :  { %v21820_v52 = vpop.eup %21819  ;;  %v8906_v54 = vmul.f32 %v8858_v40, %v8713_v38  ;;  %v8842_v56 = vadd.f32 1.0, %v21818_v46  ;;  %v471_v36 = vld [vmem:[#allocation5 + $0xb80] sm:$0xff]  ;;  %v17830_v38 = vcombine.high %v447_v22, %v459_v27  ;;  %v17829_v43 = vcombine.low %v447_v22, %v459_v27  ;;  %v489_v46 = vld [vmem:[#allocation5 + $0xc10] sm:$0xff] }
 0x20b   :  { %v21822_v62 = vpop.eup %21821  ;;  %v8907_v23 = vmul.f32 %v8859_v49, %v8714_v47  ;;  %v8843_v0 = vadd.f32 1.0, %v21820_v52  ;;  %v483_v40 = vld [vmem:[#allocation5 + $0xbe0] sm:$0xff]  ;;  %v17866_v52 = vcombine.high %v489_v46, %v501_v20 }
 0x20c   :  { %v21824_v1 = vpop.eup %21823  ;;  %v22258_v2 = vpack.c.bf16 %v8906_v54, %v8882_v53  ;;  %7420 = vmatpush1.bf16.msra.mxu1 %v17721_v24  ;;  %v8890_v3 = vmul.f32 %v8842_v56, %v8697_v45  ;;  %v8866_v4 = vadd.f32 1.0, %v21822_v62  ;;  %8194 = vmatpush1.bf16.msra.mxu0 %v17733_v26  ;;  %v17806_v26 = vcombine.high %v423_v7, %v435_v11  ;;  %v495_v47 = vld [vmem:[#allocation5 + $0xc40] sm:$0xff]  ;;  %v513_v53 = vld [vmem:[#allocation5 + $0xcd0] sm:$0xff] }
 0x20d   :  { %7421 = vmatprep.subr.bf16.mxu1 %v17746_v35  ;;  %v8891_v8 = vmul.f32 %v8843_v0, %v8698_v32  ;;  %v8867_v9 = vadd.f32 1.0, %v21824_v1  ;;  %v22262_v10 = vpack.c.bf16 %v8907_v23, %v8883_v63  ;;  %8195 = vmatprep.subr.bf16.mxu0 %v17758_v42  ;;  %v477_v35 = vld [vmem:[#allocation5 + $0xbb0] sm:$0xff]  ;;  %v17817_v42 = vcombine.low %v441_v19, %v453_v21  ;;  %v519_v55 = vld [vmem:[#allocation5 + $0xd00] sm:$0xff] }
 0x20e   :  { %v8914_v12 = vmul.f32 %v8866_v4, %v8721_v28  ;;  %v17854_v49 = vcombine.high %v471_v36, %v483_v40  ;;  %v17853_v32 = vcombine.low %v471_v36, %v483_v40  ;;  %v525_v54 = vld [vmem:[#allocation5 + $0xd30] sm:$0xff]  ;;  %v17878_v56 = vcombine.high %v495_v47, %v507_v50  ;;  %v531_v28 = vld [vmem:[#allocation5 + $0xd60] sm:$0xff] }
 0x20f   :  { %v8915_v13 = vmul.f32 %v8867_v9, %v8722_v41  ;;  %v17865_v62 = vcombine.low %v489_v46, %v501_v20  ;;  %v17877_v63 = vcombine.low %v495_v47, %v507_v50  ;;  %v17890_v23 = vcombine.high %v513_v53, %v525_v54  ;;  %v537_v0 = vld [vmem:[#allocation5 + $0xd90] sm:$0xff]  ;;  %v543_v1 = vld [vmem:[#allocation5 + $0xdc0] sm:$0xff] }
 0x210   :  { %7422 = vmatpush1.bf16.msra.mxu1 %v17745_v34  ;;  %v22264_v16 = vpack.c.bf16 %v8914_v12, %v8890_v3  ;;  %8196 = vmatpush1.bf16.msra.mxu0 %v17757_v37  ;;  %v465_v34 = vld [vmem:[#allocation5 + $0xb50] sm:$0xff]  ;;  %v17902_v37 = vcombine.high %v519_v55, %v531_v28  ;;  %v555_v3 = vld [vmem:[#allocation5 + $0xe20] sm:$0xff]  ;;  %v17889_v4 = vcombine.low %v513_v53, %v525_v54 }
 0x211   :  { %7423 = vmatprep.subr.bf16.mxu1 %v17770_v5  ;;  %v22266_v24 = vpack.c.bf16 %v8915_v13, %v8891_v8  ;;  %8197 = vmatprep.subr.bf16.mxu0 %v17782_v60  ;;  %v17842_v45 = vcombine.high %v465_v34, %v477_v35  ;;  %v17841_v51 = vcombine.low %v465_v34, %v477_v35  ;;  %v549_v41 = vld [vmem:[#allocation5 + $0xdf0] sm:$0xff]  ;;  %v567_v8 = vld [vmem:[#allocation5 + $0xe80] sm:$0xff] }
 0x212   :  { %v17901_v5 = vcombine.low %v519_v55, %v531_v28  ;;  %v17914_v6 = vcombine.high %v537_v0, %v549_v41  ;;  %v573_v7 = vld [vmem:[#allocation5 + $0xeb0] sm:$0xff]  ;;  %v17926_v9 = vcombine.high %v543_v1, %v555_v3  ;;  %v579_v60 = vld [vmem:[#allocation5 + $0xee0] sm:$0xff]  ;;  %v17913_v11 = vcombine.low %v537_v0, %v549_v41 }
 0x213   :  { %v17925_v12 = vcombine.low %v543_v1, %v555_v3  ;;  %v17938_v13 = vcombine.high %v561_v57, %v573_v7  ;;  %v17950_v19 = vcombine.high %v567_v8, %v579_v60  ;;  %v603_v21 = vld [vmem:[#allocation5 + $0xfa0] sm:$0xff]  ;;  %v17937_v22 = vcombine.low %v561_v57, %v573_v7 }
 0x214   :  { %7424 = vmatpush1.bf16.msra.mxu1 %v17769_v14  ;;  %8198 = vmatpush1.bf16.msra.mxu0 %v17781_v17  ;;  %v585_v14 = vld [vmem:[#allocation5 + $0xf10] sm:$0xff]  ;;  %v627_v35 = vld [vmem:[#allocation5 + $0x1060] sm:$0xff] }
 0x215   :  { %7425 = vmatprep.subr.bf16.mxu1 %v17794_v18  ;;  %8199 = vmatprep.subr.bf16.mxu0 %v17806_v26  ;;  %v597_v17 = vld [vmem:[#allocation5 + $0xf70] sm:$0xff]  ;;  %v591_v18 = vld [vmem:[#allocation5 + $0xf40] sm:$0xff]  ;;  %v17949_v26 = vcombine.low %v567_v8, %v579_v60 }
 0x216   :  { %v17962_v27 = vcombine.high %v585_v14, %v597_v17  ;;  %v17974_v34 = vcombine.high %v591_v18, %v603_v21  ;;  %v17961_v36 = vcombine.low %v585_v14, %v597_v17  ;;  %v651_v20 = vld [vmem:[#allocation5 + $0x1120] sm:$0xff] }
 0x217   :  { %v675_v54 = vld [vmem:[#allocation5 + $0x11e0] sm:$0xff] }
 0x218   :  { %7426 = vmatpush1.bf16.msra.mxu1 %v17793_v29  ;;  %8200 = vmatpush1.bf16.msra.mxu0 %v17805_v31  ;;  %v609_v29 = vld [vmem:[#allocation5 + $0xfd0] sm:$0xff]  ;;  %v699_v41 = vld [vmem:[#allocation5 + $0x12a0] sm:$0xff] }
 0x219   :  { %7427 = vmatprep.subr.bf16.mxu1 %v17818_v33  ;;  %8201 = vmatprep.subr.bf16.mxu0 %v17830_v38  ;;  %v621_v31 = vld [vmem:[#allocation5 + $0x1030] sm:$0xff]  ;;  %v615_v33 = vld [vmem:[#allocation5 + $0x1000] sm:$0xff]  ;;  %v17973_v38 = vcombine.low %v591_v18, %v603_v21 }
 0x21a   :  { %v17986_v40 = vcombine.high %v609_v29, %v621_v31  ;;  %v17998_v46 = vcombine.high %v615_v33, %v627_v35  ;;  %v17985_v47 = vcombine.low %v609_v29, %v621_v31  ;;  %v723_v7 = vld [vmem:[#allocation5 + $0x1360] sm:$0xff] }
 0x21b   :  { %v747_v17 = vld [vmem:[#allocation5 + $0x1420] sm:$0xff] }
 0x21c   :  { %7428 = vmatpush1.bf16.msra.mxu1 %v17817_v42  ;;  %8202 = vmatpush1.bf16.msra.mxu0 %v17829_v43  ;;  %v633_v42 = vld [vmem:[#allocation5 + $0x1090] sm:$0xff]  ;;  %v771_v31 = vld [vmem:[#allocation5 + $0x14e0] sm:$0xff] }
 0x21d   :  { %7429 = vmatprep.subr.bf16.mxu1 %v17842_v45  ;;  %8203 = vmatprep.subr.bf16.mxu0 %v17854_v49  ;;  %v645_v43 = vld [vmem:[#allocation5 + $0x10f0] sm:$0xff]  ;;  %v639_v45 = vld [vmem:[#allocation5 + $0x10c0] sm:$0xff]  ;;  %v17997_v49 = vcombine.low %v615_v33, %v627_v35 }
 0x21e   :  { %v18010_v50 = vcombine.high %v633_v42, %v645_v43  ;;  %v18022_v53 = vcombine.high %v639_v45, %v651_v20  ;;  %v18009_v55 = vcombine.low %v633_v42, %v645_v43  ;;  %v795_v43 = vld [vmem:[#allocation5 + $0x15a0] sm:$0xff] }
 0x220   :  { %7430 = vmatpush1.bf16.msra.mxu1 %v17841_v51  ;;  %8204 = vmatpush1.bf16.msra.mxu0 %v17853_v32  ;;  %v657_v51 = vld [vmem:[#allocation5 + $0x1150] sm:$0xff] }
 0x221   :  { %7442 = vmatprep.subr.bf16.mxu1 %v17866_v52  ;;  %8216 = vmatprep.subr.bf16.mxu0 %v17878_v56  ;;  %v669_v32 = vld [vmem:[#allocation5 + $0x11b0] sm:$0xff]  ;;  %v663_v52 = vld [vmem:[#allocation5 + $0x1180] sm:$0xff]  ;;  %v18021_v56 = vcombine.low %v639_v45, %v651_v20 }
 0x222   :  { %v18034_v28 = vcombine.high %v657_v51, %v669_v32  ;;  %v18046_v0 = vcombine.high %v663_v52, %v675_v54  ;;  %v18033_v1 = vcombine.low %v657_v51, %v669_v32  ;;  %v819_v32 = vld [vmem:[#allocation5 + $0x1660] sm:$0xff] }
 0x223   :  { %7432 = vmatmul.mubr.bf16.vlgmr.msra.gmra.mrb[8].mxu1 %v22162_v15  ;;  %8206 = vmatmul.mubr.bf16.vlgmr.msra.gmra.mrb[8].mxu0 %v22162_v15 }
 0x224   :  { %7443 = vmatpush1.bf16.msra.mxu1 %v17865_v62  ;;  %8217 = vmatpush1.bf16.msra.mxu0 %v17877_v63  ;;  %v681_v62 = vld [vmem:[#allocation5 + $0x1210] sm:$0xff] }
 0x225   :  { %7444 = vmatprep.subr.bf16.mxu1 %v17890_v23  ;;  %8218 = vmatprep.subr.bf16.mxu0 %v17902_v37  ;;  %v693_v63 = vld [vmem:[#allocation5 + $0x1270] sm:$0xff]  ;;  %v687_v23 = vld [vmem:[#allocation5 + $0x1240] sm:$0xff]  ;;  %v18045_v37 = vcombine.low %v663_v52, %v675_v54 }
 0x226   :  { %7474 = vmatprep.mubr.bf16.mxu1 %v22164_v25  ;;  %8248 = vmatprep.mubr.bf16.mxu0 %v22164_v25  ;;  %v18058_v3 = vcombine.high %v681_v62, %v693_v63  ;;  %v18070_v57 = vcombine.high %v687_v23, %v699_v41  ;;  %v18057_v8 = vcombine.low %v681_v62, %v693_v63  ;;  %v843_v63 = vld [vmem:[#allocation5 + $0x1720] sm:$0xff] }
 0x228   :  { %7445 = vmatpush1.bf16.msra.mxu1 %v17889_v4  ;;  %8219 = vmatpush1.bf16.msra.mxu0 %v17901_v5  ;;  %v705_v4 = vld [vmem:[#allocation5 + $0x12d0] sm:$0xff] }
 0x229   :  { %7446 = vmatprep.subr.bf16.mxu1 %v17914_v6  ;;  %8220 = vmatprep.subr.bf16.mxu0 %v17926_v9  ;;  %v717_v5 = vld [vmem:[#allocation5 + $0x1330] sm:$0xff]  ;;  %v711_v6 = vld [vmem:[#allocation5 + $0x1300] sm:$0xff]  ;;  %v18069_v9 = vcombine.low %v687_v23, %v699_v41 }
 0x22a   :  { %v18082_v60 = vcombine.high %v705_v4, %v717_v5  ;;  %v18094_v14 = vcombine.high %v711_v6, %v723_v7  ;;  %v18081_v18 = vcombine.low %v705_v4, %v717_v5  ;;  %v867_v5 = vld [vmem:[#allocation5 + $0x17e0] sm:$0xff] }
 0x22c   :  { %7447 = vmatpush1.bf16.msra.mxu1 %v17913_v11  ;;  %8221 = vmatpush1.bf16.msra.mxu0 %v17925_v12  ;;  %v729_v11 = vld [vmem:[#allocation5 + $0x1390] sm:$0xff] }
 0x22d   :  { %7448 = vmatprep.subr.bf16.mxu1 %v17938_v13  ;;  %8222 = vmatprep.subr.bf16.mxu0 %v17950_v19  ;;  %v741_v12 = vld [vmem:[#allocation5 + $0x13f0] sm:$0xff]  ;;  %v735_v13 = vld [vmem:[#allocation5 + $0x13c0] sm:$0xff]  ;;  %v18093_v19 = vcombine.low %v711_v6, %v723_v7 }
 0x22e   :  { %v18106_v21 = vcombine.high %v729_v11, %v741_v12  ;;  %v18118_v29 = vcombine.high %v735_v13, %v747_v17  ;;  %v18105_v33 = vcombine.low %v729_v11, %v741_v12  ;;  %v891_v12 = vld [vmem:[#allocation5 + $0x18a0] sm:$0xff] }
 0x230   :  { %7449 = vmatpush1.bf16.msra.mxu1 %v17937_v22  ;;  %8223 = vmatpush1.bf16.msra.mxu0 %v17949_v26  ;;  %v753_v22 = vld [vmem:[#allocation5 + $0x1450] sm:$0xff] }
 0x231   :  { %7450 = vmatprep.subr.bf16.mxu1 %v17962_v27  ;;  %8224 = vmatprep.subr.bf16.mxu0 %v17974_v34  ;;  %v765_v26 = vld [vmem:[#allocation5 + $0x14b0] sm:$0xff]  ;;  %v759_v27 = vld [vmem:[#allocation5 + $0x1480] sm:$0xff]  ;;  %v18117_v34 = vcombine.low %v735_v13, %v747_v17 }
 0x232   :  { %v18130_v35 = vcombine.high %v753_v22, %v765_v26  ;;  %v18142_v42 = vcombine.high %v759_v27, %v771_v31  ;;  %v18129_v45 = vcombine.low %v753_v22, %v765_v26  ;;  %v915_v26 = vld [vmem:[#allocation5 + $0x1960] sm:$0xff] }
 0x234   :  { %7451 = vmatpush1.bf16.msra.mxu1 %v17961_v36  ;;  %8225 = vmatpush1.bf16.msra.mxu0 %v17973_v38  ;;  %v777_v36 = vld [vmem:[#allocation5 + $0x1510] sm:$0xff] }
 0x235   :  { %7452 = vmatprep.subr.bf16.mxu1 %v17986_v40  ;;  %8226 = vmatprep.subr.bf16.mxu0 %v17998_v46  ;;  %v789_v38 = vld [vmem:[#allocation5 + $0x1570] sm:$0xff]  ;;  %v783_v40 = vld [vmem:[#allocation5 + $0x1540] sm:$0xff]  ;;  %v18141_v46 = vcombine.low %v759_v27, %v771_v31 }
 0x236   :  { %v18154_v20 = vcombine.high %v777_v36, %v789_v38  ;;  %v18166_v51 = vcombine.high %v783_v40, %v795_v43  ;;  %v18153_v52 = vcombine.low %v777_v36, %v789_v38  ;;  %v939_v38 = vld [vmem:[#allocation5 + $0x1a20] sm:$0xff] }
 0x238   :  { %7453 = vmatpush1.bf16.msra.mxu1 %v17985_v47  ;;  %8227 = vmatpush1.bf16.msra.mxu0 %v17997_v49  ;;  %v801_v47 = vld [vmem:[#allocation5 + $0x15d0] sm:$0xff] }
 0x239   :  { %7454 = vmatprep.subr.bf16.mxu1 %v18010_v50  ;;  %8228 = vmatprep.subr.bf16.mxu0 %v18022_v53  ;;  %v813_v49 = vld [vmem:[#allocation5 + $0x1630] sm:$0xff]  ;;  %v807_v50 = vld [vmem:[#allocation5 + $0x1600] sm:$0xff]  ;;  %v18165_v53 = vcombine.low %v783_v40, %v795_v43 }
 0x23a   :  { %v18178_v54 = vcombine.high %v801_v47, %v813_v49  ;;  %v18190_v62 = vcombine.high %v807_v50, %v819_v32  ;;  %v18177_v23 = vcombine.low %v801_v47, %v813_v49  ;;  %v963_v49 = vld [vmem:[#allocation5 + $0x1ae0] sm:$0xff] }
 0x23c   :  { %7455 = vmatpush1.bf16.msra.mxu1 %v18009_v55  ;;  %8229 = vmatpush1.bf16.msra.mxu0 %v18021_v56  ;;  %v825_v55 = vld [vmem:[#allocation5 + $0x1690] sm:$0xff] }
 0x23d   :  { %7456 = vmatprep.subr.bf16.mxu1 %v18034_v28  ;;  %8230 = vmatprep.subr.bf16.mxu0 %v18046_v0  ;;  %v837_v56 = vld [vmem:[#allocation5 + $0x16f0] sm:$0xff]  ;;  %v831_v28 = vld [vmem:[#allocation5 + $0x16c0] sm:$0xff]  ;;  %v18189_v0 = vcombine.low %v807_v50, %v819_v32 }
 0x23e   :  { %v18202_v41 = vcombine.high %v825_v55, %v837_v56  ;;  %v18214_v4 = vcombine.high %v831_v28, %v843_v63  ;;  %v18201_v6 = vcombine.low %v825_v55, %v837_v56  ;;  %v987_v56 = vld [vmem:[#allocation5 + $0x1ba0] sm:$0xff] }
 0x240   :  { %7457 = vmatpush1.bf16.msra.mxu1 %v18033_v1  ;;  %8231 = vmatpush1.bf16.msra.mxu0 %v18045_v37  ;;  %v849_v1 = vld [vmem:[#allocation5 + $0x1750] sm:$0xff] }
 0x241   :  { %7458 = vmatprep.subr.bf16.mxu1 %v18058_v3  ;;  %8232 = vmatprep.subr.bf16.mxu0 %v18070_v57  ;;  %v861_v37 = vld [vmem:[#allocation5 + $0x17b0] sm:$0xff]  ;;  %v855_v3 = vld [vmem:[#allocation5 + $0x1780] sm:$0xff]  ;;  %v18213_v57 = vcombine.low %v831_v28, %v843_v63 }
 0x242   :  { %v18226_v7 = vcombine.high %v849_v1, %v861_v37  ;;  %v18238_v11 = vcombine.high %v855_v3, %v867_v5  ;;  %v18225_v13 = vcombine.low %v849_v1, %v861_v37  ;;  %v1011_v37 = vld [vmem:[#allocation5 + $0x1c60] sm:$0xff] }
 0x244   :  { %7459 = vmatpush1.bf16.msra.mxu1 %v18057_v8  ;;  %8233 = vmatpush1.bf16.msra.mxu0 %v18069_v9  ;;  %v873_v8 = vld [vmem:[#allocation5 + $0x1810] sm:$0xff] }
 0x245   :  { %7460 = vmatprep.subr.bf16.mxu1 %v18082_v60  ;;  %8234 = vmatprep.subr.bf16.mxu0 %v18094_v14  ;;  %v885_v9 = vld [vmem:[#allocation5 + $0x1870] sm:$0xff]  ;;  %v879_v60 = vld [vmem:[#allocation5 + $0x1840] sm:$0xff]  ;;  %v18237_v14 = vcombine.low %v855_v3, %v867_v5 }
 0x246   :  { %v18250_v17 = vcombine.high %v873_v8, %v885_v9  ;;  %v18262_v22 = vcombine.high %v879_v60, %v891_v12  ;;  %v18249_v27 = vcombine.low %v873_v8, %v885_v9  ;;  %v1035_v9 = vld [vmem:[#allocation5 + $0x1d20] sm:$0xff] }
 0x248   :  { %7461 = vmatpush1.bf16.msra.mxu1 %v18081_v18  ;;  %8235 = vmatpush1.bf16.msra.mxu0 %v18093_v19  ;;  %v897_v18 = vld [vmem:[#allocation5 + $0x18d0] sm:$0xff] }
 0x249   :  { %7462 = vmatprep.subr.bf16.mxu1 %v18106_v21  ;;  %8236 = vmatprep.subr.bf16.mxu0 %v18118_v29  ;;  %v909_v19 = vld [vmem:[#allocation5 + $0x1930] sm:$0xff]  ;;  %v903_v21 = vld [vmem:[#allocation5 + $0x1900] sm:$0xff]  ;;  %v18261_v29 = vcombine.low %v879_v60, %v891_v12 }
 0x24a   :  { %v18274_v31 = vcombine.high %v897_v18, %v909_v19  ;;  %v18286_v36 = vcombine.high %v903_v21, %v915_v26  ;;  %v18273_v40 = vcombine.low %v897_v18, %v909_v19  ;;  %v1059_v19 = vld [vmem:[#allocation5 + $0x1de0] sm:$0xff] }
 0x24c   :  { %7463 = vmatpush1.bf16.msra.mxu1 %v18105_v33  ;;  %8237 = vmatpush1.bf16.msra.mxu0 %v18117_v34  ;;  %v921_v33 = vld [vmem:[#allocation5 + $0x1990] sm:$0xff] }
 0x24d   :  { %7464 = vmatprep.subr.bf16.mxu1 %v18130_v35  ;;  %8238 = vmatprep.subr.bf16.mxu0 %v18142_v42  ;;  %v933_v34 = vld [vmem:[#allocation5 + $0x19f0] sm:$0xff]  ;;  %v927_v35 = vld [vmem:[#allocation5 + $0x19c0] sm:$0xff]  ;;  %v18285_v42 = vcombine.low %v903_v21, %v915_v26 }
 0x24e   :  { %v18298_v43 = vcombine.high %v921_v33, %v933_v34  ;;  %v18310_v47 = vcombine.high %v927_v35, %v939_v38  ;;  %v18297_v50 = vcombine.low %v921_v33, %v933_v34  ;;  %v1083_v34 = vld [vmem:[#allocation5 + $0x1ea0] sm:$0xff] }
 0x250   :  { %7465 = vmatpush1.bf16.msra.mxu1 %v18129_v45  ;;  %8239 = vmatpush1.bf16.msra.mxu0 %v18141_v46  ;;  %v945_v45 = vld [vmem:[#allocation5 + $0x1a50] sm:$0xff] }
 0x251   :  { %7466 = vmatprep.subr.bf16.mxu1 %v18154_v20  ;;  %8240 = vmatprep.subr.bf16.mxu0 %v18166_v51  ;;  %v957_v46 = vld [vmem:[#allocation5 + $0x1ab0] sm:$0xff]  ;;  %v951_v20 = vld [vmem:[#allocation5 + $0x1a80] sm:$0xff]  ;;  %v18309_v51 = vcombine.low %v927_v35, %v939_v38 }
 0x252   :  { %v18322_v32 = vcombine.high %v945_v45, %v957_v46  ;;  %v18334_v55 = vcombine.high %v951_v20, %v963_v49  ;;  %v18321_v28 = vcombine.low %v945_v45, %v957_v46  ;;  %v1107_v46 = vld [vmem:[#allocation5 + $0x1f60] sm:$0xff] }
 0x254   :  { %7467 = vmatpush1.bf16.msra.mxu1 %v18153_v52  ;;  %8241 = vmatpush1.bf16.msra.mxu0 %v18165_v53  ;;  %v969_v52 = vld [vmem:[#allocation5 + $0x1b10] sm:$0xff] }
 0x255   :  { %7468 = vmatprep.subr.bf16.mxu1 %v18178_v54  ;;  %8242 = vmatprep.subr.bf16.mxu0 %v18190_v62  ;;  %v981_v53 = vld [vmem:[#allocation5 + $0x1b70] sm:$0xff]  ;;  %v975_v54 = vld [vmem:[#allocation5 + $0x1b40] sm:$0xff]  ;;  %v18333_v62 = vcombine.low %v951_v20, %v963_v49 }
 0x256   :  { %v18346_v63 = vcombine.high %v969_v52, %v981_v53  ;;  %v18358_v1 = vcombine.high %v975_v54, %v987_v56  ;;  %v18345_v3 = vcombine.low %v969_v52, %v981_v53  ;;  %v1131_v53 = vld [vmem:[#allocation5 + $0x2020] sm:$0xff] }
 0x258   :  { %7469 = vmatpush1.bf16.msra.mxu1 %v18177_v23  ;;  %8243 = vmatpush1.bf16.msra.mxu0 %v18189_v0  ;;  %v993_v23 = vld [vmem:[#allocation5 + $0x1bd0] sm:$0xff] }
 0x259   :  { %7470 = vmatprep.subr.bf16.mxu1 %v18202_v41  ;;  %8244 = vmatprep.subr.bf16.mxu0 %v18214_v4  ;;  %v1005_v0 = vld [vmem:[#allocation5 + $0x1c30] sm:$0xff]  ;;  %v999_v41 = vld [vmem:[#allocation5 + $0x1c00] sm:$0xff]  ;;  %v18357_v4 = vcombine.low %v975_v54, %v987_v56 }
 0x25a   :  { %v18370_v5 = vcombine.high %v993_v23, %v1005_v0  ;;  %v18382_v8 = vcombine.high %v999_v41, %v1011_v37  ;;  %v18369_v60 = vcombine.low %v993_v23, %v1005_v0  ;;  %v1155_v0 = vld [vmem:[#allocation5 + $0x20e0] sm:$0xff] }
 0x25c   :  { %7471 = vmatpush1.bf16.msra.mxu1 %v18201_v6  ;;  %8245 = vmatpush1.bf16.msra.mxu0 %v18213_v57  ;;  %v1017_v6 = vld [vmem:[#allocation5 + $0x1c90] sm:$0xff] }
 0x25d   :  { %7472 = vmatprep.subr.bf16.mxu1 %v18226_v7  ;;  %8246 = vmatprep.subr.bf16.mxu0 %v18238_v11  ;;  %v1029_v57 = vld [vmem:[#allocation5 + $0x1cf0] sm:$0xff]  ;;  %v1023_v7 = vld [vmem:[#allocation5 + $0x1cc0] sm:$0xff]  ;;  %v18381_v11 = vcombine.low %v999_v41, %v1011_v37 }
 0x25e   :  { %v18394_v12 = vcombine.high %v1017_v6, %v1029_v57  ;;  %v18406_v18 = vcombine.high %v1023_v7, %v1035_v9  ;;  %v18393_v21 = vcombine.low %v1017_v6, %v1029_v57  ;;  %v1179_v57 = vld [vmem:[#allocation5 + $0x21a0] sm:$0xff] }
 0x260   :  { %7473 = vmatpush1.bf16.msra.mxu1 %v18225_v13  ;;  %8247 = vmatpush1.bf16.msra.mxu0 %v18237_v14  ;;  %v1041_v13 = vld [vmem:[#allocation5 + $0x1d50] sm:$0xff] }
 0x261   :  { %7485 = vmatprep.subr.bf16.mxu1 %v18250_v17  ;;  %8259 = vmatprep.subr.bf16.mxu0 %v18262_v22  ;;  %v1053_v14 = vld [vmem:[#allocation5 + $0x1db0] sm:$0xff]  ;;  %v1047_v17 = vld [vmem:[#allocation5 + $0x1d80] sm:$0xff]  ;;  %v18405_v22 = vcombine.low %v1023_v7, %v1035_v9 }
 0x262   :  { %v18418_v26 = vcombine.high %v1041_v13, %v1053_v14  ;;  %v18430_v33 = vcombine.high %v1047_v17, %v1059_v19  ;;  %v18417_v35 = vcombine.low %v1041_v13, %v1053_v14  ;;  %v1203_v14 = vld [vmem:[#allocation5 + $0x2260] sm:$0xff] }
 0x263   :  { %7475 = vmatmul.mubr.bf16.vlgmr.msra.gmra.mrb[8].mxu1 %v22170_v30  ;;  %8249 = vmatmul.mubr.bf16.vlgmr.msra.gmra.mrb[8].mxu0 %v22170_v30 }
 0x264   :  { %7486 = vmatpush1.bf16.msra.mxu1 %v18249_v27  ;;  %8260 = vmatpush1.bf16.msra.mxu0 %v18261_v29  ;;  %v1065_v27 = vld [vmem:[#allocation5 + $0x1e10] sm:$0xff] }
 0x265   :  { %7487 = vmatprep.subr.bf16.mxu1 %v18274_v31  ;;  %8261 = vmatprep.subr.bf16.mxu0 %v18286_v36  ;;  %v1077_v29 = vld [vmem:[#allocation5 + $0x1e70] sm:$0xff]  ;;  %v1071_v31 = vld [vmem:[#allocation5 + $0x1e40] sm:$0xff]  ;;  %v18429_v36 = vcombine.low %v1047_v17, %v1059_v19 }
 0x266   :  { %7517 = vmatprep.mubr.bf16.mxu1 %v22172_v39  ;;  %8291 = vmatprep.mubr.bf16.mxu0 %v22172_v39  ;;  %v18442_v38 = vcombine.high %v1065_v27, %v1077_v29  ;;  %v18454_v45 = vcombine.high %v1071_v31, %v1083_v34  ;;  %v18441_v20 = vcombine.low %v1065_v27, %v1077_v29  ;;  %v1227_v29 = vld [vmem:[#allocation5 + $0x2320] sm:$0xff] }
 0x268   :  { %7488 = vmatpush1.bf16.msra.mxu1 %v18273_v40  ;;  %8262 = vmatpush1.bf16.msra.mxu0 %v18285_v42  ;;  %v1089_v40 = vld [vmem:[#allocation5 + $0x1ed0] sm:$0xff] }
 0x269   :  { %7489 = vmatprep.subr.bf16.mxu1 %v18298_v43  ;;  %8263 = vmatprep.subr.bf16.mxu0 %v18310_v47  ;;  %v1101_v42 = vld [vmem:[#allocation5 + $0x1f30] sm:$0xff]  ;;  %v1095_v43 = vld [vmem:[#allocation5 + $0x1f00] sm:$0xff]  ;;  %v18453_v47 = vcombine.low %v1071_v31, %v1083_v34 }
 0x26a   :  { %v18466_v49 = vcombine.high %v1089_v40, %v1101_v42  ;;  %v18478_v52 = vcombine.high %v1095_v43, %v1107_v46  ;;  %v18465_v54 = vcombine.low %v1089_v40, %v1101_v42  ;;  %v1251_v42 = vld [vmem:[#allocation5 + $0x23e0] sm:$0xff] }
 0x26c   :  { %7490 = vmatpush1.bf16.msra.mxu1 %v18297_v50  ;;  %8264 = vmatpush1.bf16.msra.mxu0 %v18309_v51  ;;  %v1113_v50 = vld [vmem:[#allocation5 + $0x1f90] sm:$0xff] }
 0x26d   :  { %7491 = vmatprep.subr.bf16.mxu1 %v18322_v32  ;;  %8265 = vmatprep.subr.bf16.mxu0 %v18334_v55  ;;  %v1125_v51 = vld [vmem:[#allocation5 + $0x1ff0] sm:$0xff]  ;;  %v1119_v32 = vld [vmem:[#allocation5 + $0x1fc0] sm:$0xff]  ;;  %v18477_v55 = vcombine.low %v1095_v43, %v1107_v46 }
 0x26e   :  { %v18490_v56 = vcombine.high %v1113_v50, %v1125_v51  ;;  %v18502_v23 = vcombine.high %v1119_v32, %v1131_v53  ;;  %v18489_v41 = vcombine.low %v1113_v50, %v1125_v51  ;;  %v125_v51 = vld [vmem:[#allocation5 + $0xb0] sm:$0xff] }
 0x270   :  { %7492 = vmatpush1.bf16.msra.mxu1 %v18321_v28  ;;  %8266 = vmatpush1.bf16.msra.mxu0 %v18333_v62  ;;  %v1137_v28 = vld [vmem:[#allocation5 + $0x2050] sm:$0xff] }
 0x271   :  { %7493 = vmatprep.subr.bf16.mxu1 %v18346_v63  ;;  %8267 = vmatprep.subr.bf16.mxu0 %v18358_v1  ;;  %v1149_v62 = vld [vmem:[#allocation5 + $0x20b0] sm:$0xff]  ;;  %v1143_v63 = vld [vmem:[#allocation5 + $0x2080] sm:$0xff]  ;;  %v18501_v1 = vcombine.low %v1119_v32, %v1131_v53 }
 0x272   :  { %v18514_v37 = vcombine.high %v1137_v28, %v1149_v62  ;;  %v18526_v6 = vcombine.high %v1143_v63, %v1155_v0  ;;  %v18513_v7 = vcombine.low %v1137_v28, %v1149_v62  ;;  %v149_v62 = vld [vmem:[#allocation5 + $0x170] sm:$0xff] }
 0x274   :  { %7494 = vmatpush1.bf16.msra.mxu1 %v18345_v3  ;;  %8268 = vmatpush1.bf16.msra.mxu0 %v18357_v4  ;;  %v1161_v3 = vld [vmem:[#allocation5 + $0x2110] sm:$0xff] }
 0x275   :  { %7495 = vmatprep.subr.bf16.mxu1 %v18370_v5  ;;  %8269 = vmatprep.subr.bf16.mxu0 %v18382_v8  ;;  %v1173_v4 = vld [vmem:[#allocation5 + $0x2170] sm:$0xff]  ;;  %v1167_v5 = vld [vmem:[#allocation5 + $0x2140] sm:$0xff]  ;;  %v18525_v8 = vcombine.low %v1143_v63, %v1155_v0 }
 0x276   :  { %v18538_v9 = vcombine.high %v1161_v3, %v1173_v4  ;;  %v18550_v13 = vcombine.high %v1167_v5, %v1179_v57  ;;  %v18537_v17 = vcombine.low %v1161_v3, %v1173_v4  ;;  %v173_v4 = vld [vmem:[#allocation5 + $0x230] sm:$0xff] }
 0x278   :  { %7496 = vmatpush1.bf16.msra.mxu1 %v18369_v60  ;;  %8270 = vmatpush1.bf16.msra.mxu0 %v18381_v11  ;;  %v1185_v60 = vld [vmem:[#allocation5 + $0x21d0] sm:$0xff] }
 0x279   :  { %7497 = vmatprep.subr.bf16.mxu1 %v18394_v12  ;;  %8271 = vmatprep.subr.bf16.mxu0 %v18406_v18  ;;  %v1197_v11 = vld [vmem:[#allocation5 + $0x2230] sm:$0xff]  ;;  %v1191_v12 = vld [vmem:[#allocation5 + $0x2200] sm:$0xff]  ;;  %v18549_v18 = vcombine.low %v1167_v5, %v1179_v57 }
 0x27a   :  { %v18562_v19 = vcombine.high %v1185_v60, %v1197_v11  ;;  %v18574_v27 = vcombine.high %v1191_v12, %v1203_v14  ;;  %v18561_v31 = vcombine.low %v1185_v60, %v1197_v11  ;;  %v197_v11 = vld [vmem:[#allocation5 + $0x2f0] sm:$0xff] }
 0x27c   :  { %7498 = vmatpush1.bf16.msra.mxu1 %v18393_v21  ;;  %8272 = vmatpush1.bf16.msra.mxu0 %v18405_v22  ;;  %v1209_v21 = vld [vmem:[#allocation5 + $0x2290] sm:$0xff] }
 0x27d   :  { %7499 = vmatprep.subr.bf16.mxu1 %v18418_v26  ;;  %8273 = vmatprep.subr.bf16.mxu0 %v18430_v33  ;;  %v1221_v22 = vld [vmem:[#allocation5 + $0x22f0] sm:$0xff]  ;;  %v1215_v26 = vld [vmem:[#allocation5 + $0x22c0] sm:$0xff]  ;;  %v18573_v33 = vcombine.low %v1191_v12, %v1203_v14 }
 0x27e   :  { %v18586_v34 = vcombine.high %v1209_v21, %v1221_v22  ;;  %v18598_v40 = vcombine.high %v1215_v26, %v1227_v29  ;;  %v18585_v43 = vcombine.low %v1209_v21, %v1221_v22  ;;  %v221_v22 = vld [vmem:[#allocation5 + $0x3b0] sm:$0xff] }
 0x280   :  { %7500 = vmatpush1.bf16.msra.mxu1 %v18417_v35  ;;  %8274 = vmatpush1.bf16.msra.mxu0 %v18429_v36  ;;  %v1233_v35 = vld [vmem:[#allocation5 + $0x2350] sm:$0xff] }
 0x281   :  { %7501 = vmatprep.subr.bf16.mxu1 %v18442_v38  ;;  %8275 = vmatprep.subr.bf16.mxu0 %v18454_v45  ;;  %v1245_v36 = vld [vmem:[#allocation5 + $0x23b0] sm:$0xff]  ;;  %v1239_v38 = vld [vmem:[#allocation5 + $0x2380] sm:$0xff]  ;;  %v18597_v45 = vcombine.low %v1215_v26, %v1227_v29 }
 0x282   :  { %v18610_v46 = vcombine.high %v1233_v35, %v1245_v36  ;;  %v18622_v50 = vcombine.high %v1239_v38, %v1251_v42  ;;  %v18609_v32 = vcombine.low %v1233_v35, %v1245_v36  ;;  %v245_v36 = vld [vmem:[#allocation5 + $0x470] sm:$0xff] }
 0x284   :  { %7502 = vmatpush1.bf16.msra.mxu1 %v18441_v20  ;;  %8276 = vmatpush1.bf16.msra.mxu0 %v18453_v47  ;;  %v106_v20 = vld [vmem:[#allocation5 + $0x18] sm:$0xff] }
 0x285   :  { %7503 = vmatprep.subr.bf16.mxu1 %v18466_v49  ;;  %8277 = vmatprep.subr.bf16.mxu0 %v18478_v52  ;;  %v118_v47 = vld [vmem:[#allocation5 + $0x78] sm:$0xff]  ;;  %v113_v49 = vld [vmem:[#allocation5 + $0x50] sm:$0xff]  ;;  %v18621_v52 = vcombine.low %v1239_v38, %v1251_v42  ;;  %v22281_v38 = vsub.s32 2, %v22196_v48  ;;  %v22284_v42 = vsub.s32 3, %v22196_v48 }
 0x286   :  { %v17484_v53 = vcombine.high %v106_v20, %v118_v47  ;;  %v17498_v28 = vcombine.high %v113_v49, %v125_v51  ;;  %v17483_v63 = vcombine.low %v106_v20, %v118_v47  ;;  %v250_v20 = vld [vmem:[#allocation5 + $0x498] sm:$0xff] }
 0x287   :  { %v262_v47 = vld [vmem:[#allocation5 + $0x4f8] sm:$0xff] }
 0x288   :  { %7504 = vmatpush1.bf16.msra.mxu1 %v18465_v54  ;;  %8278 = vmatpush1.bf16.msra.mxu0 %v18477_v55  ;;  %v130_v54 = vld [vmem:[#allocation5 + $0xd8] sm:$0xff] }
 0x289   :  { %7505 = vmatprep.subr.bf16.mxu1 %v18490_v56  ;;  %8279 = vmatprep.subr.bf16.mxu0 %v18502_v23  ;;  %v142_v55 = vld [vmem:[#allocation5 + $0x138] sm:$0xff]  ;;  %v137_v56 = vld [vmem:[#allocation5 + $0x110] sm:$0xff]  ;;  %v17497_v23 = vcombine.low %v113_v49, %v125_v51 }
 0x28a   :  { %v17508_v0 = vcombine.high %v130_v54, %v142_v55  ;;  %v17522_v3 = vcombine.high %v137_v56, %v149_v62  ;;  %v17507_v5 = vcombine.low %v130_v54, %v142_v55  ;;  %v257_v49 = vld [vmem:[#allocation5 + $0x4d0] sm:$0xff] }
 0x28c   :  { %7506 = vmatpush1.bf16.msra.mxu1 %v18489_v41  ;;  %8280 = vmatpush1.bf16.msra.mxu0 %v18501_v1  ;;  %v154_v41 = vld [vmem:[#allocation5 + $0x198] sm:$0xff] }
 0x28d   :  { %7507 = vmatprep.subr.bf16.mxu1 %v18514_v37  ;;  %8281 = vmatprep.subr.bf16.mxu0 %v18526_v6  ;;  %v166_v1 = vld [vmem:[#allocation5 + $0x1f8] sm:$0xff]  ;;  %v161_v37 = vld [vmem:[#allocation5 + $0x1d0] sm:$0xff]  ;;  %v17521_v6 = vcombine.low %v137_v56, %v149_v62  ;;  %v21906_v56 = vld [vmem:[#allocation7 + $0x8] sm:$0xff] }
 0x28e   :  { %v17532_v57 = vcombine.high %v154_v41, %v166_v1  ;;  %v17546_v60 = vcombine.high %v161_v37, %v173_v4  ;;  %v17531_v12 = vcombine.low %v154_v41, %v166_v1  ;;  %v281_v41 = vld [vmem:[#allocation5 + $0x590] sm:$0xff] }
 0x290   :  { %7508 = vmatpush1.bf16.msra.mxu1 %v18513_v7  ;;  %8282 = vmatpush1.bf16.msra.mxu0 %v18525_v8  ;;  %v178_v7 = vld [vmem:[#allocation5 + $0x258] sm:$0xff] }
 0x291   :  { %7509 = vmatprep.subr.bf16.mxu1 %v18538_v9  ;;  %8283 = vmatprep.subr.bf16.mxu0 %v18550_v13  ;;  %v190_v8 = vld [vmem:[#allocation5 + $0x2b8] sm:$0xff]  ;;  %v185_v9 = vld [vmem:[#allocation5 + $0x290] sm:$0xff]  ;;  %v17545_v13 = vcombine.low %v161_v37, %v173_v4 }
 0x292   :  { %v17556_v14 = vcombine.high %v178_v7, %v190_v8  ;;  %v17570_v21 = vcombine.high %v185_v9, %v197_v11  ;;  %v17555_v26 = vcombine.low %v178_v7, %v190_v8  ;;  %v293_v4 = vld [vmem:[#allocation5 + $0x5f0] sm:$0xff] }
 0x294   :  { %7510 = vmatpush1.bf16.msra.mxu1 %v18537_v17  ;;  %8284 = vmatpush1.bf16.msra.mxu0 %v18549_v18  ;;  %v202_v17 = vld [vmem:[#allocation5 + $0x318] sm:$0xff] }
 0x295   :  { %7511 = vmatprep.subr.bf16.mxu1 %v18562_v19  ;;  %8285 = vmatprep.subr.bf16.mxu0 %v18574_v27  ;;  %v214_v18 = vld [vmem:[#allocation5 + $0x378] sm:$0xff]  ;;  %v209_v19 = vld [vmem:[#allocation5 + $0x350] sm:$0xff]  ;;  %v17569_v27 = vcombine.low %v185_v9, %v197_v11  ;;  %v17627_v9 = vcombine.low %v250_v20, %v262_v47 }
 0x296   :  { %v17580_v29 = vcombine.high %v202_v17, %v214_v18  ;;  %v17594_v35 = vcombine.high %v209_v19, %v221_v22 }
 0x298   :  { %7512 = vmatpush1.bf16.msra.mxu1 %v18561_v31  ;;  %8286 = vmatpush1.bf16.msra.mxu0 %v18573_v33  ;;  %v226_v31 = vld [vmem:[#allocation5 + $0x3d8] sm:$0xff] }
 0x299   :  { %7513 = vmatprep.subr.bf16.mxu1 %v18586_v34  ;;  %8287 = vmatprep.subr.bf16.mxu0 %v18598_v40  ;;  %v238_v33 = vld [vmem:[#allocation5 + $0x438] sm:$0xff]  ;;  %v233_v34 = vld [vmem:[#allocation5 + $0x410] sm:$0xff]  ;;  %v17579_v40 = vcombine.low %v202_v17, %v214_v18 }
 0x29a   :  { %v17618_v51 = vcombine.high %v233_v34, %v245_v36  ;;  %v17603_v55 = vcombine.low %v226_v31, %v238_v33  ;;  %v17617_v62 = vcombine.low %v233_v34, %v245_v36  ;;  %v305_v36 = vld [vmem:[#allocation5 + $0x650] sm:$0xff] }
 0x29c   :  { %7514 = vmatpush1.bf16.msra.mxu1 %v18585_v43  ;;  %8288 = vmatpush1.bf16.msra.mxu0 %v18597_v45  ;;  %v22287_v43 = vsub.s32 4, %v22196_v48  ;;  %v17593_v45 = vcombine.low %v209_v19, %v221_v22  ;;  %v298_v19 = vld [vmem:[#allocation5 + $0x618] sm:$0xff] }
 0x29d   :  { %7515 = vmatprep.subr.bf16.mxu1 %v18610_v46  ;;  %8289 = vmatprep.subr.bf16.mxu0 %v18622_v50  ;;  %v17604_v46 = vcombine.high %v226_v31, %v238_v33  ;;  %v22290_v50 = vsub.s32 5, %v22196_v48  ;;  %v17666_v31 = vcombine.high %v281_v41, %v293_v4 }
 0x29f   :  { %v1316_v1 = vrot.slane %v21906_v56, %v22290_v50 }
 0x2a0   :  { %7516 = vmatpush1.bf16.msra.mxu1 %v18609_v32  ;;  %8290 = vmatpush1.bf16.msra.mxu0 %v18621_v52  ;;  %v269_v32 = vld [vmem:[#allocation5 + $0x530] sm:$0xff]  ;;  %v21905_v52 = vld [vmem:[#allocation7] sm:$0xff] }
 0x2a1   :  { %7528 = vmatprep.subr.bf16.mxu1 %v17484_v53  ;;  %8431 = vmatprep.subr.bf16.mxu0 %v17498_v28  ;;  %v1272_v53 = vrot.slane %v21905_v52, %v22281_v38  ;;  %v1276_v54 = vrot.slane %v21905_v52, %v22284_v42  ;;  %v1312_v28 = vrot.slane %v21906_v56, %v22287_v43  ;;  %v341_v56 = vld [vmem:[#allocation5 + $0x770] sm:$0xff] }
 0x2a3   :  { %7518 = vmatmul.mubr.bf16.vlgmr.msra.gmra.mrb[8].mxu1 %v22178_v44  ;;  %8292 = vmatmul.mubr.bf16.vlgmr.msra.gmra.mrb[8].mxu0 %v22178_v44 }
 0x2a4   :  { %7529 = vmatpush1.bf16.msra.mxu1 %v17483_v63  ;;  %8432 = vmatpush1.bf16.msra.mxu0 %v17497_v23  ;;  %v17628_v63 = vcombine.high %v250_v20, %v262_v47  ;;  %v274_v23 = vld [vmem:[#allocation5 + $0x558] sm:$0xff]  ;;  %v17665_v20 = vcombine.low %v281_v41, %v293_v4 }
 0x2a5   :  { %7530 = vmatprep.subr.bf16.mxu1 %v17508_v0  ;;  %8433 = vmatprep.subr.bf16.mxu0 %v17522_v3  ;;  %v286_v0 = vld [vmem:[#allocation5 + $0x5b8] sm:$0xff]  ;;  %v17642_v3 = vcombine.high %v257_v49, %v269_v32 }
 0x2a6   :  { %7560 = vmatprep.mubr.bf16.mxu1 %v22158_v58  ;;  %8463 = vmatprep.mubr.bf16.mxu0 %v22158_v58  ;;  %v17652_v18 = vcombine.high %v274_v23, %v286_v0 }
 0x2a8   :  { %7531 = vmatpush1.bf16.msra.mxu1 %v17507_v5  ;;  %8434 = vmatpush1.bf16.msra.mxu0 %v17521_v6 }
 0x2a9   :  { %7532 = vmatprep.subr.bf16.mxu1 %v17532_v57  ;;  %8435 = vmatprep.subr.bf16.mxu0 %v17546_v60  ;;  %v17641_v60 = vcombine.low %v257_v49, %v269_v32  ;;  %v322_v49 = vld [vmem:[#allocation5 + $0x6d8] sm:$0xff] }
 0x2ac   :  { %7533 = vmatpush1.bf16.msra.mxu1 %v17531_v12  ;;  %8436 = vmatpush1.bf16.msra.mxu0 %v17545_v13 }
 0x2ad   :  { %7534 = vmatprep.subr.bf16.mxu1 %v17556_v14  ;;  %8437 = vmatprep.subr.bf16.mxu0 %v17570_v21  ;;  %v310_v21 = vld [vmem:[#allocation5 + $0x678] sm:$0xff] }
 0x2ae   :  { %v17676_v47 = vcombine.high %v298_v19, %v310_v21 }
 0x2b0   :  { %7535 = vmatpush1.bf16.msra.mxu1 %v17555_v26  ;;  %8438 = vmatpush1.bf16.msra.mxu0 %v17569_v27 }
 0x2b1   :  { %7536 = vmatprep.subr.bf16.mxu1 %v17580_v29  ;;  %8439 = vmatprep.subr.bf16.mxu0 %v17594_v35  ;;  %v17651_v35 = vcombine.low %v274_v23, %v286_v0  ;;  %v22319_v23 = vld [vmem:[#allocation5 + $0x798] sm:$0xff] }
 0x2b4   :  { %7537 = vmatpush1.bf16.msra.mxu1 %v17579_v40  ;;  %8440 = vmatpush1.bf16.msra.mxu0 %v17593_v45  ;;  %v317_v40 = vld [vmem:[#allocation5 + $0x6b0] sm:$0xff] }
 0x2b5   :  { %7538 = vmatprep.subr.bf16.mxu1 %v17604_v46  ;;  %8441 = vmatprep.subr.bf16.mxu0 %v17618_v51  ;;  %v334_v51 = vld [vmem:[#allocation5 + $0x738] sm:$0xff] }
 0x2b6   :  { %v7390_v37 = vpop.f32.mrb[4].mxu1  ;;  %v8035_v57 = vpop.f32.mrb[4].mxu0  ;;  %v17700_v41 = vcombine.high %v322_v49, %v334_v51 }
 0x2b7   :  { %v22296_v5 = vadd.f32 %v7390_v37, %v1272_v53  ;;  %v7392_v6 = vpop.f32.mrb[5].mxu1  ;;  %v22300_v11 = vadd.f32 %v8035_v57, %v1312_v28  ;;  %v8037_v12 = vpop.f32.mrb[5].mxu0  ;;  %v353_v37 = vld [vmem:[#allocation5 + $0x7d0] sm:$0xff]  ;;  %v22324_v57 = vld [vmem:[#allocation5 + $0x8b8] sm:$0xff] }
 0x2b8   :  { %v22298_v7 = vadd.f32 %v7392_v6, %v1276_v54  ;;  %v7394_v8 = vpop.f32.mrb[6].mxu1  ;;  %7539 = vmatpush1.bf16.msra.mxu1 %v17603_v55  ;;  %8442 = vmatpush1.bf16.msra.mxu0 %v17617_v62  ;;  %v22305_v22 = vadd.f32 %v8037_v12, %v1316_v1  ;;  %v8039_v26 = vpop.f32.mrb[6].mxu0  ;;  %v329_v55 = vld [vmem:[#allocation5 + $0x710] sm:$0xff]  ;;  %v22322_v6 = vld [vmem:[#allocation5 + $0x858] sm:$0xff] }
 0x2b9   :  { %v8740_v13 = vmul.f32 0.70710677, %v22296_v5  ;;  %v22303_v14 = vadd.f32 %v7394_v8, %v1272_v53  ;;  %v7396_v17 = vpop.f32.mrb[7].mxu1  ;;  %7540 = vmatprep.subr.bf16.mxu1 %v17628_v63  ;;  %8443 = vmatprep.subr.bf16.mxu0 %v17642_v3  ;;  %v8041_v33 = vpop.f32.mrb[7].mxu0  ;;  %v8750_v45 = vmul.f32 0.70710677, %v22300_v11  ;;  %v22314_v52 = vadd.f32 %v8039_v26, %v1312_v28 }
 0x2ba   :  { %v8741_v27 = vmul.f32 0.70710677, %v22298_v7  ;;  %v22308_v29 = vadd.f32 %v7396_v17, %v1276_v54  ;;  %v8751_v32 = vmul.f32 0.70710677, %v22305_v22  ;;  %v22316_v53 = vadd.f32 %v8041_v33, %v1316_v1  ;;  %v358_v1 = vld [vmem:[#allocation5 + $0x7f8] sm:$0xff]  ;;  %v365_v3 = vld [vmem:[#allocation5 + $0x830] sm:$0xff] }
 0x2bb   :  { %21825 = verf.f32 %v8740_v13  ;;  %v8764_v34 = vmul.f32 0.70710677, %v22303_v14  ;;  %v17690_v54 = vcombine.high %v305_v36, %v317_v40  ;;  %v8774_v62 = vmul.f32 0.70710677, %v22314_v52  ;;  %v22327_v13 = vld [vmem:[#allocation5 + $0x890] sm:$0xff] }
 0x2bc   :  { %21827 = verf.f32 %v8741_v27  ;;  %v8765_v46 = vmul.f32 0.70710677, %v22308_v29  ;;  %7541 = vmatpush1.bf16.msra.mxu1 %v17627_v9  ;;  %8444 = vmatpush1.bf16.msra.mxu0 %v17641_v60  ;;  %v17675_v63 = vcombine.low %v298_v19, %v310_v21  ;;  %v8775_v0 = vmul.f32 0.70710677, %v22316_v53  ;;  %v22329_v17 = vld [vmem:[#allocation5 + $0x8f0] sm:$0xff] }
 0x2bd   :  { %21829 = verf.f32 %v8764_v34  ;;  %7542 = vmatprep.subr.bf16.mxu1 %v17652_v18  ;;  %8445 = vmatprep.subr.bf16.mxu0 %v17666_v31  ;;  %v17689_v28 = vcombine.low %v305_v36, %v317_v40  ;;  %v17714_v4 = vcombine.high %v329_v55, %v341_v56  ;;  %v17699_v8 = vcombine.low %v322_v49, %v334_v51 }
 0x2be   :  { %21831 = verf.f32 %v8765_v46  ;;  %v17713_v60 = vcombine.low %v329_v55, %v341_v56  ;;  %v17724_v12 = vcombine.high %v22319_v23, %v358_v1  ;;  %v17723_v21 = vcombine.low %v22319_v23, %v358_v1  ;;  %v406_v55 = vld [vmem:[#allocation5 + $0x978] sm:$0xff]  ;;  %v401_v56 = vld [vmem:[#allocation5 + $0x950] sm:$0xff] }
 0x2bf   :  { %21833 = verf.f32 %v8750_v45  ;;  %v17737_v26 = vcombine.low %v353_v37, %v365_v3  ;;  %v17738_v27 = vcombine.high %v353_v37, %v365_v3  ;;  %v8691_v33 = vmul.f32 0.5, %v22296_v5 }
 0x2c0   :  { %7543 = vmatpush1.bf16.msra.mxu1 %v17651_v35  ;;  %21835 = verf.f32 %v8751_v32  ;;  %8446 = vmatpush1.bf16.msra.mxu0 %v17665_v20  ;;  %v17747_v35 = vcombine.low %v22322_v6, %v22324_v57  ;;  %v17748_v36 = vcombine.high %v22322_v6, %v22324_v57  ;;  %v8715_v45 = vmul.f32 0.5, %v22303_v14 }
 0x2c1   :  { %7544 = vmatprep.subr.bf16.mxu1 %v17676_v47  ;;  %21837 = verf.f32 %v8774_v62  ;;  %8447 = vmatprep.subr.bf16.mxu0 %v17690_v54  ;;  %v17762_v20 = vcombine.high %v22327_v13, %v22329_v17  ;;  %v394_v47 = vld [vmem:[#allocation5 + $0x918] sm:$0xff]  ;;  %v8701_v49 = vmul.f32 0.5, %v22300_v11  ;;  %v8692_v5 = vmul.f32 0.5, %v22298_v7 }
 0x2c2   :  { %21839 = verf.f32 %v8775_v0  ;;  %v8716_v32 = vmul.f32 0.5, %v22308_v29  ;;  %v8702_v14 = vmul.f32 0.5, %v22305_v22  ;;  %v413_v0 = vld [vmem:[#allocation5 + $0x9b0] sm:$0xff]  ;;  %v8725_v11 = vmul.f32 0.5, %v22314_v52  ;;  %v430_v52 = vld [vmem:[#allocation5 + $0xa38] sm:$0xff] }
 0x2c3   :  { %v8726_v29 = vmul.f32 0.5, %v22316_v53  ;;  %v17761_v22 = vcombine.low %v22327_v13, %v22329_v17  ;;  %v17786_v53 = vcombine.high %v401_v56, %v413_v0  ;;  %v17785_v17 = vcombine.low %v401_v56, %v413_v0  ;;  %v497_v0 = vld [vmem:[#allocation5 + $0xc50] sm:$0xff] }
 0x2c4   :  { %7545 = vmatpush1.bf16.msra.mxu1 %v17675_v63  ;;  %8448 = vmatpush1.bf16.msra.mxu0 %v17689_v28 }
 0x2c5   :  { %v21826_v9 = vpop.eup %21825  ;;  %7546 = vmatprep.subr.bf16.mxu1 %v17700_v41  ;;  %8449 = vmatprep.subr.bf16.mxu0 %v17714_v4 }
 0x2c6   :  { %v21828_v18 = vpop.eup %21827  ;;  %v8836_v19 = vadd.f32 1.0, %v21826_v9  ;;  %v418_v9 = vld [vmem:[#allocation5 + $0x9d8] sm:$0xff] }
 0x2c7   :  { %v21830_v31 = vpop.eup %21829  ;;  %v8837_v34 = vadd.f32 1.0, %v21828_v18 }
 0x2c8   :  { %v21832_v40 = vpop.eup %21831  ;;  %v8860_v46 = vadd.f32 1.0, %v21830_v31  ;;  %7547 = vmatpush1.bf16.msra.mxu1 %v17699_v8  ;;  %8450 = vmatpush1.bf16.msra.mxu0 %v17713_v60  ;;  %v8884_v63 = vmul.f32 %v8836_v19, %v8691_v33  ;;  %v17772_v8 = vcombine.high %v394_v47, %v406_v55  ;;  %v425_v60 = vld [vmem:[#allocation5 + $0xa10] sm:$0xff]  ;;  %v17771_v33 = vcombine.low %v394_v47, %v406_v55 }
 0x2c9   :  { %v21834_v51 = vpop.eup %21833  ;;  %v8861_v54 = vadd.f32 1.0, %v21832_v40  ;;  %7548 = vmatprep.subr.bf16.mxu1 %v17724_v12  ;;  %8451 = vmatprep.subr.bf16.mxu0 %v17738_v27  ;;  %v8885_v1 = vmul.f32 %v8837_v34, %v8692_v5  ;;  %v437_v27 = vld [vmem:[#allocation5 + $0xa70] sm:$0xff]  ;;  %v442_v34 = vld [vmem:[#allocation5 + $0xa98] sm:$0xff] }
 0x2ca   :  { %v21836_v62 = vpop.eup %21835  ;;  %v8908_v23 = vmul.f32 %v8860_v46, %v8715_v45  ;;  %v8846_v28 = vadd.f32 1.0, %v21834_v51  ;;  %v449_v40 = vld [vmem:[#allocation5 + $0xad0] sm:$0xff]  ;;  %v17810_v46 = vcombine.high %v425_v60, %v437_v27  ;;  %v466_v51 = vld [vmem:[#allocation5 + $0xb58] sm:$0xff] }
 0x2cb   :  { %v21838_v41 = vpop.eup %21837  ;;  %v8909_v7 = vmul.f32 %v8861_v54, %v8716_v32  ;;  %v8847_v37 = vadd.f32 1.0, %v21836_v62  ;;  %v478_v5 = vld [vmem:[#allocation5 + $0xbb8] sm:$0xff]  ;;  %v473_v32 = vld [vmem:[#allocation5 + $0xb90] sm:$0xff] }
 0x2cc   :  { %v21840_v3 = vpop.eup %21839  ;;  %v22346_v4 = vpack.c.bf16 %v8908_v23, %v8884_v63  ;;  %7549 = vmatpush1.bf16.msra.mxu1 %v17723_v21  ;;  %v8894_v6 = vmul.f32 %v8846_v28, %v8701_v49  ;;  %v8870_v57 = vadd.f32 1.0, %v21838_v41  ;;  %8452 = vmatpush1.bf16.msra.mxu0 %v17737_v26  ;;  %v17796_v26 = vcombine.high %v418_v9, %v430_v52  ;;  %v485_v55 = vld [vmem:[#allocation5 + $0xbf0] sm:$0xff]  ;;  %v490_v63 = vld [vmem:[#allocation5 + $0xc18] sm:$0xff] }
 0x2cd   :  { %7550 = vmatprep.subr.bf16.mxu1 %v17748_v36  ;;  %v8895_v12 = vmul.f32 %v8847_v37, %v8702_v14  ;;  %v8871_v18 = vadd.f32 1.0, %v21840_v3  ;;  %v22350_v19 = vpack.c.bf16 %v8909_v7, %v8885_v1  ;;  %8453 = vmatprep.subr.bf16.mxu0 %v17762_v20  ;;  %v454_v36 = vld [vmem:[#allocation5 + $0xaf8] sm:$0xff]  ;;  %v461_v20 = vld [vmem:[#allocation5 + $0xb30] sm:$0xff]  ;;  %v17795_v49 = vcombine.low %v418_v9, %v430_v52 }
 0x2ce   :  { %v8918_v31 = vmul.f32 %v8870_v57, %v8725_v11  ;;  %v17820_v47 = vcombine.high %v442_v34, %v454_v36  ;;  %v17834_v54 = vcombine.high %v449_v40, %v461_v20  ;;  %v17819_v56 = vcombine.low %v442_v34, %v454_v36  ;;  %v502_v23 = vld [vmem:[#allocation5 + $0xc78] sm:$0xff]  ;;  %v509_v11 = vld [vmem:[#allocation5 + $0xcb0] sm:$0xff] }
 0x2cf   :  { %v8919_v21 = vmul.f32 %v8871_v18, %v8726_v29  ;;  %v17833_v14 = vcombine.low %v449_v40, %v461_v20  ;;  %v17844_v62 = vcombine.high %v466_v51, %v478_v5  ;;  %v17858_v28 = vcombine.high %v473_v32, %v485_v55  ;;  %v514_v37 = vld [vmem:[#allocation5 + $0xcd8] sm:$0xff]  ;;  %v521_v3 = vld [vmem:[#allocation5 + $0xd10] sm:$0xff] }
 0x2d0   :  { %7551 = vmatpush1.bf16.msra.mxu1 %v17747_v35  ;;  %v22352_v13 = vpack.c.bf16 %v8918_v31, %v8894_v6  ;;  %8454 = vmatpush1.bf16.msra.mxu0 %v17761_v22  ;;  %v17809_v35 = vcombine.low %v425_v60, %v437_v27  ;;  %v17843_v41 = vcombine.low %v466_v51, %v478_v5  ;;  %v526_v29 = vld [vmem:[#allocation5 + $0xd38] sm:$0xff]  ;;  %v533_v6 = vld [vmem:[#allocation5 + $0xd70] sm:$0xff] }
 0x2d1   :  { %7552 = vmatprep.subr.bf16.mxu1 %v17772_v8  ;;  %v22354_v45 = vpack.c.bf16 %v8919_v21, %v8895_v12  ;;  %8455 = vmatprep.subr.bf16.mxu0 %v17786_v53  ;;  %v17857_v1 = vcombine.low %v473_v32, %v485_v55  ;;  %v17868_v7 = vcombine.high %v490_v63, %v502_v23  ;;  %v538_v52 = vld [vmem:[#allocation5 + $0xd98] sm:$0xff]  ;;  %v545_v18 = vld [vmem:[#allocation5 + $0xdd0] sm:$0xff] }
 0x2d2   :  { %v17882_v22 = vcombine.high %v497_v0, %v509_v11  ;;  %v17867_v57 = vcombine.low %v490_v63, %v502_v23  ;;  %v17881_v8 = vcombine.low %v497_v0, %v509_v11  ;;  %v17892_v9 = vcombine.high %v514_v37, %v526_v29  ;;  %v550_v60 = vld [vmem:[#allocation5 + $0xdf8] sm:$0xff]  ;;  %v557_v53 = vld [vmem:[#allocation5 + $0xe30] sm:$0xff] }
 0x2d3   :  { %v17906_v12 = vcombine.high %v521_v3, %v533_v6  ;;  %v17891_v27 = vcombine.low %v514_v37, %v526_v29  ;;  %v17905_v31 = vcombine.low %v521_v3, %v533_v6  ;;  %v17916_v21 = vcombine.high %v538_v52, %v550_v60  ;;  %v569_v34 = vld [vmem:[#allocation5 + $0xe90] sm:$0xff] }
 0x2d4   :  { %7553 = vmatpush1.bf16.msra.mxu1 %v17771_v33  ;;  %8456 = vmatpush1.bf16.msra.mxu0 %v17785_v17  ;;  %v562_v33 = vld [vmem:[#allocation5 + $0xe58] sm:$0xff]  ;;  %v581_v36 = vld [vmem:[#allocation5 + $0xef0] sm:$0xff]  ;;  %v17915_v40 = vcombine.low %v538_v52, %v550_v60 }
 0x2d5   :  { %7554 = vmatprep.subr.bf16.mxu1 %v17796_v26  ;;  %8457 = vmatprep.subr.bf16.mxu0 %v17810_v46  ;;  %v574_v17 = vld [vmem:[#allocation5 + $0xeb8] sm:$0xff]  ;;  %v17930_v26 = vcombine.high %v545_v18, %v557_v53  ;;  %v17929_v46 = vcombine.low %v545_v18, %v557_v53  ;;  %v17954_v51 = vcombine.high %v569_v34, %v581_v36  ;;  %v605_v5 = vld [vmem:[#allocation5 + $0xfb0] sm:$0xff] }
 0x2d6   :  { %v17940_v20 = vcombine.high %v562_v33, %v574_v17  ;;  %v17939_v32 = vcombine.low %v562_v33, %v574_v17  ;;  %v617_v63 = vld [vmem:[#allocation5 + $0x1010] sm:$0xff] }
 0x2d7   :  { %v629_v23 = vld [vmem:[#allocation5 + $0x1070] sm:$0xff] }
 0x2d8   :  { %7555 = vmatpush1.bf16.msra.mxu1 %v17795_v49  ;;  %8458 = vmatpush1.bf16.msra.mxu0 %v17809_v35  ;;  %v586_v49 = vld [vmem:[#allocation5 + $0xf18] sm:$0xff]  ;;  %v641_v37 = vld [vmem:[#allocation5 + $0x10d0] sm:$0xff] }
 0x2d9   :  { %7556 = vmatprep.subr.bf16.mxu1 %v17820_v47  ;;  %8459 = vmatprep.subr.bf16.mxu0 %v17834_v54  ;;  %v598_v35 = vld [vmem:[#allocation5 + $0xf78] sm:$0xff]  ;;  %v593_v47 = vld [vmem:[#allocation5 + $0xf50] sm:$0xff]  ;;  %v17953_v54 = vcombine.low %v569_v34, %v581_v36 }
 0x2da   :  { %v17964_v55 = vcombine.high %v586_v49, %v598_v35  ;;  %v17963_v0 = vcombine.low %v586_v49, %v598_v35  ;;  %v653_v29 = vld [vmem:[#allocation5 + $0x1130] sm:$0xff] }
 0x2db   :  { %v665_v52 = vld [vmem:[#allocation5 + $0x1190] sm:$0xff]  ;;  %v18025_v18 = vcombine.low %v641_v37, %v653_v29 }
 0x2dc   :  { %7557 = vmatpush1.bf16.msra.mxu1 %v17819_v56  ;;  %8460 = vmatpush1.bf16.msra.mxu0 %v17833_v14  ;;  %v610_v56 = vld [vmem:[#allocation5 + $0xfd8] sm:$0xff]  ;;  %v17978_v14 = vcombine.high %v593_v47, %v605_v5  ;;  %v677_v60 = vld [vmem:[#allocation5 + $0x11f0] sm:$0xff] }
 0x2dd   :  { %7558 = vmatprep.subr.bf16.mxu1 %v17844_v62  ;;  %8461 = vmatprep.subr.bf16.mxu0 %v17858_v28  ;;  %v622_v62 = vld [vmem:[#allocation5 + $0x1038] sm:$0xff]  ;;  %v17977_v28 = vcombine.low %v593_v47, %v605_v5  ;;  %v689_v33 = vld [vmem:[#allocation5 + $0x1250] sm:$0xff]  ;;  %v18049_v34 = vcombine.low %v665_v52, %v677_v60 }
 0x2de   :  { %v17988_v11 = vcombine.high %v610_v56, %v622_v62  ;;  %v17987_v3 = vcombine.low %v610_v56, %v622_v62  ;;  %v701_v17 = vld [vmem:[#allocation5 + $0x12b0] sm:$0xff] }
 0x2df   :  { %v713_v49 = vld [vmem:[#allocation5 + $0x1310] sm:$0xff] }
 0x2e0   :  { %7559 = vmatpush1.bf16.msra.mxu1 %v17843_v41  ;;  %8462 = vmatpush1.bf16.msra.mxu0 %v17857_v1  ;;  %v18002_v41 = vcombine.high %v617_v63, %v629_v23  ;;  %v634_v1 = vld [vmem:[#allocation5 + $0x1098] sm:$0xff]  ;;  %v725_v35 = vld [vmem:[#allocation5 + $0x1370] sm:$0xff] }
 0x2e1   :  { %7571 = vmatprep.subr.bf16.mxu1 %v17868_v7  ;;  %8474 = vmatprep.subr.bf16.mxu0 %v17882_v22  ;;  %v646_v7 = vld [vmem:[#allocation5 + $0x10f8] sm:$0xff]  ;;  %v18001_v22 = vcombine.low %v617_v63, %v629_v23  ;;  %v737_v56 = vld [vmem:[#allocation5 + $0x13d0] sm:$0xff]  ;;  %v18097_v63 = vcombine.low %v713_v49, %v725_v35 }
 0x2e2   :  { %v18012_v6 = vcombine.high %v634_v1, %v646_v7 }
 0x2e3   :  { %7561 = vmatmul.mubr.bf16.vlgmr.msra.gmra.mrb[12].mxu1 %v22162_v15  ;;  %8464 = vmatmul.mubr.bf16.vlgmr.msra.gmra.mrb[12].mxu0 %v22162_v15 }
 0x2e4   :  { %7572 = vmatpush1.bf16.msra.mxu1 %v17867_v57  ;;  %8475 = vmatpush1.bf16.msra.mxu0 %v17881_v8  ;;  %v18026_v57 = vcombine.high %v641_v37, %v653_v29  ;;  %v658_v8 = vld [vmem:[#allocation5 + $0x1158] sm:$0xff] }
 0x2e5   :  { %7573 = vmatprep.subr.bf16.mxu1 %v17892_v9  ;;  %8476 = vmatprep.subr.bf16.mxu0 %v17906_v12  ;;  %v670_v9 = vld [vmem:[#allocation5 + $0x11b8] sm:$0xff]  ;;  %v18011_v12 = vcombine.low %v634_v1, %v646_v7  ;;  %v773_v1 = vld [vmem:[#allocation5 + $0x14f0] sm:$0xff] }
 0x2e6   :  { %7603 = vmatprep.mubr.bf16.mxu1 %v22164_v25  ;;  %8506 = vmatprep.mubr.bf16.mxu0 %v22164_v25  ;;  %v18036_v53 = vcombine.high %v658_v8, %v670_v9 }
 0x2e8   :  { %7574 = vmatpush1.bf16.msra.mxu1 %v17891_v27  ;;  %8477 = vmatpush1.bf16.msra.mxu0 %v17905_v31  ;;  %v18050_v27 = vcombine.high %v665_v52, %v677_v60  ;;  %v682_v31 = vld [vmem:[#allocation5 + $0x1218] sm:$0xff] }
 0x2e9   :  { %7575 = vmatprep.subr.bf16.mxu1 %v17916_v21  ;;  %8478 = vmatprep.subr.bf16.mxu0 %v17930_v26  ;;  %v694_v21 = vld [vmem:[#allocation5 + $0x1278] sm:$0xff]  ;;  %v18035_v26 = vcombine.low %v658_v8, %v670_v9  ;;  %v797_v8 = vld [vmem:[#allocation5 + $0x15b0] sm:$0xff] }
 0x2ea   :  { %v18060_v36 = vcombine.high %v682_v31, %v694_v21  ;;  %v18059_v47 = vcombine.low %v682_v31, %v694_v21  ;;  %v821_v31 = vld [vmem:[#allocation5 + $0x1670] sm:$0xff] }
 0x2ec   :  { %7576 = vmatpush1.bf16.msra.mxu1 %v17915_v40  ;;  %8479 = vmatpush1.bf16.msra.mxu0 %v17929_v46  ;;  %v18074_v40 = vcombine.high %v689_v33, %v701_v17  ;;  %v706_v46 = vld [vmem:[#allocation5 + $0x12d8] sm:$0xff] }
 0x2ed   :  { %7577 = vmatprep.subr.bf16.mxu1 %v17940_v20  ;;  %8480 = vmatprep.subr.bf16.mxu0 %v17954_v51  ;;  %v718_v20 = vld [vmem:[#allocation5 + $0x1338] sm:$0xff]  ;;  %v18073_v51 = vcombine.low %v689_v33, %v701_v17 }
 0x2ee   :  { %v18084_v5 = vcombine.high %v706_v46, %v718_v20  ;;  %v18083_v62 = vcombine.low %v706_v46, %v718_v20  ;;  %v845_v46 = vld [vmem:[#allocation5 + $0x1730] sm:$0xff] }
 0x2f0   :  { %7578 = vmatpush1.bf16.msra.mxu1 %v17939_v32  ;;  %8481 = vmatpush1.bf16.msra.mxu0 %v17953_v54  ;;  %v18098_v32 = vcombine.high %v713_v49, %v725_v35  ;;  %v730_v54 = vld [vmem:[#allocation5 + $0x1398] sm:$0xff] }
 0x2f1   :  { %7579 = vmatprep.subr.bf16.mxu1 %v17964_v55  ;;  %8482 = vmatprep.subr.bf16.mxu0 %v17978_v14  ;;  %v742_v55 = vld [vmem:[#allocation5 + $0x13f8] sm:$0xff]  ;;  %v749_v14 = vld [vmem:[#allocation5 + $0x1430] sm:$0xff] }
 0x2f2   :  { %v18108_v23 = vcombine.high %v730_v54, %v742_v55  ;;  %v18107_v7 = vcombine.low %v730_v54, %v742_v55  ;;  %v18121_v37 = vcombine.low %v737_v56, %v749_v14  ;;  %v869_v54 = vld [vmem:[#allocation5 + $0x17f0] sm:$0xff] }
 0x2f4   :  { %7580 = vmatpush1.bf16.msra.mxu1 %v17963_v0  ;;  %8483 = vmatpush1.bf16.msra.mxu0 %v17977_v28  ;;  %v18122_v0 = vcombine.high %v737_v56, %v749_v14  ;;  %v754_v28 = vld [vmem:[#allocation5 + $0x1458] sm:$0xff] }
 0x2f5   :  { %7581 = vmatprep.subr.bf16.mxu1 %v17988_v11  ;;  %8484 = vmatprep.subr.bf16.mxu0 %v18002_v41  ;;  %v766_v11 = vld [vmem:[#allocation5 + $0x14b8] sm:$0xff]  ;;  %v761_v41 = vld [vmem:[#allocation5 + $0x1490] sm:$0xff] }
 0x2f6   :  { %v18132_v29 = vcombine.high %v754_v28, %v766_v11  ;;  %v18131_v9 = vcombine.low %v754_v28, %v766_v11  ;;  %v18145_v52 = vcombine.low %v761_v41, %v773_v1  ;;  %v893_v28 = vld [vmem:[#allocation5 + $0x18b0] sm:$0xff] }
 0x2f8   :  { %7582 = vmatpush1.bf16.msra.mxu1 %v17987_v3  ;;  %8485 = vmatpush1.bf16.msra.mxu0 %v18001_v22  ;;  %v18146_v3 = vcombine.high %v761_v41, %v773_v1  ;;  %v778_v22 = vld [vmem:[#allocation5 + $0x1518] sm:$0xff] }
 0x2f9   :  { %7583 = vmatprep.subr.bf16.mxu1 %v18012_v6  ;;  %8486 = vmatprep.subr.bf16.mxu0 %v18026_v57  ;;  %v790_v6 = vld [vmem:[#allocation5 + $0x1578] sm:$0xff]  ;;  %v785_v57 = vld [vmem:[#allocation5 + $0x1550] sm:$0xff] }
 0x2fa   :  { %v18156_v60 = vcombine.high %v778_v22, %v790_v6  ;;  %v18155_v21 = vcombine.low %v778_v22, %v790_v6  ;;  %v18169_v33 = vcombine.low %v785_v57, %v797_v8  ;;  %v917_v22 = vld [vmem:[#allocation5 + $0x1970] sm:$0xff] }
 0x2fc   :  { %7584 = vmatpush1.bf16.msra.mxu1 %v18011_v12  ;;  %8487 = vmatpush1.bf16.msra.mxu0 %v18025_v18  ;;  %v18170_v12 = vcombine.high %v785_v57, %v797_v8  ;;  %v802_v18 = vld [vmem:[#allocation5 + $0x15d8] sm:$0xff] }
 0x2fd   :  { %7585 = vmatprep.subr.bf16.mxu1 %v18036_v53  ;;  %8488 = vmatprep.subr.bf16.mxu0 %v18050_v27  ;;  %v814_v53 = vld [vmem:[#allocation5 + $0x1638] sm:$0xff]  ;;  %v809_v27 = vld [vmem:[#allocation5 + $0x1610] sm:$0xff] }
 0x2fe   :  { %v18180_v17 = vcombine.high %v802_v18, %v814_v53  ;;  %v18179_v20 = vcombine.low %v802_v18, %v814_v53  ;;  %v18193_v49 = vcombine.low %v809_v27, %v821_v31  ;;  %v941_v18 = vld [vmem:[#allocation5 + $0x1a30] sm:$0xff] }
 0x300   :  { %7586 = vmatpush1.bf16.msra.mxu1 %v18035_v26  ;;  %8489 = vmatpush1.bf16.msra.mxu0 %v18049_v34  ;;  %v18194_v26 = vcombine.high %v809_v27, %v821_v31  ;;  %v826_v34 = vld [vmem:[#allocation5 + $0x1698] sm:$0xff] }
 0x301   :  { %7587 = vmatprep.subr.bf16.mxu1 %v18060_v36  ;;  %8490 = vmatprep.subr.bf16.mxu0 %v18074_v40  ;;  %v838_v36 = vld [vmem:[#allocation5 + $0x16f8] sm:$0xff]  ;;  %v833_v40 = vld [vmem:[#allocation5 + $0x16d0] sm:$0xff] }
 0x302   :  { %v18204_v35 = vcombine.high %v826_v34, %v838_v36  ;;  %v18203_v55 = vcombine.low %v826_v34, %v838_v36  ;;  %v18217_v56 = vcombine.low %v833_v40, %v845_v46  ;;  %v965_v34 = vld [vmem:[#allocation5 + $0x1af0] sm:$0xff] }
 0x304   :  { %7588 = vmatpush1.bf16.msra.mxu1 %v18059_v47  ;;  %8491 = vmatpush1.bf16.msra.mxu0 %v18073_v51  ;;  %v18218_v47 = vcombine.high %v833_v40, %v845_v46  ;;  %v850_v51 = vld [vmem:[#allocation5 + $0x1758] sm:$0xff] }
 0x305   :  { %7589 = vmatprep.subr.bf16.mxu1 %v18084_v5  ;;  %8492 = vmatprep.subr.bf16.mxu0 %v18098_v32  ;;  %v862_v5 = vld [vmem:[#allocation5 + $0x17b8] sm:$0xff]  ;;  %v857_v32 = vld [vmem:[#allocation5 + $0x1790] sm:$0xff] }
 0x306   :  { %v18228_v14 = vcombine.high %v850_v51, %v862_v5  ;;  %v18227_v11 = vcombine.low %v850_v51, %v862_v5  ;;  %v18241_v41 = vcombine.low %v857_v32, %v869_v54  ;;  %v989_v51 = vld [vmem:[#allocation5 + $0x1bb0] sm:$0xff] }
 0x308   :  { %7590 = vmatpush1.bf16.msra.mxu1 %v18083_v62  ;;  %8493 = vmatpush1.bf16.msra.mxu0 %v18097_v63  ;;  %v18242_v62 = vcombine.high %v857_v32, %v869_v54  ;;  %v874_v63 = vld [vmem:[#allocation5 + $0x1818] sm:$0xff] }
 0x309   :  { %7591 = vmatprep.subr.bf16.mxu1 %v18108_v23  ;;  %8494 = vmatprep.subr.bf16.mxu0 %v18122_v0  ;;  %v886_v23 = vld [vmem:[#allocation5 + $0x1878] sm:$0xff]  ;;  %v881_v0 = vld [vmem:[#allocation5 + $0x1850] sm:$0xff] }
 0x30a   :  { %v18252_v1 = vcombine.high %v874_v63, %v886_v23  ;;  %v18251_v6 = vcombine.low %v874_v63, %v886_v23  ;;  %v18265_v57 = vcombine.low %v881_v0, %v893_v28  ;;  %v1013_v63 = vld [vmem:[#allocation5 + $0x1c70] sm:$0xff] }
 0x30c   :  { %7592 = vmatpush1.bf16.msra.mxu1 %v18107_v7  ;;  %8495 = vmatpush1.bf16.msra.mxu0 %v18121_v37  ;;  %v18266_v7 = vcombine.high %v881_v0, %v893_v28  ;;  %v898_v37 = vld [vmem:[#allocation5 + $0x18d8] sm:$0xff] }
 0x30d   :  { %7593 = vmatprep.subr.bf16.mxu1 %v18132_v29  ;;  %8496 = vmatprep.subr.bf16.mxu0 %v18146_v3  ;;  %v910_v29 = vld [vmem:[#allocation5 + $0x1938] sm:$0xff]  ;;  %v905_v3 = vld [vmem:[#allocation5 + $0x1910] sm:$0xff] }
 0x30e   :  { %v18276_v8 = vcombine.high %v898_v37, %v910_v29  ;;  %v18275_v53 = vcombine.low %v898_v37, %v910_v29  ;;  %v18289_v27 = vcombine.low %v905_v3, %v917_v22  ;;  %v1037_v37 = vld [vmem:[#allocation5 + $0x1d30] sm:$0xff] }
 0x310   :  { %7594 = vmatpush1.bf16.msra.mxu1 %v18131_v9  ;;  %8497 = vmatpush1.bf16.msra.mxu0 %v18145_v52  ;;  %v18290_v9 = vcombine.high %v905_v3, %v917_v22  ;;  %v922_v52 = vld [vmem:[#allocation5 + $0x1998] sm:$0xff] }
 0x311   :  { %7595 = vmatprep.subr.bf16.mxu1 %v18156_v60  ;;  %8498 = vmatprep.subr.bf16.mxu0 %v18170_v12  ;;  %v934_v60 = vld [vmem:[#allocation5 + $0x19f8] sm:$0xff]  ;;  %v929_v12 = vld [vmem:[#allocation5 + $0x19d0] sm:$0xff] }
 0x312   :  { %v18300_v31 = vcombine.high %v922_v52, %v934_v60  ;;  %v18299_v36 = vcombine.low %v922_v52, %v934_v60  ;;  %v18313_v40 = vcombine.low %v929_v12, %v941_v18  ;;  %v1061_v52 = vld [vmem:[#allocation5 + $0x1df0] sm:$0xff] }
 0x314   :  { %7596 = vmatpush1.bf16.msra.mxu1 %v18155_v21  ;;  %8499 = vmatpush1.bf16.msra.mxu0 %v18169_v33  ;;  %v18314_v21 = vcombine.high %v929_v12, %v941_v18  ;;  %v946_v33 = vld [vmem:[#allocation5 + $0x1a58] sm:$0xff] }
 0x315   :  { %7597 = vmatprep.subr.bf16.mxu1 %v18180_v17  ;;  %8500 = vmatprep.subr.bf16.mxu0 %v18194_v26  ;;  %v958_v17 = vld [vmem:[#allocation5 + $0x1ab8] sm:$0xff]  ;;  %v953_v26 = vld [vmem:[#allocation5 + $0x1a90] sm:$0xff] }
 0x316   :  { %v18324_v46 = vcombine.high %v946_v33, %v958_v17  ;;  %v18323_v5 = vcombine.low %v946_v33, %v958_v17  ;;  %v18337_v32 = vcombine.low %v953_v26, %v965_v34  ;;  %v1085_v33 = vld [vmem:[#allocation5 + $0x1eb0] sm:$0xff] }
 0x318   :  { %7598 = vmatpush1.bf16.msra.mxu1 %v18179_v20  ;;  %8501 = vmatpush1.bf16.msra.mxu0 %v18193_v49  ;;  %v18338_v20 = vcombine.high %v953_v26, %v965_v34  ;;  %v970_v49 = vld [vmem:[#allocation5 + $0x1b18] sm:$0xff] }
 0x319   :  { %7599 = vmatprep.subr.bf16.mxu1 %v18204_v35  ;;  %8502 = vmatprep.subr.bf16.mxu0 %v18218_v47  ;;  %v982_v35 = vld [vmem:[#allocation5 + $0x1b78] sm:$0xff]  ;;  %v977_v47 = vld [vmem:[#allocation5 + $0x1b50] sm:$0xff] }
 0x31a   :  { %v18348_v54 = vcombine.high %v970_v49, %v982_v35  ;;  %v18347_v23 = vcombine.low %v970_v49, %v982_v35  ;;  %v18361_v0 = vcombine.low %v977_v47, %v989_v51  ;;  %v1109_v49 = vld [vmem:[#allocation5 + $0x1f70] sm:$0xff] }
 0x31c   :  { %7600 = vmatpush1.bf16.msra.mxu1 %v18203_v55  ;;  %8503 = vmatpush1.bf16.msra.mxu0 %v18217_v56  ;;  %v18362_v55 = vcombine.high %v977_v47, %v989_v51  ;;  %v994_v56 = vld [vmem:[#allocation5 + $0x1bd8] sm:$0xff] }
 0x31d   :  { %7601 = vmatprep.subr.bf16.mxu1 %v18228_v14  ;;  %8504 = vmatprep.subr.bf16.mxu0 %v18242_v62  ;;  %v1006_v14 = vld [vmem:[#allocation5 + $0x1c38] sm:$0xff]  ;;  %v1001_v62 = vld [vmem:[#allocation5 + $0x1c10] sm:$0xff] }
 0x31e   :  { %v18372_v28 = vcombine.high %v994_v56, %v1006_v14  ;;  %v18371_v29 = vcombine.low %v994_v56, %v1006_v14  ;;  %v18385_v3 = vcombine.low %v1001_v62, %v1013_v63  ;;  %v1133_v56 = vld [vmem:[#allocation5 + $0x2030] sm:$0xff] }
 0x320   :  { %7602 = vmatpush1.bf16.msra.mxu1 %v18227_v11  ;;  %8505 = vmatpush1.bf16.msra.mxu0 %v18241_v41  ;;  %v18386_v11 = vcombine.high %v1001_v62, %v1013_v63  ;;  %v1018_v41 = vld [vmem:[#allocation5 + $0x1c98] sm:$0xff] }
 0x321   :  { %7614 = vmatprep.subr.bf16.mxu1 %v18252_v1  ;;  %8517 = vmatprep.subr.bf16.mxu0 %v18266_v7  ;;  %v1030_v1 = vld [vmem:[#allocation5 + $0x1cf8] sm:$0xff]  ;;  %v1025_v7 = vld [vmem:[#allocation5 + $0x1cd0] sm:$0xff] }
 0x322   :  { %v18396_v22 = vcombine.high %v1018_v41, %v1030_v1  ;;  %v18395_v60 = vcombine.low %v1018_v41, %v1030_v1  ;;  %v18409_v12 = vcombine.low %v1025_v7, %v1037_v37  ;;  %v1157_v41 = vld [vmem:[#allocation5 + $0x20f0] sm:$0xff] }
 0x323   :  { %7604 = vmatmul.mubr.bf16.vlgmr.msra.gmra.mrb[12].mxu1 %v22170_v30  ;;  %8507 = vmatmul.mubr.bf16.vlgmr.msra.gmra.mrb[12].mxu0 %v22170_v30 }
 0x324   :  { %7615 = vmatpush1.bf16.msra.mxu1 %v18251_v6  ;;  %8518 = vmatpush1.bf16.msra.mxu0 %v18265_v57  ;;  %v18410_v6 = vcombine.high %v1025_v7, %v1037_v37  ;;  %v1042_v57 = vld [vmem:[#allocation5 + $0x1d58] sm:$0xff] }
 0x325   :  { %7616 = vmatprep.subr.bf16.mxu1 %v18276_v8  ;;  %8519 = vmatprep.subr.bf16.mxu0 %v18290_v9  ;;  %v1054_v8 = vld [vmem:[#allocation5 + $0x1db8] sm:$0xff]  ;;  %v1049_v9 = vld [vmem:[#allocation5 + $0x1d90] sm:$0xff] }
 0x326   :  { %7646 = vmatprep.mubr.bf16.mxu1 %v22172_v39  ;;  %8549 = vmatprep.mubr.bf16.mxu0 %v22172_v39  ;;  %v18420_v18 = vcombine.high %v1042_v57, %v1054_v8  ;;  %v18419_v17 = vcombine.low %v1042_v57, %v1054_v8  ;;  %v18433_v26 = vcombine.low %v1049_v9, %v1061_v52  ;;  %v1181_v57 = vld [vmem:[#allocation5 + $0x21b0] sm:$0xff] }
 0x328   :  { %7617 = vmatpush1.bf16.msra.mxu1 %v18275_v53  ;;  %8520 = vmatpush1.bf16.msra.mxu0 %v18289_v27  ;;  %v18434_v53 = vcombine.high %v1049_v9, %v1061_v52  ;;  %v1066_v27 = vld [vmem:[#allocation5 + $0x1e18] sm:$0xff] }
 0x329   :  { %7618 = vmatprep.subr.bf16.mxu1 %v18300_v31  ;;  %8521 = vmatprep.subr.bf16.mxu0 %v18314_v21  ;;  %v1078_v31 = vld [vmem:[#allocation5 + $0x1e78] sm:$0xff]  ;;  %v1073_v21 = vld [vmem:[#allocation5 + $0x1e50] sm:$0xff] }
 0x32a   :  { %v18444_v34 = vcombine.high %v1066_v27, %v1078_v31  ;;  %v18443_v35 = vcombine.low %v1066_v27, %v1078_v31  ;;  %v18457_v47 = vcombine.low %v1073_v21, %v1085_v33  ;;  %v1205_v27 = vld [vmem:[#allocation5 + $0x2270] sm:$0xff] }
 0x32c   :  { %7619 = vmatpush1.bf16.msra.mxu1 %v18299_v36  ;;  %8522 = vmatpush1.bf16.msra.mxu0 %v18313_v40  ;;  %v18458_v36 = vcombine.high %v1073_v21, %v1085_v33  ;;  %v1090_v40 = vld [vmem:[#allocation5 + $0x1ed8] sm:$0xff] }
 0x32d   :  { %7620 = vmatprep.subr.bf16.mxu1 %v18324_v46  ;;  %8523 = vmatprep.subr.bf16.mxu0 %v18338_v20  ;;  %v1102_v46 = vld [vmem:[#allocation5 + $0x1f38] sm:$0xff]  ;;  %v1097_v20 = vld [vmem:[#allocation5 + $0x1f10] sm:$0xff] }
 0x32e   :  { %v18468_v51 = vcombine.high %v1090_v40, %v1102_v46  ;;  %v18467_v14 = vcombine.low %v1090_v40, %v1102_v46  ;;  %v18481_v62 = vcombine.low %v1097_v20, %v1109_v49  ;;  %v1229_v40 = vld [vmem:[#allocation5 + $0x2330] sm:$0xff] }
 0x330   :  { %7621 = vmatpush1.bf16.msra.mxu1 %v18323_v5  ;;  %8524 = vmatpush1.bf16.msra.mxu0 %v18337_v32  ;;  %v18482_v5 = vcombine.high %v1097_v20, %v1109_v49  ;;  %v1114_v32 = vld [vmem:[#allocation5 + $0x1f98] sm:$0xff] }
 0x331   :  { %7622 = vmatprep.subr.bf16.mxu1 %v18348_v54  ;;  %8525 = vmatprep.subr.bf16.mxu0 %v18362_v55  ;;  %v1126_v54 = vld [vmem:[#allocation5 + $0x1ff8] sm:$0xff]  ;;  %v1121_v55 = vld [vmem:[#allocation5 + $0x1fd0] sm:$0xff] }
 0x332   :  { %v18492_v63 = vcombine.high %v1114_v32, %v1126_v54  ;;  %v18491_v1 = vcombine.low %v1114_v32, %v1126_v54  ;;  %v18505_v7 = vcombine.low %v1121_v55, %v1133_v56  ;;  %v1253_v32 = vld [vmem:[#allocation5 + $0x23f0] sm:$0xff] }
 0x334   :  { %7623 = vmatpush1.bf16.msra.mxu1 %v18347_v23  ;;  %8526 = vmatpush1.bf16.msra.mxu0 %v18361_v0  ;;  %v18506_v23 = vcombine.high %v1121_v55, %v1133_v56  ;;  %v1138_v0 = vld [vmem:[#allocation5 + $0x2058] sm:$0xff] }
 0x335   :  { %7624 = vmatprep.subr.bf16.mxu1 %v18372_v28  ;;  %8527 = vmatprep.subr.bf16.mxu0 %v18386_v11  ;;  %v1150_v28 = vld [vmem:[#allocation5 + $0x20b8] sm:$0xff]  ;;  %v1145_v11 = vld [vmem:[#allocation5 + $0x2090] sm:$0xff] }
 0x336   :  { %v18516_v37 = vcombine.high %v1138_v0, %v1150_v28  ;;  %v18515_v8 = vcombine.low %v1138_v0, %v1150_v28  ;;  %v18529_v9 = vcombine.low %v1145_v11, %v1157_v41 }
 0x338   :  { %7625 = vmatpush1.bf16.msra.mxu1 %v18371_v29  ;;  %8528 = vmatpush1.bf16.msra.mxu0 %v18385_v3  ;;  %v18530_v29 = vcombine.high %v1145_v11, %v1157_v41  ;;  %v1162_v3 = vld [vmem:[#allocation5 + $0x2118] sm:$0xff]  ;;  %v132_v41 = vld [vmem:[#allocation5 + $0xe8] sm:$0xff] }
 0x339   :  { %7626 = vmatprep.subr.bf16.mxu1 %v18396_v22  ;;  %8529 = vmatprep.subr.bf16.mxu0 %v18410_v6  ;;  %v1174_v22 = vld [vmem:[#allocation5 + $0x2178] sm:$0xff]  ;;  %v1169_v6 = vld [vmem:[#allocation5 + $0x2150] sm:$0xff] }
 0x33a   :  { %v18540_v52 = vcombine.high %v1162_v3, %v1174_v22  ;;  %v18539_v31 = vcombine.low %v1162_v3, %v1174_v22  ;;  %v18553_v21 = vcombine.low %v1169_v6, %v1181_v57  ;;  %v20083_v11 = vld [vmem:[#allocation8 + $0x4] ss:$24 sps:$4 sm:$0xff]   ;;  %v20086_v3 = vld [vmem:[#allocation8 + $0x34] ss:$24 sps:$4 sm:$0xff]  }
 0x33b   :  { %v156_v22 = vld [vmem:[#allocation5 + $0x1a8] sm:$0xff] }
 0x33c   :  { %7627 = vmatpush1.bf16.msra.mxu1 %v18395_v60  ;;  %8530 = vmatpush1.bf16.msra.mxu0 %v18409_v12  ;;  %v18554_v60 = vcombine.high %v1169_v6, %v1181_v57  ;;  %v1186_v12 = vld [vmem:[#allocation5 + $0x21d8] sm:$0xff]  ;;  %v168_v6 = vld [vmem:[#allocation5 + $0x208] sm:$0xff] }
 0x33d   :  { %7628 = vmatprep.subr.bf16.mxu1 %v18420_v18  ;;  %8531 = vmatprep.subr.bf16.mxu0 %v18434_v53  ;;  %v1198_v18 = vld [vmem:[#allocation5 + $0x2238] sm:$0xff]  ;;  %v1193_v53 = vld [vmem:[#allocation5 + $0x2210] sm:$0xff] }
 0x33e   :  { %v18564_v33 = vcombine.high %v1186_v12, %v1198_v18  ;;  %v18563_v46 = vcombine.low %v1186_v12, %v1198_v18  ;;  %v18577_v20 = vcombine.low %v1193_v53, %v1205_v27  ;;  %v192_v12 = vld [vmem:[#allocation5 + $0x2c8] sm:$0xff]  ;;  %v17535_v18 = vcombine.low %v156_v22, %v168_v6 }
 0x340   :  { %7629 = vmatpush1.bf16.msra.mxu1 %v18419_v17  ;;  %8532 = vmatpush1.bf16.msra.mxu0 %v18433_v26  ;;  %v18578_v17 = vcombine.high %v1193_v53, %v1205_v27  ;;  %v1210_v26 = vld [vmem:[#allocation5 + $0x2298] sm:$0xff] }
 0x341   :  { %7630 = vmatprep.subr.bf16.mxu1 %v18444_v34  ;;  %8533 = vmatprep.subr.bf16.mxu0 %v18458_v36  ;;  %v1222_v34 = vld [vmem:[#allocation5 + $0x22f8] sm:$0xff]  ;;  %v1217_v36 = vld [vmem:[#allocation5 + $0x22d0] sm:$0xff] }
 0x342   :  { %v18588_v49 = vcombine.high %v1210_v26, %v1222_v34  ;;  %v18587_v54 = vcombine.low %v1210_v26, %v1222_v34  ;;  %v18601_v55 = vcombine.low %v1217_v36, %v1229_v40  ;;  %v20087_v53 = vld [vmem:[#allocation8 + $0x60] ss:$24 sps:$4 sm:$0xff]   ;;  %v20090_v26 = vld [vmem:[#allocation8 + $0x90] ss:$24 sps:$4 sm:$0xff]  }
 0x344   :  { %7631 = vmatpush1.bf16.msra.mxu1 %v18443_v35  ;;  %8534 = vmatpush1.bf16.msra.mxu0 %v18457_v47  ;;  %v18602_v35 = vcombine.high %v1217_v36, %v1229_v40  ;;  %v1234_v47 = vld [vmem:[#allocation5 + $0x2358] sm:$0xff]  ;;  %v228_v40 = vld [vmem:[#allocation5 + $0x3e8] sm:$0xff] }
 0x345   :  { %7632 = vmatprep.subr.bf16.mxu1 %v18468_v51  ;;  %8535 = vmatprep.subr.bf16.mxu0 %v18482_v5  ;;  %v1246_v51 = vld [vmem:[#allocation5 + $0x23b8] sm:$0xff]  ;;  %v1241_v5 = vld [vmem:[#allocation5 + $0x2390] sm:$0xff] }
 0x346   :  { %v18612_v56 = vcombine.high %v1234_v47, %v1246_v51  ;;  %v18625_v0 = vcombine.low %v1241_v5, %v1253_v32  ;;  %v20095_v36 = vld [vmem:[#allocation8 + $0xc4] ss:$24 sps:$4 sm:$0xff]  }
 0x348   :  { %7633 = vmatpush1.bf16.msra.mxu1 %v18467_v14  ;;  %8536 = vmatpush1.bf16.msra.mxu0 %v18481_v62  ;;  %v18626_v14 = vcombine.high %v1241_v5, %v1253_v32  ;;  %v108_v62 = vld [vmem:[#allocation5 + $0x28] sm:$0xff] }
 0x349   :  { %7634 = vmatprep.subr.bf16.mxu1 %v18492_v63  ;;  %8537 = vmatprep.subr.bf16.mxu0 %v18506_v23  ;;  %v120_v63 = vld [vmem:[#allocation5 + $0x88] sm:$0xff]  ;;  %v18611_v23 = vcombine.low %v1234_v47, %v1246_v51  ;;  %v1257_v47 = vld [vmem:[#allocation7 + $0x10] sm:$0xff] }
 0x34a   :  { %v17488_v28 = vcombine.high %v108_v62, %v120_v63  ;;  %v20098_v51 = vld [vmem:[#allocation8 + $0xf4] ss:$24 sps:$4 sm:$0xff]  }
 0x34b   :  { %v252_v5 = vld [vmem:[#allocation5 + $0x4a8] sm:$0xff] }
 0x34c   :  { %7635 = vmatpush1.bf16.msra.mxu1 %v18491_v1  ;;  %8538 = vmatpush1.bf16.msra.mxu0 %v18505_v7  ;;  %v144_v1 = vld [vmem:[#allocation5 + $0x148] sm:$0xff]  ;;  %v17487_v7 = vcombine.low %v108_v62, %v120_v63  ;;  %v1328_v62 = vrot.slane %v1257_v47, %v22199_v59 }
 0x34d   :  { %7636 = vmatprep.subr.bf16.mxu1 %v18516_v37  ;;  %8539 = vmatprep.subr.bf16.mxu0 %v18530_v29  ;;  %v20081_v37 = vld [vmem:[#allocation8] ss:$24 sps:$4 sm:$0xff]   ;;  %v17512_v29 = vcombine.high %v132_v41, %v144_v1  ;;  %v17511_v57 = vcombine.low %v132_v41, %v144_v1  ;;  %v264_v32 = vld [vmem:[#allocation5 + $0x508] sm:$0xff] }
 0x34e   :  { %v20096_v63 = vld [vmem:[#allocation8 + $0xf0] ss:$24 sps:$4 sm:$0xff]  }
 0x34f   :  { %v276_v41 = vld [vmem:[#allocation5 + $0x568] sm:$0xff] }
 0x350   :  { %7637 = vmatpush1.bf16.msra.mxu1 %v18515_v8  ;;  %8540 = vmatpush1.bf16.msra.mxu0 %v18529_v9  ;;  %v20084_v8 = vld [vmem:[#allocation8 + $0x30] ss:$24 sps:$4 sm:$0xff]   ;;  %v17536_v9 = vcombine.high %v156_v22, %v168_v6  ;;  %v17631_v6 = vcombine.low %v252_v5, %v264_v32 }
 0x351   :  { %7638 = vmatprep.subr.bf16.mxu1 %v18540_v52  ;;  %8541 = vmatprep.subr.bf16.mxu0 %v18554_v60  ;;  %v20089_v52 = vld [vmem:[#allocation8 + $0x64] ss:$24 sps:$4 sm:$0xff]   ;;  %v180_v60 = vld [vmem:[#allocation5 + $0x268] sm:$0xff] }
 0x352   :  { %v17560_v27 = vcombine.high %v180_v60, %v192_v12  ;;  %v288_v1 = vld [vmem:[#allocation5 + $0x5c8] sm:$0xff] }
 0x354   :  { %7639 = vmatpush1.bf16.msra.mxu1 %v18539_v31  ;;  %8542 = vmatpush1.bf16.msra.mxu0 %v18553_v21  ;;  %v20092_v31 = vld [vmem:[#allocation8 + $0x94] ss:$24 sps:$4 sm:$0xff]  }
 0x355   :  { %7640 = vmatprep.subr.bf16.mxu1 %v18564_v33  ;;  %8543 = vmatprep.subr.bf16.mxu0 %v18578_v17  ;;  %v204_v21 = vld [vmem:[#allocation5 + $0x328] sm:$0xff]  ;;  %v17559_v17 = vcombine.low %v180_v60, %v192_v12 }
 0x356   :  { %v216_v33 = vld [vmem:[#allocation5 + $0x388] sm:$0xff] }
 0x357   :  { %v17584_v34 = vcombine.high %v204_v21, %v216_v33 }
 0x358   :  { %7641 = vmatpush1.bf16.msra.mxu1 %v18563_v46  ;;  %8544 = vmatpush1.bf16.msra.mxu0 %v18577_v20  ;;  %v240_v46 = vld [vmem:[#allocation5 + $0x448] sm:$0xff]  ;;  %v17583_v20 = vcombine.low %v204_v21, %v216_v33 }
 0x359   :  { %7642 = vmatprep.subr.bf16.mxu1 %v18588_v49  ;;  %8545 = vmatprep.subr.bf16.mxu0 %v18602_v35  ;;  %v20093_v49 = vld [vmem:[#allocation8 + $0xc0] ss:$24 sps:$4 sm:$0xff]   ;;  %v17608_v35 = vcombine.high %v228_v40, %v240_v46 }
 0x35c   :  { %7643 = vmatpush1.bf16.msra.mxu1 %v18587_v54  ;;  %8546 = vmatpush1.bf16.msra.mxu0 %v18601_v55  ;;  %v21907_v54 = vld [vmem:[#allocation7] sm:$0xff] }
 0x35d   :  { %7644 = vmatprep.subr.bf16.mxu1 %v18612_v56  ;;  %8547 = vmatprep.subr.bf16.mxu0 %v18626_v14  ;;  %v1280_v55 = vrot.slane %v21907_v54, %v22287_v43  ;;  %v1284_v56 = vrot.slane %v21907_v54, %v22290_v50  ;;  %v17607_v14 = vcombine.low %v228_v40, %v240_v46  ;;  %v324_v54 = vld [vmem:[#allocation5 + $0x6e8] sm:$0xff] }
 0x360   :  { %7645 = vmatpush1.bf16.msra.mxu1 %v18611_v23  ;;  %8548 = vmatpush1.bf16.msra.mxu0 %v18625_v0  ;;  %v17632_v23 = vcombine.high %v252_v5, %v264_v32  ;;  %v1332_v0 = vrot.slane %v1257_v47, %v22202_v61  ;;  %v20107_v32 = vld [vmem:[#allocation8 + $0x184] ss:$24 sps:$4 sm:$0xff]  }
 0x361   :  { %7786 = vmatprep.subr.bf16.mxu1 %v17488_v28  ;;  %15898 = vmatprep.subr.bf16.mxu0 %v20083_v11  ;;  %v20101_v11 = vld [vmem:[#allocation8 + $0x124] ss:$24 sps:$4 sm:$0xff]  }
 0x363   :  { %7647 = vmatmul.mubr.bf16.vlgmr.msra.gmra.mrb[12].mxu1 %v22178_v44  ;;  %8550 = vmatmul.mubr.bf16.vlgmr.msra.gmra.mrb[12].mxu0 %v22178_v44 }
 0x364   :  { %7787 = vmatpush1.bf16.msra.mxu1 %v17487_v7  ;;  %15899 = vmatpush1.bf16.msra.mxu0 %v20081_v37 }
 0x365   :  { %15930 = vmatprep.mubr.bf16.mxu0 %v22262_v10  ;;  %7788 = vmatprep.subr.bf16.mxu1 %v17512_v29 }
 0x366   :  { %15900 = vmatprep.subr.bf16.mxu0 %v20086_v3  ;;  %7818 = vmatprep.mubr.bf16.mxu1 %v22158_v58 }
 0x368   :  { %7789 = vmatpush1.bf16.msra.mxu1 %v17511_v57  ;;  %15901 = vmatpush1.bf16.msra.mxu0 %v20084_v8  ;;  %v20099_v57 = vld [vmem:[#allocation8 + $0x120] ss:$24 sps:$4 sm:$0xff]  }
 0x369   :  { %7790 = vmatprep.subr.bf16.mxu1 %v17536_v9  ;;  %15902 = vmatprep.subr.bf16.mxu0 %v20089_v52 }
 0x36c   :  { %7791 = vmatpush1.bf16.msra.mxu1 %v17535_v18  ;;  %15903 = vmatpush1.bf16.msra.mxu0 %v20087_v53  ;;  %v17656_v18 = vcombine.high %v276_v41, %v288_v1  ;;  %v300_v53 = vld [vmem:[#allocation5 + $0x628] sm:$0xff] }
 0x36d   :  { %7792 = vmatprep.subr.bf16.mxu1 %v17560_v27  ;;  %15904 = vmatprep.subr.bf16.mxu0 %v20092_v31  ;;  %v312_v27 = vld [vmem:[#allocation5 + $0x688] sm:$0xff] }
 0x370   :  { %7793 = vmatpush1.bf16.msra.mxu1 %v17559_v17  ;;  %15905 = vmatpush1.bf16.msra.mxu0 %v20090_v26  ;;  %v20104_v26 = vld [vmem:[#allocation8 + $0x154] ss:$24 sps:$4 sm:$0xff]  }
 0x371   :  { %7794 = vmatprep.subr.bf16.mxu1 %v17584_v34  ;;  %15906 = vmatprep.subr.bf16.mxu0 %v20095_v36 }
 0x374   :  { %7795 = vmatpush1.bf16.msra.mxu1 %v17583_v20  ;;  %15907 = vmatpush1.bf16.msra.mxu0 %v20093_v49  ;;  %v17655_v20 = vcombine.low %v276_v41, %v288_v1  ;;  %v17680_v49 = vcombine.high %v300_v53, %v312_v27  ;;  %v372_v1 = vld [vmem:[#allocation5 + $0x868] sm:$0xff] }
 0x375   :  { %7796 = vmatprep.subr.bf16.mxu1 %v17608_v35  ;;  %15908 = vmatprep.subr.bf16.mxu0 %v20098_v51  ;;  %v20102_v35 = vld [vmem:[#allocation8 + $0x150] ss:$24 sps:$4 sm:$0xff]  }
 0x376   :  { %v7519_v28 = vpop.f32.mrb[8].mxu1  ;;  %v8293_v29 = vpop.f32.mrb[8].mxu0 }
 0x377   :  { %v22372_v7 = vadd.f32 %v7519_v28, %v1280_v55  ;;  %v7521_v37 = vpop.f32.mrb[9].mxu1  ;;  %v22376_v8 = vadd.f32 %v8293_v29, %v1328_v62  ;;  %v8295_v9 = vpop.f32.mrb[9].mxu0 }
 0x378   :  { %v22374_v3 = vadd.f32 %v7521_v37, %v1284_v56  ;;  %v7523_v22 = vpop.f32.mrb[10].mxu1  ;;  %7797 = vmatpush1.bf16.msra.mxu1 %v17607_v14  ;;  %15909 = vmatpush1.bf16.msra.mxu0 %v20096_v63  ;;  %v22381_v31 = vadd.f32 %v8295_v9, %v1332_v0  ;;  %v8297_v21 = vpop.f32.mrb[10].mxu0  ;;  %v17679_v14 = vcombine.low %v300_v53, %v312_v27  ;;  %v384_v37 = vld [vmem:[#allocation5 + $0x8c8] sm:$0xff] }
 0x379   :  { %v8742_v52 = vmul.f32 0.70710677, %v22372_v7  ;;  %v22379_v60 = vadd.f32 %v7523_v22, %v1280_v55  ;;  %v7525_v12 = vpop.f32.mrb[11].mxu1  ;;  %7798 = vmatprep.subr.bf16.mxu1 %v17632_v23  ;;  %15910 = vmatprep.subr.bf16.mxu0 %v20101_v11  ;;  %v8299_v34 = vpop.f32.mrb[11].mxu0  ;;  %v8754_v40 = vmul.f32 0.70710677, %v22376_v8  ;;  %v19815_v51 = vadd.f32 %v8297_v21, %v1328_v62 }
 0x37a   :  { %v8743_v33 = vmul.f32 0.70710677, %v22374_v3  ;;  %v22384_v17 = vadd.f32 %v7525_v12, %v1284_v56  ;;  %v8755_v47 = vmul.f32 0.70710677, %v22381_v31  ;;  %v22390_v5 = vadd.f32 %v8299_v34, %v1332_v0  ;;  %v336_v55 = vld [vmem:[#allocation5 + $0x748] sm:$0xff] }
 0x37b   :  { %21841 = verf.f32 %v8742_v52  ;;  %v8766_v36 = vmul.f32 0.70710677, %v22379_v60  ;;  %v8778_v56 = vmul.f32 0.70710677, %v19815_v51  ;;  %v20105_v23 = vld [vmem:[#allocation8 + $0x180] ss:$24 sps:$4 sm:$0xff]   ;;  %v17704_v28 = vcombine.high %v324_v54, %v336_v55 }
 0x37c   :  { %21843 = verf.f32 %v8743_v33  ;;  %v8767_v46 = vmul.f32 0.70710677, %v22384_v17  ;;  %7799 = vmatpush1.bf16.msra.mxu1 %v17631_v6  ;;  %15911 = vmatpush1.bf16.msra.mxu0 %v20099_v57  ;;  %v8779_v63 = vmul.f32 0.70710677, %v22390_v5  ;;  %v20110_v62 = vld [vmem:[#allocation8 + $0x1b4] ss:$24 sps:$4 sm:$0xff]   ;;  %v17703_v41 = vcombine.low %v324_v54, %v336_v55 }
 0x37d   :  { %21845 = verf.f32 %v8766_v36  ;;  %7800 = vmatprep.subr.bf16.mxu1 %v17656_v18  ;;  %15912 = vmatprep.subr.bf16.mxu0 %v20104_v26  ;;  %v348_v0 = vld [vmem:[#allocation5 + $0x7a8] sm:$0xff]  ;;  %v20113_v52 = vld [vmem:[#allocation8 + $0x1e4] ss:$24 sps:$4 sm:$0xff]   ;;  %v17752_v27 = vcombine.high %v372_v1, %v384_v37  ;;  %v8693_v33 = vmul.f32 0.5, %v22372_v7  ;;  %v8717_v26 = vmul.f32 0.5, %v22379_v60 }
 0x37e   :  { %21847 = verf.f32 %v8767_v46  ;;  %v360_v11 = vld [vmem:[#allocation5 + $0x808] sm:$0xff]  ;;  %v8705_v36 = vmul.f32 0.5, %v22376_v8  ;;  %v8694_v46 = vmul.f32 0.5, %v22374_v3  ;;  %v8729_v8 = vmul.f32 0.5, %v19815_v51 }
 0x37f   :  { %21849 = verf.f32 %v8754_v40  ;;  %v20108_v22 = vld [vmem:[#allocation8 + $0x1b0] ss:$24 sps:$4 sm:$0xff]   ;;  %v17728_v6 = vcombine.high %v348_v0, %v360_v11  ;;  %v17727_v53 = vcombine.low %v348_v0, %v360_v11  ;;  %v20116_v60 = vld [vmem:[#allocation8 + $0x214] ss:$24 sps:$4 sm:$0xff]  }
 0x380   :  { %7801 = vmatpush1.bf16.msra.mxu1 %v17655_v20  ;;  %21851 = verf.f32 %v8755_v47  ;;  %15913 = vmatpush1.bf16.msra.mxu0 %v20102_v35  ;;  %v8718_v20 = vmul.f32 0.5, %v22384_v17  ;;  %v20111_v35 = vld [vmem:[#allocation8 + $0x1e0] ss:$24 sps:$4 sm:$0xff]   ;;  %v8706_v47 = vmul.f32 0.5, %v22381_v31  ;;  %v396_v55 = vld [vmem:[#allocation5 + $0x928] sm:$0xff]  ;;  %v8730_v17 = vmul.f32 0.5, %v22390_v5 }
 0x381   :  { %7802 = vmatprep.subr.bf16.mxu1 %v17680_v49  ;;  %21853 = verf.f32 %v8778_v56  ;;  %15914 = vmatprep.subr.bf16.mxu0 %v20107_v32  ;;  %v408_v56 = vld [vmem:[#allocation5 + $0x988] sm:$0xff]  ;;  %v17751_v31 = vcombine.low %v372_v1, %v384_v37  ;;  %v20117_v1 = vld [vmem:[#allocation8 + $0x240] ss:$24 sps:$4 sm:$0xff]  }
 0x382   :  { %21855 = verf.f32 %v8779_v63 }
 0x384   :  { %7803 = vmatpush1.bf16.msra.mxu1 %v17679_v14  ;;  %15915 = vmatpush1.bf16.msra.mxu0 %v20105_v23 }
 0x385   :  { %v21842_v29 = vpop.eup %21841  ;;  %7804 = vmatprep.subr.bf16.mxu1 %v17704_v28  ;;  %15916 = vmatprep.subr.bf16.mxu0 %v20110_v62 }
 0x386   :  { %v21844_v57 = vpop.eup %21843  ;;  %v8838_v9 = vadd.f32 1.0, %v21842_v29  ;;  %v20114_v29 = vld [vmem:[#allocation8 + $0x210] ss:$24 sps:$4 sm:$0xff]  }
 0x387   :  { %v21846_v12 = vpop.eup %21845  ;;  %v8839_v18 = vadd.f32 1.0, %v21844_v57 }
 0x388   :  { %v21848_v21 = vpop.eup %21847  ;;  %v8862_v34 = vadd.f32 1.0, %v21846_v12  ;;  %7805 = vmatpush1.bf16.msra.mxu1 %v17703_v41  ;;  %15917 = vmatpush1.bf16.msra.mxu0 %v20108_v22  ;;  %v8886_v54 = vmul.f32 %v8838_v9, %v8693_v33  ;;  %v17776_v22 = vcombine.high %v396_v55, %v408_v56  ;;  %v20119_v9 = vld [vmem:[#allocation8 + $0x244] ss:$24 sps:$4 sm:$0xff]   ;;  %v432_v12 = vld [vmem:[#allocation5 + $0xa48] sm:$0xff] }
 0x389   :  { %v21850_v40 = vpop.eup %21849  ;;  %v8863_v49 = vadd.f32 1.0, %v21848_v21  ;;  %7806 = vmatprep.subr.bf16.mxu1 %v17728_v6  ;;  %15918 = vmatprep.subr.bf16.mxu0 %v20113_v52  ;;  %v8887_v23 = vmul.f32 %v8839_v18, %v8694_v46  ;;  %v420_v52 = vld [vmem:[#allocation5 + $0x9e8] sm:$0xff]  ;;  %v17775_v21 = vcombine.low %v396_v55, %v408_v56 }
 0x38a   :  { %v21852_v32 = vpop.eup %21851  ;;  %v8910_v7 = vmul.f32 %v8862_v34, %v8717_v26  ;;  %v8850_v14 = vadd.f32 1.0, %v21850_v40  ;;  %v17800_v37 = vcombine.high %v420_v52, %v432_v12  ;;  %v20122_v33 = vld [vmem:[#allocation8 + $0x274] ss:$24 sps:$4 sm:$0xff]   ;;  %v20120_v40 = vld [vmem:[#allocation8 + $0x270] ss:$24 sps:$4 sm:$0xff]  }
 0x38b   :  { %v21854_v63 = vpop.eup %21853  ;;  %v8911_v3 = vmul.f32 %v8863_v49, %v8718_v20  ;;  %v8851_v28 = vadd.f32 1.0, %v21852_v32  ;;  %v444_v26 = vld [vmem:[#allocation5 + $0xaa8] sm:$0xff]  ;;  %v20125_v20 = vld [vmem:[#allocation8 + $0x2a4] ss:$24 sps:$4 sm:$0xff]   ;;  %v20123_v32 = vld [vmem:[#allocation8 + $0x2a0] ss:$24 sps:$4 sm:$0xff]  }
 0x38c   :  { %v21856_v62 = vpop.eup %21855  ;;  %v22400_v0 = vpack.c.bf16 %v8910_v7, %v8886_v54  ;;  %7807 = vmatpush1.bf16.msra.mxu1 %v17727_v53  ;;  %v8898_v11 = vmul.f32 %v8850_v14, %v8705_v36  ;;  %v8874_v41 = vadd.f32 1.0, %v21854_v63  ;;  %15919 = vmatpush1.bf16.msra.mxu0 %v20111_v35  ;;  %v456_v34 = vld [vmem:[#allocation5 + $0xb08] sm:$0xff]  ;;  %v17799_v36 = vcombine.low %v420_v52, %v432_v12  ;;  %v20131_v63 = vld [vmem:[#allocation8 + $0x304] ss:$24 sps:$4 sm:$0xff]  }
 0x38d   :  { %7808 = vmatprep.subr.bf16.mxu1 %v17752_v27  ;;  %v8899_v6 = vmul.f32 %v8851_v28, %v8706_v47  ;;  %v8875_v57 = vadd.f32 1.0, %v21856_v62  ;;  %v22402_v51 = vpack.c.bf16 %v8911_v3, %v8887_v23  ;;  %15920 = vmatprep.subr.bf16.mxu0 %v20116_v60  ;;  %v17824_v46 = vcombine.high %v444_v26, %v456_v34  ;;  %v468_v49 = vld [vmem:[#allocation5 + $0xb68] sm:$0xff] }
 0x38e   :  { %v8922_v5 = vmul.f32 %v8874_v41, %v8729_v8  ;;  %v480_v35 = vld [vmem:[#allocation5 + $0xbc8] sm:$0xff]  ;;  %v17823_v47 = vcombine.low %v444_v26, %v456_v34 }
 0x38f   :  { %v8923_v18 = vmul.f32 %v8875_v57, %v8730_v17  ;;  %v17848_v54 = vcombine.high %v468_v49, %v480_v35  ;;  %v20128_v7 = vld [vmem:[#allocation8 + $0x2d4] ss:$24 sps:$4 sm:$0xff]   ;;  %v17847_v56 = vcombine.low %v468_v49, %v480_v35  ;;  %v20126_v14 = vld [vmem:[#allocation8 + $0x2d0] ss:$24 sps:$4 sm:$0xff]   ;;  %v20129_v17 = vld [vmem:[#allocation8 + $0x300] ss:$24 sps:$4 sm:$0xff]  }
 0x390   :  { %7809 = vmatpush1.bf16.msra.mxu1 %v17751_v31  ;;  %v22404_v53 = vpack.c.bf16 %v8922_v5, %v8898_v11  ;;  %15921 = vmatpush1.bf16.msra.mxu0 %v20114_v29  ;;  %v492_v60 = vld [vmem:[#allocation5 + $0xc28] sm:$0xff]  ;;  %v20137_v57 = vld [vmem:[#allocation8 + $0x364] ss:$24 sps:$4 sm:$0xff]   ;;  %v20135_v5 = vld [vmem:[#allocation8 + $0x360] ss:$24 sps:$4 sm:$0xff]  }
 0x391   :  { %7810 = vmatprep.subr.bf16.mxu1 %v17776_v22  ;;  %v22406_v27 = vpack.c.bf16 %v8923_v18, %v8899_v6  ;;  %15922 = vmatprep.subr.bf16.mxu0 %v20119_v9  ;;  %v504_v55 = vld [vmem:[#allocation5 + $0xc88] sm:$0xff]  ;;  %v20141_v49 = vld [vmem:[#allocation8 + $0x3c0] ss:$24 sps:$4 sm:$0xff]  }
 0x392   :  { %v17872_v8 = vcombine.high %v492_v60, %v504_v55  ;;  %v516_v23 = vld [vmem:[#allocation5 + $0xce8] sm:$0xff]  ;;  %v17871_v28 = vcombine.low %v492_v60, %v504_v55 }
 0x393   :  { %v528_v3 = vld [vmem:[#allocation5 + $0xd48] sm:$0xff] }
 0x394   :  { %7811 = vmatpush1.bf16.msra.mxu1 %v17775_v21  ;;  %15923 = vmatpush1.bf16.msra.mxu0 %v20117_v1  ;;  %v17896_v62 = vcombine.high %v516_v23, %v528_v3  ;;  %v20134_v31 = vld [vmem:[#allocation8 + $0x334] ss:$24 sps:$4 sm:$0xff]   ;;  %v17895_v29 = vcombine.low %v516_v23, %v528_v3  ;;  %v20132_v22 = vld [vmem:[#allocation8 + $0x330] ss:$24 sps:$4 sm:$0xff]   ;;  %v20147_v23 = vld [vmem:[#allocation8 + $0x420] ss:$24 sps:$4 sm:$0xff]  }
 0x395   :  { %7812 = vmatprep.subr.bf16.mxu1 %v17800_v37  ;;  %15924 = vmatprep.subr.bf16.mxu0 %v20122_v33  ;;  %v540_v11 = vld [vmem:[#allocation5 + $0xda8] sm:$0xff] }
 0x396   :  { %v552_v41 = vld [vmem:[#allocation5 + $0xe08] sm:$0xff] }
 0x397   :  { %v17920_v6 = vcombine.high %v540_v11, %v552_v41  ;;  %v564_v9 = vld [vmem:[#allocation5 + $0xe68] sm:$0xff]  ;;  %v17919_v12 = vcombine.low %v540_v11, %v552_v41 }
 0x398   :  { %7813 = vmatpush1.bf16.msra.mxu1 %v17799_v36  ;;  %15925 = vmatpush1.bf16.msra.mxu0 %v20120_v40  ;;  %v576_v52 = vld [vmem:[#allocation5 + $0xec8] sm:$0xff]  ;;  %v20143_v36 = vld [vmem:[#allocation8 + $0x3c4] ss:$24 sps:$4 sm:$0xff]  }
 0x399   :  { %7814 = vmatprep.subr.bf16.mxu1 %v17824_v46  ;;  %15926 = vmatprep.subr.bf16.mxu0 %v20125_v20  ;;  %v17944_v18 = vcombine.high %v564_v9, %v576_v52  ;;  %v20140_v21 = vld [vmem:[#allocation8 + $0x394] ss:$24 sps:$4 sm:$0xff]   ;;  %v17943_v33 = vcombine.low %v564_v9, %v576_v52  ;;  %v20138_v26 = vld [vmem:[#allocation8 + $0x390] ss:$24 sps:$4 sm:$0xff]   ;;  %v20153_v9 = vld [vmem:[#allocation8 + $0x480] ss:$24 sps:$4 sm:$0xff]  }
 0x39a   :  { %v588_v1 = vld [vmem:[#allocation5 + $0xf28] sm:$0xff] }
 0x39b   :  { %v600_v37 = vld [vmem:[#allocation5 + $0xf88] sm:$0xff] }
 0x39c   :  { %7815 = vmatpush1.bf16.msra.mxu1 %v17823_v47  ;;  %15927 = vmatpush1.bf16.msra.mxu0 %v20123_v32  ;;  %v17968_v34 = vcombine.high %v588_v1, %v600_v37  ;;  %v612_v40 = vld [vmem:[#allocation5 + $0xfe8] sm:$0xff]  ;;  %v17967_v20 = vcombine.low %v588_v1, %v600_v37 }
 0x39d   :  { %7816 = vmatprep.subr.bf16.mxu1 %v17848_v54  ;;  %15928 = vmatprep.subr.bf16.mxu0 %v20128_v7  ;;  %v624_v46 = vld [vmem:[#allocation5 + $0x1048] sm:$0xff] }
 0x39e   :  { %v17992_v35 = vcombine.high %v612_v40, %v624_v46  ;;  %v20146_v47 = vld [vmem:[#allocation8 + $0x3f4] ss:$24 sps:$4 sm:$0xff]   ;;  %v17991_v7 = vcombine.low %v612_v40, %v624_v46  ;;  %v20144_v60 = vld [vmem:[#allocation8 + $0x3f0] ss:$24 sps:$4 sm:$0xff]   ;;  %v20159_v40 = vld [vmem:[#allocation8 + $0x4e0] ss:$24 sps:$4 sm:$0xff]  }
 0x39f   :  { %v636_v32 = vld [vmem:[#allocation5 + $0x10a8] sm:$0xff] }
 0x3a0   :  { %7817 = vmatpush1.bf16.msra.mxu1 %v17847_v56  ;;  %15929 = vmatpush1.bf16.msra.mxu0 %v20126_v14  ;;  %v648_v54 = vld [vmem:[#allocation5 + $0x1108] sm:$0xff]  ;;  %v20149_v56 = vld [vmem:[#allocation8 + $0x424] ss:$24 sps:$4 sm:$0xff]  }
 0x3a1   :  { %7829 = vmatprep.subr.bf16.mxu1 %v17872_v8  ;;  %15941 = vmatprep.subr.bf16.mxu0 %v20131_v63  ;;  %v18016_v55 = vcombine.high %v636_v32, %v648_v54  ;;  %v660_v14 = vld [vmem:[#allocation5 + $0x1168] sm:$0xff]  ;;  %v18015_v63 = vcombine.low %v636_v32, %v648_v54 }
 0x3a2   :  { %v672_v8 = vld [vmem:[#allocation5 + $0x11c8] sm:$0xff] }
 0x3a3   :  { %7819 = vmatmul.mubr.bf16.vlgmr.msra.gmra.mrb[16].mxu1 %v22162_v15  ;;  %15931 = vmatmul.mubr.bf16.vlgmr.msra.gmra.mrb[16].mxu0 %v22258_v2  ;;  %v18040_v3 = vcombine.high %v660_v14, %v672_v8  ;;  %v20150_v11 = vld [vmem:[#allocation8 + $0x450] ss:$24 sps:$4 sm:$0xff]  }
 0x3a4   :  { %7830 = vmatpush1.bf16.msra.mxu1 %v17871_v28  ;;  %15942 = vmatpush1.bf16.msra.mxu0 %v20129_v17  ;;  %v20152_v28 = vld [vmem:[#allocation8 + $0x454] ss:$24 sps:$4 sm:$0xff]   ;;  %v20156_v1 = vld [vmem:[#allocation8 + $0x4b0] ss:$24 sps:$4 sm:$0xff]  }
 0x3a5   :  { %15973 = vmatprep.mubr.bf16.mxu0 %v22350_v19  ;;  %7831 = vmatprep.subr.bf16.mxu1 %v17896_v62  ;;  %v684_v17 = vld [vmem:[#allocation5 + $0x1228] sm:$0xff] }
 0x3a6   :  { %15943 = vmatprep.subr.bf16.mxu0 %v20134_v31  ;;  %7861 = vmatprep.mubr.bf16.mxu1 %v22164_v25  ;;  %v696_v62 = vld [vmem:[#allocation5 + $0x1288] sm:$0xff]  ;;  %v18039_v31 = vcombine.low %v660_v14, %v672_v8  ;;  %v20165_v14 = vld [vmem:[#allocation8 + $0x540] ss:$24 sps:$4 sm:$0xff]  }
 0x3a7   :  { %v18064_v41 = vcombine.high %v684_v17, %v696_v62  ;;  %v20162_v32 = vld [vmem:[#allocation8 + $0x510] ss:$24 sps:$4 sm:$0xff]  }
 0x3a8   :  { %7832 = vmatpush1.bf16.msra.mxu1 %v17895_v29  ;;  %15944 = vmatpush1.bf16.msra.mxu0 %v20132_v22  ;;  %v20155_v29 = vld [vmem:[#allocation8 + $0x484] ss:$24 sps:$4 sm:$0xff]   ;;  %v708_v22 = vld [vmem:[#allocation5 + $0x12e8] sm:$0xff] }
 0x3a9   :  { %7833 = vmatprep.subr.bf16.mxu1 %v17920_v6  ;;  %15945 = vmatprep.subr.bf16.mxu0 %v20137_v57  ;;  %v720_v6 = vld [vmem:[#allocation5 + $0x1348] sm:$0xff]  ;;  %v18063_v57 = vcombine.low %v684_v17, %v696_v62 }
 0x3aa   :  { %v18088_v52 = vcombine.high %v708_v22, %v720_v6  ;;  %v20168_v17 = vld [vmem:[#allocation8 + $0x570] ss:$24 sps:$4 sm:$0xff]  }
 0x3ac   :  { %7834 = vmatpush1.bf16.msra.mxu1 %v17919_v12  ;;  %15946 = vmatpush1.bf16.msra.mxu0 %v20135_v5  ;;  %v20158_v12 = vld [vmem:[#allocation8 + $0x4b4] ss:$24 sps:$4 sm:$0xff]  }
 0x3ad   :  { %7835 = vmatprep.subr.bf16.mxu1 %v17944_v18  ;;  %15947 = vmatprep.subr.bf16.mxu0 %v20140_v21  ;;  %v732_v5 = vld [vmem:[#allocation5 + $0x13a8] sm:$0xff]  ;;  %v18087_v21 = vcombine.low %v708_v22, %v720_v6  ;;  %v20171_v22 = vld [vmem:[#allocation8 + $0x5a0] ss:$24 sps:$4 sm:$0xff]  }
 0x3ae   :  { %v744_v18 = vld [vmem:[#allocation5 + $0x1408] sm:$0xff] }
 0x3af   :  { %v18112_v37 = vcombine.high %v732_v5, %v744_v18 }
 0x3b0   :  { %7836 = vmatpush1.bf16.msra.mxu1 %v17943_v33  ;;  %15948 = vmatpush1.bf16.msra.mxu0 %v20138_v26  ;;  %v20161_v33 = vld [vmem:[#allocation8 + $0x4e4] ss:$24 sps:$4 sm:$0xff]   ;;  %v756_v26 = vld [vmem:[#allocation5 + $0x1468] sm:$0xff] }
 0x3b1   :  { %7837 = vmatprep.subr.bf16.mxu1 %v17968_v34  ;;  %15949 = vmatprep.subr.bf16.mxu0 %v20143_v36  ;;  %v768_v34 = vld [vmem:[#allocation5 + $0x14c8] sm:$0xff]  ;;  %v18111_v36 = vcombine.low %v732_v5, %v744_v18 }
 0x3b2   :  { %v18136_v46 = vcombine.high %v756_v26, %v768_v34  ;;  %v20174_v5 = vld [vmem:[#allocation8 + $0x5d0] ss:$24 sps:$4 sm:$0xff]  }
 0x3b4   :  { %7838 = vmatpush1.bf16.msra.mxu1 %v17967_v20  ;;  %15950 = vmatpush1.bf16.msra.mxu0 %v20141_v49  ;;  %v20164_v20 = vld [vmem:[#allocation8 + $0x514] ss:$24 sps:$4 sm:$0xff]  }
 0x3b5   :  { %7839 = vmatprep.subr.bf16.mxu1 %v17992_v35  ;;  %15951 = vmatprep.subr.bf16.mxu0 %v20146_v47  ;;  %v780_v49 = vld [vmem:[#allocation5 + $0x1528] sm:$0xff]  ;;  %v18135_v47 = vcombine.low %v756_v26, %v768_v34  ;;  %v20177_v26 = vld [vmem:[#allocation8 + $0x600] ss:$24 sps:$4 sm:$0xff]  }
 0x3b6   :  { %v792_v35 = vld [vmem:[#allocation5 + $0x1588] sm:$0xff] }
 0x3b7   :  { %v18160_v54 = vcombine.high %v780_v49, %v792_v35 }
 0x3b8   :  { %7840 = vmatpush1.bf16.msra.mxu1 %v17991_v7  ;;  %15952 = vmatpush1.bf16.msra.mxu0 %v20144_v60  ;;  %v20167_v7 = vld [vmem:[#allocation8 + $0x544] ss:$24 sps:$4 sm:$0xff]   ;;  %v804_v60 = vld [vmem:[#allocation5 + $0x15e8] sm:$0xff] }
 0x3b9   :  { %7841 = vmatprep.subr.bf16.mxu1 %v18016_v55  ;;  %15953 = vmatprep.subr.bf16.mxu0 %v20149_v56  ;;  %v816_v55 = vld [vmem:[#allocation5 + $0x1648] sm:$0xff]  ;;  %v18159_v56 = vcombine.low %v780_v49, %v792_v35 }
 0x3ba   :  { %v18184_v8 = vcombine.high %v804_v60, %v816_v55  ;;  %v20180_v49 = vld [vmem:[#allocation8 + $0x630] ss:$24 sps:$4 sm:$0xff]  }
 0x3bc   :  { %7842 = vmatpush1.bf16.msra.mxu1 %v18015_v63  ;;  %15954 = vmatpush1.bf16.msra.mxu0 %v20147_v23  ;;  %v20170_v63 = vld [vmem:[#allocation8 + $0x574] ss:$24 sps:$4 sm:$0xff]  }
 0x3bd   :  { %7843 = vmatprep.subr.bf16.mxu1 %v18040_v3  ;;  %15955 = vmatprep.subr.bf16.mxu0 %v20152_v28  ;;  %v828_v23 = vld [vmem:[#allocation5 + $0x16a8] sm:$0xff]  ;;  %v18183_v28 = vcombine.low %v804_v60, %v816_v55  ;;  %v20183_v60 = vld [vmem:[#allocation8 + $0x660] ss:$24 sps:$4 sm:$0xff]  }
 0x3be   :  { %v840_v3 = vld [vmem:[#allocation5 + $0x1708] sm:$0xff] }
 0x3bf   :  { %v18208_v62 = vcombine.high %v828_v23, %v840_v3 }
 0x3c0   :  { %7844 = vmatpush1.bf16.msra.mxu1 %v18039_v31  ;;  %15956 = vmatpush1.bf16.msra.mxu0 %v20150_v11  ;;  %v20173_v31 = vld [vmem:[#allocation8 + $0x5a4] ss:$24 sps:$4 sm:$0xff]   ;;  %v852_v11 = vld [vmem:[#allocation5 + $0x1768] sm:$0xff] }
 0x3c1   :  { %7845 = vmatprep.subr.bf16.mxu1 %v18064_v41  ;;  %15957 = vmatprep.subr.bf16.mxu0 %v20155_v29  ;;  %v864_v41 = vld [vmem:[#allocation5 + $0x17c8] sm:$0xff]  ;;  %v18207_v29 = vcombine.low %v828_v23, %v840_v3 }
 0x3c2   :  { %v18232_v6 = vcombine.high %v852_v11, %v864_v41  ;;  %v20186_v23 = vld [vmem:[#allocation8 + $0x690] ss:$24 sps:$4 sm:$0xff]  }
 0x3c4   :  { %7846 = vmatpush1.bf16.msra.mxu1 %v18063_v57  ;;  %15958 = vmatpush1.bf16.msra.mxu0 %v20153_v9  ;;  %v20176_v57 = vld [vmem:[#allocation8 + $0x5d4] ss:$24 sps:$4 sm:$0xff]  }
 0x3c5   :  { %7847 = vmatprep.subr.bf16.mxu1 %v18088_v52  ;;  %15959 = vmatprep.subr.bf16.mxu0 %v20158_v12  ;;  %v876_v9 = vld [vmem:[#allocation5 + $0x1828] sm:$0xff]  ;;  %v18231_v12 = vcombine.low %v852_v11, %v864_v41  ;;  %v20189_v11 = vld [vmem:[#allocation8 + $0x6c0] ss:$24 sps:$4 sm:$0xff]  }
 0x3c6   :  { %v888_v52 = vld [vmem:[#allocation5 + $0x1888] sm:$0xff] }
 0x3c7   :  { %v18256_v18 = vcombine.high %v876_v9, %v888_v52 }
 0x3c8   :  { %7848 = vmatpush1.bf16.msra.mxu1 %v18087_v21  ;;  %15960 = vmatpush1.bf16.msra.mxu0 %v20156_v1  ;;  %v20179_v21 = vld [vmem:[#allocation8 + $0x604] ss:$24 sps:$4 sm:$0xff]   ;;  %v900_v1 = vld [vmem:[#allocation5 + $0x18e8] sm:$0xff] }
 0x3c9   :  { %7849 = vmatprep.subr.bf16.mxu1 %v18112_v37  ;;  %15961 = vmatprep.subr.bf16.mxu0 %v20161_v33  ;;  %v912_v37 = vld [vmem:[#allocation5 + $0x1948] sm:$0xff]  ;;  %v18255_v33 = vcombine.low %v876_v9, %v888_v52 }
 0x3ca   :  { %v18280_v34 = vcombine.high %v900_v1, %v912_v37  ;;  %v20192_v9 = vld [vmem:[#allocation8 + $0x6f0] ss:$24 sps:$4 sm:$0xff]  }
 0x3cc   :  { %7850 = vmatpush1.bf16.msra.mxu1 %v18111_v36  ;;  %15962 = vmatpush1.bf16.msra.mxu0 %v20159_v40  ;;  %v20182_v36 = vld [vmem:[#allocation8 + $0x634] ss:$24 sps:$4 sm:$0xff]  }
 0x3cd   :  { %7851 = vmatprep.subr.bf16.mxu1 %v18136_v46  ;;  %15963 = vmatprep.subr.bf16.mxu0 %v20164_v20  ;;  %v924_v40 = vld [vmem:[#allocation5 + $0x19a8] sm:$0xff]  ;;  %v18279_v20 = vcombine.low %v900_v1, %v912_v37  ;;  %v20195_v1 = vld [vmem:[#allocation8 + $0x720] ss:$24 sps:$4 sm:$0xff]  }
 0x3ce   :  { %v936_v46 = vld [vmem:[#allocation5 + $0x1a08] sm:$0xff] }
 0x3cf   :  { %v18304_v35 = vcombine.high %v924_v40, %v936_v46 }
 0x3d0   :  { %7852 = vmatpush1.bf16.msra.mxu1 %v18135_v47  ;;  %15964 = vmatpush1.bf16.msra.mxu0 %v20162_v32  ;;  %v20185_v47 = vld [vmem:[#allocation8 + $0x664] ss:$24 sps:$4 sm:$0xff]   ;;  %v948_v32 = vld [vmem:[#allocation5 + $0x1a68] sm:$0xff] }
 0x3d1   :  { %7853 = vmatprep.subr.bf16.mxu1 %v18160_v54  ;;  %15965 = vmatprep.subr.bf16.mxu0 %v20167_v7  ;;  %v960_v54 = vld [vmem:[#allocation5 + $0x1ac8] sm:$0xff]  ;;  %v18303_v7 = vcombine.low %v924_v40, %v936_v46 }
 0x3d2   :  { %v18328_v55 = vcombine.high %v948_v32, %v960_v54  ;;  %v20198_v40 = vld [vmem:[#allocation8 + $0x750] ss:$24 sps:$4 sm:$0xff]  }
 0x3d4   :  { %7854 = vmatpush1.bf16.msra.mxu1 %v18159_v56  ;;  %15966 = vmatpush1.bf16.msra.mxu0 %v20165_v14  ;;  %v20188_v56 = vld [vmem:[#allocation8 + $0x694] ss:$24 sps:$4 sm:$0xff]  }
 0x3d5   :  { %7855 = vmatprep.subr.bf16.mxu1 %v18184_v8  ;;  %15967 = vmatprep.subr.bf16.mxu0 %v20170_v63  ;;  %v972_v14 = vld [vmem:[#allocation5 + $0x1b28] sm:$0xff]  ;;  %v18327_v63 = vcombine.low %v948_v32, %v960_v54  ;;  %v20201_v32 = vld [vmem:[#allocation8 + $0x780] ss:$24 sps:$4 sm:$0xff]  }
 0x3d6   :  { %v984_v8 = vld [vmem:[#allocation5 + $0x1b88] sm:$0xff] }
 0x3d7   :  { %v18352_v3 = vcombine.high %v972_v14, %v984_v8 }
 0x3d8   :  { %7856 = vmatpush1.bf16.msra.mxu1 %v18183_v28  ;;  %15968 = vmatpush1.bf16.msra.mxu0 %v20168_v17  ;;  %v20191_v28 = vld [vmem:[#allocation8 + $0x6c4] ss:$24 sps:$4 sm:$0xff]   ;;  %v996_v17 = vld [vmem:[#allocation5 + $0x1be8] sm:$0xff] }
 0x3d9   :  { %7857 = vmatprep.subr.bf16.mxu1 %v18208_v62  ;;  %15969 = vmatprep.subr.bf16.mxu0 %v20173_v31  ;;  %v1008_v62 = vld [vmem:[#allocation5 + $0x1c48] sm:$0xff]  ;;  %v18351_v31 = vcombine.low %v972_v14, %v984_v8 }
 0x3da   :  { %v18376_v41 = vcombine.high %v996_v17, %v1008_v62  ;;  %v20204_v14 = vld [vmem:[#allocation8 + $0x7b0] ss:$24 sps:$4 sm:$0xff]  }
 0x3dc   :  { %7858 = vmatpush1.bf16.msra.mxu1 %v18207_v29  ;;  %15970 = vmatpush1.bf16.msra.mxu0 %v20171_v22  ;;  %v20194_v29 = vld [vmem:[#allocation8 + $0x6f4] ss:$24 sps:$4 sm:$0xff]  }
 0x3dd   :  { %7859 = vmatprep.subr.bf16.mxu1 %v18232_v6  ;;  %15971 = vmatprep.subr.bf16.mxu0 %v20176_v57  ;;  %v1020_v22 = vld [vmem:[#allocation5 + $0x1ca8] sm:$0xff]  ;;  %v18375_v57 = vcombine.low %v996_v17, %v1008_v62  ;;  %v20207_v17 = vld [vmem:[#allocation8 + $0x7e0] ss:$24 sps:$4 sm:$0xff]  }
 0x3de   :  { %v1032_v6 = vld [vmem:[#allocation5 + $0x1d08] sm:$0xff] }
 0x3df   :  { %v18400_v52 = vcombine.high %v1020_v22, %v1032_v6 }
 0x3e0   :  { %7860 = vmatpush1.bf16.msra.mxu1 %v18231_v12  ;;  %15972 = vmatpush1.bf16.msra.mxu0 %v20174_v5  ;;  %v20197_v12 = vld [vmem:[#allocation8 + $0x724] ss:$24 sps:$4 sm:$0xff]   ;;  %v1044_v5 = vld [vmem:[#allocation5 + $0x1d68] sm:$0xff] }
 0x3e1   :  { %7872 = vmatprep.subr.bf16.mxu1 %v18256_v18  ;;  %15984 = vmatprep.subr.bf16.mxu0 %v20179_v21  ;;  %v1056_v18 = vld [vmem:[#allocation5 + $0x1dc8] sm:$0xff]  ;;  %v18399_v21 = vcombine.low %v1020_v22, %v1032_v6 }
 0x3e2   :  { %v18424_v37 = vcombine.high %v1044_v5, %v1056_v18  ;;  %v20210_v22 = vld [vmem:[#allocation8 + $0x810] ss:$24 sps:$4 sm:$0xff]  }
 0x3e3   :  { %7862 = vmatmul.mubr.bf16.vlgmr.msra.gmra.mrb[16].mxu1 %v22170_v30  ;;  %15974 = vmatmul.mubr.bf16.vlgmr.msra.gmra.mrb[16].mxu0 %v22346_v4 }
 0x3e4   :  { %7873 = vmatpush1.bf16.msra.mxu1 %v18255_v33  ;;  %15985 = vmatpush1.bf16.msra.mxu0 %v20177_v26  ;;  %v20200_v33 = vld [vmem:[#allocation8 + $0x754] ss:$24 sps:$4 sm:$0xff]  }
 0x3e5   :  { %16016 = vmatprep.mubr.bf16.mxu0 %v22402_v51  ;;  %7874 = vmatprep.subr.bf16.mxu1 %v18280_v34  ;;  %v1068_v26 = vld [vmem:[#allocation5 + $0x1e28] sm:$0xff] }
 0x3e6   :  { %15986 = vmatprep.subr.bf16.mxu0 %v20182_v36  ;;  %7904 = vmatprep.mubr.bf16.mxu1 %v22172_v39  ;;  %v1080_v34 = vld [vmem:[#allocation5 + $0x1e88] sm:$0xff]  ;;  %v18423_v36 = vcombine.low %v1044_v5, %v1056_v18  ;;  %v20213_v5 = vld [vmem:[#allocation8 + $0x840] ss:$24 sps:$4 sm:$0xff]  }
 0x3e7   :  { %v18448_v46 = vcombine.high %v1068_v26, %v1080_v34 }
 0x3e8   :  { %7875 = vmatpush1.bf16.msra.mxu1 %v18279_v20  ;;  %15987 = vmatpush1.bf16.msra.mxu0 %v20180_v49  ;;  %v20203_v20 = vld [vmem:[#allocation8 + $0x784] ss:$24 sps:$4 sm:$0xff]   ;;  %v1092_v49 = vld [vmem:[#allocation5 + $0x1ee8] sm:$0xff] }
 0x3e9   :  { %7876 = vmatprep.subr.bf16.mxu1 %v18304_v35  ;;  %15988 = vmatprep.subr.bf16.mxu0 %v20185_v47  ;;  %v1104_v35 = vld [vmem:[#allocation5 + $0x1f48] sm:$0xff]  ;;  %v18447_v47 = vcombine.low %v1068_v26, %v1080_v34 }
 0x3ea   :  { %v18472_v54 = vcombine.high %v1092_v49, %v1104_v35  ;;  %v20216_v26 = vld [vmem:[#allocation8 + $0x870] ss:$24 sps:$4 sm:$0xff]  }
 0x3ec   :  { %7877 = vmatpush1.bf16.msra.mxu1 %v18303_v7  ;;  %15989 = vmatpush1.bf16.msra.mxu0 %v20183_v60  ;;  %v20206_v7 = vld [vmem:[#allocation8 + $0x7b4] ss:$24 sps:$4 sm:$0xff]  }
 0x3ed   :  { %7878 = vmatprep.subr.bf16.mxu1 %v18328_v55  ;;  %15990 = vmatprep.subr.bf16.mxu0 %v20188_v56  ;;  %v1116_v60 = vld [vmem:[#allocation5 + $0x1fa8] sm:$0xff]  ;;  %v18471_v56 = vcombine.low %v1092_v49, %v1104_v35  ;;  %v20219_v49 = vld [vmem:[#allocation8 + $0x8a0] ss:$24 sps:$4 sm:$0xff]  }
 0x3ee   :  { %v1128_v55 = vld [vmem:[#allocation5 + $0x2008] sm:$0xff] }
 0x3ef   :  { %v18496_v8 = vcombine.high %v1116_v60, %v1128_v55 }
 0x3f0   :  { %7879 = vmatpush1.bf16.msra.mxu1 %v18327_v63  ;;  %15991 = vmatpush1.bf16.msra.mxu0 %v20186_v23  ;;  %v20209_v63 = vld [vmem:[#allocation8 + $0x7e4] ss:$24 sps:$4 sm:$0xff]   ;;  %v1140_v23 = vld [vmem:[#allocation5 + $0x2068] sm:$0xff] }
 0x3f1   :  { %7880 = vmatprep.subr.bf16.mxu1 %v18352_v3  ;;  %15992 = vmatprep.subr.bf16.mxu0 %v20191_v28  ;;  %v1152_v3 = vld [vmem:[#allocation5 + $0x20c8] sm:$0xff]  ;;  %v18495_v28 = vcombine.low %v1116_v60, %v1128_v55 }
 0x3f2   :  { %v18520_v62 = vcombine.high %v1140_v23, %v1152_v3  ;;  %v20222_v60 = vld [vmem:[#allocation8 + $0x8d0] ss:$24 sps:$4 sm:$0xff]  }
 0x3f4   :  { %7881 = vmatpush1.bf16.msra.mxu1 %v18351_v31  ;;  %15993 = vmatpush1.bf16.msra.mxu0 %v20189_v11  ;;  %v20212_v31 = vld [vmem:[#allocation8 + $0x814] ss:$24 sps:$4 sm:$0xff]  }
 0x3f5   :  { %7882 = vmatprep.subr.bf16.mxu1 %v18376_v41  ;;  %15994 = vmatprep.subr.bf16.mxu0 %v20194_v29  ;;  %v1164_v11 = vld [vmem:[#allocation5 + $0x2128] sm:$0xff]  ;;  %v18519_v29 = vcombine.low %v1140_v23, %v1152_v3  ;;  %v20225_v23 = vld [vmem:[#allocation8 + $0x900] ss:$24 sps:$4 sm:$0xff]  }
 0x3f6   :  { %v1176_v41 = vld [vmem:[#allocation5 + $0x2188] sm:$0xff] }
 0x3f7   :  { %v18544_v6 = vcombine.high %v1164_v11, %v1176_v41 }
 0x3f8   :  { %7883 = vmatpush1.bf16.msra.mxu1 %v18375_v57  ;;  %15995 = vmatpush1.bf16.msra.mxu0 %v20192_v9  ;;  %v20215_v57 = vld [vmem:[#allocation8 + $0x844] ss:$24 sps:$4 sm:$0xff]   ;;  %v1188_v9 = vld [vmem:[#allocation5 + $0x21e8] sm:$0xff] }
 0x3f9   :  { %7884 = vmatprep.subr.bf16.mxu1 %v18400_v52  ;;  %15996 = vmatprep.subr.bf16.mxu0 %v20197_v12  ;;  %v1200_v52 = vld [vmem:[#allocation5 + $0x2248] sm:$0xff]  ;;  %v18543_v12 = vcombine.low %v1164_v11, %v1176_v41 }
 0x3fa   :  { %v18568_v18 = vcombine.high %v1188_v9, %v1200_v52  ;;  %v20228_v11 = vld [vmem:[#allocation8 + $0x930] ss:$24 sps:$4 sm:$0xff]  }
 0x3fc   :  { %7885 = vmatpush1.bf16.msra.mxu1 %v18399_v21  ;;  %15997 = vmatpush1.bf16.msra.mxu0 %v20195_v1  ;;  %v20218_v21 = vld [vmem:[#allocation8 + $0x874] ss:$24 sps:$4 sm:$0xff]  }
 0x3fd   :  { %7886 = vmatprep.subr.bf16.mxu1 %v18424_v37  ;;  %15998 = vmatprep.subr.bf16.mxu0 %v20200_v33  ;;  %v1212_v1 = vld [vmem:[#allocation5 + $0x22a8] sm:$0xff]  ;;  %v18567_v33 = vcombine.low %v1188_v9, %v1200_v52  ;;  %v20231_v9 = vld [vmem:[#allocation8 + $0x960] ss:$24 sps:$4 sm:$0xff]  }
 0x3fe   :  { %v1224_v37 = vld [vmem:[#allocation5 + $0x2308] sm:$0xff] }
 0x3ff   :  { %v18592_v34 = vcombine.high %v1212_v1, %v1224_v37 }
 0x400   :  { %7887 = vmatpush1.bf16.msra.mxu1 %v18423_v36  ;;  %15999 = vmatpush1.bf16.msra.mxu0 %v20198_v40  ;;  %v20221_v36 = vld [vmem:[#allocation8 + $0x8a4] ss:$24 sps:$4 sm:$0xff]   ;;  %v1236_v40 = vld [vmem:[#allocation5 + $0x2368] sm:$0xff] }
 0x401   :  { %7888 = vmatprep.subr.bf16.mxu1 %v18448_v46  ;;  %16000 = vmatprep.subr.bf16.mxu0 %v20203_v20  ;;  %v1248_v46 = vld [vmem:[#allocation5 + $0x23c8] sm:$0xff]  ;;  %v18591_v20 = vcombine.low %v1212_v1, %v1224_v37 }
 0x402   :  { %v18616_v35 = vcombine.high %v1236_v40, %v1248_v46  ;;  %v20234_v1 = vld [vmem:[#allocation8 + $0x990] ss:$24 sps:$4 sm:$0xff]  }
 0x404   :  { %7889 = vmatpush1.bf16.msra.mxu1 %v18447_v47  ;;  %16001 = vmatpush1.bf16.msra.mxu0 %v20201_v32  ;;  %v20224_v47 = vld [vmem:[#allocation8 + $0x8d4] ss:$24 sps:$4 sm:$0xff]   ;;  %v110_v32 = vld [vmem:[#allocation5 + $0x38] sm:$0xff] }
 0x405   :  { %7890 = vmatprep.subr.bf16.mxu1 %v18472_v54  ;;  %16002 = vmatprep.subr.bf16.mxu0 %v20206_v7  ;;  %v122_v54 = vld [vmem:[#allocation5 + $0x98] sm:$0xff]  ;;  %v18615_v7 = vcombine.low %v1236_v40, %v1248_v46  ;;  %v22423_v46 = vsub.s32 7, %v22196_v48 }
 0x406   :  { %v17492_v55 = vcombine.high %v110_v32, %v122_v54 }
 0x408   :  { %7891 = vmatpush1.bf16.msra.mxu1 %v18471_v56  ;;  %16003 = vmatpush1.bf16.msra.mxu0 %v20204_v14  ;;  %v20227_v56 = vld [vmem:[#allocation8 + $0x904] ss:$24 sps:$4 sm:$0xff]  }
 0x409   :  { %7892 = vmatprep.subr.bf16.mxu1 %v18496_v8  ;;  %16004 = vmatprep.subr.bf16.mxu0 %v20209_v63  ;;  %v134_v14 = vld [vmem:[#allocation5 + $0xf8] sm:$0xff]  ;;  %v17491_v63 = vcombine.low %v110_v32, %v122_v54  ;;  %v21908_v54 = vld [vmem:[#allocation7] sm:$0xff] }
 0x40a   :  { %v146_v8 = vld [vmem:[#allocation5 + $0x158] sm:$0xff] }
 0x40b   :  { %v17516_v3 = vcombine.high %v134_v14, %v146_v8  ;;  %v266_v32 = vld [vmem:[#allocation5 + $0x518] sm:$0xff] }
 0x40c   :  { %7893 = vmatpush1.bf16.msra.mxu1 %v18495_v28  ;;  %16005 = vmatpush1.bf16.msra.mxu0 %v20207_v17  ;;  %v20230_v28 = vld [vmem:[#allocation8 + $0x934] ss:$24 sps:$4 sm:$0xff]   ;;  %v158_v17 = vld [vmem:[#allocation5 + $0x1b8] sm:$0xff] }
 0x40d   :  { %7894 = vmatprep.subr.bf16.mxu1 %v18520_v62  ;;  %16006 = vmatprep.subr.bf16.mxu0 %v20212_v31  ;;  %v170_v62 = vld [vmem:[#allocation5 + $0x218] sm:$0xff]  ;;  %v17515_v31 = vcombine.low %v134_v14, %v146_v8 }
 0x40e   :  { %v17540_v41 = vcombine.high %v158_v17, %v170_v62 }
 0x410   :  { %7895 = vmatpush1.bf16.msra.mxu1 %v18519_v29  ;;  %16007 = vmatpush1.bf16.msra.mxu0 %v20210_v22  ;;  %v20233_v29 = vld [vmem:[#allocation8 + $0x964] ss:$24 sps:$4 sm:$0xff]  }
 0x411   :  { %7896 = vmatprep.subr.bf16.mxu1 %v18544_v6  ;;  %16008 = vmatprep.subr.bf16.mxu0 %v20215_v57  ;;  %v182_v22 = vld [vmem:[#allocation5 + $0x278] sm:$0xff]  ;;  %v17539_v57 = vcombine.low %v158_v17, %v170_v62 }
 0x412   :  { %v194_v6 = vld [vmem:[#allocation5 + $0x2d8] sm:$0xff] }
 0x413   :  { %v17564_v52 = vcombine.high %v182_v22, %v194_v6  ;;  %v290_v17 = vld [vmem:[#allocation5 + $0x5d8] sm:$0xff] }
 0x414   :  { %7897 = vmatpush1.bf16.msra.mxu1 %v18543_v12  ;;  %16009 = vmatpush1.bf16.msra.mxu0 %v20213_v5  ;;  %v20236_v12 = vld [vmem:[#allocation8 + $0x994] ss:$24 sps:$4 sm:$0xff]   ;;  %v206_v5 = vld [vmem:[#allocation5 + $0x338] sm:$0xff] }
 0x415   :  { %7898 = vmatprep.subr.bf16.mxu1 %v18568_v18  ;;  %16010 = vmatprep.subr.bf16.mxu0 %v20218_v21  ;;  %v218_v18 = vld [vmem:[#allocation5 + $0x398] sm:$0xff]  ;;  %v17563_v21 = vcombine.low %v182_v22, %v194_v6 }
 0x416   :  { %v17588_v37 = vcombine.high %v206_v5, %v218_v18  ;;  %v17587_v40 = vcombine.low %v206_v5, %v218_v18  ;;  %v20243_v6 = vld [vmem:[#allocation8 + $0xa20] ss:$24 sps:$4 sm:$0xff]  }
 0x418   :  { %7899 = vmatpush1.bf16.msra.mxu1 %v18567_v33  ;;  %16011 = vmatpush1.bf16.msra.mxu0 %v20216_v26  ;;  %v20239_v33 = vld [vmem:[#allocation8 + $0x9c4] ss:$24 sps:$4 sm:$0xff]  }
 0x419   :  { %7900 = vmatprep.subr.bf16.mxu1 %v18592_v34  ;;  %16012 = vmatprep.subr.bf16.mxu0 %v20221_v36  ;;  %v230_v26 = vld [vmem:[#allocation5 + $0x3f8] sm:$0xff]  ;;  %v22420_v36 = vsub.s32 6, %v22196_v48  ;;  %v20240_v48 = vld [vmem:[#allocation8 + $0x9f0] ss:$24 sps:$4 sm:$0xff]  }
 0x41a   :  { %v242_v34 = vld [vmem:[#allocation5 + $0x458] sm:$0xff] }
 0x41c   :  { %7901 = vmatpush1.bf16.msra.mxu1 %v18591_v20  ;;  %16013 = vmatpush1.bf16.msra.mxu0 %v20219_v49  ;;  %v20237_v20 = vld [vmem:[#allocation8 + $0x9c0] ss:$24 sps:$4 sm:$0xff]   ;;  %v17612_v49 = vcombine.high %v230_v26, %v242_v34 }
 0x41d   :  { %7902 = vmatprep.subr.bf16.mxu1 %v18616_v35  ;;  %16014 = vmatprep.subr.bf16.mxu0 %v20224_v47  ;;  %v20242_v35 = vld [vmem:[#allocation8 + $0x9f4] ss:$24 sps:$4 sm:$0xff]   ;;  %v254_v47 = vld [vmem:[#allocation5 + $0x4b8] sm:$0xff] }
 0x41e   :  { %v17636_v8 = vcombine.high %v254_v47, %v266_v32  ;;  %v17635_v22 = vcombine.low %v254_v47, %v266_v32 }
 0x420   :  { %7903 = vmatpush1.bf16.msra.mxu1 %v18615_v7  ;;  %16015 = vmatpush1.bf16.msra.mxu0 %v20222_v60  ;;  %v1288_v7 = vrot.slane %v21908_v54, %v22420_v36  ;;  %v1292_v60 = vrot.slane %v21908_v54, %v22423_v46 }
 0x421   :  { %8044 = vmatprep.subr.bf16.mxu1 %v17492_v55  ;;  %16027 = vmatprep.subr.bf16.mxu0 %v20227_v56  ;;  %v17611_v55 = vcombine.low %v230_v26, %v242_v34  ;;  %v21909_v56 = vld [vmem:[#allocation7 + $0x10] sm:$0xff] }
 0x422   :  { %v1344_v14 = vrot.slane %v21909_v56, %v22287_v43 }
 0x423   :  { %7905 = vmatmul.mubr.bf16.vlgmr.msra.gmra.mrb[16].mxu1 %v22178_v44  ;;  %16017 = vmatmul.mubr.bf16.vlgmr.msra.gmra.mrb[16].mxu0 %v22400_v0 }
 0x424   :  { %8045 = vmatpush1.bf16.msra.mxu1 %v17491_v63  ;;  %16028 = vmatpush1.bf16.msra.mxu0 %v20225_v23  ;;  %v1348_v63 = vrot.slane %v21909_v56, %v22290_v50 }
 0x425   :  { %8046 = vmatprep.subr.bf16.mxu1 %v17516_v3  ;;  %16029 = vmatprep.subr.bf16.mxu0 %v20230_v28  ;;  %v20245_v3 = vld [vmem:[#allocation8 + $0xa24] ss:$24 sps:$4 sm:$0xff]  }
 0x426   :  { %8076 = vmatprep.mubr.bf16.mxu1 %v22158_v58  ;;  %v278_v28 = vld [vmem:[#allocation5 + $0x578] sm:$0xff] }
 0x427   :  { %v17660_v18 = vcombine.high %v278_v28, %v290_v17  ;;  %v17659_v32 = vcombine.low %v278_v28, %v290_v17  ;;  %v20249_v17 = vld [vmem:[#allocation8 + $0xa80] ss:$24 sps:$4 sm:$0xff]  }
 0x428   :  { %8047 = vmatpush1.bf16.msra.mxu1 %v17515_v31  ;;  %16030 = vmatpush1.bf16.msra.mxu0 %v20228_v11 }
 0x429   :  { %8048 = vmatprep.subr.bf16.mxu1 %v17540_v41  ;;  %16031 = vmatprep.subr.bf16.mxu0 %v20233_v29 }
 0x42c   :  { %8049 = vmatpush1.bf16.msra.mxu1 %v17539_v57  ;;  %16032 = vmatpush1.bf16.msra.mxu0 %v20231_v9 }
 0x42d   :  { %8050 = vmatprep.subr.bf16.mxu1 %v17564_v52  ;;  %16033 = vmatprep.subr.bf16.mxu0 %v20236_v12 }
 0x430   :  { %8051 = vmatpush1.bf16.msra.mxu1 %v17563_v21  ;;  %16034 = vmatpush1.bf16.msra.mxu0 %v20234_v1  ;;  %v302_v21 = vld [vmem:[#allocation5 + $0x638] sm:$0xff] }
 0x431   :  { %8052 = vmatprep.subr.bf16.mxu1 %v17588_v37  ;;  %16035 = vmatprep.subr.bf16.mxu0 %v20239_v33  ;;  %v314_v1 = vld [vmem:[#allocation5 + $0x698] sm:$0xff] }
 0x432   :  { %v17684_v54 = vcombine.high %v302_v21, %v314_v1 }
 0x434   :  { %8053 = vmatpush1.bf16.msra.mxu1 %v17587_v40  ;;  %16036 = vmatpush1.bf16.msra.mxu0 %v20237_v20  ;;  %v20248_v40 = vld [vmem:[#allocation8 + $0xa54] ss:$24 sps:$4 sm:$0xff]  }
 0x435   :  { %8054 = vmatprep.subr.bf16.mxu1 %v17612_v49  ;;  %16037 = vmatprep.subr.bf16.mxu0 %v20242_v35 }
 0x436   :  { %v7648_v23 = vpop.f32.mrb[12].mxu1  ;;  %v8551_v11 = vpop.f32.mrb[12].mxu0 }
 0x437   :  { %v22429_v62 = vadd.f32 %v7648_v23, %v1288_v7  ;;  %v7650_v31 = vpop.f32.mrb[13].mxu1  ;;  %v22433_v57 = vadd.f32 %v8551_v11, %v1344_v14  ;;  %v8553_v9 = vpop.f32.mrb[13].mxu0  ;;  %v338_v23 = vld [vmem:[#allocation5 + $0x758] sm:$0xff] }
 0x438   :  { %v22431_v41 = vadd.f32 %v7650_v31, %v1292_v60  ;;  %v7652_v29 = vpop.f32.mrb[14].mxu1  ;;  %8055 = vmatpush1.bf16.msra.mxu1 %v17611_v55  ;;  %16038 = vmatpush1.bf16.msra.mxu0 %v20240_v48  ;;  %v22438_v37 = vadd.f32 %v8553_v9, %v1348_v63  ;;  %v8555_v33 = vpop.f32.mrb[14].mxu0  ;;  %v20251_v48 = vld [vmem:[#allocation8 + $0xa84] ss:$24 sps:$4 sm:$0xff]   ;;  %v17683_v31 = vcombine.low %v302_v21, %v314_v1 }
 0x439   :  { %v8744_v52 = vmul.f32 0.70710677, %v22429_v62  ;;  %v22436_v12 = vadd.f32 %v7652_v29, %v1288_v7  ;;  %v7654_v5 = vpop.f32.mrb[15].mxu1  ;;  %8056 = vmatprep.subr.bf16.mxu1 %v17636_v8  ;;  %16039 = vmatprep.subr.bf16.mxu0 %v20245_v3  ;;  %v8557_v20 = vpop.f32.mrb[15].mxu0  ;;  %v8758_v35 = vmul.f32 0.70710677, %v22433_v57  ;;  %v19823_v55 = vadd.f32 %v8555_v33, %v1344_v14 }
 0x43a   :  { %v8745_v26 = vmul.f32 0.70710677, %v22431_v41  ;;  %v22441_v34 = vadd.f32 %v7654_v5, %v1292_v60  ;;  %v20246_v7 = vld [vmem:[#allocation8 + $0xa50] ss:$24 sps:$4 sm:$0xff]   ;;  %v8759_v60 = vmul.f32 0.70710677, %v22438_v37  ;;  %v22447_v56 = vadd.f32 %v8557_v20, %v1348_v63 }
 0x43b   :  { %21857 = verf.f32 %v8744_v52  ;;  %v8768_v49 = vmul.f32 0.70710677, %v22436_v12  ;;  %v326_v8 = vld [vmem:[#allocation5 + $0x6f8] sm:$0xff]  ;;  %v8782_v3 = vmul.f32 0.70710677, %v19823_v55 }
 0x43c   :  { %21859 = verf.f32 %v8745_v26  ;;  %v8769_v47 = vmul.f32 0.70710677, %v22441_v34  ;;  %8057 = vmatpush1.bf16.msra.mxu1 %v17635_v22  ;;  %16040 = vmatpush1.bf16.msra.mxu0 %v20243_v6  ;;  %v8783_v28 = vmul.f32 0.70710677, %v22447_v56  ;;  %v17708_v11 = vcombine.high %v326_v8, %v338_v23  ;;  %v20254_v14 = vld [vmem:[#allocation8 + $0xab4] ss:$24 sps:$4 sm:$0xff]  }
 0x43d   :  { %21861 = verf.f32 %v8768_v49  ;;  %8058 = vmatprep.subr.bf16.mxu1 %v17660_v18  ;;  %16041 = vmatprep.subr.bf16.mxu0 %v20248_v40  ;;  %v350_v63 = vld [vmem:[#allocation5 + $0x7b8] sm:$0xff]  ;;  %v17707_v22 = vcombine.low %v326_v8, %v338_v23  ;;  %v20252_v5 = vld [vmem:[#allocation8 + $0xab0] ss:$24 sps:$4 sm:$0xff]   ;;  %v8720_v8 = vmul.f32 0.5, %v22441_v34  ;;  %v8734_v34 = vmul.f32 0.5, %v22447_v56 }
 0x43e   :  { %21863 = verf.f32 %v8769_v47  ;;  %v362_v29 = vld [vmem:[#allocation5 + $0x818] sm:$0xff]  ;;  %v8695_v47 = vmul.f32 0.5, %v22429_v62 }
 0x43f   :  { %21865 = verf.f32 %v8758_v35  ;;  %v22450_v6 = vld [vmem:[#allocation5 + $0x878] sm:$0xff]  ;;  %v17732_v18 = vcombine.high %v350_v63, %v362_v29  ;;  %v17731_v20 = vcombine.low %v350_v63, %v362_v29 }
 0x440   :  { %8059 = vmatpush1.bf16.msra.mxu1 %v17659_v32  ;;  %21867 = verf.f32 %v8759_v60  ;;  %16042 = vmatpush1.bf16.msra.mxu0 %v20246_v7  ;;  %v386_v9 = vld [vmem:[#allocation5 + $0x8d8] sm:$0xff]  ;;  %v8719_v32 = vmul.f32 0.5, %v22436_v12  ;;  %v8709_v7 = vmul.f32 0.5, %v22433_v57  ;;  %v20260_v12 = vld [vmem:[#allocation8 + $0xb14] ss:$24 sps:$4 sm:$0xff]   ;;  %v8733_v57 = vmul.f32 0.5, %v19823_v55 }
 0x441   :  { %8060 = vmatprep.subr.bf16.mxu1 %v17684_v54  ;;  %21869 = verf.f32 %v8782_v3  ;;  %16043 = vmatprep.subr.bf16.mxu0 %v20251_v48  ;;  %v20257_v33 = vld [vmem:[#allocation8 + $0xae4] ss:$24 sps:$4 sm:$0xff]   ;;  %v17756_v49 = vcombine.high %v22450_v6, %v386_v9  ;;  %v8696_v48 = vmul.f32 0.5, %v22431_v41  ;;  %v20255_v3 = vld [vmem:[#allocation8 + $0xae0] ss:$24 sps:$4 sm:$0xff]  }
 0x442   :  { %21871 = verf.f32 %v8783_v28  ;;  %v434_v56 = vld [vmem:[#allocation5 + $0xa58] sm:$0xff] }
 0x444   :  { %8061 = vmatpush1.bf16.msra.mxu1 %v17683_v31  ;;  %16044 = vmatpush1.bf16.msra.mxu0 %v20249_v17  ;;  %v8710_v31 = vmul.f32 0.5, %v22438_v37  ;;  %v17755_v37 = vcombine.low %v22450_v6, %v386_v9 }
 0x445   :  { %v21858_v52 = vpop.eup %21857  ;;  %8062 = vmatprep.subr.bf16.mxu1 %v17708_v11  ;;  %16045 = vmatprep.subr.bf16.mxu0 %v20254_v14  ;;  %v398_v11 = vld [vmem:[#allocation5 + $0x938] sm:$0xff] }
 0x446   :  { %v21860_v21 = vpop.eup %21859  ;;  %v8840_v1 = vadd.f32 1.0, %v21858_v52  ;;  %v410_v14 = vld [vmem:[#allocation5 + $0x998] sm:$0xff] }
 0x447   :  { %v21862_v26 = vpop.eup %21861  ;;  %v8841_v40 = vadd.f32 1.0, %v21860_v21  ;;  %v17780_v55 = vcombine.high %v398_v11, %v410_v14  ;;  %v17779_v6 = vcombine.low %v398_v11, %v410_v14  ;;  %v20267_v14 = vld [vmem:[#allocation8 + $0xba0] ss:$24 sps:$4 sm:$0xff]  }
 0x448   :  { %v21864_v35 = vpop.eup %21863  ;;  %v8864_v54 = vadd.f32 1.0, %v21862_v26  ;;  %8063 = vmatpush1.bf16.msra.mxu1 %v17707_v22  ;;  %16046 = vmatpush1.bf16.msra.mxu0 %v20252_v5  ;;  %v8888_v17 = vmul.f32 %v8840_v1, %v8695_v47  ;;  %v20263_v47 = vld [vmem:[#allocation8 + $0xb44] ss:$24 sps:$4 sm:$0xff]  }
 0x449   :  { %v21866_v60 = vpop.eup %21865  ;;  %v8865_v23 = vadd.f32 1.0, %v21864_v35  ;;  %8064 = vmatprep.subr.bf16.mxu1 %v17732_v18  ;;  %16047 = vmatprep.subr.bf16.mxu0 %v20257_v33  ;;  %v8889_v22 = vmul.f32 %v8841_v40, %v8696_v48  ;;  %v20258_v33 = vld [vmem:[#allocation8 + $0xb10] ss:$24 sps:$4 sm:$0xff]   ;;  %v20266_v48 = vld [vmem:[#allocation8 + $0xb74] ss:$24 sps:$4 sm:$0xff]  }
 0x44a   :  { %v21868_v28 = vpop.eup %21867  ;;  %v8912_v62 = vmul.f32 %v8864_v54, %v8719_v32  ;;  %v8854_v63 = vadd.f32 1.0, %v21866_v60  ;;  %v422_v32 = vld [vmem:[#allocation5 + $0x9f8] sm:$0xff] }
 0x44b   :  { %v21870_v29 = vpop.eup %21869  ;;  %v8913_v41 = vmul.f32 %v8865_v23, %v8720_v8  ;;  %v8855_v52 = vadd.f32 1.0, %v21868_v28  ;;  %v446_v8 = vld [vmem:[#allocation5 + $0xab8] sm:$0xff] }
 0x44c   :  { %v21872_v5 = vpop.eup %21871  ;;  %v22460_v18 = vpack.c.bf16 %v8912_v62, %v8888_v17  ;;  %8065 = vmatpush1.bf16.msra.mxu1 %v17731_v20  ;;  %v8902_v21 = vmul.f32 %v8854_v63, %v8709_v7  ;;  %v8878_v1 = vadd.f32 1.0, %v21870_v29  ;;  %16048 = vmatpush1.bf16.msra.mxu0 %v20255_v3  ;;  %v17804_v7 = vcombine.high %v422_v32, %v434_v56  ;;  %v458_v23 = vld [vmem:[#allocation5 + $0xb18] sm:$0xff] }
 0x44d   :  { %8066 = vmatprep.subr.bf16.mxu1 %v17756_v49  ;;  %v22463_v26 = vpack.c.bf16 %v8913_v41, %v8889_v22  ;;  %v8903_v35 = vmul.f32 %v8855_v52, %v8710_v31  ;;  %v8879_v40 = vadd.f32 1.0, %v21872_v5  ;;  %16049 = vmatprep.subr.bf16.mxu0 %v20260_v12  ;;  %v20261_v49 = vld [vmem:[#allocation8 + $0xb40] ss:$24 sps:$4 sm:$0xff]   ;;  %v17803_v3 = vcombine.low %v422_v32, %v434_v56  ;;  %v20264_v31 = vld [vmem:[#allocation8 + $0xb70] ss:$24 sps:$4 sm:$0xff]  }
 0x44e   :  { %v8926_v54 = vmul.f32 %v8878_v1, %v8733_v57  ;;  %v17828_v28 = vcombine.high %v446_v8, %v458_v23  ;;  %v20269_v17 = vld [vmem:[#allocation8 + $0xba4] ss:$24 sps:$4 sm:$0xff]   ;;  %v17827_v11 = vcombine.low %v446_v8, %v458_v23  ;;  %v20272_v57 = vld [vmem:[#allocation8 + $0xbd4] ss:$24 sps:$4 sm:$0xff]   ;;  %v20270_v52 = vld [vmem:[#allocation8 + $0xbd0] ss:$24 sps:$4 sm:$0xff]  }
 0x44f   :  { %16059 = vmatprep.mubr.bf16.mxu0 %v22463_v26  ;;  %v8927_v20 = vmul.f32 %v8879_v40, %v8734_v34  ;;  %v470_v62 = vld [vmem:[#allocation5 + $0xb78] sm:$0xff]  ;;  %v20276_v56 = vld [vmem:[#allocation8 + $0xc30] ss:$24 sps:$4 sm:$0xff]   ;;  %v20284_v23 = vld [vmem:[#allocation8 + $0xc94] ss:$24 sps:$4 sm:$0xff]  }
 0x450   :  { %8067 = vmatpush1.bf16.msra.mxu1 %v17755_v37  ;;  %v22466_v9 = vpack.c.bf16 %v8926_v54, %v8902_v21  ;;  %16050 = vmatpush1.bf16.msra.mxu0 %v20258_v33  ;;  %v482_v12 = vld [vmem:[#allocation5 + $0xbd8] sm:$0xff] }
 0x451   :  { %8068 = vmatprep.subr.bf16.mxu1 %v17780_v55  ;;  %v22468_v60 = vpack.c.bf16 %v8927_v20, %v8903_v35  ;;  %16051 = vmatprep.subr.bf16.mxu0 %v20263_v47  ;;  %v17852_v63 = vcombine.high %v470_v62, %v482_v12  ;;  %v494_v29 = vld [vmem:[#allocation5 + $0xc38] sm:$0xff]  ;;  %v17851_v41 = vcombine.low %v470_v62, %v482_v12  ;;  %v20278_v35 = vld [vmem:[#allocation8 + $0xc34] ss:$24 sps:$4 sm:$0xff]  }
 0x452   :  { %v506_v22 = vld [vmem:[#allocation5 + $0xc98] sm:$0xff] }
 0x453   :  { %v17876_v34 = vcombine.high %v494_v29, %v506_v22  ;;  %v20275_v5 = vld [vmem:[#allocation8 + $0xc04] ss:$24 sps:$4 sm:$0xff]   ;;  %v17875_v1 = vcombine.low %v494_v29, %v506_v22  ;;  %v20273_v33 = vld [vmem:[#allocation8 + $0xc00] ss:$24 sps:$4 sm:$0xff]   ;;  %v20290_v22 = vld [vmem:[#allocation8 + $0xcf4] ss:$24 sps:$4 sm:$0xff]  }
 0x454   :  { %8069 = vmatpush1.bf16.msra.mxu1 %v17779_v6  ;;  %16052 = vmatpush1.bf16.msra.mxu0 %v20261_v49  ;;  %v518_v37 = vld [vmem:[#allocation5 + $0xcf8] sm:$0xff] }
 0x455   :  { %8070 = vmatprep.subr.bf16.mxu1 %v17804_v7  ;;  %16053 = vmatprep.subr.bf16.mxu0 %v20266_v48  ;;  %v530_v21 = vld [vmem:[#allocation5 + $0xd58] sm:$0xff] }
 0x456   :  { %v17900_v55 = vcombine.high %v518_v37, %v530_v21  ;;  %v542_v40 = vld [vmem:[#allocation5 + $0xdb8] sm:$0xff]  ;;  %v17899_v32 = vcombine.low %v518_v37, %v530_v21 }
 0x457   :  { %v554_v47 = vld [vmem:[#allocation5 + $0xe18] sm:$0xff] }
 0x458   :  { %8071 = vmatpush1.bf16.msra.mxu1 %v17803_v3  ;;  %16054 = vmatpush1.bf16.msra.mxu0 %v20264_v31  ;;  %v17924_v54 = vcombine.high %v542_v40, %v554_v47  ;;  %v20281_v20 = vld [vmem:[#allocation8 + $0xc64] ss:$24 sps:$4 sm:$0xff]   ;;  %v17923_v7 = vcombine.low %v542_v40, %v554_v47  ;;  %v20279_v48 = vld [vmem:[#allocation8 + $0xc60] ss:$24 sps:$4 sm:$0xff]   ;;  %v20296_v47 = vld [vmem:[#allocation8 + $0xd54] ss:$24 sps:$4 sm:$0xff]  }
 0x459   :  { %8072 = vmatprep.subr.bf16.mxu1 %v17828_v28  ;;  %16055 = vmatprep.subr.bf16.mxu0 %v20269_v17  ;;  %v566_v6 = vld [vmem:[#allocation5 + $0xe78] sm:$0xff]  ;;  %v20282_v17 = vld [vmem:[#allocation8 + $0xc90] ss:$24 sps:$4 sm:$0xff]  }
 0x45a   :  { %v578_v49 = vld [vmem:[#allocation5 + $0xed8] sm:$0xff] }
 0x45b   :  { %v17948_v8 = vcombine.high %v566_v6, %v578_v49  ;;  %v590_v3 = vld [vmem:[#allocation5 + $0xf38] sm:$0xff]  ;;  %v17947_v28 = vcombine.low %v566_v6, %v578_v49 }
 0x45c   :  { %8073 = vmatpush1.bf16.msra.mxu1 %v17827_v11  ;;  %16056 = vmatpush1.bf16.msra.mxu0 %v20267_v14  ;;  %v602_v31 = vld [vmem:[#allocation5 + $0xf98] sm:$0xff] }
 0x45d   :  { %8074 = vmatprep.subr.bf16.mxu1 %v17852_v63  ;;  %16057 = vmatprep.subr.bf16.mxu0 %v20272_v57  ;;  %v17972_v62 = vcombine.high %v590_v3, %v602_v31  ;;  %v20287_v12 = vld [vmem:[#allocation8 + $0xcc4] ss:$24 sps:$4 sm:$0xff]   ;;  %v17971_v63 = vcombine.low %v590_v3, %v602_v31  ;;  %v20285_v57 = vld [vmem:[#allocation8 + $0xcc0] ss:$24 sps:$4 sm:$0xff]   ;;  %v20302_v31 = vld [vmem:[#allocation8 + $0xdb4] ss:$24 sps:$4 sm:$0xff]  }
 0x45e   :  { %v614_v11 = vld [vmem:[#allocation5 + $0xff8] sm:$0xff] }
 0x45f   :  { %v626_v14 = vld [vmem:[#allocation5 + $0x1058] sm:$0xff] }
 0x460   :  { %8075 = vmatpush1.bf16.msra.mxu1 %v17851_v41  ;;  %16058 = vmatpush1.bf16.msra.mxu0 %v20270_v52  ;;  %v17996_v29 = vcombine.high %v614_v11, %v626_v14  ;;  %v638_v41 = vld [vmem:[#allocation5 + $0x10b8] sm:$0xff] }
 0x461   :  { %8087 = vmatprep.subr.bf16.mxu1 %v17876_v34  ;;  %16070 = vmatprep.subr.bf16.mxu0 %v20275_v5  ;;  %v650_v52 = vld [vmem:[#allocation5 + $0x1118] sm:$0xff]  ;;  %v17995_v34 = vcombine.low %v614_v11, %v626_v14  ;;  %v20288_v5 = vld [vmem:[#allocation8 + $0xcf0] ss:$24 sps:$4 sm:$0xff]  }
 0x462   :  { %v18020_v37 = vcombine.high %v638_v41, %v650_v52  ;;  %v20293_v21 = vld [vmem:[#allocation8 + $0xd24] ss:$24 sps:$4 sm:$0xff]  }
 0x463   :  { %8077 = vmatmul.mubr.bf16.vlgmr.msra.gmra.mrb[20].mxu1 %v22162_v15  ;;  %16060 = vmatmul.mubr.bf16.vlgmr.msra.gmra.mrb[16].mxu0 %v22460_v18  ;;  %v20299_v49 = vld [vmem:[#allocation8 + $0xd84] ss:$24 sps:$4 sm:$0xff]  }
 0x464   :  { %8088 = vmatpush1.bf16.msra.mxu1 %v17875_v1  ;;  %16071 = vmatpush1.bf16.msra.mxu0 %v20273_v33  ;;  %v662_v1 = vld [vmem:[#allocation5 + $0x1178] sm:$0xff] }
 0x465   :  { %16102 = vmatprep.mubr.bf16.mxu0 %v22266_v24  ;;  %8089 = vmatprep.subr.bf16.mxu1 %v17900_v55  ;;  %v674_v33 = vld [vmem:[#allocation5 + $0x11d8] sm:$0xff]  ;;  %v18019_v55 = vcombine.low %v638_v41, %v650_v52  ;;  %v20308_v52 = vld [vmem:[#allocation8 + $0xe14] ss:$24 sps:$4 sm:$0xff]  }
 0x466   :  { %16072 = vmatprep.subr.bf16.mxu0 %v20278_v35  ;;  %8119 = vmatprep.mubr.bf16.mxu1 %v22164_v25  ;;  %v20291_v35 = vld [vmem:[#allocation8 + $0xd20] ss:$24 sps:$4 sm:$0xff]   ;;  %v18044_v40 = vcombine.high %v662_v1, %v674_v33  ;;  %v20305_v14 = vld [vmem:[#allocation8 + $0xde4] ss:$24 sps:$4 sm:$0xff]  }
 0x468   :  { %8090 = vmatpush1.bf16.msra.mxu1 %v17899_v32  ;;  %16073 = vmatpush1.bf16.msra.mxu0 %v20276_v56  ;;  %v686_v32 = vld [vmem:[#allocation5 + $0x1238] sm:$0xff] }
 0x469   :  { %8091 = vmatprep.subr.bf16.mxu1 %v17924_v54  ;;  %16074 = vmatprep.subr.bf16.mxu0 %v20281_v20  ;;  %v698_v56 = vld [vmem:[#allocation5 + $0x1298] sm:$0xff]  ;;  %v18043_v54 = vcombine.low %v662_v1, %v674_v33  ;;  %v20294_v20 = vld [vmem:[#allocation8 + $0xd50] ss:$24 sps:$4 sm:$0xff]  }
 0x46a   :  { %v18068_v6 = vcombine.high %v686_v32, %v698_v56  ;;  %v20311_v33 = vld [vmem:[#allocation8 + $0xe44] ss:$24 sps:$4 sm:$0xff]  }
 0x46c   :  { %8092 = vmatpush1.bf16.msra.mxu1 %v17923_v7  ;;  %16075 = vmatpush1.bf16.msra.mxu0 %v20279_v48  ;;  %v710_v7 = vld [vmem:[#allocation5 + $0x12f8] sm:$0xff] }
 0x46d   :  { %8093 = vmatprep.subr.bf16.mxu1 %v17948_v8  ;;  %16076 = vmatprep.subr.bf16.mxu0 %v20284_v23  ;;  %v722_v48 = vld [vmem:[#allocation5 + $0x1358] sm:$0xff]  ;;  %v18067_v8 = vcombine.low %v686_v32, %v698_v56  ;;  %v20314_v56 = vld [vmem:[#allocation8 + $0xe74] ss:$24 sps:$4 sm:$0xff]  }
 0x46e   :  { %v20297_v23 = vld [vmem:[#allocation8 + $0xd80] ss:$24 sps:$4 sm:$0xff]   ;;  %v18092_v3 = vcombine.high %v710_v7, %v722_v48 }
 0x470   :  { %8094 = vmatpush1.bf16.msra.mxu1 %v17947_v28  ;;  %16077 = vmatpush1.bf16.msra.mxu0 %v20282_v17  ;;  %v734_v28 = vld [vmem:[#allocation5 + $0x13b8] sm:$0xff] }
 0x471   :  { %8095 = vmatprep.subr.bf16.mxu1 %v17972_v62  ;;  %16078 = vmatprep.subr.bf16.mxu0 %v20287_v12  ;;  %v746_v17 = vld [vmem:[#allocation5 + $0x1418] sm:$0xff]  ;;  %v18091_v62 = vcombine.low %v710_v7, %v722_v48  ;;  %v20300_v12 = vld [vmem:[#allocation8 + $0xdb0] ss:$24 sps:$4 sm:$0xff]  }
 0x472   :  { %v18116_v11 = vcombine.high %v734_v28, %v746_v17  ;;  %v20317_v48 = vld [vmem:[#allocation8 + $0xea4] ss:$24 sps:$4 sm:$0xff]  }
 0x474   :  { %8096 = vmatpush1.bf16.msra.mxu1 %v17971_v63  ;;  %16079 = vmatpush1.bf16.msra.mxu0 %v20285_v57  ;;  %v758_v63 = vld [vmem:[#allocation5 + $0x1478] sm:$0xff] }
 0x475   :  { %8097 = vmatprep.subr.bf16.mxu1 %v17996_v29  ;;  %16080 = vmatprep.subr.bf16.mxu0 %v20290_v22  ;;  %v770_v57 = vld [vmem:[#allocation5 + $0x14d8] sm:$0xff]  ;;  %v18115_v29 = vcombine.low %v734_v28, %v746_v17  ;;  %v20320_v17 = vld [vmem:[#allocation8 + $0xed4] ss:$24 sps:$4 sm:$0xff]  }
 0x476   :  { %v20303_v22 = vld [vmem:[#allocation8 + $0xde0] ss:$24 sps:$4 sm:$0xff]   ;;  %v18140_v41 = vcombine.high %v758_v63, %v770_v57 }
 0x478   :  { %8098 = vmatpush1.bf16.msra.mxu1 %v17995_v34  ;;  %16081 = vmatpush1.bf16.msra.mxu0 %v20288_v5  ;;  %v782_v34 = vld [vmem:[#allocation5 + $0x1538] sm:$0xff] }
 0x479   :  { %8099 = vmatprep.subr.bf16.mxu1 %v18020_v37  ;;  %16082 = vmatprep.subr.bf16.mxu0 %v20293_v21  ;;  %v794_v5 = vld [vmem:[#allocation5 + $0x1598] sm:$0xff]  ;;  %v18139_v37 = vcombine.low %v758_v63, %v770_v57  ;;  %v20306_v21 = vld [vmem:[#allocation8 + $0xe10] ss:$24 sps:$4 sm:$0xff]  }
 0x47a   :  { %v18164_v1 = vcombine.high %v782_v34, %v794_v5  ;;  %v902_v57 = vld [vmem:[#allocation5 + $0x18f8] sm:$0xff] }
 0x47c   :  { %8100 = vmatpush1.bf16.msra.mxu1 %v18019_v55  ;;  %16083 = vmatpush1.bf16.msra.mxu0 %v20291_v35  ;;  %v806_v55 = vld [vmem:[#allocation5 + $0x15f8] sm:$0xff] }
 0x47d   :  { %8101 = vmatprep.subr.bf16.mxu1 %v18044_v40  ;;  %16084 = vmatprep.subr.bf16.mxu0 %v20296_v47  ;;  %v818_v35 = vld [vmem:[#allocation5 + $0x1658] sm:$0xff]  ;;  %v18163_v40 = vcombine.low %v782_v34, %v794_v5 }
 0x47e   :  { %v20309_v47 = vld [vmem:[#allocation8 + $0xe40] ss:$24 sps:$4 sm:$0xff]   ;;  %v18188_v32 = vcombine.high %v806_v55, %v818_v35 }
 0x47f   :  { %v20321_v34 = vld [vmem:[#allocation8 + $0xf00] ss:$24 sps:$4 sm:$0xff]  }
 0x480   :  { %8102 = vmatpush1.bf16.msra.mxu1 %v18043_v54  ;;  %16085 = vmatpush1.bf16.msra.mxu0 %v20294_v20  ;;  %v830_v54 = vld [vmem:[#allocation5 + $0x16b8] sm:$0xff] }
 0x481   :  { %8103 = vmatprep.subr.bf16.mxu1 %v18068_v6  ;;  %16086 = vmatprep.subr.bf16.mxu0 %v20299_v49  ;;  %v842_v20 = vld [vmem:[#allocation5 + $0x1718] sm:$0xff]  ;;  %v18187_v6 = vcombine.low %v806_v55, %v818_v35  ;;  %v20312_v49 = vld [vmem:[#allocation8 + $0xe70] ss:$24 sps:$4 sm:$0xff]  }
 0x482   :  { %v18212_v7 = vcombine.high %v830_v54, %v842_v20  ;;  %v926_v5 = vld [vmem:[#allocation5 + $0x19b8] sm:$0xff]  ;;  %v20324_v55 = vld [vmem:[#allocation8 + $0xf30] ss:$24 sps:$4 sm:$0xff]  }
 0x483   :  { %v950_v35 = vld [vmem:[#allocation5 + $0x1a78] sm:$0xff] }
 0x484   :  { %8104 = vmatpush1.bf16.msra.mxu1 %v18067_v8  ;;  %16087 = vmatpush1.bf16.msra.mxu0 %v20297_v23  ;;  %v854_v8 = vld [vmem:[#allocation5 + $0x1778] sm:$0xff] }
 0x485   :  { %8105 = vmatprep.subr.bf16.mxu1 %v18092_v3  ;;  %16088 = vmatprep.subr.bf16.mxu0 %v20302_v31  ;;  %v866_v23 = vld [vmem:[#allocation5 + $0x17d8] sm:$0xff]  ;;  %v18211_v3 = vcombine.low %v830_v54, %v842_v20 }
 0x486   :  { %v20315_v31 = vld [vmem:[#allocation8 + $0xea0] ss:$24 sps:$4 sm:$0xff]   ;;  %v18236_v28 = vcombine.high %v854_v8, %v866_v23 }
 0x487   :  { %v20327_v54 = vld [vmem:[#allocation8 + $0xf60] ss:$24 sps:$4 sm:$0xff]  }
 0x488   :  { %8106 = vmatpush1.bf16.msra.mxu1 %v18091_v62  ;;  %16089 = vmatpush1.bf16.msra.mxu0 %v20300_v12  ;;  %v878_v62 = vld [vmem:[#allocation5 + $0x1838] sm:$0xff] }
 0x489   :  { %8107 = vmatprep.subr.bf16.mxu1 %v18116_v11  ;;  %16090 = vmatprep.subr.bf16.mxu0 %v20305_v14  ;;  %v890_v12 = vld [vmem:[#allocation5 + $0x1898] sm:$0xff]  ;;  %v18235_v11 = vcombine.low %v854_v8, %v866_v23  ;;  %v20318_v14 = vld [vmem:[#allocation8 + $0xed0] ss:$24 sps:$4 sm:$0xff]  }
 0x48a   :  { %v18260_v63 = vcombine.high %v878_v62, %v890_v12  ;;  %v974_v20 = vld [vmem:[#allocation5 + $0x1b38] sm:$0xff]  ;;  %v20330_v8 = vld [vmem:[#allocation8 + $0xf90] ss:$24 sps:$4 sm:$0xff]  }
 0x48b   :  { %v998_v23 = vld [vmem:[#allocation5 + $0x1bf8] sm:$0xff] }
 0x48c   :  { %8108 = vmatpush1.bf16.msra.mxu1 %v18115_v29  ;;  %16091 = vmatpush1.bf16.msra.mxu0 %v20303_v22  ;;  %v914_v29 = vld [vmem:[#allocation5 + $0x1958] sm:$0xff] }
 0x48d   :  { %8109 = vmatprep.subr.bf16.mxu1 %v18140_v41  ;;  %16092 = vmatprep.subr.bf16.mxu0 %v20308_v52  ;;  %v20323_v22 = vld [vmem:[#allocation8 + $0xf04] ss:$24 sps:$4 sm:$0xff]   ;;  %v18259_v41 = vcombine.low %v878_v62, %v890_v12  ;;  %v18284_v52 = vcombine.high %v902_v57, %v914_v29  ;;  %v20333_v62 = vld [vmem:[#allocation8 + $0xfc0] ss:$24 sps:$4 sm:$0xff]  }
 0x48e   :  { %v1022_v12 = vld [vmem:[#allocation5 + $0x1cb8] sm:$0xff] }
 0x490   :  { %8110 = vmatpush1.bf16.msra.mxu1 %v18139_v37  ;;  %16093 = vmatpush1.bf16.msra.mxu0 %v20306_v21  ;;  %v938_v37 = vld [vmem:[#allocation5 + $0x1a18] sm:$0xff]  ;;  %v20326_v21 = vld [vmem:[#allocation8 + $0xf34] ss:$24 sps:$4 sm:$0xff]  }
 0x491   :  { %8111 = vmatprep.subr.bf16.mxu1 %v18164_v1  ;;  %16094 = vmatprep.subr.bf16.mxu0 %v20311_v33  ;;  %v18283_v1 = vcombine.low %v902_v57, %v914_v29  ;;  %v18308_v33 = vcombine.high %v926_v5, %v938_v37  ;;  %v20336_v29 = vld [vmem:[#allocation8 + $0xff0] ss:$24 sps:$4 sm:$0xff]  }
 0x494   :  { %8112 = vmatpush1.bf16.msra.mxu1 %v18163_v40  ;;  %16095 = vmatpush1.bf16.msra.mxu0 %v20309_v47  ;;  %v962_v40 = vld [vmem:[#allocation5 + $0x1ad8] sm:$0xff] }
 0x495   :  { %8113 = vmatprep.subr.bf16.mxu1 %v18188_v32  ;;  %16096 = vmatprep.subr.bf16.mxu0 %v20314_v56  ;;  %v20329_v47 = vld [vmem:[#allocation8 + $0xf64] ss:$24 sps:$4 sm:$0xff]   ;;  %v18307_v32 = vcombine.low %v926_v5, %v938_v37  ;;  %v18332_v56 = vcombine.high %v950_v35, %v962_v40  ;;  %v20339_v37 = vld [vmem:[#allocation8 + $0x1020] ss:$24 sps:$4 sm:$0xff]  }
 0x498   :  { %8114 = vmatpush1.bf16.msra.mxu1 %v18187_v6  ;;  %16097 = vmatpush1.bf16.msra.mxu0 %v20312_v49  ;;  %v986_v6 = vld [vmem:[#allocation5 + $0x1b98] sm:$0xff]  ;;  %v20332_v49 = vld [vmem:[#allocation8 + $0xf94] ss:$24 sps:$4 sm:$0xff]  }
 0x499   :  { %8115 = vmatprep.subr.bf16.mxu1 %v18212_v7  ;;  %16098 = vmatprep.subr.bf16.mxu0 %v20317_v48  ;;  %v18331_v7 = vcombine.low %v950_v35, %v962_v40  ;;  %v18356_v48 = vcombine.high %v974_v20, %v986_v6  ;;  %v20342_v40 = vld [vmem:[#allocation8 + $0x1050] ss:$24 sps:$4 sm:$0xff]  }
 0x49c   :  { %8116 = vmatpush1.bf16.msra.mxu1 %v18211_v3  ;;  %16099 = vmatpush1.bf16.msra.mxu0 %v20315_v31  ;;  %v1010_v3 = vld [vmem:[#allocation5 + $0x1c58] sm:$0xff] }
 0x49d   :  { %8117 = vmatprep.subr.bf16.mxu1 %v18236_v28  ;;  %16100 = vmatprep.subr.bf16.mxu0 %v20320_v17  ;;  %v20335_v31 = vld [vmem:[#allocation8 + $0xfc4] ss:$24 sps:$4 sm:$0xff]   ;;  %v18355_v28 = vcombine.low %v974_v20, %v986_v6  ;;  %v18380_v17 = vcombine.high %v998_v23, %v1010_v3  ;;  %v20345_v6 = vld [vmem:[#allocation8 + $0x1080] ss:$24 sps:$4 sm:$0xff]  }
 0x4a0   :  { %8118 = vmatpush1.bf16.msra.mxu1 %v18235_v11  ;;  %16101 = vmatpush1.bf16.msra.mxu0 %v20318_v14  ;;  %v1034_v11 = vld [vmem:[#allocation5 + $0x1d18] sm:$0xff]  ;;  %v20338_v14 = vld [vmem:[#allocation8 + $0xff4] ss:$24 sps:$4 sm:$0xff]  }
 0x4a1   :  { %8130 = vmatprep.subr.bf16.mxu1 %v18260_v63  ;;  %16113 = vmatprep.subr.bf16.mxu0 %v20323_v22  ;;  %v18379_v63 = vcombine.low %v998_v23, %v1010_v3  ;;  %v18404_v57 = vcombine.high %v1022_v12, %v1034_v11  ;;  %v1046_v22 = vld [vmem:[#allocation5 + $0x1d78] sm:$0xff]  ;;  %v20348_v3 = vld [vmem:[#allocation8 + $0x10b0] ss:$24 sps:$4 sm:$0xff]  }
 0x4a3   :  { %8120 = vmatmul.mubr.bf16.vlgmr.msra.gmra.mrb[20].mxu1 %v22170_v30  ;;  %16103 = vmatmul.mubr.bf16.vlgmr.msra.gmra.mrb[16].mxu0 %v22264_v16 }
 0x4a4   :  { %8131 = vmatpush1.bf16.msra.mxu1 %v18259_v41  ;;  %16114 = vmatpush1.bf16.msra.mxu0 %v20321_v34  ;;  %v1058_v41 = vld [vmem:[#allocation5 + $0x1dd8] sm:$0xff]  ;;  %v18403_v34 = vcombine.low %v1022_v12, %v1034_v11 }
 0x4a5   :  { %8132 = vmatprep.subr.bf16.mxu1 %v18284_v52  ;;  %16115 = vmatprep.subr.bf16.mxu0 %v20326_v21  ;;  %v20341_v52 = vld [vmem:[#allocation8 + $0x1024] ss:$24 sps:$4 sm:$0xff]   ;;  %v18428_v5 = vcombine.high %v1046_v22, %v1058_v41  ;;  %v20351_v11 = vld [vmem:[#allocation8 + $0x10e0] ss:$24 sps:$4 sm:$0xff]  }
 0x4a6   :  { %8162 = vmatprep.mubr.bf16.mxu1 %v22172_v39  ;;  %v1070_v21 = vld [vmem:[#allocation5 + $0x1e38] sm:$0xff] }
 0x4a8   :  { %8133 = vmatpush1.bf16.msra.mxu1 %v18283_v1  ;;  %16116 = vmatpush1.bf16.msra.mxu0 %v20324_v55  ;;  %v1082_v1 = vld [vmem:[#allocation5 + $0x1e98] sm:$0xff]  ;;  %v18427_v55 = vcombine.low %v1046_v22, %v1058_v41  ;;  %v20354_v41 = vld [vmem:[#allocation8 + $0x1110] ss:$24 sps:$4 sm:$0xff]  }
 0x4a9   :  { %8134 = vmatprep.subr.bf16.mxu1 %v18308_v33  ;;  %16117 = vmatprep.subr.bf16.mxu0 %v20329_v47  ;;  %v20344_v33 = vld [vmem:[#allocation8 + $0x1054] ss:$24 sps:$4 sm:$0xff]   ;;  %v18452_v35 = vcombine.high %v1070_v21, %v1082_v1  ;;  %v1094_v47 = vld [vmem:[#allocation5 + $0x1ef8] sm:$0xff] }
 0x4ac   :  { %8135 = vmatpush1.bf16.msra.mxu1 %v18307_v32  ;;  %16118 = vmatpush1.bf16.msra.mxu0 %v20327_v54  ;;  %v1106_v32 = vld [vmem:[#allocation5 + $0x1f58] sm:$0xff]  ;;  %v18451_v54 = vcombine.low %v1070_v21, %v1082_v1 }
 0x4ad   :  { %8136 = vmatprep.subr.bf16.mxu1 %v18332_v56  ;;  %16119 = vmatprep.subr.bf16.mxu0 %v20332_v49  ;;  %v20347_v56 = vld [vmem:[#allocation8 + $0x1084] ss:$24 sps:$4 sm:$0xff]   ;;  %v18476_v20 = vcombine.high %v1094_v47, %v1106_v32  ;;  %v20357_v1 = vld [vmem:[#allocation8 + $0x1140] ss:$24 sps:$4 sm:$0xff]  }
 0x4ae   :  { %v1118_v49 = vld [vmem:[#allocation5 + $0x1fb8] sm:$0xff] }
 0x4b0   :  { %8137 = vmatpush1.bf16.msra.mxu1 %v18331_v7  ;;  %16120 = vmatpush1.bf16.msra.mxu0 %v20330_v8  ;;  %v1130_v7 = vld [vmem:[#allocation5 + $0x2018] sm:$0xff]  ;;  %v18475_v8 = vcombine.low %v1094_v47, %v1106_v32  ;;  %v20360_v32 = vld [vmem:[#allocation8 + $0x1170] ss:$24 sps:$4 sm:$0xff]  }
 0x4b1   :  { %8138 = vmatprep.subr.bf16.mxu1 %v18356_v48  ;;  %16121 = vmatprep.subr.bf16.mxu0 %v20335_v31  ;;  %v20350_v48 = vld [vmem:[#allocation8 + $0x10b4] ss:$24 sps:$4 sm:$0xff]   ;;  %v18500_v23 = vcombine.high %v1118_v49, %v1130_v7  ;;  %v1142_v31 = vld [vmem:[#allocation5 + $0x2078] sm:$0xff] }
 0x4b4   :  { %8139 = vmatpush1.bf16.msra.mxu1 %v18355_v28  ;;  %16122 = vmatpush1.bf16.msra.mxu0 %v20333_v62  ;;  %v1154_v28 = vld [vmem:[#allocation5 + $0x20d8] sm:$0xff]  ;;  %v18499_v62 = vcombine.low %v1118_v49, %v1130_v7 }
 0x4b5   :  { %8140 = vmatprep.subr.bf16.mxu1 %v18380_v17  ;;  %16123 = vmatprep.subr.bf16.mxu0 %v20338_v14  ;;  %v20353_v17 = vld [vmem:[#allocation8 + $0x10e4] ss:$24 sps:$4 sm:$0xff]   ;;  %v18524_v12 = vcombine.high %v1142_v31, %v1154_v28  ;;  %v20363_v7 = vld [vmem:[#allocation8 + $0x11a0] ss:$24 sps:$4 sm:$0xff]  }
 0x4b6   :  { %v1166_v14 = vld [vmem:[#allocation5 + $0x2138] sm:$0xff] }
 0x4b8   :  { %8141 = vmatpush1.bf16.msra.mxu1 %v18379_v63  ;;  %16124 = vmatpush1.bf16.msra.mxu0 %v20336_v29  ;;  %v1178_v63 = vld [vmem:[#allocation5 + $0x2198] sm:$0xff]  ;;  %v18523_v29 = vcombine.low %v1142_v31, %v1154_v28  ;;  %v20366_v28 = vld [vmem:[#allocation8 + $0x11d0] ss:$24 sps:$4 sm:$0xff]  }
 0x4b9   :  { %8142 = vmatprep.subr.bf16.mxu1 %v18404_v57  ;;  %16125 = vmatprep.subr.bf16.mxu0 %v20341_v52  ;;  %v20356_v57 = vld [vmem:[#allocation8 + $0x1114] ss:$24 sps:$4 sm:$0xff]   ;;  %v18548_v22 = vcombine.high %v1166_v14, %v1178_v63  ;;  %v1190_v52 = vld [vmem:[#allocation5 + $0x21f8] sm:$0xff] }
 0x4bc   :  { %8143 = vmatpush1.bf16.msra.mxu1 %v18403_v34  ;;  %16126 = vmatpush1.bf16.msra.mxu0 %v20339_v37  ;;  %v1202_v34 = vld [vmem:[#allocation5 + $0x2258] sm:$0xff]  ;;  %v18547_v37 = vcombine.low %v1166_v14, %v1178_v63  ;;  %v160_v63 = vld [vmem:[#allocation5 + $0x1c8] sm:$0xff] }
 0x4bd   :  { %8144 = vmatprep.subr.bf16.mxu1 %v18428_v5  ;;  %16127 = vmatprep.subr.bf16.mxu0 %v20344_v33  ;;  %v20359_v5 = vld [vmem:[#allocation8 + $0x1144] ss:$24 sps:$4 sm:$0xff]   ;;  %v18572_v21 = vcombine.high %v1190_v52, %v1202_v34 }
 0x4be   :  { %v1214_v33 = vld [vmem:[#allocation5 + $0x22b8] sm:$0xff] }
 0x4c0   :  { %8145 = vmatpush1.bf16.msra.mxu1 %v18427_v55  ;;  %16128 = vmatpush1.bf16.msra.mxu0 %v20342_v40  ;;  %v1226_v55 = vld [vmem:[#allocation5 + $0x2318] sm:$0xff]  ;;  %v18571_v40 = vcombine.low %v1190_v52, %v1202_v34  ;;  %v196_v52 = vld [vmem:[#allocation5 + $0x2e8] sm:$0xff] }
 0x4c1   :  { %8146 = vmatprep.subr.bf16.mxu1 %v18452_v35  ;;  %16129 = vmatprep.subr.bf16.mxu0 %v20347_v56  ;;  %v20362_v35 = vld [vmem:[#allocation8 + $0x1174] ss:$24 sps:$4 sm:$0xff]   ;;  %v18596_v47 = vcombine.high %v1214_v33, %v1226_v55  ;;  %v1238_v56 = vld [vmem:[#allocation5 + $0x2378] sm:$0xff] }
 0x4c4   :  { %8147 = vmatpush1.bf16.msra.mxu1 %v18451_v54  ;;  %16130 = vmatpush1.bf16.msra.mxu0 %v20345_v6  ;;  %v1250_v54 = vld [vmem:[#allocation5 + $0x23d8] sm:$0xff]  ;;  %v18595_v6 = vcombine.low %v1214_v33, %v1226_v55  ;;  %v232_v55 = vld [vmem:[#allocation5 + $0x408] sm:$0xff] }
 0x4c5   :  { %8148 = vmatprep.subr.bf16.mxu1 %v18476_v20  ;;  %16131 = vmatprep.subr.bf16.mxu0 %v20350_v48  ;;  %v20365_v20 = vld [vmem:[#allocation8 + $0x11a4] ss:$24 sps:$4 sm:$0xff]   ;;  %v18620_v49 = vcombine.high %v1238_v56, %v1250_v54  ;;  %v112_v48 = vld [vmem:[#allocation5 + $0x48] sm:$0xff] }
 0x4c8   :  { %8149 = vmatpush1.bf16.msra.mxu1 %v18475_v8  ;;  %16132 = vmatpush1.bf16.msra.mxu0 %v20348_v3  ;;  %v124_v8 = vld [vmem:[#allocation5 + $0xa8] sm:$0xff]  ;;  %v18619_v3 = vcombine.low %v1238_v56, %v1250_v54 }
 0x4c9   :  { %8150 = vmatprep.subr.bf16.mxu1 %v18500_v23  ;;  %16133 = vmatprep.subr.bf16.mxu0 %v20353_v17  ;;  %v20368_v23 = vld [vmem:[#allocation8 + $0x11d4] ss:$24 sps:$4 sm:$0xff]   ;;  %v17496_v31 = vcombine.high %v112_v48, %v124_v8 }
 0x4ca   :  { %v136_v17 = vld [vmem:[#allocation5 + $0x108] sm:$0xff] }
 0x4cb   :  { %v268_v56 = vld [vmem:[#allocation5 + $0x528] sm:$0xff] }
 0x4cc   :  { %8151 = vmatpush1.bf16.msra.mxu1 %v18499_v62  ;;  %16134 = vmatpush1.bf16.msra.mxu0 %v20351_v11  ;;  %v148_v62 = vld [vmem:[#allocation5 + $0x168] sm:$0xff]  ;;  %v17495_v11 = vcombine.low %v112_v48, %v124_v8 }
 0x4cd   :  { %8152 = vmatprep.subr.bf16.mxu1 %v18524_v12  ;;  %16135 = vmatprep.subr.bf16.mxu0 %v20356_v57  ;;  %v20371_v12 = vld [vmem:[#allocation8 + $0x1204] ss:$24 sps:$4 sm:$0xff]   ;;  %v17520_v14 = vcombine.high %v136_v17, %v148_v62  ;;  %v172_v57 = vld [vmem:[#allocation5 + $0x228] sm:$0xff] }
 0x4ce   :  { %v17543_v34 = vcombine.low %v160_v63, %v172_v57  ;;  %v22479_v54 = vld [vmem:[#allocation7 + $0x8] sm:$0xff] }
 0x4cf   :  { %v280_v8 = vld [vmem:[#allocation5 + $0x588] sm:$0xff] }
 0x4d0   :  { %8153 = vmatpush1.bf16.msra.mxu1 %v18523_v29  ;;  %16136 = vmatpush1.bf16.msra.mxu0 %v20354_v41  ;;  %v17519_v29 = vcombine.low %v136_v17, %v148_v62  ;;  %v184_v41 = vld [vmem:[#allocation5 + $0x288] sm:$0xff] }
 0x4d1   :  { %8154 = vmatprep.subr.bf16.mxu1 %v18548_v22  ;;  %16137 = vmatprep.subr.bf16.mxu0 %v20359_v5  ;;  %v17544_v22 = vcombine.high %v160_v63, %v172_v57  ;;  %v17568_v5 = vcombine.high %v184_v41, %v196_v52 }
 0x4d4   :  { %8155 = vmatpush1.bf16.msra.mxu1 %v18547_v37  ;;  %16138 = vmatpush1.bf16.msra.mxu0 %v20357_v1  ;;  %v208_v37 = vld [vmem:[#allocation5 + $0x348] sm:$0xff]  ;;  %v17567_v1 = vcombine.low %v184_v41, %v196_v52 }
 0x4d5   :  { %8156 = vmatprep.subr.bf16.mxu1 %v18572_v21  ;;  %16139 = vmatprep.subr.bf16.mxu0 %v20362_v35  ;;  %v220_v21 = vld [vmem:[#allocation5 + $0x3a8] sm:$0xff] }
 0x4d6   :  { %v17592_v33 = vcombine.high %v208_v37, %v220_v21  ;;  %v244_v35 = vld [vmem:[#allocation5 + $0x468] sm:$0xff] }
 0x4d7   :  { %v316_v41 = vld [vmem:[#allocation5 + $0x6a8] sm:$0xff] }
 0x4d8   :  { %8157 = vmatpush1.bf16.msra.mxu1 %v18571_v40  ;;  %16140 = vmatpush1.bf16.msra.mxu0 %v20360_v32  ;;  %v17591_v40 = vcombine.low %v208_v37, %v220_v21  ;;  %v256_v32 = vld [vmem:[#allocation5 + $0x4c8] sm:$0xff] }
 0x4d9   :  { %8158 = vmatprep.subr.bf16.mxu1 %v18596_v47  ;;  %16141 = vmatprep.subr.bf16.mxu0 %v20365_v20  ;;  %v17616_v47 = vcombine.high %v232_v55, %v244_v35  ;;  %v1304_v20 = vrot.slane %v22479_v54, %v22281_v38  ;;  %v17639_v62 = vcombine.low %v256_v32, %v268_v56  ;;  %v328_v21 = vld [vmem:[#allocation5 + $0x708] sm:$0xff] }
 0x4dc   :  { %8159 = vmatpush1.bf16.msra.mxu1 %v18595_v6  ;;  %16142 = vmatpush1.bf16.msra.mxu0 %v20363_v7  ;;  %v1308_v6 = vrot.slane %v22479_v54, %v22284_v42  ;;  %v17640_v7 = vcombine.high %v256_v32, %v268_v56 }
 0x4dd   :  { %8160 = vmatprep.subr.bf16.mxu1 %v18620_v49  ;;  %16143 = vmatprep.subr.bf16.mxu0 %v20368_v23  ;;  %v17615_v49 = vcombine.low %v232_v55, %v244_v35  ;;  %v292_v23 = vld [vmem:[#allocation5 + $0x5e8] sm:$0xff] }
 0x4de   :  { %v17664_v63 = vcombine.high %v280_v8, %v292_v23  ;;  %v352_v35 = vld [vmem:[#allocation5 + $0x7c8] sm:$0xff] }
 0x4e0   :  { %8161 = vmatpush1.bf16.msra.mxu1 %v18619_v3  ;;  %16144 = vmatpush1.bf16.msra.mxu0 %v20366_v28 }
 0x4e1   :  { %8302 = vmatprep.subr.bf16.mxu1 %v17496_v31  ;;  %16156 = vmatprep.subr.bf16.mxu0 %v20371_v12 }
 0x4e3   :  { %8163 = vmatmul.mubr.bf16.vlgmr.msra.gmra.mrb[20].mxu1 %v22178_v44 }
 0x4e4   :  { %8303 = vmatpush1.bf16.msra.mxu1 %v17495_v11  ;;  %8334 = vmatprep.mubr.bf16.mxu1 %v22158_v58 }
 0x4e5   :  { %8304 = vmatprep.subr.bf16.mxu1 %v17520_v14 }
 0x4e8   :  { %8305 = vmatpush1.bf16.msra.mxu1 %v17519_v29 }
 0x4e9   :  { %8306 = vmatprep.subr.bf16.mxu1 %v17544_v22  ;;  %v304_v22 = vld [vmem:[#allocation5 + $0x648] sm:$0xff] }
 0x4ea   :  { %v17688_v37 = vcombine.high %v304_v22, %v316_v41 }
 0x4ec   :  { %8307 = vmatpush1.bf16.msra.mxu1 %v17543_v34 }
 0x4ed   :  { %8308 = vmatprep.subr.bf16.mxu1 %v17568_v5  ;;  %v17663_v5 = vcombine.low %v280_v8, %v292_v23 }
 0x4f0   :  { %8309 = vmatpush1.bf16.msra.mxu1 %v17567_v1  ;;  %v340_v1 = vld [vmem:[#allocation5 + $0x768] sm:$0xff] }
 0x4f1   :  { %8310 = vmatprep.subr.bf16.mxu1 %v17592_v33  ;;  %v17687_v33 = vcombine.low %v304_v22, %v316_v41  ;;  %v17712_v55 = vcombine.high %v328_v21, %v340_v1 }
 0x4f4   :  { %8311 = vmatpush1.bf16.msra.mxu1 %v17591_v40  ;;  %v364_v40 = vld [vmem:[#allocation5 + $0x828] sm:$0xff] }
 0x4f5   :  { %8312 = vmatprep.subr.bf16.mxu1 %v17616_v47  ;;  %v17711_v47 = vcombine.low %v328_v21, %v340_v1  ;;  %v17736_v56 = vcombine.high %v352_v35, %v364_v40  ;;  %v412_v21 = vld [vmem:[#allocation5 + $0x9a8] sm:$0xff] }
 0x4f6   :  { %v7906_v48 = vpop.f32.mrb[16].mxu1 }
 0x4f7   :  { %v19801_v3 = vadd.f32 %v7906_v48, %v1304_v20  ;;  %v7908_v31 = vpop.f32.mrb[17].mxu1 }
 0x4f8   :  { %v19802_v28 = vadd.f32 %v7908_v31, %v1308_v6  ;;  %v7910_v17 = vpop.f32.mrb[18].mxu1  ;;  %8313 = vmatpush1.bf16.msra.mxu1 %v17615_v49  ;;  %v376_v49 = vld [vmem:[#allocation5 + $0x888] sm:$0xff] }
 0x4f9   :  { %v8748_v12 = vmul.f32 0.70710677, %v19801_v3  ;;  %v19803_v11 = vadd.f32 %v7910_v17, %v1304_v20  ;;  %v7912_v14 = vpop.f32.mrb[19].mxu1  ;;  %8314 = vmatprep.subr.bf16.mxu1 %v17640_v7  ;;  %v388_v7 = vld [vmem:[#allocation5 + $0x8e8] sm:$0xff]  ;;  %v8699_v31 = vmul.f32 0.5, %v19801_v3 }
 0x4fa   :  { %v8749_v57 = vmul.f32 0.70710677, %v19802_v28  ;;  %v19804_v29 = vadd.f32 %v7912_v14, %v1308_v6  ;;  %v8700_v14 = vmul.f32 0.5, %v19802_v28  ;;  %v17760_v22 = vcombine.high %v376_v49, %v388_v7  ;;  %v20374_v28 = vld [vmem:[#allocation8 + $0x1234] ss:$24 sps:$4 sm:$0xff]  }
 0x4fb   :  { %21873 = verf.f32 %v8748_v12  ;;  %v8772_v52 = vmul.f32 0.70710677, %v19803_v11  ;;  %v8723_v17 = vmul.f32 0.5, %v19803_v11  ;;  %v17735_v12 = vcombine.low %v352_v35, %v364_v40  ;;  %v20369_v11 = vld [vmem:[#allocation8 + $0x1200] ss:$24 sps:$4 sm:$0xff]   ;;  %v436_v35 = vld [vmem:[#allocation5 + $0xa68] sm:$0xff] }
 0x4fc   :  { %21875 = verf.f32 %v8749_v57  ;;  %v8773_v34 = vmul.f32 0.70710677, %v19804_v29  ;;  %8315 = vmatpush1.bf16.msra.mxu1 %v17639_v62 }
 0x4fd   :  { %21877 = verf.f32 %v8772_v52  ;;  %8316 = vmatprep.subr.bf16.mxu1 %v17664_v63  ;;  %v8724_v63 = vmul.f32 0.5, %v19804_v29  ;;  %v424_v29 = vld [vmem:[#allocation5 + $0xa08] sm:$0xff] }
 0x4fe   :  { %21879 = verf.f32 %v8773_v34 }
 0x500   :  { %8317 = vmatpush1.bf16.msra.mxu1 %v17663_v5 }
 0x501   :  { %8318 = vmatprep.subr.bf16.mxu1 %v17688_v37  ;;  %v400_v37 = vld [vmem:[#allocation5 + $0x948] sm:$0xff] }
 0x502   :  { %v17783_v40 = vcombine.low %v400_v37, %v412_v21 }
 0x504   :  { %8319 = vmatpush1.bf16.msra.mxu1 %v17687_v33  ;;  %v17759_v33 = vcombine.low %v376_v49, %v388_v7  ;;  %v17807_v49 = vcombine.low %v424_v29, %v436_v35  ;;  %v20375_v7 = vld [vmem:[#allocation8 + $0x1260] ss:$24 sps:$4 sm:$0xff]  }
 0x505   :  { %v21874_v32 = vpop.eup %21873  ;;  %8320 = vmatprep.subr.bf16.mxu1 %v17712_v55  ;;  %v17784_v55 = vcombine.high %v400_v37, %v412_v21  ;;  %v532_v37 = vld [vmem:[#allocation5 + $0xd68] sm:$0xff] }
 0x506   :  { %v21876_v20 = vpop.eup %21875  ;;  %v8844_v6 = vadd.f32 1.0, %v21874_v32  ;;  %v17808_v32 = vcombine.high %v424_v29, %v436_v35  ;;  %v556_v29 = vld [vmem:[#allocation5 + $0xe28] sm:$0xff] }
 0x507   :  { %v21878_v48 = vpop.eup %21877  ;;  %v8845_v8 = vadd.f32 1.0, %v21876_v20  ;;  %v448_v20 = vld [vmem:[#allocation5 + $0xac8] sm:$0xff] }
 0x508   :  { %v21880_v23 = vpop.eup %21879  ;;  %v8868_v62 = vadd.f32 1.0, %v21878_v48  ;;  %8321 = vmatpush1.bf16.msra.mxu1 %v17711_v47  ;;  %v8892_v41 = vmul.f32 %v8844_v6, %v8699_v31  ;;  %v20372_v47 = vld [vmem:[#allocation8 + $0x1230] ss:$24 sps:$4 sm:$0xff]  }
 0x509   :  { %v8869_v57 = vadd.f32 1.0, %v21880_v23  ;;  %8322 = vmatprep.subr.bf16.mxu1 %v17736_v56  ;;  %v8893_v34 = vmul.f32 %v8845_v8, %v8700_v14  ;;  %v20377_v56 = vld [vmem:[#allocation8 + $0x1264] ss:$24 sps:$4 sm:$0xff]   ;;  %v460_v6 = vld [vmem:[#allocation5 + $0xb28] sm:$0xff] }
 0x50a   :  { %v8916_v52 = vmul.f32 %v8868_v62, %v8723_v17  ;;  %v17832_v48 = vcombine.high %v448_v20, %v460_v6  ;;  %v20380_v8 = vld [vmem:[#allocation8 + $0x1294] ss:$24 sps:$4 sm:$0xff]   ;;  %v17831_v17 = vcombine.low %v448_v20, %v460_v6  ;;  %v20378_v62 = vld [vmem:[#allocation8 + $0x1290] ss:$24 sps:$4 sm:$0xff]   ;;  %v20383_v14 = vld [vmem:[#allocation8 + $0x12c4] ss:$24 sps:$4 sm:$0xff]  }
 0x50b   :  { %v8917_v5 = vmul.f32 %v8869_v57, %v8724_v63  ;;  %v472_v23 = vld [vmem:[#allocation5 + $0xb88] sm:$0xff] }
 0x50c   :  { %v22485_v1 = vpack.c.bf16 %v8916_v52, %v8892_v41  ;;  %8323 = vmatpush1.bf16.msra.mxu1 %v17735_v12  ;;  %v484_v31 = vld [vmem:[#allocation5 + $0xbe8] sm:$0xff]  ;;  %v20381_v41 = vld [vmem:[#allocation8 + $0x12c0] ss:$24 sps:$4 sm:$0xff]  }
 0x50d   :  { %8324 = vmatprep.subr.bf16.mxu1 %v17760_v22  ;;  %v22487_v3 = vpack.c.bf16 %v8917_v5, %v8893_v34  ;;  %v17856_v12 = vcombine.high %v472_v23, %v484_v31  ;;  %v496_v63 = vld [vmem:[#allocation5 + $0xc48] sm:$0xff]  ;;  %v17855_v22 = vcombine.low %v472_v23, %v484_v31 }
 0x50e   :  { %v508_v57 = vld [vmem:[#allocation5 + $0xca8] sm:$0xff] }
 0x50f   :  { %16145 = vmatprep.mubr.bf16.mxu0 %v22487_v3  ;;  %v17880_v52 = vcombine.high %v496_v63, %v508_v57  ;;  %v20386_v34 = vld [vmem:[#allocation8 + $0x12f4] ss:$24 sps:$4 sm:$0xff]   ;;  %v17879_v21 = vcombine.low %v496_v63, %v508_v57 }
 0x510   :  { %8325 = vmatpush1.bf16.msra.mxu1 %v17759_v33  ;;  %16146 = vmatmul.mubr.bf16.vlgmr.msra.gmra.mrb[16].mxu0 %v22485_v1  ;;  %v520_v5 = vld [vmem:[#allocation5 + $0xd08] sm:$0xff] }
 0x511   :  { %16157 = vmatpush1.bf16.msra.mxu0 %v20369_v11  ;;  %16188 = vmatprep.mubr.bf16.mxu0 %v22354_v45  ;;  %v20384_v33 = vld [vmem:[#allocation8 + $0x12f0] ss:$24 sps:$4 sm:$0xff]   ;;  %v17904_v11 = vcombine.high %v520_v5, %v532_v37  ;;  %v17903_v35 = vcombine.low %v520_v5, %v532_v37 }
 0x512   :  { %8326 = vmatprep.subr.bf16.mxu1 %v17784_v55  ;;  %16158 = vmatprep.subr.bf16.mxu0 %v20374_v28  ;;  %v20389_v55 = vld [vmem:[#allocation8 + $0x1324] ss:$24 sps:$4 sm:$0xff]   ;;  %v544_v28 = vld [vmem:[#allocation5 + $0xdc8] sm:$0xff] }
 0x513   :  { %v580_v20 = vld [vmem:[#allocation5 + $0xee8] sm:$0xff]  ;;  %v17927_v6 = vcombine.low %v544_v28, %v556_v29 }
 0x514   :  { %8327 = vmatpush1.bf16.msra.mxu1 %v17783_v40  ;;  %v20387_v40 = vld [vmem:[#allocation8 + $0x1320] ss:$24 sps:$4 sm:$0xff]   ;;  %v604_v23 = vld [vmem:[#allocation5 + $0xfa8] sm:$0xff] }
 0x515   :  { %16159 = vmatpush1.bf16.msra.mxu0 %v20372_v47  ;;  %8328 = vmatprep.subr.bf16.mxu1 %v17808_v32  ;;  %v17928_v47 = vcombine.high %v544_v28, %v556_v29  ;;  %v20392_v32 = vld [vmem:[#allocation8 + $0x1354] ss:$24 sps:$4 sm:$0xff]  }
 0x516   :  { %16160 = vmatprep.subr.bf16.mxu0 %v20377_v56  ;;  %v568_v56 = vld [vmem:[#allocation5 + $0xe88] sm:$0xff] }
 0x517   :  { %v17951_v31 = vcombine.low %v568_v56, %v580_v20  ;;  %v628_v63 = vld [vmem:[#allocation5 + $0x1068] sm:$0xff] }
 0x518   :  { %8329 = vmatpush1.bf16.msra.mxu1 %v17807_v49  ;;  %v20390_v49 = vld [vmem:[#allocation8 + $0x1350] ss:$24 sps:$4 sm:$0xff]  }
 0x519   :  { %16161 = vmatpush1.bf16.msra.mxu0 %v20375_v7  ;;  %8330 = vmatprep.subr.bf16.mxu1 %v17832_v48  ;;  %v17952_v7 = vcombine.high %v568_v56, %v580_v20  ;;  %v20395_v48 = vld [vmem:[#allocation8 + $0x1384] ss:$24 sps:$4 sm:$0xff]   ;;  %v652_v5 = vld [vmem:[#allocation5 + $0x1128] sm:$0xff] }
 0x51a   :  { %16162 = vmatprep.subr.bf16.mxu0 %v20380_v8  ;;  %v592_v8 = vld [vmem:[#allocation5 + $0xf48] sm:$0xff] }
 0x51b   :  { %v17975_v57 = vcombine.low %v592_v8, %v604_v23  ;;  %v676_v28 = vld [vmem:[#allocation5 + $0x11e8] sm:$0xff] }
 0x51c   :  { %8331 = vmatpush1.bf16.msra.mxu1 %v17831_v17  ;;  %v20393_v17 = vld [vmem:[#allocation8 + $0x1380] ss:$24 sps:$4 sm:$0xff]   ;;  %v700_v56 = vld [vmem:[#allocation5 + $0x12a8] sm:$0xff] }
 0x51d   :  { %16163 = vmatpush1.bf16.msra.mxu0 %v20378_v62  ;;  %8332 = vmatprep.subr.bf16.mxu1 %v17856_v12  ;;  %v17976_v62 = vcombine.high %v592_v8, %v604_v23  ;;  %v20398_v12 = vld [vmem:[#allocation8 + $0x13b4] ss:$24 sps:$4 sm:$0xff]  }
 0x51e   :  { %16164 = vmatprep.subr.bf16.mxu0 %v20383_v14  ;;  %v616_v14 = vld [vmem:[#allocation5 + $0x1008] sm:$0xff] }
 0x51f   :  { %v17999_v37 = vcombine.low %v616_v14, %v628_v63  ;;  %v724_v8 = vld [vmem:[#allocation5 + $0x1368] sm:$0xff] }
 0x520   :  { %8333 = vmatpush1.bf16.msra.mxu1 %v17855_v22  ;;  %v20396_v22 = vld [vmem:[#allocation8 + $0x13b0] ss:$24 sps:$4 sm:$0xff]  }
 0x521   :  { %16165 = vmatpush1.bf16.msra.mxu0 %v20381_v41  ;;  %8345 = vmatprep.subr.bf16.mxu1 %v17880_v52  ;;  %v18000_v41 = vcombine.high %v616_v14, %v628_v63  ;;  %v20401_v52 = vld [vmem:[#allocation8 + $0x13e4] ss:$24 sps:$4 sm:$0xff]   ;;  %v748_v14 = vld [vmem:[#allocation5 + $0x1428] sm:$0xff] }
 0x522   :  { %16166 = vmatprep.subr.bf16.mxu0 %v20386_v34  ;;  %v640_v34 = vld [vmem:[#allocation5 + $0x10c8] sm:$0xff] }
 0x523   :  { %8335 = vmatmul.mubr.bf16.vlgmr.msra.gmra.mrb[24].mxu1 %v22162_v15  ;;  %v18023_v29 = vcombine.low %v640_v34, %v652_v5 }
 0x524   :  { %8346 = vmatpush1.bf16.msra.mxu1 %v17879_v21  ;;  %8377 = vmatprep.mubr.bf16.mxu1 %v22164_v25  ;;  %v20399_v21 = vld [vmem:[#allocation8 + $0x13e0] ss:$24 sps:$4 sm:$0xff]  }
 0x525   :  { %16167 = vmatpush1.bf16.msra.mxu0 %v20384_v33  ;;  %8347 = vmatprep.subr.bf16.mxu1 %v17904_v11  ;;  %v18024_v33 = vcombine.high %v640_v34, %v652_v5  ;;  %v20404_v11 = vld [vmem:[#allocation8 + $0x1414] ss:$24 sps:$4 sm:$0xff]  }
 0x526   :  { %16168 = vmatprep.subr.bf16.mxu0 %v20389_v55  ;;  %v664_v55 = vld [vmem:[#allocation5 + $0x1188] sm:$0xff] }
 0x527   :  { %v18047_v20 = vcombine.low %v664_v55, %v676_v28  ;;  %v772_v34 = vld [vmem:[#allocation5 + $0x14e8] sm:$0xff] }
 0x528   :  { %8348 = vmatpush1.bf16.msra.mxu1 %v17903_v35  ;;  %v20402_v35 = vld [vmem:[#allocation8 + $0x1410] ss:$24 sps:$4 sm:$0xff]  }
 0x529   :  { %16169 = vmatpush1.bf16.msra.mxu0 %v20387_v40  ;;  %8349 = vmatprep.subr.bf16.mxu1 %v17928_v47  ;;  %v18048_v40 = vcombine.high %v664_v55, %v676_v28  ;;  %v20407_v47 = vld [vmem:[#allocation8 + $0x1444] ss:$24 sps:$4 sm:$0xff]  }
 0x52a   :  { %16170 = vmatprep.subr.bf16.mxu0 %v20392_v32  ;;  %v688_v32 = vld [vmem:[#allocation5 + $0x1248] sm:$0xff]  ;;  %v20419_v55 = vld [vmem:[#allocation8 + $0x1504] ss:$24 sps:$4 sm:$0xff]  }
 0x52b   :  { %v18071_v23 = vcombine.low %v688_v32, %v700_v56 }
 0x52c   :  { %8350 = vmatpush1.bf16.msra.mxu1 %v17927_v6  ;;  %v20405_v6 = vld [vmem:[#allocation8 + $0x1440] ss:$24 sps:$4 sm:$0xff]  }
 0x52d   :  { %16171 = vmatpush1.bf16.msra.mxu0 %v20390_v49  ;;  %8351 = vmatprep.subr.bf16.mxu1 %v17952_v7  ;;  %v18072_v49 = vcombine.high %v688_v32, %v700_v56  ;;  %v20410_v7 = vld [vmem:[#allocation8 + $0x1474] ss:$24 sps:$4 sm:$0xff]  }
 0x52e   :  { %16172 = vmatprep.subr.bf16.mxu0 %v20395_v48  ;;  %v712_v48 = vld [vmem:[#allocation5 + $0x1308] sm:$0xff] }
 0x52f   :  { %v18095_v63 = vcombine.low %v712_v48, %v724_v8  ;;  %v20422_v32 = vld [vmem:[#allocation8 + $0x1534] ss:$24 sps:$4 sm:$0xff]  }
 0x530   :  { %8352 = vmatpush1.bf16.msra.mxu1 %v17951_v31  ;;  %v20408_v31 = vld [vmem:[#allocation8 + $0x1470] ss:$24 sps:$4 sm:$0xff]  }
 0x531   :  { %16173 = vmatpush1.bf16.msra.mxu0 %v20393_v17  ;;  %8353 = vmatprep.subr.bf16.mxu1 %v17976_v62  ;;  %v18096_v17 = vcombine.high %v712_v48, %v724_v8  ;;  %v20413_v62 = vld [vmem:[#allocation8 + $0x14a4] ss:$24 sps:$4 sm:$0xff]  }
 0x532   :  { %16174 = vmatprep.subr.bf16.mxu0 %v20398_v12  ;;  %v736_v12 = vld [vmem:[#allocation5 + $0x13c8] sm:$0xff]  ;;  %v20425_v48 = vld [vmem:[#allocation8 + $0x1564] ss:$24 sps:$4 sm:$0xff]  }
 0x533   :  { %v18119_v5 = vcombine.low %v736_v12, %v748_v14 }
 0x534   :  { %8354 = vmatpush1.bf16.msra.mxu1 %v17975_v57  ;;  %v20411_v57 = vld [vmem:[#allocation8 + $0x14a0] ss:$24 sps:$4 sm:$0xff]  }
 0x535   :  { %16175 = vmatpush1.bf16.msra.mxu0 %v20396_v22  ;;  %8355 = vmatprep.subr.bf16.mxu1 %v18000_v41  ;;  %v18120_v22 = vcombine.high %v736_v12, %v748_v14  ;;  %v20416_v41 = vld [vmem:[#allocation8 + $0x14d4] ss:$24 sps:$4 sm:$0xff]  }
 0x536   :  { %16176 = vmatprep.subr.bf16.mxu0 %v20401_v52  ;;  %v760_v52 = vld [vmem:[#allocation5 + $0x1488] sm:$0xff] }
 0x537   :  { %v18143_v28 = vcombine.low %v760_v52, %v772_v34  ;;  %v20428_v12 = vld [vmem:[#allocation8 + $0x1594] ss:$24 sps:$4 sm:$0xff]  }
 0x538   :  { %8356 = vmatpush1.bf16.msra.mxu1 %v17999_v37  ;;  %v20414_v37 = vld [vmem:[#allocation8 + $0x14d0] ss:$24 sps:$4 sm:$0xff]  }
 0x539   :  { %16177 = vmatpush1.bf16.msra.mxu0 %v20399_v21  ;;  %8357 = vmatprep.subr.bf16.mxu1 %v18024_v33  ;;  %v18144_v21 = vcombine.high %v760_v52, %v772_v34  ;;  %v784_v33 = vld [vmem:[#allocation5 + $0x1548] sm:$0xff]  ;;  %v20431_v52 = vld [vmem:[#allocation8 + $0x15c4] ss:$24 sps:$4 sm:$0xff]  }
 0x53a   :  { %16178 = vmatprep.subr.bf16.mxu0 %v20404_v11  ;;  %v796_v11 = vld [vmem:[#allocation5 + $0x15a8] sm:$0xff] }
 0x53b   :  { %v18167_v56 = vcombine.low %v784_v33, %v796_v11 }
 0x53c   :  { %8358 = vmatpush1.bf16.msra.mxu1 %v18023_v29  ;;  %v18168_v29 = vcombine.high %v784_v33, %v796_v11  ;;  %v916_v33 = vld [vmem:[#allocation5 + $0x1968] sm:$0xff] }
 0x53d   :  { %16179 = vmatpush1.bf16.msra.mxu0 %v20402_v35  ;;  %8359 = vmatprep.subr.bf16.mxu1 %v18048_v40  ;;  %v20417_v35 = vld [vmem:[#allocation8 + $0x1500] ss:$24 sps:$4 sm:$0xff]   ;;  %v808_v40 = vld [vmem:[#allocation5 + $0x1608] sm:$0xff] }
 0x53e   :  { %16180 = vmatprep.subr.bf16.mxu0 %v20407_v47  ;;  %v820_v47 = vld [vmem:[#allocation5 + $0x1668] sm:$0xff] }
 0x53f   :  { %v18191_v8 = vcombine.low %v808_v40, %v820_v47  ;;  %v20434_v11 = vld [vmem:[#allocation8 + $0x15f4] ss:$24 sps:$4 sm:$0xff]  }
 0x540   :  { %8360 = vmatpush1.bf16.msra.mxu1 %v18047_v20  ;;  %v18192_v20 = vcombine.high %v808_v40, %v820_v47  ;;  %v940_v40 = vld [vmem:[#allocation5 + $0x1a28] sm:$0xff]  ;;  %v20437_v47 = vld [vmem:[#allocation8 + $0x1624] ss:$24 sps:$4 sm:$0xff]  }
 0x541   :  { %16181 = vmatpush1.bf16.msra.mxu0 %v20405_v6  ;;  %8361 = vmatprep.subr.bf16.mxu1 %v18072_v49  ;;  %v20420_v6 = vld [vmem:[#allocation8 + $0x1530] ss:$24 sps:$4 sm:$0xff]  }
 0x542   :  { %16182 = vmatprep.subr.bf16.mxu0 %v20410_v7  ;;  %v832_v49 = vld [vmem:[#allocation5 + $0x16c8] sm:$0xff] }
 0x543   :  { %v844_v7 = vld [vmem:[#allocation5 + $0x1728] sm:$0xff] }
 0x544   :  { %8362 = vmatpush1.bf16.msra.mxu1 %v18071_v23  ;;  %v18216_v23 = vcombine.high %v832_v49, %v844_v7  ;;  %v18215_v14 = vcombine.low %v832_v49, %v844_v7  ;;  %v964_v49 = vld [vmem:[#allocation5 + $0x1ae8] sm:$0xff] }
 0x545   :  { %16183 = vmatpush1.bf16.msra.mxu0 %v20408_v31  ;;  %8363 = vmatprep.subr.bf16.mxu1 %v18096_v17  ;;  %v20423_v31 = vld [vmem:[#allocation8 + $0x1560] ss:$24 sps:$4 sm:$0xff]   ;;  %v856_v17 = vld [vmem:[#allocation5 + $0x1788] sm:$0xff] }
 0x546   :  { %16184 = vmatprep.subr.bf16.mxu0 %v20413_v62  ;;  %v868_v62 = vld [vmem:[#allocation5 + $0x17e8] sm:$0xff] }
 0x547   :  { %v18239_v34 = vcombine.low %v856_v17, %v868_v62  ;;  %v20440_v7 = vld [vmem:[#allocation8 + $0x1654] ss:$24 sps:$4 sm:$0xff]  }
 0x548   :  { %8364 = vmatpush1.bf16.msra.mxu1 %v18095_v63  ;;  %v18240_v63 = vcombine.high %v856_v17, %v868_v62  ;;  %v988_v17 = vld [vmem:[#allocation5 + $0x1ba8] sm:$0xff]  ;;  %v20443_v62 = vld [vmem:[#allocation8 + $0x1684] ss:$24 sps:$4 sm:$0xff]  }
 0x549   :  { %16185 = vmatpush1.bf16.msra.mxu0 %v20411_v57  ;;  %8365 = vmatprep.subr.bf16.mxu1 %v18120_v22  ;;  %v20426_v57 = vld [vmem:[#allocation8 + $0x1590] ss:$24 sps:$4 sm:$0xff]  }
 0x54a   :  { %16186 = vmatprep.subr.bf16.mxu0 %v20416_v41  ;;  %v880_v22 = vld [vmem:[#allocation5 + $0x1848] sm:$0xff] }
 0x54b   :  { %v892_v41 = vld [vmem:[#allocation5 + $0x18a8] sm:$0xff] }
 0x54c   :  { %8366 = vmatpush1.bf16.msra.mxu1 %v18119_v5  ;;  %v18264_v5 = vcombine.high %v880_v22, %v892_v41 }
 0x54d   :  { %16187 = vmatpush1.bf16.msra.mxu0 %v20414_v37  ;;  %8367 = vmatprep.subr.bf16.mxu1 %v18144_v21  ;;  %v20429_v37 = vld [vmem:[#allocation8 + $0x15c0] ss:$24 sps:$4 sm:$0xff]   ;;  %v904_v21 = vld [vmem:[#allocation5 + $0x1908] sm:$0xff] }
 0x54e   :  { %16199 = vmatprep.subr.bf16.mxu0 %v20419_v55  ;;  %v18263_v55 = vcombine.low %v880_v22, %v892_v41  ;;  %v1012_v22 = vld [vmem:[#allocation5 + $0x1c68] sm:$0xff] }
 0x54f   :  { %v20446_v41 = vld [vmem:[#allocation8 + $0x16b4] ss:$24 sps:$4 sm:$0xff]  }
 0x550   :  { %16189 = vmatmul.mubr.bf16.vlgmr.msra.gmra.mrb[16].mxu0 %v22352_v13  ;;  %8368 = vmatpush1.bf16.msra.mxu1 %v18143_v28  ;;  %v18288_v28 = vcombine.high %v904_v21, %v916_v33 }
 0x551   :  { %8369 = vmatprep.subr.bf16.mxu1 %v18168_v29  ;;  %16200 = vmatpush1.bf16.msra.mxu0 %v20417_v35  ;;  %v20432_v29 = vld [vmem:[#allocation8 + $0x15f0] ss:$24 sps:$4 sm:$0xff]  }
 0x552   :  { %16201 = vmatprep.subr.bf16.mxu0 %v20422_v32  ;;  %v928_v35 = vld [vmem:[#allocation5 + $0x19c8] sm:$0xff]  ;;  %v18287_v32 = vcombine.low %v904_v21, %v916_v33  ;;  %v20449_v33 = vld [vmem:[#allocation8 + $0x16e4] ss:$24 sps:$4 sm:$0xff]  }
 0x553   :  { %v1036_v21 = vld [vmem:[#allocation5 + $0x1d28] sm:$0xff] }
 0x554   :  { %8370 = vmatpush1.bf16.msra.mxu1 %v18167_v56  ;;  %v18312_v56 = vcombine.high %v928_v35, %v940_v40 }
 0x555   :  { %8371 = vmatprep.subr.bf16.mxu1 %v18192_v20  ;;  %16202 = vmatpush1.bf16.msra.mxu0 %v20420_v6  ;;  %v20435_v20 = vld [vmem:[#allocation8 + $0x1620] ss:$24 sps:$4 sm:$0xff]   ;;  %v952_v6 = vld [vmem:[#allocation5 + $0x1a88] sm:$0xff] }
 0x556   :  { %16203 = vmatprep.subr.bf16.mxu0 %v20425_v48  ;;  %v18311_v48 = vcombine.low %v928_v35, %v940_v40  ;;  %v1060_v35 = vld [vmem:[#allocation5 + $0x1de8] sm:$0xff] }
 0x557   :  { %v20452_v40 = vld [vmem:[#allocation8 + $0x1714] ss:$24 sps:$4 sm:$0xff]  }
 0x558   :  { %8372 = vmatpush1.bf16.msra.mxu1 %v18191_v8  ;;  %v18336_v8 = vcombine.high %v952_v6, %v964_v49 }
 0x559   :  { %8373 = vmatprep.subr.bf16.mxu1 %v18216_v23  ;;  %16204 = vmatpush1.bf16.msra.mxu0 %v20423_v31  ;;  %v20438_v23 = vld [vmem:[#allocation8 + $0x1650] ss:$24 sps:$4 sm:$0xff]  }
 0x55a   :  { %16205 = vmatprep.subr.bf16.mxu0 %v20428_v12  ;;  %v976_v31 = vld [vmem:[#allocation5 + $0x1b48] sm:$0xff]  ;;  %v18335_v12 = vcombine.low %v952_v6, %v964_v49  ;;  %v20455_v49 = vld [vmem:[#allocation8 + $0x1744] ss:$24 sps:$4 sm:$0xff]  }
 0x55b   :  { %v1084_v6 = vld [vmem:[#allocation5 + $0x1ea8] sm:$0xff] }
 0x55c   :  { %8374 = vmatpush1.bf16.msra.mxu1 %v18215_v14  ;;  %v18360_v14 = vcombine.high %v976_v31, %v988_v17 }
 0x55d   :  { %8375 = vmatprep.subr.bf16.mxu1 %v18240_v63  ;;  %16206 = vmatpush1.bf16.msra.mxu0 %v20426_v57  ;;  %v20441_v63 = vld [vmem:[#allocation8 + $0x1680] ss:$24 sps:$4 sm:$0xff]   ;;  %v1000_v57 = vld [vmem:[#allocation5 + $0x1c08] sm:$0xff] }
 0x55e   :  { %16207 = vmatprep.subr.bf16.mxu0 %v20431_v52  ;;  %v18359_v52 = vcombine.low %v976_v31, %v988_v17  ;;  %v1108_v31 = vld [vmem:[#allocation5 + $0x1f68] sm:$0xff] }
 0x55f   :  { %v20458_v17 = vld [vmem:[#allocation8 + $0x1774] ss:$24 sps:$4 sm:$0xff]  }
 0x560   :  { %8376 = vmatpush1.bf16.msra.mxu1 %v18239_v34  ;;  %v18384_v34 = vcombine.high %v1000_v57, %v1012_v22 }
 0x561   :  { %8388 = vmatprep.subr.bf16.mxu1 %v18264_v5  ;;  %16208 = vmatpush1.bf16.msra.mxu0 %v20429_v37  ;;  %v20444_v5 = vld [vmem:[#allocation8 + $0x16b0] ss:$24 sps:$4 sm:$0xff]  }
 0x562   :  { %16209 = vmatprep.subr.bf16.mxu0 %v20434_v11  ;;  %v1024_v37 = vld [vmem:[#allocation5 + $0x1cc8] sm:$0xff]  ;;  %v18383_v11 = vcombine.low %v1000_v57, %v1012_v22  ;;  %v20461_v22 = vld [vmem:[#allocation8 + $0x17a4] ss:$24 sps:$4 sm:$0xff]  }
 0x563   :  { %8378 = vmatmul.mubr.bf16.vlgmr.msra.gmra.mrb[24].mxu1 %v22170_v30  ;;  %v1132_v57 = vld [vmem:[#allocation5 + $0x2028] sm:$0xff] }
 0x564   :  { %8389 = vmatpush1.bf16.msra.mxu1 %v18263_v55  ;;  %8420 = vmatprep.mubr.bf16.mxu1 %v22172_v39  ;;  %v18408_v55 = vcombine.high %v1024_v37, %v1036_v21 }
 0x565   :  { %8390 = vmatprep.subr.bf16.mxu1 %v18288_v28  ;;  %16210 = vmatpush1.bf16.msra.mxu0 %v20432_v29  ;;  %v20447_v28 = vld [vmem:[#allocation8 + $0x16e0] ss:$24 sps:$4 sm:$0xff]   ;;  %v1048_v29 = vld [vmem:[#allocation5 + $0x1d88] sm:$0xff] }
 0x566   :  { %16211 = vmatprep.subr.bf16.mxu0 %v20437_v47  ;;  %v18407_v47 = vcombine.low %v1024_v37, %v1036_v21  ;;  %v1156_v37 = vld [vmem:[#allocation5 + $0x20e8] sm:$0xff] }
 0x567   :  { %v20464_v21 = vld [vmem:[#allocation8 + $0x17d4] ss:$24 sps:$4 sm:$0xff]  }
 0x568   :  { %8391 = vmatpush1.bf16.msra.mxu1 %v18287_v32  ;;  %v18432_v32 = vcombine.high %v1048_v29, %v1060_v35 }
 0x569   :  { %8392 = vmatprep.subr.bf16.mxu1 %v18312_v56  ;;  %16212 = vmatpush1.bf16.msra.mxu0 %v20435_v20  ;;  %v20450_v56 = vld [vmem:[#allocation8 + $0x1710] ss:$24 sps:$4 sm:$0xff]  }
 0x56a   :  { %16213 = vmatprep.subr.bf16.mxu0 %v20440_v7  ;;  %v1072_v20 = vld [vmem:[#allocation5 + $0x1e48] sm:$0xff]  ;;  %v18431_v7 = vcombine.low %v1048_v29, %v1060_v35  ;;  %v20467_v35 = vld [vmem:[#allocation8 + $0x1804] ss:$24 sps:$4 sm:$0xff]  }
 0x56b   :  { %v1180_v29 = vld [vmem:[#allocation5 + $0x21a8] sm:$0xff] }
 0x56c   :  { %8393 = vmatpush1.bf16.msra.mxu1 %v18311_v48  ;;  %v18456_v48 = vcombine.high %v1072_v20, %v1084_v6 }
 0x56d   :  { %8394 = vmatprep.subr.bf16.mxu1 %v18336_v8  ;;  %16214 = vmatpush1.bf16.msra.mxu0 %v20438_v23  ;;  %v20453_v8 = vld [vmem:[#allocation8 + $0x1740] ss:$24 sps:$4 sm:$0xff]   ;;  %v1096_v23 = vld [vmem:[#allocation5 + $0x1f08] sm:$0xff] }
 0x56e   :  { %16215 = vmatprep.subr.bf16.mxu0 %v20443_v62  ;;  %v18455_v62 = vcombine.low %v1072_v20, %v1084_v6 }
 0x570   :  { %8395 = vmatpush1.bf16.msra.mxu1 %v18335_v12  ;;  %v18480_v12 = vcombine.high %v1096_v23, %v1108_v31 }
 0x571   :  { %8396 = vmatprep.subr.bf16.mxu1 %v18360_v14  ;;  %16216 = vmatpush1.bf16.msra.mxu0 %v20441_v63  ;;  %v20456_v14 = vld [vmem:[#allocation8 + $0x1770] ss:$24 sps:$4 sm:$0xff]  }
 0x572   :  { %16217 = vmatprep.subr.bf16.mxu0 %v20446_v41  ;;  %v1120_v63 = vld [vmem:[#allocation5 + $0x1fc8] sm:$0xff]  ;;  %v18479_v41 = vcombine.low %v1096_v23, %v1108_v31 }
 0x573   :  { %v1240_v23 = vld [vmem:[#allocation5 + $0x2388] sm:$0xff] }
 0x574   :  { %8397 = vmatpush1.bf16.msra.mxu1 %v18359_v52  ;;  %v18504_v52 = vcombine.high %v1120_v63, %v1132_v57  ;;  %v1252_v31 = vld [vmem:[#allocation5 + $0x23e8] sm:$0xff] }
 0x575   :  { %8398 = vmatprep.subr.bf16.mxu1 %v18384_v34  ;;  %16218 = vmatpush1.bf16.msra.mxu0 %v20444_v5  ;;  %v20459_v34 = vld [vmem:[#allocation8 + $0x17a0] ss:$24 sps:$4 sm:$0xff]   ;;  %v1144_v5 = vld [vmem:[#allocation5 + $0x2088] sm:$0xff] }
 0x576   :  { %16219 = vmatprep.subr.bf16.mxu0 %v20449_v33  ;;  %v18503_v33 = vcombine.low %v1120_v63, %v1132_v57  ;;  %v18623_v63 = vcombine.low %v1240_v23, %v1252_v31 }
 0x578   :  { %8399 = vmatpush1.bf16.msra.mxu1 %v18383_v11  ;;  %v18528_v11 = vcombine.high %v1144_v5, %v1156_v37 }
 0x579   :  { %8400 = vmatprep.subr.bf16.mxu1 %v18408_v55  ;;  %16220 = vmatpush1.bf16.msra.mxu0 %v20447_v28  ;;  %v20462_v55 = vld [vmem:[#allocation8 + $0x17d0] ss:$24 sps:$4 sm:$0xff]  }
 0x57a   :  { %16221 = vmatprep.subr.bf16.mxu0 %v20452_v40  ;;  %v1168_v28 = vld [vmem:[#allocation5 + $0x2148] sm:$0xff]  ;;  %v18527_v40 = vcombine.low %v1144_v5, %v1156_v37  ;;  %v162_v5 = vld [vmem:[#allocation5 + $0x1d8] sm:$0xff] }
 0x57b   :  { %v18551_v20 = vcombine.low %v1168_v28, %v1180_v29  ;;  %v174_v37 = vld [vmem:[#allocation5 + $0x238] sm:$0xff] }
 0x57c   :  { %8401 = vmatpush1.bf16.msra.mxu1 %v18407_v47  ;;  %v18552_v47 = vcombine.high %v1168_v28, %v1180_v29  ;;  %v17547_v28 = vcombine.low %v162_v5, %v174_v37 }
 0x57d   :  { %8402 = vmatprep.subr.bf16.mxu1 %v18432_v32  ;;  %16222 = vmatpush1.bf16.msra.mxu0 %v20450_v56  ;;  %v1192_v32 = vld [vmem:[#allocation5 + $0x2208] sm:$0xff] }
 0x57e   :  { %16223 = vmatprep.subr.bf16.mxu0 %v20455_v49  ;;  %v1204_v56 = vld [vmem:[#allocation5 + $0x2268] sm:$0xff] }
 0x57f   :  { %v18576_v6 = vcombine.high %v1192_v32, %v1204_v56  ;;  %v1216_v49 = vld [vmem:[#allocation5 + $0x22c8] sm:$0xff] }
 0x580   :  { %8403 = vmatpush1.bf16.msra.mxu1 %v18431_v7  ;;  %v1228_v7 = vld [vmem:[#allocation5 + $0x2328] sm:$0xff] }
 0x581   :  { %8404 = vmatprep.subr.bf16.mxu1 %v18456_v48  ;;  %16224 = vmatpush1.bf16.msra.mxu0 %v20453_v8  ;;  %v18575_v48 = vcombine.low %v1192_v32, %v1204_v56  ;;  %v18600_v8 = vcombine.high %v1216_v49, %v1228_v7  ;;  %v234_v56 = vld [vmem:[#allocation5 + $0x418] sm:$0xff] }
 0x582   :  { %16225 = vmatprep.subr.bf16.mxu0 %v20458_v17  ;;  %v18599_v17 = vcombine.low %v1216_v49, %v1228_v7  ;;  %v258_v49 = vld [vmem:[#allocation5 + $0x4d8] sm:$0xff] }
 0x583   :  { %v270_v7 = vld [vmem:[#allocation5 + $0x538] sm:$0xff] }
 0x584   :  { %8405 = vmatpush1.bf16.msra.mxu1 %v18455_v62  ;;  %v18624_v62 = vcombine.high %v1240_v23, %v1252_v31  ;;  %v17644_v31 = vcombine.high %v258_v49, %v270_v7 }
 0x585   :  { %8406 = vmatprep.subr.bf16.mxu1 %v18480_v12  ;;  %16226 = vmatpush1.bf16.msra.mxu0 %v20456_v14  ;;  %v114_v12 = vld [vmem:[#allocation5 + $0x58] sm:$0xff] }
 0x586   :  { %16227 = vmatprep.subr.bf16.mxu0 %v20461_v22  ;;  %v126_v14 = vld [vmem:[#allocation5 + $0xb8] sm:$0xff] }
 0x587   :  { %v17500_v57 = vcombine.high %v114_v12, %v126_v14  ;;  %v138_v22 = vld [vmem:[#allocation5 + $0x118] sm:$0xff] }
 0x588   :  { %8407 = vmatpush1.bf16.msra.mxu1 %v18479_v41  ;;  %v150_v41 = vld [vmem:[#allocation5 + $0x178] sm:$0xff] }
 0x589   :  { %8408 = vmatprep.subr.bf16.mxu1 %v18504_v52  ;;  %16228 = vmatpush1.bf16.msra.mxu0 %v20459_v34  ;;  %v17499_v52 = vcombine.low %v114_v12, %v126_v14  ;;  %v17524_v34 = vcombine.high %v138_v22, %v150_v41  ;;  %v294_v12 = vld [vmem:[#allocation5 + $0x5f8] sm:$0xff] }
 0x58a   :  { %16229 = vmatprep.subr.bf16.mxu0 %v20464_v21  ;;  %v17523_v21 = vcombine.low %v138_v22, %v150_v41  ;;  %v17643_v41 = vcombine.low %v258_v49, %v270_v7 }
 0x58c   :  { %8409 = vmatpush1.bf16.msra.mxu1 %v18503_v33  ;;  %v17548_v33 = vcombine.high %v162_v5, %v174_v37 }
 0x58d   :  { %8410 = vmatprep.subr.bf16.mxu1 %v18528_v11  ;;  %16230 = vmatpush1.bf16.msra.mxu0 %v20462_v55  ;;  %v186_v11 = vld [vmem:[#allocation5 + $0x298] sm:$0xff] }
 0x58e   :  { %16242 = vmatprep.subr.bf16.mxu0 %v20467_v35  ;;  %v198_v55 = vld [vmem:[#allocation5 + $0x2f8] sm:$0xff] }
 0x58f   :  { %v17572_v29 = vcombine.high %v186_v11, %v198_v55  ;;  %v210_v35 = vld [vmem:[#allocation5 + $0x358] sm:$0xff] }
 0x590   :  { %8411 = vmatpush1.bf16.msra.mxu1 %v18527_v40  ;;  %v222_v40 = vld [vmem:[#allocation5 + $0x3b8] sm:$0xff] }
 0x591   :  { %8412 = vmatprep.subr.bf16.mxu1 %v18552_v47  ;;  %v17571_v47 = vcombine.low %v186_v11, %v198_v55  ;;  %v17596_v32 = vcombine.high %v210_v35, %v222_v40  ;;  %v318_v11 = vld [vmem:[#allocation5 + $0x6b8] sm:$0xff] }
 0x594   :  { %8413 = vmatpush1.bf16.msra.mxu1 %v18551_v20  ;;  %v246_v20 = vld [vmem:[#allocation5 + $0x478] sm:$0xff] }
 0x595   :  { %8414 = vmatprep.subr.bf16.mxu1 %v18576_v6  ;;  %v17595_v6 = vcombine.low %v210_v35, %v222_v40  ;;  %v17619_v23 = vcombine.low %v234_v56, %v246_v20  ;;  %v330_v40 = vld [vmem:[#allocation5 + $0x718] sm:$0xff] }
 0x598   :  { %8415 = vmatpush1.bf16.msra.mxu1 %v18575_v48  ;;  %v1320_v48 = vrot.slane %v22479_v54, %v22420_v36 }
 0x599   :  { %8416 = vmatprep.subr.bf16.mxu1 %v18600_v8  ;;  %v1324_v8 = vrot.slane %v22479_v54, %v22423_v46  ;;  %v306_v54 = vld [vmem:[#allocation5 + $0x658] sm:$0xff] }
 0x59a   :  { %v17692_v35 = vcombine.high %v306_v54, %v318_v11 }
 0x59c   :  { %8417 = vmatpush1.bf16.msra.mxu1 %v18599_v17 }
 0x59d   :  { %8418 = vmatprep.subr.bf16.mxu1 %v18624_v62  ;;  %v282_v62 = vld [vmem:[#allocation5 + $0x598] sm:$0xff] }
 0x59e   :  { %v17668_v37 = vcombine.high %v282_v62, %v294_v12 }
 0x5a0   :  { %8419 = vmatpush1.bf16.msra.mxu1 %v18623_v63 }
 0x5a1   :  { %8560 = vmatprep.subr.bf16.mxu1 %v17500_v57 }
 0x5a3   :  { %8421 = vmatmul.mubr.bf16.vlgmr.msra.gmra.mrb[24].mxu1 %v22178_v44 }
 0x5a4   :  { %8561 = vmatpush1.bf16.msra.mxu1 %v17499_v52  ;;  %8592 = vmatprep.mubr.bf16.mxu1 %v22158_v58  ;;  %v17620_v58 = vcombine.high %v234_v56, %v246_v20  ;;  %v354_v20 = vld [vmem:[#allocation5 + $0x7d8] sm:$0xff] }
 0x5a5   :  { %8562 = vmatprep.subr.bf16.mxu1 %v17524_v34 }
 0x5a8   :  { %8563 = vmatpush1.bf16.msra.mxu1 %v17523_v21 }
 0x5a9   :  { %8564 = vmatprep.subr.bf16.mxu1 %v17548_v33 }
 0x5ac   :  { %8565 = vmatpush1.bf16.msra.mxu1 %v17547_v28 }
 0x5ad   :  { %8566 = vmatprep.subr.bf16.mxu1 %v17572_v29  ;;  %v17667_v29 = vcombine.low %v282_v62, %v294_v12 }
 0x5b0   :  { %8567 = vmatpush1.bf16.msra.mxu1 %v17571_v47  ;;  %v342_v47 = vld [vmem:[#allocation5 + $0x778] sm:$0xff] }
 0x5b1   :  { %8568 = vmatprep.subr.bf16.mxu1 %v17596_v32  ;;  %v17691_v32 = vcombine.low %v306_v54, %v318_v11  ;;  %v17716_v56 = vcombine.high %v330_v40, %v342_v47 }
 0x5b4   :  { %8569 = vmatpush1.bf16.msra.mxu1 %v17595_v6  ;;  %v366_v6 = vld [vmem:[#allocation5 + $0x838] sm:$0xff] }
 0x5b5   :  { %8570 = vmatprep.subr.bf16.mxu1 %v17620_v58  ;;  %v17715_v58 = vcombine.low %v330_v40, %v342_v47  ;;  %v17740_v7 = vcombine.high %v354_v20, %v366_v6  ;;  %v414_v40 = vld [vmem:[#allocation5 + $0x9b8] sm:$0xff] }
 0x5b6   :  { %v8164_v17 = vpop.f32.mrb[20].mxu1 }
 0x5b7   :  { %v19809_v14 = vadd.f32 %v8164_v17, %v1320_v48  ;;  %v8166_v63 = vpop.f32.mrb[21].mxu1 }
 0x5b8   :  { %v19810_v57 = vadd.f32 %v8166_v63, %v1324_v8  ;;  %v8168_v22 = vpop.f32.mrb[22].mxu1  ;;  %8571 = vmatpush1.bf16.msra.mxu1 %v17619_v23  ;;  %v378_v23 = vld [vmem:[#allocation5 + $0x898] sm:$0xff] }
 0x5b9   :  { %v8752_v52 = vmul.f32 0.70710677, %v19809_v14  ;;  %v19811_v34 = vadd.f32 %v8168_v22, %v1320_v48  ;;  %v8170_v5 = vpop.f32.mrb[23].mxu1  ;;  %8572 = vmatprep.subr.bf16.mxu1 %v17644_v31  ;;  %v390_v31 = vld [vmem:[#allocation5 + $0x8f8] sm:$0xff]  ;;  %v8703_v63 = vmul.f32 0.5, %v19809_v14 }
 0x5ba   :  { %v8753_v21 = vmul.f32 0.70710677, %v19810_v57  ;;  %v19812_v33 = vadd.f32 %v8170_v5, %v1324_v8  ;;  %v8704_v5 = vmul.f32 0.5, %v19810_v57  ;;  %v17764_v54 = vcombine.high %v378_v23, %v390_v31  ;;  %v20470_v57 = vld [vmem:[#allocation8 + $0x1834] ss:$24 sps:$4 sm:$0xff]  }
 0x5bb   :  { %21881 = verf.f32 %v8752_v52  ;;  %v8776_v55 = vmul.f32 0.70710677, %v19811_v34  ;;  %v8727_v22 = vmul.f32 0.5, %v19811_v34  ;;  %v17739_v52 = vcombine.low %v354_v20, %v366_v6  ;;  %v20465_v34 = vld [vmem:[#allocation8 + $0x1800] ss:$24 sps:$4 sm:$0xff]  }
 0x5bc   :  { %21883 = verf.f32 %v8753_v21  ;;  %v8777_v28 = vmul.f32 0.70710677, %v19812_v33  ;;  %8573 = vmatpush1.bf16.msra.mxu1 %v17643_v41  ;;  %v438_v20 = vld [vmem:[#allocation5 + $0xa78] sm:$0xff] }
 0x5bd   :  { %21885 = verf.f32 %v8776_v55  ;;  %8574 = vmatprep.subr.bf16.mxu1 %v17668_v37  ;;  %v8728_v37 = vmul.f32 0.5, %v19812_v33  ;;  %v426_v33 = vld [vmem:[#allocation5 + $0xa18] sm:$0xff] }
 0x5be   :  { %21887 = verf.f32 %v8777_v28 }
 0x5c0   :  { %8575 = vmatpush1.bf16.msra.mxu1 %v17667_v29 }
 0x5c1   :  { %8576 = vmatprep.subr.bf16.mxu1 %v17692_v35  ;;  %v402_v35 = vld [vmem:[#allocation5 + $0x958] sm:$0xff] }
 0x5c2   :  { %v17787_v6 = vcombine.low %v402_v35, %v414_v40 }
 0x5c4   :  { %8577 = vmatpush1.bf16.msra.mxu1 %v17691_v32  ;;  %v17763_v32 = vcombine.low %v378_v23, %v390_v31  ;;  %v17811_v23 = vcombine.low %v426_v33, %v438_v20  ;;  %v20471_v31 = vld [vmem:[#allocation8 + $0x1860] ss:$24 sps:$4 sm:$0xff]  }
 0x5c5   :  { %v21882_v49 = vpop.eup %21881  ;;  %8578 = vmatprep.subr.bf16.mxu1 %v17716_v56  ;;  %v17788_v56 = vcombine.high %v402_v35, %v414_v40  ;;  %v534_v35 = vld [vmem:[#allocation5 + $0xd78] sm:$0xff] }
 0x5c6   :  { %v21884_v48 = vpop.eup %21883  ;;  %v8848_v8 = vadd.f32 1.0, %v21882_v49  ;;  %v17812_v49 = vcombine.high %v426_v33, %v438_v20  ;;  %v558_v33 = vld [vmem:[#allocation5 + $0xe38] sm:$0xff] }
 0x5c7   :  { %v21886_v17 = vpop.eup %21885  ;;  %v8849_v62 = vadd.f32 1.0, %v21884_v48  ;;  %v450_v48 = vld [vmem:[#allocation5 + $0xad8] sm:$0xff] }
 0x5c8   :  { %v21888_v12 = vpop.eup %21887  ;;  %v8872_v41 = vadd.f32 1.0, %v21886_v17  ;;  %8579 = vmatpush1.bf16.msra.mxu1 %v17715_v58  ;;  %v8896_v11 = vmul.f32 %v8848_v8, %v8703_v63  ;;  %v20468_v58 = vld [vmem:[#allocation8 + $0x1830] ss:$24 sps:$4 sm:$0xff]   ;;  %v462_v8 = vld [vmem:[#allocation5 + $0xb38] sm:$0xff] }
 0x5c9   :  { %v8873_v21 = vadd.f32 1.0, %v21888_v12  ;;  %8580 = vmatprep.subr.bf16.mxu1 %v17740_v7  ;;  %v8897_v28 = vmul.f32 %v8849_v62, %v8704_v5  ;;  %v20473_v7 = vld [vmem:[#allocation8 + $0x1864] ss:$24 sps:$4 sm:$0xff]   ;;  %v17836_v17 = vcombine.high %v450_v48, %v462_v8  ;;  %v20476_v62 = vld [vmem:[#allocation8 + $0x1894] ss:$24 sps:$4 sm:$0xff]  }
 0x5ca   :  { %v8920_v55 = vmul.f32 %v8872_v41, %v8727_v22  ;;  %v474_v12 = vld [vmem:[#allocation5 + $0xb98] sm:$0xff]  ;;  %v17835_v22 = vcombine.low %v450_v48, %v462_v8  ;;  %v20474_v41 = vld [vmem:[#allocation8 + $0x1890] ss:$24 sps:$4 sm:$0xff]  }
 0x5cb   :  { %v8921_v29 = vmul.f32 %v8873_v21, %v8728_v37  ;;  %v486_v63 = vld [vmem:[#allocation5 + $0xbf8] sm:$0xff] }
 0x5cc   :  { %v22503_v47 = vpack.c.bf16 %v8920_v55, %v8896_v11  ;;  %8581 = vmatpush1.bf16.msra.mxu1 %v17739_v52  ;;  %v17860_v52 = vcombine.high %v474_v12, %v486_v63  ;;  %v20479_v5 = vld [vmem:[#allocation8 + $0x18c4] ss:$24 sps:$4 sm:$0xff]   ;;  %v20477_v11 = vld [vmem:[#allocation8 + $0x18c0] ss:$24 sps:$4 sm:$0xff]  }
 0x5cd   :  { %8582 = vmatprep.subr.bf16.mxu1 %v17764_v54  ;;  %v22505_v14 = vpack.c.bf16 %v8921_v29, %v8897_v28  ;;  %v498_v37 = vld [vmem:[#allocation5 + $0xc58] sm:$0xff]  ;;  %v17859_v54 = vcombine.low %v474_v12, %v486_v63  ;;  %v20482_v28 = vld [vmem:[#allocation8 + $0x18f4] ss:$24 sps:$4 sm:$0xff]  }
 0x5ce   :  { %v510_v21 = vld [vmem:[#allocation5 + $0xcb8] sm:$0xff] }
 0x5cf   :  { %16231 = vmatprep.mubr.bf16.mxu0 %v22505_v14  ;;  %v17884_v55 = vcombine.high %v498_v37, %v510_v21  ;;  %v522_v29 = vld [vmem:[#allocation5 + $0xd18] sm:$0xff]  ;;  %v17883_v40 = vcombine.low %v498_v37, %v510_v21  ;;  %v20492_v37 = vld [vmem:[#allocation8 + $0x19b0] ss:$24 sps:$4 sm:$0xff]  }
 0x5d0   :  { %8583 = vmatpush1.bf16.msra.mxu1 %v17763_v32  ;;  %16232 = vmatmul.mubr.bf16.vlgmr.msra.gmra.mrb[16].mxu0 %v22503_v47  ;;  %v20480_v32 = vld [vmem:[#allocation8 + $0x18f0] ss:$24 sps:$4 sm:$0xff]   ;;  %v17907_v20 = vcombine.low %v522_v29, %v534_v35  ;;  %v582_v48 = vld [vmem:[#allocation5 + $0xef8] sm:$0xff] }
 0x5d1   :  { %16243 = vmatpush1.bf16.msra.mxu0 %v20465_v34  ;;  %16274 = vmatprep.mubr.bf16.mxu0 %v22406_v27  ;;  %v17908_v34 = vcombine.high %v522_v29, %v534_v35  ;;  %v20489_v12 = vld [vmem:[#allocation8 + $0x1980] ss:$24 sps:$4 sm:$0xff]  }
 0x5d2   :  { %8584 = vmatprep.subr.bf16.mxu1 %v17788_v56  ;;  %16244 = vmatprep.subr.bf16.mxu0 %v20470_v57  ;;  %v20485_v56 = vld [vmem:[#allocation8 + $0x1924] ss:$24 sps:$4 sm:$0xff]   ;;  %v20495_v29 = vld [vmem:[#allocation8 + $0x19e0] ss:$24 sps:$4 sm:$0xff]  }
 0x5d3   :  { %v546_v57 = vld [vmem:[#allocation5 + $0xdd8] sm:$0xff] }
 0x5d4   :  { %8585 = vmatpush1.bf16.msra.mxu1 %v17787_v6  ;;  %v20483_v6 = vld [vmem:[#allocation8 + $0x1920] ss:$24 sps:$4 sm:$0xff]   ;;  %v17931_v8 = vcombine.low %v546_v57, %v558_v33 }
 0x5d5   :  { %16245 = vmatpush1.bf16.msra.mxu0 %v20468_v58  ;;  %8586 = vmatprep.subr.bf16.mxu1 %v17812_v49  ;;  %v17932_v58 = vcombine.high %v546_v57, %v558_v33  ;;  %v20488_v49 = vld [vmem:[#allocation8 + $0x1954] ss:$24 sps:$4 sm:$0xff]   ;;  %v20498_v57 = vld [vmem:[#allocation8 + $0x1a10] ss:$24 sps:$4 sm:$0xff]  }
 0x5d6   :  { %16246 = vmatprep.subr.bf16.mxu0 %v20473_v7  ;;  %v570_v7 = vld [vmem:[#allocation5 + $0xe98] sm:$0xff] }
 0x5d8   :  { %8587 = vmatpush1.bf16.msra.mxu1 %v17811_v23  ;;  %v20486_v23 = vld [vmem:[#allocation8 + $0x1950] ss:$24 sps:$4 sm:$0xff]  }
 0x5d9   :  { %16247 = vmatpush1.bf16.msra.mxu0 %v20471_v31  ;;  %8588 = vmatprep.subr.bf16.mxu1 %v17836_v17  ;;  %v17956_v31 = vcombine.high %v570_v7, %v582_v48  ;;  %v594_v17 = vld [vmem:[#allocation5 + $0xf58] sm:$0xff] }
 0x5da   :  { %16248 = vmatprep.subr.bf16.mxu0 %v20476_v62  ;;  %v606_v62 = vld [vmem:[#allocation5 + $0xfb8] sm:$0xff] }
 0x5db   :  { %v17980_v63 = vcombine.high %v594_v17, %v606_v62 }
 0x5dc   :  { %8589 = vmatpush1.bf16.msra.mxu1 %v17835_v22  ;;  %v20494_v22 = vld [vmem:[#allocation8 + $0x19b4] ss:$24 sps:$4 sm:$0xff]  }
 0x5dd   :  { %16249 = vmatpush1.bf16.msra.mxu0 %v20474_v41  ;;  %8590 = vmatprep.subr.bf16.mxu1 %v17860_v52  ;;  %v618_v41 = vld [vmem:[#allocation5 + $0x1018] sm:$0xff] }
 0x5de   :  { %16250 = vmatprep.subr.bf16.mxu0 %v20479_v5  ;;  %v630_v52 = vld [vmem:[#allocation5 + $0x1078] sm:$0xff]  ;;  %v17979_v5 = vcombine.low %v594_v17, %v606_v62  ;;  %v20504_v17 = vld [vmem:[#allocation8 + $0x1a70] ss:$24 sps:$4 sm:$0xff]  }
 0x5df   :  { %v18004_v21 = vcombine.high %v618_v41, %v630_v52 }
 0x5e0   :  { %8591 = vmatpush1.bf16.msra.mxu1 %v17859_v54  ;;  %v20497_v54 = vld [vmem:[#allocation8 + $0x19e4] ss:$24 sps:$4 sm:$0xff]  }
 0x5e1   :  { %16251 = vmatpush1.bf16.msra.mxu0 %v20477_v11  ;;  %8603 = vmatprep.subr.bf16.mxu1 %v17884_v55  ;;  %v642_v11 = vld [vmem:[#allocation5 + $0x10d8] sm:$0xff] }
 0x5e2   :  { %16252 = vmatprep.subr.bf16.mxu0 %v20482_v28  ;;  %v654_v55 = vld [vmem:[#allocation5 + $0x1138] sm:$0xff]  ;;  %v18003_v28 = vcombine.low %v618_v41, %v630_v52 }
 0x5e3   :  { %8593 = vmatmul.mubr.bf16.vlgmr.msra.gmra.mrb[28].mxu1 %v22162_v15  ;;  %v20491_v15 = vld [vmem:[#allocation8 + $0x1984] ss:$24 sps:$4 sm:$0xff]   ;;  %v18028_v35 = vcombine.high %v642_v11, %v654_v55  ;;  %v20507_v41 = vld [vmem:[#allocation8 + $0x1aa0] ss:$24 sps:$4 sm:$0xff]  }
 0x5e4   :  { %8604 = vmatpush1.bf16.msra.mxu1 %v17883_v40  ;;  %8635 = vmatprep.mubr.bf16.mxu1 %v22164_v25  ;;  %v17955_v25 = vcombine.low %v570_v7, %v582_v48  ;;  %v20500_v40 = vld [vmem:[#allocation8 + $0x1a14] ss:$24 sps:$4 sm:$0xff]   ;;  %v20501_v7 = vld [vmem:[#allocation8 + $0x1a40] ss:$24 sps:$4 sm:$0xff]  }
 0x5e5   :  { %16253 = vmatpush1.bf16.msra.mxu0 %v20480_v32  ;;  %8605 = vmatprep.subr.bf16.mxu1 %v17908_v34  ;;  %v666_v32 = vld [vmem:[#allocation5 + $0x1198] sm:$0xff] }
 0x5e6   :  { %16254 = vmatprep.subr.bf16.mxu0 %v20485_v56  ;;  %v678_v34 = vld [vmem:[#allocation5 + $0x11f8] sm:$0xff]  ;;  %v18027_v56 = vcombine.low %v642_v11, %v654_v55  ;;  %v20510_v11 = vld [vmem:[#allocation8 + $0x1ad0] ss:$24 sps:$4 sm:$0xff]  }
 0x5e7   :  { %v18052_v33 = vcombine.high %v666_v32, %v678_v34 }
 0x5e8   :  { %8606 = vmatpush1.bf16.msra.mxu1 %v17907_v20  ;;  %v20503_v20 = vld [vmem:[#allocation8 + $0x1a44] ss:$24 sps:$4 sm:$0xff]  }
 0x5e9   :  { %16255 = vmatpush1.bf16.msra.mxu0 %v20483_v6  ;;  %8607 = vmatprep.subr.bf16.mxu1 %v17932_v58  ;;  %v690_v6 = vld [vmem:[#allocation5 + $0x1258] sm:$0xff] }
 0x5ea   :  { %16256 = vmatprep.subr.bf16.mxu0 %v20488_v49  ;;  %v702_v58 = vld [vmem:[#allocation5 + $0x12b8] sm:$0xff]  ;;  %v18051_v49 = vcombine.low %v666_v32, %v678_v34 }
 0x5eb   :  { %v18076_v48 = vcombine.high %v690_v6, %v702_v58  ;;  %v20513_v34 = vld [vmem:[#allocation8 + $0x1b00] ss:$24 sps:$4 sm:$0xff]  }
 0x5ec   :  { %8608 = vmatpush1.bf16.msra.mxu1 %v17931_v8  ;;  %v20506_v8 = vld [vmem:[#allocation8 + $0x1a74] ss:$24 sps:$4 sm:$0xff]  }
 0x5ed   :  { %16257 = vmatpush1.bf16.msra.mxu0 %v20486_v23  ;;  %8609 = vmatprep.subr.bf16.mxu1 %v17956_v31  ;;  %v714_v23 = vld [vmem:[#allocation5 + $0x1318] sm:$0xff] }
 0x5ee   :  { %16258 = vmatprep.subr.bf16.mxu0 %v20491_v15  ;;  %v726_v31 = vld [vmem:[#allocation5 + $0x1378] sm:$0xff]  ;;  %v18075_v15 = vcombine.low %v690_v6, %v702_v58  ;;  %v20516_v58 = vld [vmem:[#allocation8 + $0x1b30] ss:$24 sps:$4 sm:$0xff]  }
 0x5ef   :  { %v18100_v62 = vcombine.high %v714_v23, %v726_v31 }
 0x5f0   :  { %8610 = vmatpush1.bf16.msra.mxu1 %v17955_v25  ;;  %v20509_v25 = vld [vmem:[#allocation8 + $0x1aa4] ss:$24 sps:$4 sm:$0xff]  }
 0x5f1   :  { %16259 = vmatpush1.bf16.msra.mxu0 %v20489_v12  ;;  %8611 = vmatprep.subr.bf16.mxu1 %v17980_v63  ;;  %v738_v12 = vld [vmem:[#allocation5 + $0x13d8] sm:$0xff] }
 0x5f2   :  { %16260 = vmatprep.subr.bf16.mxu0 %v20494_v22  ;;  %v750_v63 = vld [vmem:[#allocation5 + $0x1438] sm:$0xff]  ;;  %v18099_v22 = vcombine.low %v714_v23, %v726_v31 }
 0x5f3   :  { %v18124_v52 = vcombine.high %v738_v12, %v750_v63  ;;  %v20519_v31 = vld [vmem:[#allocation8 + $0x1b60] ss:$24 sps:$4 sm:$0xff]  }
 0x5f4   :  { %8612 = vmatpush1.bf16.msra.mxu1 %v17979_v5  ;;  %v20512_v5 = vld [vmem:[#allocation8 + $0x1ad4] ss:$24 sps:$4 sm:$0xff]  }
 0x5f5   :  { %16261 = vmatpush1.bf16.msra.mxu0 %v20492_v37  ;;  %8613 = vmatprep.subr.bf16.mxu1 %v18004_v21  ;;  %v762_v37 = vld [vmem:[#allocation5 + $0x1498] sm:$0xff] }
 0x5f6   :  { %16262 = vmatprep.subr.bf16.mxu0 %v20497_v54  ;;  %v774_v21 = vld [vmem:[#allocation5 + $0x14f8] sm:$0xff]  ;;  %v18123_v54 = vcombine.low %v738_v12, %v750_v63  ;;  %v20522_v63 = vld [vmem:[#allocation8 + $0x1b90] ss:$24 sps:$4 sm:$0xff]  }
 0x5f7   :  { %v18148_v55 = vcombine.high %v762_v37, %v774_v21 }
 0x5f8   :  { %8614 = vmatpush1.bf16.msra.mxu1 %v18003_v28  ;;  %v786_v28 = vld [vmem:[#allocation5 + $0x1558] sm:$0xff] }
 0x5f9   :  { %16263 = vmatpush1.bf16.msra.mxu0 %v20495_v29  ;;  %8615 = vmatprep.subr.bf16.mxu1 %v18028_v35  ;;  %v798_v29 = vld [vmem:[#allocation5 + $0x15b8] sm:$0xff] }
 0x5fa   :  { %16264 = vmatprep.subr.bf16.mxu0 %v20500_v40  ;;  %v20515_v35 = vld [vmem:[#allocation8 + $0x1b04] ss:$24 sps:$4 sm:$0xff]   ;;  %v18147_v40 = vcombine.low %v762_v37, %v774_v21  ;;  %v18172_v32 = vcombine.high %v786_v28, %v798_v29  ;;  %v20525_v21 = vld [vmem:[#allocation8 + $0x1bc0] ss:$24 sps:$4 sm:$0xff]  }
 0x5fc   :  { %8616 = vmatpush1.bf16.msra.mxu1 %v18027_v56  ;;  %v810_v56 = vld [vmem:[#allocation5 + $0x1618] sm:$0xff] }
 0x5fd   :  { %16265 = vmatpush1.bf16.msra.mxu0 %v20498_v57  ;;  %8617 = vmatprep.subr.bf16.mxu1 %v18052_v33  ;;  %v822_v57 = vld [vmem:[#allocation5 + $0x1678] sm:$0xff]  ;;  %v20518_v33 = vld [vmem:[#allocation8 + $0x1b34] ss:$24 sps:$4 sm:$0xff]  }
 0x5fe   :  { %16266 = vmatprep.subr.bf16.mxu0 %v20503_v20  ;;  %v18171_v20 = vcombine.low %v786_v28, %v798_v29  ;;  %v18196_v6 = vcombine.high %v810_v56, %v822_v57 }
 0x600   :  { %8618 = vmatpush1.bf16.msra.mxu1 %v18051_v49  ;;  %v834_v49 = vld [vmem:[#allocation5 + $0x16d8] sm:$0xff] }
 0x601   :  { %16267 = vmatpush1.bf16.msra.mxu0 %v20501_v7  ;;  %8619 = vmatprep.subr.bf16.mxu1 %v18076_v48  ;;  %v846_v7 = vld [vmem:[#allocation5 + $0x1738] sm:$0xff] }
 0x602   :  { %16268 = vmatprep.subr.bf16.mxu0 %v20506_v8  ;;  %v20521_v48 = vld [vmem:[#allocation8 + $0x1b64] ss:$24 sps:$4 sm:$0xff]   ;;  %v18195_v8 = vcombine.low %v810_v56, %v822_v57  ;;  %v18220_v23 = vcombine.high %v834_v49, %v846_v7 }
 0x604   :  { %8620 = vmatpush1.bf16.msra.mxu1 %v18075_v15  ;;  %v858_v15 = vld [vmem:[#allocation5 + $0x1798] sm:$0xff] }
 0x605   :  { %16269 = vmatpush1.bf16.msra.mxu0 %v20504_v17  ;;  %8621 = vmatprep.subr.bf16.mxu1 %v18100_v62  ;;  %v870_v17 = vld [vmem:[#allocation5 + $0x17f8] sm:$0xff]  ;;  %v20524_v62 = vld [vmem:[#allocation8 + $0x1b94] ss:$24 sps:$4 sm:$0xff]  }
 0x606   :  { %16270 = vmatprep.subr.bf16.mxu0 %v20509_v25  ;;  %v18219_v25 = vcombine.low %v834_v49, %v846_v7  ;;  %v18244_v12 = vcombine.high %v858_v15, %v870_v17 }
 0x608   :  { %8622 = vmatpush1.bf16.msra.mxu1 %v18099_v22  ;;  %v882_v22 = vld [vmem:[#allocation5 + $0x1858] sm:$0xff] }
 0x609   :  { %16271 = vmatpush1.bf16.msra.mxu0 %v20507_v41  ;;  %8623 = vmatprep.subr.bf16.mxu1 %v18124_v52  ;;  %v894_v41 = vld [vmem:[#allocation5 + $0x18b8] sm:$0xff] }
 0x60a   :  { %16272 = vmatprep.subr.bf16.mxu0 %v20512_v5  ;;  %v20527_v52 = vld [vmem:[#allocation8 + $0x1bc4] ss:$24 sps:$4 sm:$0xff]   ;;  %v18243_v5 = vcombine.low %v858_v15, %v870_v17  ;;  %v18268_v37 = vcombine.high %v882_v22, %v894_v41  ;;  %v18267_v28 = vcombine.low %v882_v22, %v894_v41  ;;  %v20546_v15 = vld [vmem:[#allocation8 + $0x1c80] ss:$24 sps:$4 sm:$0xff]   ;;  %v20552_v22 = vld [vmem:[#allocation8 + $0x1cb0] ss:$24 sps:$4 sm:$0xff]  }
 0x60b   :  { %v1002_v17 = vld [vmem:[#allocation5 + $0x1c18] sm:$0xff] }
 0x60c   :  { %8624 = vmatpush1.bf16.msra.mxu1 %v18123_v54  ;;  %v906_v54 = vld [vmem:[#allocation5 + $0x1918] sm:$0xff] }
 0x60d   :  { %16273 = vmatpush1.bf16.msra.mxu0 %v20510_v11  ;;  %8625 = vmatprep.subr.bf16.mxu1 %v18148_v55  ;;  %v918_v11 = vld [vmem:[#allocation5 + $0x1978] sm:$0xff]  ;;  %v20530_v55 = vld [vmem:[#allocation8 + $0x1bf4] ss:$24 sps:$4 sm:$0xff]  }
 0x60e   :  { %16285 = vmatprep.subr.bf16.mxu0 %v20515_v35  ;;  %v18292_v29 = vcombine.high %v906_v54, %v918_v11  ;;  %v20528_v35 = vld [vmem:[#allocation8 + $0x1bf0] ss:$24 sps:$4 sm:$0xff]   ;;  %v18291_v56 = vcombine.low %v906_v54, %v918_v11  ;;  %v1026_v41 = vld [vmem:[#allocation5 + $0x1cd8] sm:$0xff] }
 0x60f   :  { %v20558_v54 = vld [vmem:[#allocation8 + $0x1ce0] ss:$24 sps:$4 sm:$0xff]  }
 0x610   :  { %16275 = vmatmul.mubr.bf16.vlgmr.msra.gmra.mrb[16].mxu0 %v22404_v53  ;;  %8626 = vmatpush1.bf16.msra.mxu1 %v18147_v40  ;;  %v930_v40 = vld [vmem:[#allocation5 + $0x19d8] sm:$0xff] }
 0x611   :  { %8627 = vmatprep.subr.bf16.mxu1 %v18172_v32  ;;  %16286 = vmatpush1.bf16.msra.mxu0 %v20513_v34  ;;  %v942_v32 = vld [vmem:[#allocation5 + $0x1a38] sm:$0xff] }
 0x612   :  { %16287 = vmatprep.subr.bf16.mxu0 %v20518_v33  ;;  %v20536_v34 = vld [vmem:[#allocation8 + $0x1c24] ss:$24 sps:$4 sm:$0xff]   ;;  %v18316_v57 = vcombine.high %v930_v40, %v942_v32  ;;  %v20534_v33 = vld [vmem:[#allocation8 + $0x1c20] ss:$24 sps:$4 sm:$0xff]   ;;  %v18315_v49 = vcombine.low %v930_v40, %v942_v32  ;;  %v20564_v40 = vld [vmem:[#allocation8 + $0x1d10] ss:$24 sps:$4 sm:$0xff]  }
 0x613   :  { %v1050_v11 = vld [vmem:[#allocation5 + $0x1d98] sm:$0xff] }
 0x614   :  { %8628 = vmatpush1.bf16.msra.mxu1 %v18171_v20  ;;  %v954_v20 = vld [vmem:[#allocation5 + $0x1a98] sm:$0xff] }
 0x615   :  { %8629 = vmatprep.subr.bf16.mxu1 %v18196_v6  ;;  %16288 = vmatpush1.bf16.msra.mxu0 %v20516_v58  ;;  %v966_v6 = vld [vmem:[#allocation5 + $0x1af8] sm:$0xff]  ;;  %v20542_v58 = vld [vmem:[#allocation8 + $0x1c54] ss:$24 sps:$4 sm:$0xff]  }
 0x616   :  { %16289 = vmatprep.subr.bf16.mxu0 %v20521_v48  ;;  %v18340_v7 = vcombine.high %v954_v20, %v966_v6  ;;  %v20540_v48 = vld [vmem:[#allocation8 + $0x1c50] ss:$24 sps:$4 sm:$0xff]   ;;  %v1074_v32 = vld [vmem:[#allocation5 + $0x1e58] sm:$0xff] }
 0x618   :  { %8630 = vmatpush1.bf16.msra.mxu1 %v18195_v8  ;;  %v978_v8 = vld [vmem:[#allocation5 + $0x1b58] sm:$0xff] }
 0x619   :  { %8631 = vmatprep.subr.bf16.mxu1 %v18220_v23  ;;  %16290 = vmatpush1.bf16.msra.mxu0 %v20519_v31  ;;  %v20548_v23 = vld [vmem:[#allocation8 + $0x1c84] ss:$24 sps:$4 sm:$0xff]  }
 0x61a   :  { %16291 = vmatprep.subr.bf16.mxu0 %v20524_v62  ;;  %v1014_v62 = vld [vmem:[#allocation5 + $0x1c78] sm:$0xff] }
 0x61c   :  { %8632 = vmatpush1.bf16.msra.mxu1 %v18219_v25  ;;  %v20554_v25 = vld [vmem:[#allocation8 + $0x1cb4] ss:$24 sps:$4 sm:$0xff]  }
 0x61d   :  { %8633 = vmatprep.subr.bf16.mxu1 %v18244_v12  ;;  %16292 = vmatpush1.bf16.msra.mxu0 %v20522_v63  ;;  %v18388_v63 = vcombine.high %v1002_v17, %v1014_v62 }
 0x61e   :  { %16293 = vmatprep.subr.bf16.mxu0 %v20527_v52  ;;  %v1038_v52 = vld [vmem:[#allocation5 + $0x1d38] sm:$0xff] }
 0x620   :  { %8634 = vmatpush1.bf16.msra.mxu1 %v18243_v5  ;;  %v20560_v5 = vld [vmem:[#allocation8 + $0x1ce4] ss:$24 sps:$4 sm:$0xff]  }
 0x621   :  { %8646 = vmatprep.subr.bf16.mxu1 %v18268_v37  ;;  %16294 = vmatpush1.bf16.msra.mxu0 %v20525_v21  ;;  %v18387_v37 = vcombine.low %v1002_v17, %v1014_v62  ;;  %v18412_v21 = vcombine.high %v1026_v41, %v1038_v52  ;;  %v20582_v17 = vld [vmem:[#allocation8 + $0x1da0] ss:$24 sps:$4 sm:$0xff]  }
 0x622   :  { %16295 = vmatprep.subr.bf16.mxu0 %v20530_v55  ;;  %v1062_v55 = vld [vmem:[#allocation5 + $0x1df8] sm:$0xff] }
 0x623   :  { %8636 = vmatmul.mubr.bf16.vlgmr.msra.gmra.mrb[28].mxu1 %v22170_v30  ;;  %v990_v30 = vld [vmem:[#allocation5 + $0x1bb8] sm:$0xff] }
 0x624   :  { %8647 = vmatpush1.bf16.msra.mxu1 %v18267_v28  ;;  %8678 = vmatprep.mubr.bf16.mxu1 %v22172_v39  ;;  %v18339_v39 = vcombine.low %v954_v20, %v966_v6  ;;  %v18364_v31 = vcombine.high %v978_v8, %v990_v30  ;;  %v18363_v12 = vcombine.low %v978_v8, %v990_v30  ;;  %v20566_v28 = vld [vmem:[#allocation8 + $0x1d14] ss:$24 sps:$4 sm:$0xff]   ;;  %v20570_v20 = vld [vmem:[#allocation8 + $0x1d40] ss:$24 sps:$4 sm:$0xff]   ;;  %v20576_v8 = vld [vmem:[#allocation8 + $0x1d70] ss:$24 sps:$4 sm:$0xff]  }
 0x625   :  { %8648 = vmatprep.subr.bf16.mxu1 %v18292_v29  ;;  %16296 = vmatpush1.bf16.msra.mxu0 %v20528_v35  ;;  %v18411_v29 = vcombine.low %v1026_v41, %v1038_v52  ;;  %v18436_v35 = vcombine.high %v1050_v11, %v1062_v55  ;;  %v1098_v6 = vld [vmem:[#allocation5 + $0x1f18] sm:$0xff]  ;;  %v20588_v41 = vld [vmem:[#allocation8 + $0x1dd0] ss:$24 sps:$4 sm:$0xff]  }
 0x626   :  { %16297 = vmatprep.subr.bf16.mxu0 %v20536_v34  ;;  %v1086_v34 = vld [vmem:[#allocation5 + $0x1eb8] sm:$0xff] }
 0x627   :  { %v1122_v30 = vld [vmem:[#allocation5 + $0x1fd8] sm:$0xff] }
 0x628   :  { %8649 = vmatpush1.bf16.msra.mxu1 %v18291_v56  ;;  %v20572_v56 = vld [vmem:[#allocation8 + $0x1d44] ss:$24 sps:$4 sm:$0xff]  }
 0x629   :  { %8650 = vmatprep.subr.bf16.mxu1 %v18316_v57  ;;  %16298 = vmatpush1.bf16.msra.mxu0 %v20534_v33  ;;  %v18435_v57 = vcombine.low %v1050_v11, %v1062_v55  ;;  %v18460_v33 = vcombine.high %v1074_v32, %v1086_v34  ;;  %v1146_v62 = vld [vmem:[#allocation5 + $0x2098] sm:$0xff] }
 0x62a   :  { %16299 = vmatprep.subr.bf16.mxu0 %v20542_v58  ;;  %v1110_v58 = vld [vmem:[#allocation5 + $0x1f78] sm:$0xff] }
 0x62b   :  { %v1170_v52 = vld [vmem:[#allocation5 + $0x2158] sm:$0xff] }
 0x62c   :  { %8651 = vmatpush1.bf16.msra.mxu1 %v18315_v49  ;;  %v20578_v49 = vld [vmem:[#allocation8 + $0x1d74] ss:$24 sps:$4 sm:$0xff]   ;;  %v1194_v11 = vld [vmem:[#allocation5 + $0x2218] sm:$0xff] }
 0x62d   :  { %8652 = vmatprep.subr.bf16.mxu1 %v18340_v7  ;;  %16300 = vmatpush1.bf16.msra.mxu0 %v20540_v48  ;;  %v18459_v7 = vcombine.low %v1074_v32, %v1086_v34  ;;  %v18484_v48 = vcombine.high %v1098_v6, %v1110_v58  ;;  %v1206_v55 = vld [vmem:[#allocation5 + $0x2278] sm:$0xff] }
 0x62e   :  { %16301 = vmatprep.subr.bf16.mxu0 %v20548_v23  ;;  %v1134_v23 = vld [vmem:[#allocation5 + $0x2038] sm:$0xff]  ;;  %v18579_v32 = vcombine.low %v1194_v11, %v1206_v55 }
 0x630   :  { %8653 = vmatpush1.bf16.msra.mxu1 %v18339_v39  ;;  %v20584_v39 = vld [vmem:[#allocation8 + $0x1da4] ss:$24 sps:$4 sm:$0xff]  }
 0x631   :  { %8654 = vmatprep.subr.bf16.mxu1 %v18364_v31  ;;  %16302 = vmatpush1.bf16.msra.mxu0 %v20546_v15  ;;  %v18483_v31 = vcombine.low %v1098_v6, %v1110_v58  ;;  %v18508_v15 = vcombine.high %v1122_v30, %v1134_v23  ;;  %v20533_v58 = vld [vmem:[#allocation8 + $0xc] ss:$24 sps:$4 sm:$0xff]  }
 0x632   :  { %16303 = vmatprep.subr.bf16.mxu0 %v20554_v25  ;;  %v1158_v25 = vld [vmem:[#allocation5 + $0x20f8] sm:$0xff] }
 0x634   :  { %8655 = vmatpush1.bf16.msra.mxu1 %v18363_v12  ;;  %v20590_v12 = vld [vmem:[#allocation8 + $0x1dd4] ss:$24 sps:$4 sm:$0xff]  }
 0x635   :  { %8656 = vmatprep.subr.bf16.mxu1 %v18388_v63  ;;  %16304 = vmatpush1.bf16.msra.mxu0 %v20552_v22  ;;  %v18507_v63 = vcombine.low %v1122_v30, %v1134_v23  ;;  %v18532_v22 = vcombine.high %v1146_v62, %v1158_v25  ;;  %v20543_v30 = vld [vmem:[#allocation8 + $0x68] ss:$24 sps:$4 sm:$0xff]   ;;  %v20551_v23 = vld [vmem:[#allocation8 + $0x9c] ss:$24 sps:$4 sm:$0xff]  }
 0x636   :  { %16305 = vmatprep.subr.bf16.mxu0 %v20560_v5  ;;  %v1182_v5 = vld [vmem:[#allocation5 + $0x21b8] sm:$0xff] }
 0x638   :  { %8657 = vmatpush1.bf16.msra.mxu1 %v18387_v37  ;;  %v20596_v37 = vld [vmem:[#allocation8 + $0x1e04] ss:$24 sps:$4 sm:$0xff]  }
 0x639   :  { %8658 = vmatprep.subr.bf16.mxu1 %v18412_v21  ;;  %16306 = vmatpush1.bf16.msra.mxu0 %v20558_v54  ;;  %v18531_v21 = vcombine.low %v1146_v62, %v1158_v25  ;;  %v18556_v54 = vcombine.high %v1170_v52, %v1182_v5  ;;  %v22517_v62 = vld [vmem:[#allocation7 + $0x10] sm:$0xff] }
 0x63a   :  { %16307 = vmatprep.subr.bf16.mxu0 %v20566_v28  ;;  %v18555_v28 = vcombine.low %v1170_v52, %v1182_v5  ;;  %v1340_v25 = vrot.slane %v22517_v62, %v22284_v42 }
 0x63c   :  { %8659 = vmatpush1.bf16.msra.mxu1 %v18411_v29  ;;  %v18580_v29 = vcombine.high %v1194_v11, %v1206_v55 }
 0x63d   :  { %8660 = vmatprep.subr.bf16.mxu1 %v18436_v35  ;;  %16308 = vmatpush1.bf16.msra.mxu0 %v20564_v40  ;;  %v1218_v35 = vld [vmem:[#allocation5 + $0x22d8] sm:$0xff] }
 0x63e   :  { %16309 = vmatprep.subr.bf16.mxu0 %v20572_v56  ;;  %v1230_v40 = vld [vmem:[#allocation5 + $0x2338] sm:$0xff] }
 0x63f   :  { %v18604_v34 = vcombine.high %v1218_v35, %v1230_v40  ;;  %v1242_v56 = vld [vmem:[#allocation5 + $0x2398] sm:$0xff] }
 0x640   :  { %8661 = vmatpush1.bf16.msra.mxu1 %v18435_v57  ;;  %v1254_v57 = vld [vmem:[#allocation5 + $0x23f8] sm:$0xff] }
 0x641   :  { %8662 = vmatprep.subr.bf16.mxu1 %v18460_v33  ;;  %16310 = vmatpush1.bf16.msra.mxu0 %v20570_v20  ;;  %v18603_v33 = vcombine.low %v1218_v35, %v1230_v40  ;;  %v18628_v20 = vcombine.high %v1242_v56, %v1254_v57  ;;  %v18627_v6 = vcombine.low %v1242_v56, %v1254_v57  ;;  %v20581_v56 = vld [vmem:[#allocation8 + $0x18c] ss:$24 sps:$4 sm:$0xff]   ;;  %v20579_v57 = vld [vmem:[#allocation8 + $0x188] ss:$24 sps:$4 sm:$0xff]  }
 0x642   :  { %16311 = vmatprep.subr.bf16.mxu0 %v20578_v49  ;;  %v20531_v49 = vld [vmem:[#allocation8 + $0x8] ss:$24 sps:$4 sm:$0xff]  }
 0x644   :  { %8663 = vmatpush1.bf16.msra.mxu1 %v18459_v7  ;;  %v20539_v7 = vld [vmem:[#allocation8 + $0x3c] ss:$24 sps:$4 sm:$0xff]  }
 0x645   :  { %8664 = vmatprep.subr.bf16.mxu1 %v18484_v48  ;;  %16312 = vmatpush1.bf16.msra.mxu0 %v20576_v8  ;;  %v20537_v48 = vld [vmem:[#allocation8 + $0x38] ss:$24 sps:$4 sm:$0xff]   ;;  %v20545_v8 = vld [vmem:[#allocation8 + $0x6c] ss:$24 sps:$4 sm:$0xff]  }
 0x646   :  { %16313 = vmatprep.subr.bf16.mxu0 %v20584_v39  ;;  %v20549_v39 = vld [vmem:[#allocation8 + $0x98] ss:$24 sps:$4 sm:$0xff]  }
 0x648   :  { %8665 = vmatpush1.bf16.msra.mxu1 %v18483_v31  ;;  %v20557_v31 = vld [vmem:[#allocation8 + $0xcc] ss:$24 sps:$4 sm:$0xff]  }
 0x649   :  { %8666 = vmatprep.subr.bf16.mxu1 %v18508_v15  ;;  %16314 = vmatpush1.bf16.msra.mxu0 %v20582_v17  ;;  %v20555_v15 = vld [vmem:[#allocation8 + $0xc8] ss:$24 sps:$4 sm:$0xff]   ;;  %v20563_v17 = vld [vmem:[#allocation8 + $0xfc] ss:$24 sps:$4 sm:$0xff]  }
 0x64a   :  { %16315 = vmatprep.subr.bf16.mxu0 %v20590_v12  ;;  %v20561_v12 = vld [vmem:[#allocation8 + $0xf8] ss:$24 sps:$4 sm:$0xff]  }
 0x64c   :  { %8667 = vmatpush1.bf16.msra.mxu1 %v18507_v63  ;;  %v20569_v63 = vld [vmem:[#allocation8 + $0x12c] ss:$24 sps:$4 sm:$0xff]  }
 0x64d   :  { %8668 = vmatprep.subr.bf16.mxu1 %v18532_v22  ;;  %16316 = vmatpush1.bf16.msra.mxu0 %v20588_v41 }
 0x64e   :  { %16328 = vmatprep.subr.bf16.mxu0 %v20596_v37 }
 0x650   :  { %8669 = vmatpush1.bf16.msra.mxu1 %v18531_v21  ;;  %v20567_v21 = vld [vmem:[#allocation8 + $0x128] ss:$24 sps:$4 sm:$0xff]  }
 0x651   :  { %8670 = vmatprep.subr.bf16.mxu1 %v18556_v54 }
 0x654   :  { %8671 = vmatpush1.bf16.msra.mxu1 %v18555_v28  ;;  %v20575_v28 = vld [vmem:[#allocation8 + $0x15c] ss:$24 sps:$4 sm:$0xff]  }
 0x655   :  { %8672 = vmatprep.subr.bf16.mxu1 %v18580_v29 }
 0x658   :  { %8673 = vmatpush1.bf16.msra.mxu1 %v18579_v32 }
 0x659   :  { %8674 = vmatprep.subr.bf16.mxu1 %v18604_v34  ;;  %v20573_v34 = vld [vmem:[#allocation8 + $0x158] ss:$24 sps:$4 sm:$0xff]  }
 0x65c   :  { %8675 = vmatpush1.bf16.msra.mxu1 %v18603_v33  ;;  %v20587_v33 = vld [vmem:[#allocation8 + $0x1bc] ss:$24 sps:$4 sm:$0xff]  }
 0x65d   :  { %8676 = vmatprep.subr.bf16.mxu1 %v18628_v20  ;;  %v20585_v20 = vld [vmem:[#allocation8 + $0x1b8] ss:$24 sps:$4 sm:$0xff]  }
 0x660   :  { %8677 = vmatpush1.bf16.msra.mxu1 %v18627_v6 }
 0x661   :  { %16414 = vmatprep.subr.bf16.mxu1 %v20533_v58  ;;  %v20593_v58 = vld [vmem:[#allocation8 + $0x1ec] ss:$24 sps:$4 sm:$0xff]  }
 0x663   :  { %8679 = vmatmul.mubr.bf16.vlgmr.msra.gmra.mrb[28].mxu1 %v22178_v44  ;;  %v1336_v44 = vrot.slane %v22517_v62, %v22281_v38 }
 0x664   :  { %16415 = vmatpush1.bf16.msra.mxu1 %v20531_v49  ;;  %16446 = vmatprep.mubr.bf16.mxu1 %v22262_v10 }
 0x665   :  { %16416 = vmatprep.subr.bf16.mxu1 %v20539_v7 }
 0x668   :  { %16417 = vmatpush1.bf16.msra.mxu1 %v20537_v48 }
 0x669   :  { %16418 = vmatprep.subr.bf16.mxu1 %v20545_v8 }
 0x66c   :  { %16419 = vmatpush1.bf16.msra.mxu1 %v20543_v30 }
 0x66d   :  { %16420 = vmatprep.subr.bf16.mxu1 %v20551_v23 }
 0x670   :  { %16421 = vmatpush1.bf16.msra.mxu1 %v20549_v39 }
 0x671   :  { %16422 = vmatprep.subr.bf16.mxu1 %v20557_v31 }
 0x674   :  { %16423 = vmatpush1.bf16.msra.mxu1 %v20555_v15  ;;  %v20591_v15 = vld [vmem:[#allocation8 + $0x1e8] ss:$24 sps:$4 sm:$0xff]  }
 0x675   :  { %16424 = vmatprep.subr.bf16.mxu1 %v20563_v17 }
 0x676   :  { %v8422_v22 = vpop.f32.mrb[24].mxu1 }
 0x677   :  { %v19817_v41 = vadd.f32 %v8422_v22, %v1336_v44  ;;  %v8424_v52 = vpop.f32.mrb[25].mxu1 }
 0x678   :  { %v19818_v5 = vadd.f32 %v8424_v52, %v1340_v25  ;;  %v8426_v37 = vpop.f32.mrb[26].mxu1  ;;  %16425 = vmatpush1.bf16.msra.mxu1 %v20561_v12  ;;  %v20599_v12 = vld [vmem:[#allocation8 + $0x21c] ss:$24 sps:$4 sm:$0xff]  }
 0x679   :  { %v8756_v54 = vmul.f32 0.70710677, %v19817_v41  ;;  %v19819_v11 = vadd.f32 %v8426_v37, %v1336_v44  ;;  %v8428_v55 = vpop.f32.mrb[27].mxu1  ;;  %16426 = vmatprep.subr.bf16.mxu1 %v20569_v63  ;;  %v8707_v23 = vmul.f32 0.5, %v19817_v41  ;;  %v20594_v41 = vld [vmem:[#allocation8 + $0x1e00] ss:$24 sps:$4 sm:$0xff]  }
 0x67a   :  { %v8757_v29 = vmul.f32 0.70710677, %v19818_v5  ;;  %v19820_v35 = vadd.f32 %v8428_v55, %v1340_v25  ;;  %v8708_v17 = vmul.f32 0.5, %v19818_v5  ;;  %v20603_v5 = vld [vmem:[#allocation8 + $0x248] ss:$24 sps:$4 sm:$0xff]  }
 0x67b   :  { %21889 = verf.f32 %v8756_v54  ;;  %v8780_v40 = vmul.f32 0.70710677, %v19819_v11  ;;  %v8731_v39 = vmul.f32 0.5, %v19819_v11  ;;  %v20597_v54 = vld [vmem:[#allocation8 + $0x218] ss:$24 sps:$4 sm:$0xff]  }
 0x67c   :  { %21891 = verf.f32 %v8757_v29  ;;  %v8781_v32 = vmul.f32 0.70710677, %v19820_v35  ;;  %16427 = vmatpush1.bf16.msra.mxu1 %v20567_v21  ;;  %v8732_v44 = vmul.f32 0.5, %v19820_v35  ;;  %v20602_v11 = vld [vmem:[#allocation8 + $0x1e34] ss:$24 sps:$4 sm:$0xff]  }
 0x67d   :  { %21893 = verf.f32 %v8780_v40  ;;  %16428 = vmatprep.subr.bf16.mxu1 %v20575_v28  ;;  %v20605_v28 = vld [vmem:[#allocation8 + $0x24c] ss:$24 sps:$4 sm:$0xff]   ;;  %v20600_v29 = vld [vmem:[#allocation8 + $0x1e30] ss:$24 sps:$4 sm:$0xff]   ;;  %v20611_v35 = vld [vmem:[#allocation8 + $0x27c] ss:$24 sps:$4 sm:$0xff]  }
 0x67e   :  { %21895 = verf.f32 %v8781_v32  ;;  %v20608_v40 = vld [vmem:[#allocation8 + $0x1e64] ss:$24 sps:$4 sm:$0xff]   ;;  %v20609_v32 = vld [vmem:[#allocation8 + $0x278] ss:$24 sps:$4 sm:$0xff]  }
 0x680   :  { %16429 = vmatpush1.bf16.msra.mxu1 %v20573_v34  ;;  %v20606_v34 = vld [vmem:[#allocation8 + $0x1e60] ss:$24 sps:$4 sm:$0xff]  }
 0x681   :  { %16430 = vmatprep.subr.bf16.mxu1 %v20581_v56  ;;  %v20617_v56 = vld [vmem:[#allocation8 + $0x2ac] ss:$24 sps:$4 sm:$0xff]  }
 0x684   :  { %16431 = vmatpush1.bf16.msra.mxu1 %v20579_v57  ;;  %v20614_v57 = vld [vmem:[#allocation8 + $0x1e94] ss:$24 sps:$4 sm:$0xff]  }
 0x685   :  { %v21890_v6 = vpop.eup %21889  ;;  %16432 = vmatprep.subr.bf16.mxu1 %v20587_v33  ;;  %v20615_v33 = vld [vmem:[#allocation8 + $0x2a8] ss:$24 sps:$4 sm:$0xff]  }
 0x686   :  { %v21892_v49 = vpop.eup %21891  ;;  %v8852_v7 = vadd.f32 1.0, %v21890_v6  ;;  %v20623_v6 = vld [vmem:[#allocation8 + $0x2dc] ss:$24 sps:$4 sm:$0xff]  }
 0x687   :  { %v21894_v48 = vpop.eup %21893  ;;  %v8853_v8 = vadd.f32 1.0, %v21892_v49  ;;  %v20621_v49 = vld [vmem:[#allocation8 + $0x2d8] ss:$24 sps:$4 sm:$0xff]  }
 0x688   :  { %v21896_v30 = vpop.eup %21895  ;;  %v8876_v31 = vadd.f32 1.0, %v21894_v48  ;;  %16433 = vmatpush1.bf16.msra.mxu1 %v20585_v20  ;;  %v8900_v63 = vmul.f32 %v8852_v7, %v8707_v23  ;;  %v20612_v20 = vld [vmem:[#allocation8 + $0x1e90] ss:$24 sps:$4 sm:$0xff]   ;;  %v20618_v7 = vld [vmem:[#allocation8 + $0x1ec0] ss:$24 sps:$4 sm:$0xff]  }
 0x689   :  { %v8877_v25 = vadd.f32 1.0, %v21896_v30  ;;  %16434 = vmatprep.subr.bf16.mxu1 %v20593_v58  ;;  %v8901_v52 = vmul.f32 %v8853_v8, %v8708_v17  ;;  %v20620_v58 = vld [vmem:[#allocation8 + $0x1ec4] ss:$24 sps:$4 sm:$0xff]   ;;  %v20626_v8 = vld [vmem:[#allocation8 + $0x1ef4] ss:$24 sps:$4 sm:$0xff]  }
 0x68a   :  { %v8924_v22 = vmul.f32 %v8876_v31, %v8731_v39  ;;  %v20629_v48 = vld [vmem:[#allocation8 + $0x30c] ss:$24 sps:$4 sm:$0xff]   ;;  %v20627_v30 = vld [vmem:[#allocation8 + $0x308] ss:$24 sps:$4 sm:$0xff]   ;;  %v20635_v39 = vld [vmem:[#allocation8 + $0x33c] ss:$24 sps:$4 sm:$0xff]  }
 0x68b   :  { %v8925_v37 = vmul.f32 %v8877_v25, %v8732_v44  ;;  %v20624_v23 = vld [vmem:[#allocation8 + $0x1ef0] ss:$24 sps:$4 sm:$0xff]   ;;  %v20632_v31 = vld [vmem:[#allocation8 + $0x1f24] ss:$24 sps:$4 sm:$0xff]   ;;  %v20630_v17 = vld [vmem:[#allocation8 + $0x1f20] ss:$24 sps:$4 sm:$0xff]  }
 0x68c   :  { %v22523_v21 = vpack.c.bf16 %v8924_v22, %v8900_v63  ;;  %16435 = vmatpush1.bf16.msra.mxu1 %v20591_v15  ;;  %v20633_v15 = vld [vmem:[#allocation8 + $0x338] ss:$24 sps:$4 sm:$0xff]   ;;  %v20641_v44 = vld [vmem:[#allocation8 + $0x36c] ss:$24 sps:$4 sm:$0xff]   ;;  %v20647_v22 = vld [vmem:[#allocation8 + $0x39c] ss:$24 sps:$4 sm:$0xff]  }
 0x68d   :  { %v22525_v55 = vpack.c.bf16 %v8925_v37, %v8901_v52  ;;  %16436 = vmatprep.subr.bf16.mxu1 %v20599_v12  ;;  %v20638_v25 = vld [vmem:[#allocation8 + $0x1f54] ss:$24 sps:$4 sm:$0xff]   ;;  %v20639_v12 = vld [vmem:[#allocation8 + $0x368] ss:$24 sps:$4 sm:$0xff]   ;;  %v20644_v52 = vld [vmem:[#allocation8 + $0x1f84] ss:$24 sps:$4 sm:$0xff]  }
 0x68e   :  { %v20636_v63 = vld [vmem:[#allocation8 + $0x1f50] ss:$24 sps:$4 sm:$0xff]  }
 0x68f   :  { %16317 = vmatprep.mubr.bf16.mxu0 %v22525_v55  ;;  %v20645_v37 = vld [vmem:[#allocation8 + $0x398] ss:$24 sps:$4 sm:$0xff]  }
 0x690   :  { %16318 = vmatmul.mubr.bf16.vlgmr.msra.gmra.mrb[16].mxu0 %v22523_v21  ;;  %16437 = vmatpush1.bf16.msra.mxu1 %v20597_v54  ;;  %v20642_v54 = vld [vmem:[#allocation8 + $0x1f80] ss:$24 sps:$4 sm:$0xff]  }
 0x691   :  { %16329 = vmatpush1.bf16.msra.mxu0 %v20594_v41  ;;  %16360 = vmatprep.mubr.bf16.mxu0 %v22468_v60  ;;  %v20653_v41 = vld [vmem:[#allocation8 + $0x3cc] ss:$24 sps:$4 sm:$0xff]  }
 0x692   :  { %16330 = vmatprep.subr.bf16.mxu0 %v20602_v11  ;;  %16438 = vmatprep.subr.bf16.mxu1 %v20605_v28  ;;  %v20650_v11 = vld [vmem:[#allocation8 + $0x1fb4] ss:$24 sps:$4 sm:$0xff]   ;;  %v20651_v28 = vld [vmem:[#allocation8 + $0x3c8] ss:$24 sps:$4 sm:$0xff]  }
 0x694   :  { %16439 = vmatpush1.bf16.msra.mxu1 %v20603_v5  ;;  %v20648_v5 = vld [vmem:[#allocation8 + $0x1fb0] ss:$24 sps:$4 sm:$0xff]  }
 0x695   :  { %16331 = vmatpush1.bf16.msra.mxu0 %v20600_v29  ;;  %16440 = vmatprep.subr.bf16.mxu1 %v20611_v35  ;;  %v20659_v29 = vld [vmem:[#allocation8 + $0x3fc] ss:$24 sps:$4 sm:$0xff]  }
 0x696   :  { %16332 = vmatprep.subr.bf16.mxu0 %v20608_v40  ;;  %v20656_v35 = vld [vmem:[#allocation8 + $0x1fe4] ss:$24 sps:$4 sm:$0xff]   ;;  %v20657_v40 = vld [vmem:[#allocation8 + $0x3f8] ss:$24 sps:$4 sm:$0xff]  }
 0x698   :  { %16441 = vmatpush1.bf16.msra.mxu1 %v20609_v32  ;;  %v20654_v32 = vld [vmem:[#allocation8 + $0x1fe0] ss:$24 sps:$4 sm:$0xff]  }
 0x699   :  { %16333 = vmatpush1.bf16.msra.mxu0 %v20606_v34  ;;  %16442 = vmatprep.subr.bf16.mxu1 %v20617_v56  ;;  %v20665_v34 = vld [vmem:[#allocation8 + $0x42c] ss:$24 sps:$4 sm:$0xff]  }
 0x69a   :  { %16334 = vmatprep.subr.bf16.mxu0 %v20614_v57  ;;  %v20662_v56 = vld [vmem:[#allocation8 + $0x2014] ss:$24 sps:$4 sm:$0xff]   ;;  %v20663_v57 = vld [vmem:[#allocation8 + $0x428] ss:$24 sps:$4 sm:$0xff]  }
 0x69c   :  { %16443 = vmatpush1.bf16.msra.mxu1 %v20615_v33  ;;  %v20660_v33 = vld [vmem:[#allocation8 + $0x2010] ss:$24 sps:$4 sm:$0xff]  }
 0x69d   :  { %16335 = vmatpush1.bf16.msra.mxu0 %v20612_v20  ;;  %16444 = vmatprep.subr.bf16.mxu1 %v20623_v6  ;;  %v20671_v20 = vld [vmem:[#allocation8 + $0x45c] ss:$24 sps:$4 sm:$0xff]  }
 0x69e   :  { %16336 = vmatprep.subr.bf16.mxu0 %v20620_v58  ;;  %v20668_v6 = vld [vmem:[#allocation8 + $0x2044] ss:$24 sps:$4 sm:$0xff]   ;;  %v20669_v58 = vld [vmem:[#allocation8 + $0x458] ss:$24 sps:$4 sm:$0xff]  }
 0x6a0   :  { %16445 = vmatpush1.bf16.msra.mxu1 %v20621_v49  ;;  %v20666_v49 = vld [vmem:[#allocation8 + $0x2040] ss:$24 sps:$4 sm:$0xff]  }
 0x6a1   :  { %16337 = vmatpush1.bf16.msra.mxu0 %v20618_v7  ;;  %16457 = vmatprep.subr.bf16.mxu1 %v20629_v48  ;;  %v20677_v7 = vld [vmem:[#allocation8 + $0x48c] ss:$24 sps:$4 sm:$0xff]  }
 0x6a2   :  { %16338 = vmatprep.subr.bf16.mxu0 %v20626_v8  ;;  %v20674_v48 = vld [vmem:[#allocation8 + $0x2074] ss:$24 sps:$4 sm:$0xff]   ;;  %v20675_v8 = vld [vmem:[#allocation8 + $0x488] ss:$24 sps:$4 sm:$0xff]  }
 0x6a3   :  { %16447 = vmatmul.mubr.bf16.vlgmr.msra.gmra.mrb[32].mxu1 %v22258_v2 }
 0x6a4   :  { %16458 = vmatpush1.bf16.msra.mxu1 %v20627_v30  ;;  %16489 = vmatprep.mubr.bf16.mxu1 %v22350_v19  ;;  %v20672_v30 = vld [vmem:[#allocation8 + $0x2070] ss:$24 sps:$4 sm:$0xff]  }
 0x6a5   :  { %16339 = vmatpush1.bf16.msra.mxu0 %v20624_v23  ;;  %16459 = vmatprep.subr.bf16.mxu1 %v20635_v39  ;;  %v20683_v23 = vld [vmem:[#allocation8 + $0x4bc] ss:$24 sps:$4 sm:$0xff]  }
 0x6a6   :  { %16340 = vmatprep.subr.bf16.mxu0 %v20632_v31  ;;  %v20680_v39 = vld [vmem:[#allocation8 + $0x20a4] ss:$24 sps:$4 sm:$0xff]   ;;  %v20681_v31 = vld [vmem:[#allocation8 + $0x4b8] ss:$24 sps:$4 sm:$0xff]  }
 0x6a8   :  { %16460 = vmatpush1.bf16.msra.mxu1 %v20633_v15  ;;  %v20678_v15 = vld [vmem:[#allocation8 + $0x20a0] ss:$24 sps:$4 sm:$0xff]  }
 0x6a9   :  { %16341 = vmatpush1.bf16.msra.mxu0 %v20630_v17  ;;  %16461 = vmatprep.subr.bf16.mxu1 %v20641_v44  ;;  %v20689_v17 = vld [vmem:[#allocation8 + $0x4ec] ss:$24 sps:$4 sm:$0xff]  }
 0x6aa   :  { %16342 = vmatprep.subr.bf16.mxu0 %v20638_v25  ;;  %v20686_v44 = vld [vmem:[#allocation8 + $0x20d4] ss:$24 sps:$4 sm:$0xff]   ;;  %v20687_v25 = vld [vmem:[#allocation8 + $0x4e8] ss:$24 sps:$4 sm:$0xff]  }
 0x6ac   :  { %16462 = vmatpush1.bf16.msra.mxu1 %v20639_v12  ;;  %v20684_v12 = vld [vmem:[#allocation8 + $0x20d0] ss:$24 sps:$4 sm:$0xff]  }
 0x6ad   :  { %16343 = vmatpush1.bf16.msra.mxu0 %v20636_v63  ;;  %16463 = vmatprep.subr.bf16.mxu1 %v20647_v22  ;;  %v20692_v63 = vld [vmem:[#allocation8 + $0x51c] ss:$24 sps:$4 sm:$0xff]  }
 0x6ae   :  { %16344 = vmatprep.subr.bf16.mxu0 %v20644_v52  ;;  %v20740_v22 = vld [vmem:[#allocation8 + $0x2104] ss:$24 sps:$4 sm:$0xff]   ;;  %v20690_v52 = vld [vmem:[#allocation8 + $0x518] ss:$24 sps:$4 sm:$0xff]  }
 0x6b0   :  { %16464 = vmatpush1.bf16.msra.mxu1 %v20645_v37  ;;  %v20695_v37 = vld [vmem:[#allocation8 + $0x54c] ss:$24 sps:$4 sm:$0xff]  }
 0x6b1   :  { %16345 = vmatpush1.bf16.msra.mxu0 %v20642_v54  ;;  %16465 = vmatprep.subr.bf16.mxu1 %v20653_v41  ;;  %v20738_v54 = vld [vmem:[#allocation8 + $0x2100] ss:$24 sps:$4 sm:$0xff]   ;;  %v20746_v41 = vld [vmem:[#allocation8 + $0x2134] ss:$24 sps:$4 sm:$0xff]  }
 0x6b2   :  { %16346 = vmatprep.subr.bf16.mxu0 %v20650_v11  ;;  %v20693_v11 = vld [vmem:[#allocation8 + $0x548] ss:$24 sps:$4 sm:$0xff]  }
 0x6b4   :  { %16466 = vmatpush1.bf16.msra.mxu1 %v20651_v28  ;;  %v20698_v28 = vld [vmem:[#allocation8 + $0x57c] ss:$24 sps:$4 sm:$0xff]  }
 0x6b5   :  { %16347 = vmatpush1.bf16.msra.mxu0 %v20648_v5  ;;  %16467 = vmatprep.subr.bf16.mxu1 %v20659_v29  ;;  %v20744_v5 = vld [vmem:[#allocation8 + $0x2130] ss:$24 sps:$4 sm:$0xff]   ;;  %v20752_v29 = vld [vmem:[#allocation8 + $0x2164] ss:$24 sps:$4 sm:$0xff]  }
 0x6b6   :  { %16348 = vmatprep.subr.bf16.mxu0 %v20656_v35  ;;  %v20696_v35 = vld [vmem:[#allocation8 + $0x578] ss:$24 sps:$4 sm:$0xff]  }
 0x6b8   :  { %16468 = vmatpush1.bf16.msra.mxu1 %v20657_v40  ;;  %v20701_v40 = vld [vmem:[#allocation8 + $0x5ac] ss:$24 sps:$4 sm:$0xff]  }
 0x6b9   :  { %16349 = vmatpush1.bf16.msra.mxu0 %v20654_v32  ;;  %16469 = vmatprep.subr.bf16.mxu1 %v20665_v34  ;;  %v20750_v32 = vld [vmem:[#allocation8 + $0x2160] ss:$24 sps:$4 sm:$0xff]   ;;  %v20758_v34 = vld [vmem:[#allocation8 + $0x2194] ss:$24 sps:$4 sm:$0xff]  }
 0x6ba   :  { %16350 = vmatprep.subr.bf16.mxu0 %v20662_v56  ;;  %v20699_v56 = vld [vmem:[#allocation8 + $0x5a8] ss:$24 sps:$4 sm:$0xff]  }
 0x6bc   :  { %16470 = vmatpush1.bf16.msra.mxu1 %v20663_v57  ;;  %v20704_v57 = vld [vmem:[#allocation8 + $0x5dc] ss:$24 sps:$4 sm:$0xff]  }
 0x6bd   :  { %16351 = vmatpush1.bf16.msra.mxu0 %v20660_v33  ;;  %16471 = vmatprep.subr.bf16.mxu1 %v20671_v20  ;;  %v20756_v33 = vld [vmem:[#allocation8 + $0x2190] ss:$24 sps:$4 sm:$0xff]   ;;  %v20764_v20 = vld [vmem:[#allocation8 + $0x21c4] ss:$24 sps:$4 sm:$0xff]  }
 0x6be   :  { %16352 = vmatprep.subr.bf16.mxu0 %v20668_v6  ;;  %v20702_v6 = vld [vmem:[#allocation8 + $0x5d8] ss:$24 sps:$4 sm:$0xff]  }
 0x6c0   :  { %16472 = vmatpush1.bf16.msra.mxu1 %v20669_v58  ;;  %v20707_v58 = vld [vmem:[#allocation8 + $0x60c] ss:$24 sps:$4 sm:$0xff]  }
 0x6c1   :  { %16353 = vmatpush1.bf16.msra.mxu0 %v20666_v49  ;;  %16473 = vmatprep.subr.bf16.mxu1 %v20677_v7  ;;  %v20762_v49 = vld [vmem:[#allocation8 + $0x21c0] ss:$24 sps:$4 sm:$0xff]   ;;  %v20770_v7 = vld [vmem:[#allocation8 + $0x21f4] ss:$24 sps:$4 sm:$0xff]  }
 0x6c2   :  { %16354 = vmatprep.subr.bf16.mxu0 %v20674_v48  ;;  %v20705_v48 = vld [vmem:[#allocation8 + $0x608] ss:$24 sps:$4 sm:$0xff]  }
 0x6c4   :  { %16474 = vmatpush1.bf16.msra.mxu1 %v20675_v8  ;;  %v20710_v8 = vld [vmem:[#allocation8 + $0x63c] ss:$24 sps:$4 sm:$0xff]  }
 0x6c5   :  { %16355 = vmatpush1.bf16.msra.mxu0 %v20672_v30  ;;  %16475 = vmatprep.subr.bf16.mxu1 %v20683_v23  ;;  %v20768_v30 = vld [vmem:[#allocation8 + $0x21f0] ss:$24 sps:$4 sm:$0xff]   ;;  %v20776_v23 = vld [vmem:[#allocation8 + $0x2224] ss:$24 sps:$4 sm:$0xff]  }
 0x6c6   :  { %16356 = vmatprep.subr.bf16.mxu0 %v20680_v39  ;;  %v20708_v39 = vld [vmem:[#allocation8 + $0x638] ss:$24 sps:$4 sm:$0xff]  }
 0x6c8   :  { %16476 = vmatpush1.bf16.msra.mxu1 %v20681_v31  ;;  %v20713_v31 = vld [vmem:[#allocation8 + $0x66c] ss:$24 sps:$4 sm:$0xff]  }
 0x6c9   :  { %16357 = vmatpush1.bf16.msra.mxu0 %v20678_v15  ;;  %16477 = vmatprep.subr.bf16.mxu1 %v20689_v17  ;;  %v20774_v15 = vld [vmem:[#allocation8 + $0x2220] ss:$24 sps:$4 sm:$0xff]   ;;  %v20782_v17 = vld [vmem:[#allocation8 + $0x2254] ss:$24 sps:$4 sm:$0xff]  }
 0x6ca   :  { %16358 = vmatprep.subr.bf16.mxu0 %v20686_v44  ;;  %v20711_v44 = vld [vmem:[#allocation8 + $0x668] ss:$24 sps:$4 sm:$0xff]  }
 0x6cc   :  { %16478 = vmatpush1.bf16.msra.mxu1 %v20687_v25  ;;  %v20716_v25 = vld [vmem:[#allocation8 + $0x69c] ss:$24 sps:$4 sm:$0xff]  }
 0x6cd   :  { %16359 = vmatpush1.bf16.msra.mxu0 %v20684_v12  ;;  %16479 = vmatprep.subr.bf16.mxu1 %v20692_v63  ;;  %v20780_v12 = vld [vmem:[#allocation8 + $0x2250] ss:$24 sps:$4 sm:$0xff]   ;;  %v20788_v63 = vld [vmem:[#allocation8 + $0x2284] ss:$24 sps:$4 sm:$0xff]  }
 0x6ce   :  { %16371 = vmatprep.subr.bf16.mxu0 %v20740_v22  ;;  %v20714_v22 = vld [vmem:[#allocation8 + $0x698] ss:$24 sps:$4 sm:$0xff]  }
 0x6d0   :  { %16361 = vmatmul.mubr.bf16.vlgmr.msra.gmra.mrb[16].mxu0 %v22466_v9  ;;  %16480 = vmatpush1.bf16.msra.mxu1 %v20690_v52  ;;  %v20719_v52 = vld [vmem:[#allocation8 + $0x6cc] ss:$24 sps:$4 sm:$0xff]  }
 0x6d1   :  { %16481 = vmatprep.subr.bf16.mxu1 %v20695_v37  ;;  %16372 = vmatpush1.bf16.msra.mxu0 %v20738_v54  ;;  %v20786_v37 = vld [vmem:[#allocation8 + $0x2280] ss:$24 sps:$4 sm:$0xff]   ;;  %v20794_v54 = vld [vmem:[#allocation8 + $0x22b4] ss:$24 sps:$4 sm:$0xff]  }
 0x6d2   :  { %16373 = vmatprep.subr.bf16.mxu0 %v20746_v41  ;;  %v20717_v41 = vld [vmem:[#allocation8 + $0x6c8] ss:$24 sps:$4 sm:$0xff]  }
 0x6d4   :  { %16482 = vmatpush1.bf16.msra.mxu1 %v20693_v11  ;;  %v20722_v11 = vld [vmem:[#allocation8 + $0x6fc] ss:$24 sps:$4 sm:$0xff]  }
 0x6d5   :  { %16483 = vmatprep.subr.bf16.mxu1 %v20698_v28  ;;  %16374 = vmatpush1.bf16.msra.mxu0 %v20744_v5  ;;  %v20792_v28 = vld [vmem:[#allocation8 + $0x22b0] ss:$24 sps:$4 sm:$0xff]   ;;  %v20800_v5 = vld [vmem:[#allocation8 + $0x22e4] ss:$24 sps:$4 sm:$0xff]  }
 0x6d6   :  { %16375 = vmatprep.subr.bf16.mxu0 %v20752_v29  ;;  %v20720_v29 = vld [vmem:[#allocation8 + $0x6f8] ss:$24 sps:$4 sm:$0xff]  }
 0x6d8   :  { %16484 = vmatpush1.bf16.msra.mxu1 %v20696_v35  ;;  %v20725_v35 = vld [vmem:[#allocation8 + $0x72c] ss:$24 sps:$4 sm:$0xff]  }
 0x6d9   :  { %16485 = vmatprep.subr.bf16.mxu1 %v20701_v40  ;;  %16376 = vmatpush1.bf16.msra.mxu0 %v20750_v32  ;;  %v20798_v40 = vld [vmem:[#allocation8 + $0x22e0] ss:$24 sps:$4 sm:$0xff]   ;;  %v20806_v32 = vld [vmem:[#allocation8 + $0x2314] ss:$24 sps:$4 sm:$0xff]  }
 0x6da   :  { %16377 = vmatprep.subr.bf16.mxu0 %v20758_v34  ;;  %v20723_v34 = vld [vmem:[#allocation8 + $0x728] ss:$24 sps:$4 sm:$0xff]  }
 0x6dc   :  { %16486 = vmatpush1.bf16.msra.mxu1 %v20699_v56  ;;  %v20728_v56 = vld [vmem:[#allocation8 + $0x75c] ss:$24 sps:$4 sm:$0xff]  }
 0x6dd   :  { %16487 = vmatprep.subr.bf16.mxu1 %v20704_v57  ;;  %16378 = vmatpush1.bf16.msra.mxu0 %v20756_v33  ;;  %v20804_v57 = vld [vmem:[#allocation8 + $0x2310] ss:$24 sps:$4 sm:$0xff]   ;;  %v20812_v33 = vld [vmem:[#allocation8 + $0x2344] ss:$24 sps:$4 sm:$0xff]  }
 0x6de   :  { %16379 = vmatprep.subr.bf16.mxu0 %v20764_v20  ;;  %v20726_v20 = vld [vmem:[#allocation8 + $0x758] ss:$24 sps:$4 sm:$0xff]  }
 0x6e0   :  { %16488 = vmatpush1.bf16.msra.mxu1 %v20702_v6  ;;  %v20731_v6 = vld [vmem:[#allocation8 + $0x78c] ss:$24 sps:$4 sm:$0xff]  }
 0x6e1   :  { %16500 = vmatprep.subr.bf16.mxu1 %v20707_v58  ;;  %16380 = vmatpush1.bf16.msra.mxu0 %v20762_v49  ;;  %v20810_v58 = vld [vmem:[#allocation8 + $0x2340] ss:$24 sps:$4 sm:$0xff]   ;;  %v20818_v49 = vld [vmem:[#allocation8 + $0x2374] ss:$24 sps:$4 sm:$0xff]  }
 0x6e2   :  { %16381 = vmatprep.subr.bf16.mxu0 %v20770_v7  ;;  %v20729_v7 = vld [vmem:[#allocation8 + $0x788] ss:$24 sps:$4 sm:$0xff]  }
 0x6e3   :  { %16490 = vmatmul.mubr.bf16.vlgmr.msra.gmra.mrb[32].mxu1 %v22346_v4 }
 0x6e4   :  { %16501 = vmatpush1.bf16.msra.mxu1 %v20705_v48  ;;  %16532 = vmatprep.mubr.bf16.mxu1 %v22402_v51  ;;  %v20734_v48 = vld [vmem:[#allocation8 + $0x7bc] ss:$24 sps:$4 sm:$0xff]  }
 0x6e5   :  { %16502 = vmatprep.subr.bf16.mxu1 %v20710_v8  ;;  %16382 = vmatpush1.bf16.msra.mxu0 %v20768_v30  ;;  %v20816_v8 = vld [vmem:[#allocation8 + $0x2370] ss:$24 sps:$4 sm:$0xff]   ;;  %v20824_v30 = vld [vmem:[#allocation8 + $0x23a4] ss:$24 sps:$4 sm:$0xff]  }
 0x6e6   :  { %16383 = vmatprep.subr.bf16.mxu0 %v20776_v23  ;;  %v20732_v23 = vld [vmem:[#allocation8 + $0x7b8] ss:$24 sps:$4 sm:$0xff]  }
 0x6e8   :  { %16503 = vmatpush1.bf16.msra.mxu1 %v20708_v39  ;;  %v20737_v39 = vld [vmem:[#allocation8 + $0x7ec] ss:$24 sps:$4 sm:$0xff]  }
 0x6e9   :  { %16504 = vmatprep.subr.bf16.mxu1 %v20713_v31  ;;  %16384 = vmatpush1.bf16.msra.mxu0 %v20774_v15  ;;  %v20822_v31 = vld [vmem:[#allocation8 + $0x23a0] ss:$24 sps:$4 sm:$0xff]   ;;  %v20830_v15 = vld [vmem:[#allocation8 + $0x23d4] ss:$24 sps:$4 sm:$0xff]  }
 0x6ea   :  { %16385 = vmatprep.subr.bf16.mxu0 %v20782_v17  ;;  %v20735_v17 = vld [vmem:[#allocation8 + $0x7e8] ss:$24 sps:$4 sm:$0xff]  }
 0x6ec   :  { %16505 = vmatpush1.bf16.msra.mxu1 %v20711_v44  ;;  %v20743_v44 = vld [vmem:[#allocation8 + $0x81c] ss:$24 sps:$4 sm:$0xff]  }
 0x6ed   :  { %16506 = vmatprep.subr.bf16.mxu1 %v20716_v25  ;;  %16386 = vmatpush1.bf16.msra.mxu0 %v20780_v12  ;;  %v20828_v25 = vld [vmem:[#allocation8 + $0x23d0] ss:$24 sps:$4 sm:$0xff]   ;;  %v20839_v12 = vld [vmem:[#allocation8 + $0x14] ss:$24 sps:$4 sm:$0xff]  }
 0x6ee   :  { %16387 = vmatprep.subr.bf16.mxu0 %v20788_v63  ;;  %v20741_v63 = vld [vmem:[#allocation8 + $0x818] ss:$24 sps:$4 sm:$0xff]  }
 0x6f0   :  { %16507 = vmatpush1.bf16.msra.mxu1 %v20714_v22  ;;  %v20749_v22 = vld [vmem:[#allocation8 + $0x84c] ss:$24 sps:$4 sm:$0xff]  }
 0x6f1   :  { %16508 = vmatprep.subr.bf16.mxu1 %v20719_v52  ;;  %16388 = vmatpush1.bf16.msra.mxu0 %v20786_v37  ;;  %v20747_v52 = vld [vmem:[#allocation8 + $0x848] ss:$24 sps:$4 sm:$0xff]   ;;  %v20755_v37 = vld [vmem:[#allocation8 + $0x87c] ss:$24 sps:$4 sm:$0xff]  }
 0x6f2   :  { %16389 = vmatprep.subr.bf16.mxu0 %v20794_v54  ;;  %v20753_v54 = vld [vmem:[#allocation8 + $0x878] ss:$24 sps:$4 sm:$0xff]  }
 0x6f4   :  { %16509 = vmatpush1.bf16.msra.mxu1 %v20717_v41  ;;  %v20761_v41 = vld [vmem:[#allocation8 + $0x8ac] ss:$24 sps:$4 sm:$0xff]  }
 0x6f5   :  { %16510 = vmatprep.subr.bf16.mxu1 %v20722_v11  ;;  %16390 = vmatpush1.bf16.msra.mxu0 %v20792_v28  ;;  %v20759_v11 = vld [vmem:[#allocation8 + $0x8a8] ss:$24 sps:$4 sm:$0xff]   ;;  %v20767_v28 = vld [vmem:[#allocation8 + $0x8dc] ss:$24 sps:$4 sm:$0xff]  }
 0x6f6   :  { %16391 = vmatprep.subr.bf16.mxu0 %v20800_v5  ;;  %v20765_v5 = vld [vmem:[#allocation8 + $0x8d8] ss:$24 sps:$4 sm:$0xff]  }
 0x6f8   :  { %16511 = vmatpush1.bf16.msra.mxu1 %v20720_v29  ;;  %v20773_v29 = vld [vmem:[#allocation8 + $0x90c] ss:$24 sps:$4 sm:$0xff]  }
 0x6f9   :  { %16512 = vmatprep.subr.bf16.mxu1 %v20725_v35  ;;  %16392 = vmatpush1.bf16.msra.mxu0 %v20798_v40  ;;  %v20771_v35 = vld [vmem:[#allocation8 + $0x908] ss:$24 sps:$4 sm:$0xff]   ;;  %v20779_v40 = vld [vmem:[#allocation8 + $0x93c] ss:$24 sps:$4 sm:$0xff]  }
 0x6fa   :  { %16393 = vmatprep.subr.bf16.mxu0 %v20806_v32  ;;  %v20777_v32 = vld [vmem:[#allocation8 + $0x938] ss:$24 sps:$4 sm:$0xff]  }
 0x6fc   :  { %16513 = vmatpush1.bf16.msra.mxu1 %v20723_v34  ;;  %v20785_v34 = vld [vmem:[#allocation8 + $0x96c] ss:$24 sps:$4 sm:$0xff]  }
 0x6fd   :  { %16514 = vmatprep.subr.bf16.mxu1 %v20728_v56  ;;  %16394 = vmatpush1.bf16.msra.mxu0 %v20804_v57  ;;  %v20783_v56 = vld [vmem:[#allocation8 + $0x968] ss:$24 sps:$4 sm:$0xff]   ;;  %v20791_v57 = vld [vmem:[#allocation8 + $0x99c] ss:$24 sps:$4 sm:$0xff]  }
 0x6fe   :  { %16395 = vmatprep.subr.bf16.mxu0 %v20812_v33  ;;  %v20789_v33 = vld [vmem:[#allocation8 + $0x998] ss:$24 sps:$4 sm:$0xff]  }
 0x700   :  { %16515 = vmatpush1.bf16.msra.mxu1 %v20726_v20  ;;  %v20797_v20 = vld [vmem:[#allocation8 + $0x9cc] ss:$24 sps:$4 sm:$0xff]  }
 0x701   :  { %16516 = vmatprep.subr.bf16.mxu1 %v20731_v6  ;;  %16396 = vmatpush1.bf16.msra.mxu0 %v20810_v58  ;;  %v20795_v6 = vld [vmem:[#allocation8 + $0x9c8] ss:$24 sps:$4 sm:$0xff]   ;;  %v20803_v58 = vld [vmem:[#allocation8 + $0x9fc] ss:$24 sps:$4 sm:$0xff]  }
 0x702   :  { %16397 = vmatprep.subr.bf16.mxu0 %v20818_v49  ;;  %v1352_v49 = vrot.slane %v22517_v62, %v22420_v36 }
 0x704   :  { %16517 = vmatpush1.bf16.msra.mxu1 %v20729_v7  ;;  %v1356_v7 = vrot.slane %v22517_v62, %v22423_v46  ;;  %v20813_v62 = vld [vmem:[#allocation8 + $0xa58] ss:$24 sps:$4 sm:$0xff]  }
 0x705   :  { %16518 = vmatprep.subr.bf16.mxu1 %v20734_v48  ;;  %16398 = vmatpush1.bf16.msra.mxu0 %v20816_v8  ;;  %v20801_v48 = vld [vmem:[#allocation8 + $0x9f8] ss:$24 sps:$4 sm:$0xff]   ;;  %v20809_v8 = vld [vmem:[#allocation8 + $0xa2c] ss:$24 sps:$4 sm:$0xff]  }
 0x706   :  { %16399 = vmatprep.subr.bf16.mxu0 %v20824_v30 }
 0x708   :  { %16519 = vmatpush1.bf16.msra.mxu1 %v20732_v23 }
 0x709   :  { %16520 = vmatprep.subr.bf16.mxu1 %v20737_v39  ;;  %16400 = vmatpush1.bf16.msra.mxu0 %v20822_v31 }
 0x70a   :  { %16401 = vmatprep.subr.bf16.mxu0 %v20830_v15 }
 0x70c   :  { %16521 = vmatpush1.bf16.msra.mxu1 %v20735_v17  ;;  %v20807_v17 = vld [vmem:[#allocation8 + $0xa28] ss:$24 sps:$4 sm:$0xff]  }
 0x70d   :  { %16522 = vmatprep.subr.bf16.mxu1 %v20743_v44  ;;  %16402 = vmatpush1.bf16.msra.mxu0 %v20828_v25 }
 0x70e   :  { %16930 = vmatprep.subr.bf16.mxu0 %v20839_v12 }
 0x710   :  { %16523 = vmatpush1.bf16.msra.mxu1 %v20741_v63  ;;  %v20815_v63 = vld [vmem:[#allocation8 + $0xa5c] ss:$24 sps:$4 sm:$0xff]  }
 0x711   :  { %16524 = vmatprep.subr.bf16.mxu1 %v20749_v22 }
 0x714   :  { %16525 = vmatpush1.bf16.msra.mxu1 %v20747_v52 }
 0x715   :  { %16526 = vmatprep.subr.bf16.mxu1 %v20755_v37  ;;  %v20821_v37 = vld [vmem:[#allocation8 + $0xa8c] ss:$24 sps:$4 sm:$0xff]  }
 0x718   :  { %16527 = vmatpush1.bf16.msra.mxu1 %v20753_v54  ;;  %v20819_v54 = vld [vmem:[#allocation8 + $0xa88] ss:$24 sps:$4 sm:$0xff]  }
 0x719   :  { %16528 = vmatprep.subr.bf16.mxu1 %v20761_v41  ;;  %v20827_v41 = vld [vmem:[#allocation8 + $0xabc] ss:$24 sps:$4 sm:$0xff]  }
 0x71c   :  { %16529 = vmatpush1.bf16.msra.mxu1 %v20759_v11  ;;  %v20825_v11 = vld [vmem:[#allocation8 + $0xab8] ss:$24 sps:$4 sm:$0xff]  }
 0x71d   :  { %16530 = vmatprep.subr.bf16.mxu1 %v20767_v28 }
 0x720   :  { %16531 = vmatpush1.bf16.msra.mxu1 %v20765_v5  ;;  %v20833_v5 = vld [vmem:[#allocation8 + $0xaec] ss:$24 sps:$4 sm:$0xff]  }
 0x721   :  { %16543 = vmatprep.subr.bf16.mxu1 %v20773_v29 }
 0x723   :  { %16533 = vmatmul.mubr.bf16.vlgmr.msra.gmra.mrb[32].mxu1 %v22400_v0 }
 0x724   :  { %16544 = vmatpush1.bf16.msra.mxu1 %v20771_v35  ;;  %16575 = vmatprep.mubr.bf16.mxu1 %v22463_v26 }
 0x725   :  { %16545 = vmatprep.subr.bf16.mxu1 %v20779_v40 }
 0x728   :  { %16546 = vmatpush1.bf16.msra.mxu1 %v20777_v32 }
 0x729   :  { %16547 = vmatprep.subr.bf16.mxu1 %v20785_v34 }
 0x72c   :  { %16548 = vmatpush1.bf16.msra.mxu1 %v20783_v56 }
 0x72d   :  { %16549 = vmatprep.subr.bf16.mxu1 %v20791_v57 }
 0x730   :  { %16550 = vmatpush1.bf16.msra.mxu1 %v20789_v33 }
 0x731   :  { %16551 = vmatprep.subr.bf16.mxu1 %v20797_v20  ;;  %v20831_v20 = vld [vmem:[#allocation8 + $0xae8] ss:$24 sps:$4 sm:$0xff]  }
 0x734   :  { %16552 = vmatpush1.bf16.msra.mxu1 %v20795_v6 }
 0x735   :  { %16553 = vmatprep.subr.bf16.mxu1 %v20803_v58 }
 0x736   :  { %v8680_v30 = vpop.f32.mrb[28].mxu1 }
 0x737   :  { %v19825_v23 = vadd.f32 %v8680_v30, %v1352_v49  ;;  %v8682_v39 = vpop.f32.mrb[29].mxu1 }
 0x738   :  { %v19826_v31 = vadd.f32 %v8682_v39, %v1356_v7  ;;  %v8684_v15 = vpop.f32.mrb[30].mxu1  ;;  %16554 = vmatpush1.bf16.msra.mxu1 %v20801_v48 }
 0x739   :  { %v8760_v44 = vmul.f32 0.70710677, %v19825_v23  ;;  %v19827_v25 = vadd.f32 %v8684_v15, %v1352_v49  ;;  %v8686_v12 = vpop.f32.mrb[31].mxu1  ;;  %16555 = vmatprep.subr.bf16.mxu1 %v20809_v8  ;;  %v8711_v56 = vmul.f32 0.5, %v19825_v23  ;;  %v20837_v23 = vld [vmem:[#allocation8 + $0x10] ss:$24 sps:$4 sm:$0xff]  }
 0x73a   :  { %v8761_v36 = vmul.f32 0.70710677, %v19826_v31  ;;  %v19828_v22 = vadd.f32 %v8686_v12, %v1356_v7  ;;  %v8712_v6 = vmul.f32 0.5, %v19826_v31  ;;  %v20836_v7 = vld [vmem:[#allocation8 + $0xb1c] ss:$24 sps:$4 sm:$0xff]  }
 0x73b   :  { %21897 = verf.f32 %v8760_v44  ;;  %v8784_v52 = vmul.f32 0.70710677, %v19827_v25  ;;  %v8735_v57 = vmul.f32 0.5, %v19827_v25  ;;  %v20842_v25 = vld [vmem:[#allocation8 + $0xb4c] ss:$24 sps:$4 sm:$0xff]  }
 0x73c   :  { %21899 = verf.f32 %v8761_v36  ;;  %v8785_v46 = vmul.f32 0.70710677, %v19828_v22  ;;  %16556 = vmatpush1.bf16.msra.mxu1 %v20807_v17  ;;  %v8736_v58 = vmul.f32 0.5, %v19828_v22  ;;  %v20834_v17 = vld [vmem:[#allocation8 + $0xb18] ss:$24 sps:$4 sm:$0xff]  }
 0x73d   :  { %21901 = verf.f32 %v8784_v52  ;;  %16557 = vmatprep.subr.bf16.mxu1 %v20815_v63  ;;  %v20845_v12 = vld [vmem:[#allocation8 + $0x44] ss:$24 sps:$4 sm:$0xff]   ;;  %v20840_v31 = vld [vmem:[#allocation8 + $0xb48] ss:$24 sps:$4 sm:$0xff]   ;;  %v20851_v22 = vld [vmem:[#allocation8 + $0x74] ss:$24 sps:$4 sm:$0xff]  }
 0x73e   :  { %21903 = verf.f32 %v8785_v46  ;;  %v20843_v63 = vld [vmem:[#allocation8 + $0x40] ss:$24 sps:$4 sm:$0xff]   ;;  %v20848_v36 = vld [vmem:[#allocation8 + $0xb7c] ss:$24 sps:$4 sm:$0xff]   ;;  %v20849_v46 = vld [vmem:[#allocation8 + $0x70] ss:$24 sps:$4 sm:$0xff]  }
 0x73f   :  { %v20846_v52 = vld [vmem:[#allocation8 + $0xb78] ss:$24 sps:$4 sm:$0xff]  }
 0x740   :  { %16558 = vmatpush1.bf16.msra.mxu1 %v20813_v62  ;;  %v20854_v62 = vld [vmem:[#allocation8 + $0xbac] ss:$24 sps:$4 sm:$0xff]  }
 0x741   :  { %16559 = vmatprep.subr.bf16.mxu1 %v20821_v37  ;;  %v20857_v37 = vld [vmem:[#allocation8 + $0xa4] ss:$24 sps:$4 sm:$0xff]  }
 0x744   :  { %16560 = vmatpush1.bf16.msra.mxu1 %v20819_v54  ;;  %v20852_v54 = vld [vmem:[#allocation8 + $0xba8] ss:$24 sps:$4 sm:$0xff]  }
 0x745   :  { %v21898_v28 = vpop.eup %21897  ;;  %16561 = vmatprep.subr.bf16.mxu1 %v20827_v41  ;;  %v20855_v41 = vld [vmem:[#allocation8 + $0xa0] ss:$24 sps:$4 sm:$0xff]  }
 0x746   :  { %v21900_v29 = vpop.eup %21899  ;;  %v8856_v35 = vadd.f32 1.0, %v21898_v28  ;;  %v20858_v28 = vld [vmem:[#allocation8 + $0xbd8] ss:$24 sps:$4 sm:$0xff]  }
 0x747   :  { %v21902_v40 = vpop.eup %21901  ;;  %v8857_v32 = vadd.f32 1.0, %v21900_v29  ;;  %v20866_v29 = vld [vmem:[#allocation8 + $0xc0c] ss:$24 sps:$4 sm:$0xff]  }
 0x748   :  { %v21904_v34 = vpop.eup %21903  ;;  %v8880_v33 = vadd.f32 1.0, %v21902_v40  ;;  %16562 = vmatpush1.bf16.msra.mxu1 %v20825_v11  ;;  %v8904_v48 = vmul.f32 %v8856_v35, %v8711_v56  ;;  %v20860_v11 = vld [vmem:[#allocation8 + $0xbdc] ss:$24 sps:$4 sm:$0xff]   ;;  %v20864_v40 = vld [vmem:[#allocation8 + $0xc08] ss:$24 sps:$4 sm:$0xff]  }
 0x749   :  { %v8881_v49 = vadd.f32 1.0, %v21904_v34  ;;  %16563 = vmatprep.subr.bf16.mxu1 %v20833_v5  ;;  %v8905_v30 = vmul.f32 %v8857_v32, %v8712_v6  ;;  %v20861_v5 = vld [vmem:[#allocation8 + $0xd0] ss:$24 sps:$4 sm:$0xff]   ;;  %v20869_v35 = vld [vmem:[#allocation8 + $0x104] ss:$24 sps:$4 sm:$0xff]  }
 0x74a   :  { %v8928_v8 = vmul.f32 %v8880_v33, %v8735_v57  ;;  %v20867_v32 = vld [vmem:[#allocation8 + $0x100] ss:$24 sps:$4 sm:$0xff]   ;;  %v20872_v34 = vld [vmem:[#allocation8 + $0xc3c] ss:$24 sps:$4 sm:$0xff]   ;;  %v20873_v33 = vld [vmem:[#allocation8 + $0x130] ss:$24 sps:$4 sm:$0xff]  }
 0x74b   :  { %v8929_v39 = vmul.f32 %v8881_v49, %v8736_v58  ;;  %v20875_v56 = vld [vmem:[#allocation8 + $0x134] ss:$24 sps:$4 sm:$0xff]   ;;  %v20870_v57 = vld [vmem:[#allocation8 + $0xc38] ss:$24 sps:$4 sm:$0xff]   ;;  %v20881_v6 = vld [vmem:[#allocation8 + $0x164] ss:$24 sps:$4 sm:$0xff]  }
 0x74c   :  { %v22541_v15 = vpack.c.bf16 %v8928_v8, %v8904_v48  ;;  %16564 = vmatpush1.bf16.msra.mxu1 %v20831_v20  ;;  %v20878_v20 = vld [vmem:[#allocation8 + $0xc6c] ss:$24 sps:$4 sm:$0xff]   ;;  %v20876_v58 = vld [vmem:[#allocation8 + $0xc68] ss:$24 sps:$4 sm:$0xff]   ;;  %v20882_v8 = vld [vmem:[#allocation8 + $0xc98] ss:$24 sps:$4 sm:$0xff]  }
 0x74d   :  { %v22543_v44 = vpack.c.bf16 %v8929_v39, %v8905_v30  ;;  %16565 = vmatprep.subr.bf16.mxu1 %v20836_v7  ;;  %v20879_v49 = vld [vmem:[#allocation8 + $0x160] ss:$24 sps:$4 sm:$0xff]   ;;  %v20884_v7 = vld [vmem:[#allocation8 + $0xc9c] ss:$24 sps:$4 sm:$0xff]   ;;  %v20885_v30 = vld [vmem:[#allocation8 + $0x190] ss:$24 sps:$4 sm:$0xff]  }
 0x74e   :  { %v20887_v48 = vld [vmem:[#allocation8 + $0x194] ss:$24 sps:$4 sm:$0xff]  }
 0x74f   :  { %16403 = vmatprep.mubr.bf16.mxu0 %v22543_v44  ;;  %v20890_v39 = vld [vmem:[#allocation8 + $0xccc] ss:$24 sps:$4 sm:$0xff]  }
 0x750   :  { %16404 = vmatmul.mubr.bf16.vlgmr.msra.gmra.mrb[16].mxu0 %v22541_v15  ;;  %16566 = vmatpush1.bf16.msra.mxu1 %v20834_v17  ;;  %v20893_v17 = vld [vmem:[#allocation8 + $0x1c4] ss:$24 sps:$4 sm:$0xff]  }
 0x751   :  { %16931 = vmatpush1.bf16.msra.mxu0 %v20837_v23  ;;  %16962 = vmatprep.mubr.bf16.mxu0 %v22262_v10  ;;  %v20863_v10 = vld [vmem:[#allocation8 + $0xd4] ss:$24 sps:$4 sm:$0xff]   ;;  %v20888_v23 = vld [vmem:[#allocation8 + $0xcc8] ss:$24 sps:$4 sm:$0xff]  }
 0x752   :  { %16567 = vmatprep.subr.bf16.mxu1 %v20842_v25  ;;  %16932 = vmatprep.subr.bf16.mxu0 %v20845_v12  ;;  %v20891_v25 = vld [vmem:[#allocation8 + $0x1c0] ss:$24 sps:$4 sm:$0xff]   ;;  %v20896_v12 = vld [vmem:[#allocation8 + $0xcfc] ss:$24 sps:$4 sm:$0xff]  }
 0x754   :  { %16568 = vmatpush1.bf16.msra.mxu1 %v20840_v31  ;;  %v20899_v31 = vld [vmem:[#allocation8 + $0x1f4] ss:$24 sps:$4 sm:$0xff]  }
 0x755   :  { %16933 = vmatpush1.bf16.msra.mxu0 %v20843_v63  ;;  %16569 = vmatprep.subr.bf16.mxu1 %v20848_v36  ;;  %v20894_v63 = vld [vmem:[#allocation8 + $0xcf8] ss:$24 sps:$4 sm:$0xff]  }
 0x756   :  { %16934 = vmatprep.subr.bf16.mxu0 %v20851_v22  ;;  %v20897_v36 = vld [vmem:[#allocation8 + $0x1f0] ss:$24 sps:$4 sm:$0xff]   ;;  %v20902_v22 = vld [vmem:[#allocation8 + $0xd2c] ss:$24 sps:$4 sm:$0xff]  }
 0x758   :  { %16570 = vmatpush1.bf16.msra.mxu1 %v20846_v52  ;;  %v20905_v52 = vld [vmem:[#allocation8 + $0x224] ss:$24 sps:$4 sm:$0xff]  }
 0x759   :  { %16935 = vmatpush1.bf16.msra.mxu0 %v20849_v46  ;;  %16571 = vmatprep.subr.bf16.mxu1 %v20854_v62  ;;  %v20900_v46 = vld [vmem:[#allocation8 + $0xd28] ss:$24 sps:$4 sm:$0xff]  }
 0x75a   :  { %16936 = vmatprep.subr.bf16.mxu0 %v20857_v37  ;;  %v20903_v62 = vld [vmem:[#allocation8 + $0x220] ss:$24 sps:$4 sm:$0xff]   ;;  %v20908_v37 = vld [vmem:[#allocation8 + $0xd5c] ss:$24 sps:$4 sm:$0xff]  }
 0x75c   :  { %16572 = vmatpush1.bf16.msra.mxu1 %v20852_v54  ;;  %v20911_v54 = vld [vmem:[#allocation8 + $0x254] ss:$24 sps:$4 sm:$0xff]  }
 0x75d   :  { %16937 = vmatpush1.bf16.msra.mxu0 %v20855_v41  ;;  %16573 = vmatprep.subr.bf16.mxu1 %v20860_v11  ;;  %v20906_v41 = vld [vmem:[#allocation8 + $0xd58] ss:$24 sps:$4 sm:$0xff]  }
 0x75e   :  { %16938 = vmatprep.subr.bf16.mxu0 %v20863_v10  ;;  %v20909_v11 = vld [vmem:[#allocation8 + $0x250] ss:$24 sps:$4 sm:$0xff]   ;;  %v20914_v10 = vld [vmem:[#allocation8 + $0xd8c] ss:$24 sps:$4 sm:$0xff]  }
 0x760   :  { %16574 = vmatpush1.bf16.msra.mxu1 %v20858_v28  ;;  %v20917_v28 = vld [vmem:[#allocation8 + $0x284] ss:$24 sps:$4 sm:$0xff]  }
 0x761   :  { %16939 = vmatpush1.bf16.msra.mxu0 %v20861_v5  ;;  %16586 = vmatprep.subr.bf16.mxu1 %v20866_v29  ;;  %v20912_v5 = vld [vmem:[#allocation8 + $0xd88] ss:$24 sps:$4 sm:$0xff]  }
 0x762   :  { %16940 = vmatprep.subr.bf16.mxu0 %v20869_v35  ;;  %v20915_v29 = vld [vmem:[#allocation8 + $0x280] ss:$24 sps:$4 sm:$0xff]   ;;  %v20920_v35 = vld [vmem:[#allocation8 + $0xdbc] ss:$24 sps:$4 sm:$0xff]  }
 0x763   :  { %16576 = vmatmul.mubr.bf16.vlgmr.msra.gmra.mrb[32].mxu1 %v22460_v18 }
 0x764   :  { %16587 = vmatpush1.bf16.msra.mxu1 %v20864_v40  ;;  %16618 = vmatprep.mubr.bf16.mxu1 %v22266_v24  ;;  %v20923_v40 = vld [vmem:[#allocation8 + $0x2b4] ss:$24 sps:$4 sm:$0xff]  }
 0x765   :  { %16941 = vmatpush1.bf16.msra.mxu0 %v20867_v32  ;;  %16588 = vmatprep.subr.bf16.mxu1 %v20872_v34  ;;  %v20918_v32 = vld [vmem:[#allocation8 + $0xdb8] ss:$24 sps:$4 sm:$0xff]  }
 0x766   :  { %16942 = vmatprep.subr.bf16.mxu0 %v20875_v56  ;;  %v20921_v34 = vld [vmem:[#allocation8 + $0x2b0] ss:$24 sps:$4 sm:$0xff]   ;;  %v20926_v56 = vld [vmem:[#allocation8 + $0xdec] ss:$24 sps:$4 sm:$0xff]  }
 0x768   :  { %16589 = vmatpush1.bf16.msra.mxu1 %v20870_v57  ;;  %v20929_v57 = vld [vmem:[#allocation8 + $0x2e4] ss:$24 sps:$4 sm:$0xff]  }
 0x769   :  { %16943 = vmatpush1.bf16.msra.mxu0 %v20873_v33  ;;  %16590 = vmatprep.subr.bf16.mxu1 %v20878_v20  ;;  %v20924_v33 = vld [vmem:[#allocation8 + $0xde8] ss:$24 sps:$4 sm:$0xff]  }
 0x76a   :  { %16944 = vmatprep.subr.bf16.mxu0 %v20881_v6  ;;  %v20927_v20 = vld [vmem:[#allocation8 + $0x2e0] ss:$24 sps:$4 sm:$0xff]   ;;  %v20932_v6 = vld [vmem:[#allocation8 + $0xe1c] ss:$24 sps:$4 sm:$0xff]  }
 0x76c   :  { %16591 = vmatpush1.bf16.msra.mxu1 %v20876_v58  ;;  %v20935_v58 = vld [vmem:[#allocation8 + $0x314] ss:$24 sps:$4 sm:$0xff]  }
 0x76d   :  { %16945 = vmatpush1.bf16.msra.mxu0 %v20879_v49  ;;  %16592 = vmatprep.subr.bf16.mxu1 %v20884_v7  ;;  %v20930_v49 = vld [vmem:[#allocation8 + $0xe18] ss:$24 sps:$4 sm:$0xff]  }
 0x76e   :  { %16946 = vmatprep.subr.bf16.mxu0 %v20887_v48  ;;  %v20933_v7 = vld [vmem:[#allocation8 + $0x310] ss:$24 sps:$4 sm:$0xff]   ;;  %v20938_v48 = vld [vmem:[#allocation8 + $0xe4c] ss:$24 sps:$4 sm:$0xff]  }
 0x770   :  { %16593 = vmatpush1.bf16.msra.mxu1 %v20882_v8  ;;  %v20941_v8 = vld [vmem:[#allocation8 + $0x344] ss:$24 sps:$4 sm:$0xff]  }
 0x771   :  { %16947 = vmatpush1.bf16.msra.mxu0 %v20885_v30  ;;  %16594 = vmatprep.subr.bf16.mxu1 %v20890_v39  ;;  %v20936_v30 = vld [vmem:[#allocation8 + $0xe48] ss:$24 sps:$4 sm:$0xff]  }
 0x772   :  { %16948 = vmatprep.subr.bf16.mxu0 %v20893_v17  ;;  %v20939_v39 = vld [vmem:[#allocation8 + $0x340] ss:$24 sps:$4 sm:$0xff]   ;;  %v20944_v17 = vld [vmem:[#allocation8 + $0xe7c] ss:$24 sps:$4 sm:$0xff]  }
 0x774   :  { %16595 = vmatpush1.bf16.msra.mxu1 %v20888_v23  ;;  %v20947_v23 = vld [vmem:[#allocation8 + $0x374] ss:$24 sps:$4 sm:$0xff]  }
 0x775   :  { %16949 = vmatpush1.bf16.msra.mxu0 %v20891_v25  ;;  %16596 = vmatprep.subr.bf16.mxu1 %v20896_v12  ;;  %v20942_v25 = vld [vmem:[#allocation8 + $0xe78] ss:$24 sps:$4 sm:$0xff]  }
 0x776   :  { %16950 = vmatprep.subr.bf16.mxu0 %v20899_v31  ;;  %v20945_v12 = vld [vmem:[#allocation8 + $0x370] ss:$24 sps:$4 sm:$0xff]   ;;  %v20950_v31 = vld [vmem:[#allocation8 + $0xeac] ss:$24 sps:$4 sm:$0xff]  }
 0x778   :  { %16597 = vmatpush1.bf16.msra.mxu1 %v20894_v63  ;;  %v20953_v63 = vld [vmem:[#allocation8 + $0x3a4] ss:$24 sps:$4 sm:$0xff]  }
 0x779   :  { %16951 = vmatpush1.bf16.msra.mxu0 %v20897_v36  ;;  %16598 = vmatprep.subr.bf16.mxu1 %v20902_v22  ;;  %v20951_v36 = vld [vmem:[#allocation8 + $0x3a0] ss:$24 sps:$4 sm:$0xff]   ;;  %v20956_v22 = vld [vmem:[#allocation8 + $0xedc] ss:$24 sps:$4 sm:$0xff]  }
 0x77a   :  { %16952 = vmatprep.subr.bf16.mxu0 %v20905_v52  ;;  %v20954_v52 = vld [vmem:[#allocation8 + $0xed8] ss:$24 sps:$4 sm:$0xff]  }
 0x77c   :  { %16599 = vmatpush1.bf16.msra.mxu1 %v20900_v46  ;;  %v20957_v46 = vld [vmem:[#allocation8 + $0x3d0] ss:$24 sps:$4 sm:$0xff]  }
 0x77d   :  { %16953 = vmatpush1.bf16.msra.mxu0 %v20903_v62  ;;  %16600 = vmatprep.subr.bf16.mxu1 %v20908_v37  ;;  %v20962_v62 = vld [vmem:[#allocation8 + $0xf0c] ss:$24 sps:$4 sm:$0xff]  }
 0x77e   :  { %16954 = vmatprep.subr.bf16.mxu0 %v20911_v54  ;;  %v20965_v37 = vld [vmem:[#allocation8 + $0x404] ss:$24 sps:$4 sm:$0xff]   ;;  %v20960_v54 = vld [vmem:[#allocation8 + $0xf08] ss:$24 sps:$4 sm:$0xff]  }
 0x780   :  { %16601 = vmatpush1.bf16.msra.mxu1 %v20906_v41  ;;  %v20963_v41 = vld [vmem:[#allocation8 + $0x400] ss:$24 sps:$4 sm:$0xff]  }
 0x781   :  { %16955 = vmatpush1.bf16.msra.mxu0 %v20909_v11  ;;  %16602 = vmatprep.subr.bf16.mxu1 %v20914_v10  ;;  %v20968_v11 = vld [vmem:[#allocation8 + $0xf3c] ss:$24 sps:$4 sm:$0xff]  }
 0x782   :  { %16956 = vmatprep.subr.bf16.mxu0 %v20917_v28  ;;  %v20971_v10 = vld [vmem:[#allocation8 + $0x434] ss:$24 sps:$4 sm:$0xff]   ;;  %v20966_v28 = vld [vmem:[#allocation8 + $0xf38] ss:$24 sps:$4 sm:$0xff]  }
 0x784   :  { %16603 = vmatpush1.bf16.msra.mxu1 %v20912_v5  ;;  %v20969_v5 = vld [vmem:[#allocation8 + $0x430] ss:$24 sps:$4 sm:$0xff]  }
 0x785   :  { %16957 = vmatpush1.bf16.msra.mxu0 %v20915_v29  ;;  %16604 = vmatprep.subr.bf16.mxu1 %v20920_v35  ;;  %v20974_v29 = vld [vmem:[#allocation8 + $0xf6c] ss:$24 sps:$4 sm:$0xff]  }
 0x786   :  { %16958 = vmatprep.subr.bf16.mxu0 %v20923_v40  ;;  %v20977_v35 = vld [vmem:[#allocation8 + $0x464] ss:$24 sps:$4 sm:$0xff]   ;;  %v20972_v40 = vld [vmem:[#allocation8 + $0xf68] ss:$24 sps:$4 sm:$0xff]  }
 0x788   :  { %16605 = vmatpush1.bf16.msra.mxu1 %v20918_v32  ;;  %v20975_v32 = vld [vmem:[#allocation8 + $0x460] ss:$24 sps:$4 sm:$0xff]  }
 0x789   :  { %16959 = vmatpush1.bf16.msra.mxu0 %v20921_v34  ;;  %16606 = vmatprep.subr.bf16.mxu1 %v20926_v56  ;;  %v20980_v34 = vld [vmem:[#allocation8 + $0xf9c] ss:$24 sps:$4 sm:$0xff]  }
 0x78a   :  { %16960 = vmatprep.subr.bf16.mxu0 %v20929_v57  ;;  %v20983_v56 = vld [vmem:[#allocation8 + $0x494] ss:$24 sps:$4 sm:$0xff]   ;;  %v20978_v57 = vld [vmem:[#allocation8 + $0xf98] ss:$24 sps:$4 sm:$0xff]  }
 0x78c   :  { %16607 = vmatpush1.bf16.msra.mxu1 %v20924_v33  ;;  %v20981_v33 = vld [vmem:[#allocation8 + $0x490] ss:$24 sps:$4 sm:$0xff]  }
 0x78d   :  { %16961 = vmatpush1.bf16.msra.mxu0 %v20927_v20  ;;  %16608 = vmatprep.subr.bf16.mxu1 %v20932_v6  ;;  %v20986_v20 = vld [vmem:[#allocation8 + $0xfcc] ss:$24 sps:$4 sm:$0xff]  }
 0x78e   :  { %16973 = vmatprep.subr.bf16.mxu0 %v20935_v58  ;;  %v20989_v6 = vld [vmem:[#allocation8 + $0x4c4] ss:$24 sps:$4 sm:$0xff]   ;;  %v20984_v58 = vld [vmem:[#allocation8 + $0xfc8] ss:$24 sps:$4 sm:$0xff]  }
 0x790   :  { %16963 = vmatmul.mubr.bf16.vlgmr.msra.gmra.mrb[20].mxu0 %v22258_v2  ;;  %16609 = vmatpush1.bf16.msra.mxu1 %v20930_v49  ;;  %v20948_v2 = vld [vmem:[#allocation8 + $0xea8] ss:$24 sps:$4 sm:$0xff]  }
 0x791   :  { %16974 = vmatpush1.bf16.msra.mxu0 %v20933_v7  ;;  %17005 = vmatprep.mubr.bf16.mxu0 %v22350_v19  ;;  %v20959_v19 = vld [vmem:[#allocation8 + $0x3d4] ss:$24 sps:$4 sm:$0xff]   ;;  %v20987_v49 = vld [vmem:[#allocation8 + $0x4c0] ss:$24 sps:$4 sm:$0xff]  }
 0x792   :  { %16610 = vmatprep.subr.bf16.mxu1 %v20938_v48  ;;  %16975 = vmatprep.subr.bf16.mxu0 %v20941_v8  ;;  %v20992_v7 = vld [vmem:[#allocation8 + $0xffc] ss:$24 sps:$4 sm:$0xff]   ;;  %v20990_v8 = vld [vmem:[#allocation8 + $0xff8] ss:$24 sps:$4 sm:$0xff]  }
 0x793   :  { %v20995_v48 = vld [vmem:[#allocation8 + $0x4f4] ss:$24 sps:$4 sm:$0xff]  }
 0x794   :  { %16611 = vmatpush1.bf16.msra.mxu1 %v20936_v30  ;;  %v20993_v30 = vld [vmem:[#allocation8 + $0x4f0] ss:$24 sps:$4 sm:$0xff]  }
 0x795   :  { %16976 = vmatpush1.bf16.msra.mxu0 %v20939_v39  ;;  %16612 = vmatprep.subr.bf16.mxu1 %v20944_v17  ;;  %v20998_v39 = vld [vmem:[#allocation8 + $0x102c] ss:$24 sps:$4 sm:$0xff]  }
 0x796   :  { %16977 = vmatprep.subr.bf16.mxu0 %v20947_v23  ;;  %v21001_v17 = vld [vmem:[#allocation8 + $0x524] ss:$24 sps:$4 sm:$0xff]   ;;  %v20996_v23 = vld [vmem:[#allocation8 + $0x1028] ss:$24 sps:$4 sm:$0xff]  }
 0x798   :  { %16613 = vmatpush1.bf16.msra.mxu1 %v20942_v25  ;;  %v20999_v25 = vld [vmem:[#allocation8 + $0x520] ss:$24 sps:$4 sm:$0xff]  }
 0x799   :  { %16978 = vmatpush1.bf16.msra.mxu0 %v20945_v12  ;;  %16614 = vmatprep.subr.bf16.mxu1 %v20950_v31  ;;  %v21004_v12 = vld [vmem:[#allocation8 + $0x105c] ss:$24 sps:$4 sm:$0xff]  }
 0x79a   :  { %16979 = vmatprep.subr.bf16.mxu0 %v20953_v63  ;;  %v21007_v31 = vld [vmem:[#allocation8 + $0x554] ss:$24 sps:$4 sm:$0xff]   ;;  %v21002_v63 = vld [vmem:[#allocation8 + $0x1058] ss:$24 sps:$4 sm:$0xff]  }
 0x79c   :  { %16615 = vmatpush1.bf16.msra.mxu1 %v20948_v2  ;;  %v21005_v2 = vld [vmem:[#allocation8 + $0x550] ss:$24 sps:$4 sm:$0xff]  }
 0x79d   :  { %16980 = vmatpush1.bf16.msra.mxu0 %v20951_v36  ;;  %16616 = vmatprep.subr.bf16.mxu1 %v20956_v22  ;;  %v21010_v36 = vld [vmem:[#allocation8 + $0x108c] ss:$24 sps:$4 sm:$0xff]  }
 0x79e   :  { %16981 = vmatprep.subr.bf16.mxu0 %v20959_v19  ;;  %v21013_v22 = vld [vmem:[#allocation8 + $0x584] ss:$24 sps:$4 sm:$0xff]   ;;  %v21008_v19 = vld [vmem:[#allocation8 + $0x1088] ss:$24 sps:$4 sm:$0xff]  }
 0x7a0   :  { %16617 = vmatpush1.bf16.msra.mxu1 %v20954_v52  ;;  %v21011_v52 = vld [vmem:[#allocation8 + $0x580] ss:$24 sps:$4 sm:$0xff]  }
 0x7a1   :  { %16982 = vmatpush1.bf16.msra.mxu0 %v20957_v46  ;;  %16629 = vmatprep.subr.bf16.mxu1 %v20962_v62  ;;  %v21016_v46 = vld [vmem:[#allocation8 + $0x10bc] ss:$24 sps:$4 sm:$0xff]  }
 0x7a2   :  { %16983 = vmatprep.subr.bf16.mxu0 %v20965_v37  ;;  %v21019_v62 = vld [vmem:[#allocation8 + $0x5b4] ss:$24 sps:$4 sm:$0xff]   ;;  %v21014_v37 = vld [vmem:[#allocation8 + $0x10b8] ss:$24 sps:$4 sm:$0xff]  }
 0x7a3   :  { %16619 = vmatmul.mubr.bf16.vlgmr.msra.gmra.mrb[32].mxu1 %v22264_v16 }
 0x7a4   :  { %16630 = vmatpush1.bf16.msra.mxu1 %v20960_v54  ;;  %16661 = vmatprep.mubr.bf16.mxu1 %v22487_v3  ;;  %v21017_v54 = vld [vmem:[#allocation8 + $0x5b0] ss:$24 sps:$4 sm:$0xff]  }
 0x7a5   :  { %16984 = vmatpush1.bf16.msra.mxu0 %v20963_v41  ;;  %16631 = vmatprep.subr.bf16.mxu1 %v20968_v11  ;;  %v21022_v41 = vld [vmem:[#allocation8 + $0x10ec] ss:$24 sps:$4 sm:$0xff]  }
 0x7a6   :  { %16985 = vmatprep.subr.bf16.mxu0 %v20971_v10  ;;  %v21025_v11 = vld [vmem:[#allocation8 + $0x5e4] ss:$24 sps:$4 sm:$0xff]   ;;  %v21020_v10 = vld [vmem:[#allocation8 + $0x10e8] ss:$24 sps:$4 sm:$0xff]  }
 0x7a8   :  { %16632 = vmatpush1.bf16.msra.mxu1 %v20966_v28  ;;  %v21023_v28 = vld [vmem:[#allocation8 + $0x5e0] ss:$24 sps:$4 sm:$0xff]  }
 0x7a9   :  { %16986 = vmatpush1.bf16.msra.mxu0 %v20969_v5  ;;  %16633 = vmatprep.subr.bf16.mxu1 %v20974_v29  ;;  %v21028_v5 = vld [vmem:[#allocation8 + $0x111c] ss:$24 sps:$4 sm:$0xff]  }
 0x7aa   :  { %16987 = vmatprep.subr.bf16.mxu0 %v20977_v35  ;;  %v21031_v29 = vld [vmem:[#allocation8 + $0x614] ss:$24 sps:$4 sm:$0xff]   ;;  %v21026_v35 = vld [vmem:[#allocation8 + $0x1118] ss:$24 sps:$4 sm:$0xff]  }
 0x7ac   :  { %16634 = vmatpush1.bf16.msra.mxu1 %v20972_v40  ;;  %v21029_v40 = vld [vmem:[#allocation8 + $0x610] ss:$24 sps:$4 sm:$0xff]  }
 0x7ad   :  { %16988 = vmatpush1.bf16.msra.mxu0 %v20975_v32  ;;  %16635 = vmatprep.subr.bf16.mxu1 %v20980_v34  ;;  %v21034_v32 = vld [vmem:[#allocation8 + $0x114c] ss:$24 sps:$4 sm:$0xff]  }
 0x7ae   :  { %16989 = vmatprep.subr.bf16.mxu0 %v20983_v56  ;;  %v21037_v34 = vld [vmem:[#allocation8 + $0x644] ss:$24 sps:$4 sm:$0xff]   ;;  %v21032_v56 = vld [vmem:[#allocation8 + $0x1148] ss:$24 sps:$4 sm:$0xff]  }
 0x7b0   :  { %16636 = vmatpush1.bf16.msra.mxu1 %v20978_v57  ;;  %v21035_v57 = vld [vmem:[#allocation8 + $0x640] ss:$24 sps:$4 sm:$0xff]  }
 0x7b1   :  { %16990 = vmatpush1.bf16.msra.mxu0 %v20981_v33  ;;  %16637 = vmatprep.subr.bf16.mxu1 %v20986_v20  ;;  %v21040_v33 = vld [vmem:[#allocation8 + $0x117c] ss:$24 sps:$4 sm:$0xff]  }
 0x7b2   :  { %16991 = vmatprep.subr.bf16.mxu0 %v20989_v6  ;;  %v21043_v20 = vld [vmem:[#allocation8 + $0x674] ss:$24 sps:$4 sm:$0xff]   ;;  %v21038_v6 = vld [vmem:[#allocation8 + $0x1178] ss:$24 sps:$4 sm:$0xff]  }
 0x7b4   :  { %16638 = vmatpush1.bf16.msra.mxu1 %v20984_v58  ;;  %v21041_v58 = vld [vmem:[#allocation8 + $0x670] ss:$24 sps:$4 sm:$0xff]  }
 0x7b5   :  { %16992 = vmatpush1.bf16.msra.mxu0 %v20987_v49  ;;  %16639 = vmatprep.subr.bf16.mxu1 %v20992_v7  ;;  %v21046_v49 = vld [vmem:[#allocation8 + $0x11ac] ss:$24 sps:$4 sm:$0xff]  }
 0x7b6   :  { %16993 = vmatprep.subr.bf16.mxu0 %v20995_v48  ;;  %v21049_v7 = vld [vmem:[#allocation8 + $0x6a4] ss:$24 sps:$4 sm:$0xff]   ;;  %v21047_v48 = vld [vmem:[#allocation8 + $0x6a0] ss:$24 sps:$4 sm:$0xff]  }
 0x7b8   :  { %16640 = vmatpush1.bf16.msra.mxu1 %v20990_v8  ;;  %v21052_v8 = vld [vmem:[#allocation8 + $0x11dc] ss:$24 sps:$4 sm:$0xff]  }
 0x7b9   :  { %16994 = vmatpush1.bf16.msra.mxu0 %v20993_v30  ;;  %16641 = vmatprep.subr.bf16.mxu1 %v20998_v39  ;;  %v21050_v30 = vld [vmem:[#allocation8 + $0x11d8] ss:$24 sps:$4 sm:$0xff]  }
 0x7ba   :  { %16995 = vmatprep.subr.bf16.mxu0 %v21001_v17  ;;  %v21053_v39 = vld [vmem:[#allocation8 + $0x6d0] ss:$24 sps:$4 sm:$0xff]   ;;  %v21058_v17 = vld [vmem:[#allocation8 + $0x120c] ss:$24 sps:$4 sm:$0xff]  }
 0x7bc   :  { %16642 = vmatpush1.bf16.msra.mxu1 %v20996_v23  ;;  %v21061_v23 = vld [vmem:[#allocation8 + $0x704] ss:$24 sps:$4 sm:$0xff]  }
 0x7bd   :  { %16996 = vmatpush1.bf16.msra.mxu0 %v20999_v25  ;;  %16643 = vmatprep.subr.bf16.mxu1 %v21004_v12  ;;  %v21056_v25 = vld [vmem:[#allocation8 + $0x1208] ss:$24 sps:$4 sm:$0xff]  }
 0x7be   :  { %16997 = vmatprep.subr.bf16.mxu0 %v21007_v31  ;;  %v21059_v12 = vld [vmem:[#allocation8 + $0x700] ss:$24 sps:$4 sm:$0xff]   ;;  %v21064_v31 = vld [vmem:[#allocation8 + $0x123c] ss:$24 sps:$4 sm:$0xff]  }
 0x7c0   :  { %16644 = vmatpush1.bf16.msra.mxu1 %v21002_v63  ;;  %v21067_v63 = vld [vmem:[#allocation8 + $0x734] ss:$24 sps:$4 sm:$0xff]  }
 0x7c1   :  { %16998 = vmatpush1.bf16.msra.mxu0 %v21005_v2  ;;  %16645 = vmatprep.subr.bf16.mxu1 %v21010_v36  ;;  %v21062_v2 = vld [vmem:[#allocation8 + $0x1238] ss:$24 sps:$4 sm:$0xff]  }
 0x7c2   :  { %16999 = vmatprep.subr.bf16.mxu0 %v21013_v22  ;;  %v21065_v36 = vld [vmem:[#allocation8 + $0x730] ss:$24 sps:$4 sm:$0xff]   ;;  %v21070_v22 = vld [vmem:[#allocation8 + $0x126c] ss:$24 sps:$4 sm:$0xff]  }
 0x7c4   :  { %16646 = vmatpush1.bf16.msra.mxu1 %v21008_v19  ;;  %v21073_v19 = vld [vmem:[#allocation8 + $0x764] ss:$24 sps:$4 sm:$0xff]  }
 0x7c5   :  { %17000 = vmatpush1.bf16.msra.mxu0 %v21011_v52  ;;  %16647 = vmatprep.subr.bf16.mxu1 %v21016_v46  ;;  %v21068_v52 = vld [vmem:[#allocation8 + $0x1268] ss:$24 sps:$4 sm:$0xff]  }
 0x7c6   :  { %17001 = vmatprep.subr.bf16.mxu0 %v21019_v62  ;;  %v21071_v46 = vld [vmem:[#allocation8 + $0x760] ss:$24 sps:$4 sm:$0xff]   ;;  %v21076_v62 = vld [vmem:[#allocation8 + $0x129c] ss:$24 sps:$4 sm:$0xff]  }
 0x7c8   :  { %16648 = vmatpush1.bf16.msra.mxu1 %v21014_v37  ;;  %v21079_v37 = vld [vmem:[#allocation8 + $0x794] ss:$24 sps:$4 sm:$0xff]  }
 0x7c9   :  { %17002 = vmatpush1.bf16.msra.mxu0 %v21017_v54  ;;  %16649 = vmatprep.subr.bf16.mxu1 %v21022_v41  ;;  %v21074_v54 = vld [vmem:[#allocation8 + $0x1298] ss:$24 sps:$4 sm:$0xff]  }
 0x7ca   :  { %17003 = vmatprep.subr.bf16.mxu0 %v21025_v11  ;;  %v21077_v41 = vld [vmem:[#allocation8 + $0x790] ss:$24 sps:$4 sm:$0xff]   ;;  %v21082_v11 = vld [vmem:[#allocation8 + $0x12cc] ss:$24 sps:$4 sm:$0xff]  }
 0x7cc   :  { %16650 = vmatpush1.bf16.msra.mxu1 %v21020_v10  ;;  %v21085_v10 = vld [vmem:[#allocation8 + $0x7c4] ss:$24 sps:$4 sm:$0xff]  }
 0x7cd   :  { %17004 = vmatpush1.bf16.msra.mxu0 %v21023_v28  ;;  %16651 = vmatprep.subr.bf16.mxu1 %v21028_v5  ;;  %v21080_v28 = vld [vmem:[#allocation8 + $0x12c8] ss:$24 sps:$4 sm:$0xff]  }
 0x7ce   :  { %17016 = vmatprep.subr.bf16.mxu0 %v21031_v29  ;;  %v21083_v5 = vld [vmem:[#allocation8 + $0x7c0] ss:$24 sps:$4 sm:$0xff]   ;;  %v21088_v29 = vld [vmem:[#allocation8 + $0x12fc] ss:$24 sps:$4 sm:$0xff]  }
 0x7d0   :  { %17006 = vmatmul.mubr.bf16.vlgmr.msra.gmra.mrb[20].mxu0 %v22346_v4  ;;  %16652 = vmatpush1.bf16.msra.mxu1 %v21026_v35  ;;  %v21044_v4 = vld [vmem:[#allocation8 + $0x11a8] ss:$24 sps:$4 sm:$0xff]   ;;  %v21091_v35 = vld [vmem:[#allocation8 + $0x7f4] ss:$24 sps:$4 sm:$0xff]  }
 0x7d1   :  { %17017 = vmatpush1.bf16.msra.mxu0 %v21029_v40  ;;  %17048 = vmatprep.mubr.bf16.mxu0 %v22402_v51  ;;  %v21055_v51 = vld [vmem:[#allocation8 + $0x6d4] ss:$24 sps:$4 sm:$0xff]   ;;  %v21086_v40 = vld [vmem:[#allocation8 + $0x12f8] ss:$24 sps:$4 sm:$0xff]  }
 0x7d2   :  { %16653 = vmatprep.subr.bf16.mxu1 %v21034_v32  ;;  %17018 = vmatprep.subr.bf16.mxu0 %v21037_v34  ;;  %v21089_v32 = vld [vmem:[#allocation8 + $0x7f0] ss:$24 sps:$4 sm:$0xff]   ;;  %v21094_v34 = vld [vmem:[#allocation8 + $0x132c] ss:$24 sps:$4 sm:$0xff]  }
 0x7d4   :  { %16654 = vmatpush1.bf16.msra.mxu1 %v21032_v56  ;;  %v21097_v56 = vld [vmem:[#allocation8 + $0x824] ss:$24 sps:$4 sm:$0xff]  }
 0x7d5   :  { %17019 = vmatpush1.bf16.msra.mxu0 %v21035_v57  ;;  %16655 = vmatprep.subr.bf16.mxu1 %v21040_v33  ;;  %v21092_v57 = vld [vmem:[#allocation8 + $0x1328] ss:$24 sps:$4 sm:$0xff]  }
 0x7d6   :  { %17020 = vmatprep.subr.bf16.mxu0 %v21043_v20  ;;  %v21095_v33 = vld [vmem:[#allocation8 + $0x820] ss:$24 sps:$4 sm:$0xff]   ;;  %v21100_v20 = vld [vmem:[#allocation8 + $0x135c] ss:$24 sps:$4 sm:$0xff]  }
 0x7d8   :  { %16656 = vmatpush1.bf16.msra.mxu1 %v21038_v6  ;;  %v21103_v6 = vld [vmem:[#allocation8 + $0x854] ss:$24 sps:$4 sm:$0xff]  }
 0x7d9   :  { %17021 = vmatpush1.bf16.msra.mxu0 %v21041_v58  ;;  %16657 = vmatprep.subr.bf16.mxu1 %v21046_v49  ;;  %v21098_v58 = vld [vmem:[#allocation8 + $0x1358] ss:$24 sps:$4 sm:$0xff]  }
 0x7da   :  { %17022 = vmatprep.subr.bf16.mxu0 %v21049_v7  ;;  %v21101_v49 = vld [vmem:[#allocation8 + $0x850] ss:$24 sps:$4 sm:$0xff]   ;;  %v21106_v7 = vld [vmem:[#allocation8 + $0x138c] ss:$24 sps:$4 sm:$0xff]  }
 0x7dc   :  { %16658 = vmatpush1.bf16.msra.mxu1 %v21044_v4  ;;  %v21109_v4 = vld [vmem:[#allocation8 + $0x884] ss:$24 sps:$4 sm:$0xff]  }
 0x7dd   :  { %17023 = vmatpush1.bf16.msra.mxu0 %v21047_v48  ;;  %16659 = vmatprep.subr.bf16.mxu1 %v21052_v8  ;;  %v21104_v48 = vld [vmem:[#allocation8 + $0x1388] ss:$24 sps:$4 sm:$0xff]  }
 0x7de   :  { %17024 = vmatprep.subr.bf16.mxu0 %v21055_v51  ;;  %v21107_v8 = vld [vmem:[#allocation8 + $0x880] ss:$24 sps:$4 sm:$0xff]   ;;  %v21112_v51 = vld [vmem:[#allocation8 + $0x13bc] ss:$24 sps:$4 sm:$0xff]  }
 0x7e0   :  { %16660 = vmatpush1.bf16.msra.mxu1 %v21050_v30  ;;  %v21115_v30 = vld [vmem:[#allocation8 + $0x8b4] ss:$24 sps:$4 sm:$0xff]  }
 0x7e1   :  { %17025 = vmatpush1.bf16.msra.mxu0 %v21053_v39  ;;  %16672 = vmatprep.subr.bf16.mxu1 %v21058_v17  ;;  %v21110_v39 = vld [vmem:[#allocation8 + $0x13b8] ss:$24 sps:$4 sm:$0xff]  }
 0x7e2   :  { %17026 = vmatprep.subr.bf16.mxu0 %v21061_v23  ;;  %v21113_v17 = vld [vmem:[#allocation8 + $0x8b0] ss:$24 sps:$4 sm:$0xff]   ;;  %v21118_v23 = vld [vmem:[#allocation8 + $0x13ec] ss:$24 sps:$4 sm:$0xff]  }
 0x7e3   :  { %16662 = vmatmul.mubr.bf16.vlgmr.msra.gmra.mrb[32].mxu1 %v22485_v1 }
 0x7e4   :  { %16673 = vmatpush1.bf16.msra.mxu1 %v21056_v25  ;;  %16704 = vmatprep.mubr.bf16.mxu1 %v22354_v45  ;;  %v21121_v25 = vld [vmem:[#allocation8 + $0x8e4] ss:$24 sps:$4 sm:$0xff]  }
 0x7e5   :  { %17027 = vmatpush1.bf16.msra.mxu0 %v21059_v12  ;;  %16674 = vmatprep.subr.bf16.mxu1 %v21064_v31  ;;  %v21116_v12 = vld [vmem:[#allocation8 + $0x13e8] ss:$24 sps:$4 sm:$0xff]  }
 0x7e6   :  { %17028 = vmatprep.subr.bf16.mxu0 %v21067_v63  ;;  %v21119_v31 = vld [vmem:[#allocation8 + $0x8e0] ss:$24 sps:$4 sm:$0xff]   ;;  %v21124_v63 = vld [vmem:[#allocation8 + $0x141c] ss:$24 sps:$4 sm:$0xff]  }
 0x7e8   :  { %16675 = vmatpush1.bf16.msra.mxu1 %v21062_v2  ;;  %v21127_v2 = vld [vmem:[#allocation8 + $0x914] ss:$24 sps:$4 sm:$0xff]  }
 0x7e9   :  { %17029 = vmatpush1.bf16.msra.mxu0 %v21065_v36  ;;  %16676 = vmatprep.subr.bf16.mxu1 %v21070_v22  ;;  %v21122_v36 = vld [vmem:[#allocation8 + $0x1418] ss:$24 sps:$4 sm:$0xff]  }
 0x7ea   :  { %17030 = vmatprep.subr.bf16.mxu0 %v21073_v19  ;;  %v21125_v22 = vld [vmem:[#allocation8 + $0x910] ss:$24 sps:$4 sm:$0xff]   ;;  %v21130_v19 = vld [vmem:[#allocation8 + $0x144c] ss:$24 sps:$4 sm:$0xff]  }
 0x7ec   :  { %16677 = vmatpush1.bf16.msra.mxu1 %v21068_v52  ;;  %v21133_v52 = vld [vmem:[#allocation8 + $0x944] ss:$24 sps:$4 sm:$0xff]  }
 0x7ed   :  { %17031 = vmatpush1.bf16.msra.mxu0 %v21071_v46  ;;  %16678 = vmatprep.subr.bf16.mxu1 %v21076_v62  ;;  %v21128_v46 = vld [vmem:[#allocation8 + $0x1448] ss:$24 sps:$4 sm:$0xff]  }
 0x7ee   :  { %17032 = vmatprep.subr.bf16.mxu0 %v21079_v37  ;;  %v21131_v62 = vld [vmem:[#allocation8 + $0x940] ss:$24 sps:$4 sm:$0xff]   ;;  %v21136_v37 = vld [vmem:[#allocation8 + $0x147c] ss:$24 sps:$4 sm:$0xff]  }
 0x7f0   :  { %16679 = vmatpush1.bf16.msra.mxu1 %v21074_v54  ;;  %v21139_v54 = vld [vmem:[#allocation8 + $0x974] ss:$24 sps:$4 sm:$0xff]  }
 0x7f1   :  { %17033 = vmatpush1.bf16.msra.mxu0 %v21077_v41  ;;  %16680 = vmatprep.subr.bf16.mxu1 %v21082_v11  ;;  %v21134_v41 = vld [vmem:[#allocation8 + $0x1478] ss:$24 sps:$4 sm:$0xff]  }
 0x7f2   :  { %17034 = vmatprep.subr.bf16.mxu0 %v21085_v10  ;;  %v21137_v11 = vld [vmem:[#allocation8 + $0x970] ss:$24 sps:$4 sm:$0xff]   ;;  %v21142_v10 = vld [vmem:[#allocation8 + $0x14ac] ss:$24 sps:$4 sm:$0xff]  }
 0x7f4   :  { %16681 = vmatpush1.bf16.msra.mxu1 %v21080_v28  ;;  %v21145_v28 = vld [vmem:[#allocation8 + $0x9a4] ss:$24 sps:$4 sm:$0xff]  }
 0x7f5   :  { %17035 = vmatpush1.bf16.msra.mxu0 %v21083_v5  ;;  %16682 = vmatprep.subr.bf16.mxu1 %v21088_v29  ;;  %v21143_v5 = vld [vmem:[#allocation8 + $0x9a0] ss:$24 sps:$4 sm:$0xff]   ;;  %v21148_v29 = vld [vmem:[#allocation8 + $0x14dc] ss:$24 sps:$4 sm:$0xff]  }
 0x7f6   :  { %17036 = vmatprep.subr.bf16.mxu0 %v21091_v35  ;;  %v21146_v35 = vld [vmem:[#allocation8 + $0x14d8] ss:$24 sps:$4 sm:$0xff]  }
 0x7f8   :  { %16683 = vmatpush1.bf16.msra.mxu1 %v21086_v40  ;;  %v21149_v40 = vld [vmem:[#allocation8 + $0x9d0] ss:$24 sps:$4 sm:$0xff]  }
 0x7f9   :  { %17037 = vmatpush1.bf16.msra.mxu0 %v21089_v32  ;;  %16684 = vmatprep.subr.bf16.mxu1 %v21094_v34  ;;  %v10106_v32 = vld [vmem:[#allocation10] sm:$0x3f] }
 0x7fa   :  { %17038 = vmatprep.subr.bf16.mxu0 %v21097_v56  ;;  %v21154_v34 = vld [vmem:[#allocation8 + $0x150c] ss:$24 sps:$4 sm:$0xff]  }
 0x7fb   :  { %v21157_v56 = vld [vmem:[#allocation8 + $0xa04] ss:$24 sps:$4 sm:$0xff]  }
 0x7fc   :  { %16685 = vmatpush1.bf16.msra.mxu1 %v21092_v57  ;;  %v10111_v57 = vrot.slane %v10106_v32, %v22199_v59 }
 0x7fd   :  { %17039 = vmatpush1.bf16.msra.mxu0 %v21095_v33  ;;  %16686 = vmatprep.subr.bf16.mxu1 %v21100_v20  ;;  %v21152_v33 = vld [vmem:[#allocation8 + $0x1508] ss:$24 sps:$4 sm:$0xff]  }
 0x7fe   :  { %17040 = vmatprep.subr.bf16.mxu0 %v21103_v6  ;;  %v21155_v20 = vld [vmem:[#allocation8 + $0xa00] ss:$24 sps:$4 sm:$0xff]   ;;  %v10115_v6 = vrot.slane %v10106_v32, %v22202_v61  ;;  %v21202_v32 = vld [vmem:[#allocation8 + $0x168c] ss:$24 sps:$4 sm:$0xff]  }
 0x800   :  { %16687 = vmatpush1.bf16.msra.mxu1 %v21098_v58  ;;  %v21160_v58 = vld [vmem:[#allocation8 + $0x153c] ss:$24 sps:$4 sm:$0xff]  }
 0x801   :  { %17041 = vmatpush1.bf16.msra.mxu0 %v21101_v49  ;;  %16688 = vmatprep.subr.bf16.mxu1 %v21106_v7  ;;  %v21163_v49 = vld [vmem:[#allocation8 + $0xa34] ss:$24 sps:$4 sm:$0xff]  }
 0x802   :  { %17042 = vmatprep.subr.bf16.mxu0 %v21109_v4 }
 0x804   :  { %16689 = vmatpush1.bf16.msra.mxu1 %v21104_v48 }
 0x805   :  { %17043 = vmatpush1.bf16.msra.mxu0 %v21107_v8  ;;  %16690 = vmatprep.subr.bf16.mxu1 %v21112_v51  ;;  %v21158_v8 = vld [vmem:[#allocation8 + $0x1538] ss:$24 sps:$4 sm:$0xff]  }
 0x806   :  { %17044 = vmatprep.subr.bf16.mxu0 %v21115_v30  ;;  %v21161_v30 = vld [vmem:[#allocation8 + $0xa30] ss:$24 sps:$4 sm:$0xff]  }
 0x808   :  { %16691 = vmatpush1.bf16.msra.mxu1 %v21110_v39  ;;  %v21166_v39 = vld [vmem:[#allocation8 + $0x156c] ss:$24 sps:$4 sm:$0xff]  }
 0x809   :  { %17045 = vmatpush1.bf16.msra.mxu0 %v21113_v17  ;;  %16692 = vmatprep.subr.bf16.mxu1 %v21118_v23  ;;  %v21169_v23 = vld [vmem:[#allocation8 + $0xa64] ss:$24 sps:$4 sm:$0xff]  }
 0x80a   :  { %17046 = vmatprep.subr.bf16.mxu0 %v21121_v25 }
 0x80c   :  { %16693 = vmatpush1.bf16.msra.mxu1 %v21116_v12  ;;  %v21164_v12 = vld [vmem:[#allocation8 + $0x1568] ss:$24 sps:$4 sm:$0xff]  }
 0x80d   :  { %17047 = vmatpush1.bf16.msra.mxu0 %v21119_v31  ;;  %16694 = vmatprep.subr.bf16.mxu1 %v21124_v63  ;;  %v21167_v31 = vld [vmem:[#allocation8 + $0xa60] ss:$24 sps:$4 sm:$0xff]   ;;  %v21172_v63 = vld [vmem:[#allocation8 + $0x159c] ss:$24 sps:$4 sm:$0xff]  }
 0x80e   :  { %17059 = vmatprep.subr.bf16.mxu0 %v21127_v2  ;;  %v21175_v2 = vld [vmem:[#allocation8 + $0xa94] ss:$24 sps:$4 sm:$0xff]  }
 0x810   :  { %17049 = vmatmul.mubr.bf16.vlgmr.msra.gmra.mrb[20].mxu0 %v22400_v0  ;;  %16695 = vmatpush1.bf16.msra.mxu1 %v21122_v36  ;;  %v21140_v0 = vld [vmem:[#allocation8 + $0x14a8] ss:$24 sps:$4 sm:$0xff]   ;;  %v21170_v36 = vld [vmem:[#allocation8 + $0x1598] ss:$24 sps:$4 sm:$0xff]  }
 0x811   :  { %17060 = vmatpush1.bf16.msra.mxu0 %v21125_v22  ;;  %17091 = vmatprep.mubr.bf16.mxu0 %v22463_v26  ;;  %v21151_v26 = vld [vmem:[#allocation8 + $0x9d4] ss:$24 sps:$4 sm:$0xff]   ;;  %v21173_v22 = vld [vmem:[#allocation8 + $0xa90] ss:$24 sps:$4 sm:$0xff]  }
 0x812   :  { %16696 = vmatprep.subr.bf16.mxu1 %v21130_v19  ;;  %17061 = vmatprep.subr.bf16.mxu0 %v21133_v52  ;;  %v21178_v19 = vld [vmem:[#allocation8 + $0x15cc] ss:$24 sps:$4 sm:$0xff]  }
 0x813   :  { %v21181_v52 = vld [vmem:[#allocation8 + $0xac4] ss:$24 sps:$4 sm:$0xff]  }
 0x814   :  { %16697 = vmatpush1.bf16.msra.mxu1 %v21128_v46  ;;  %v21176_v46 = vld [vmem:[#allocation8 + $0x15c8] ss:$24 sps:$4 sm:$0xff]  }
 0x815   :  { %17062 = vmatpush1.bf16.msra.mxu0 %v21131_v62  ;;  %16698 = vmatprep.subr.bf16.mxu1 %v21136_v37  ;;  %v21179_v62 = vld [vmem:[#allocation8 + $0xac0] ss:$24 sps:$4 sm:$0xff]   ;;  %v21184_v37 = vld [vmem:[#allocation8 + $0x15fc] ss:$24 sps:$4 sm:$0xff]  }
 0x816   :  { %17063 = vmatprep.subr.bf16.mxu0 %v21139_v54  ;;  %v21187_v54 = vld [vmem:[#allocation8 + $0xaf4] ss:$24 sps:$4 sm:$0xff]  }
 0x818   :  { %16699 = vmatpush1.bf16.msra.mxu1 %v21134_v41  ;;  %v21182_v41 = vld [vmem:[#allocation8 + $0x15f8] ss:$24 sps:$4 sm:$0xff]  }
 0x819   :  { %17064 = vmatpush1.bf16.msra.mxu0 %v21137_v11  ;;  %16700 = vmatprep.subr.bf16.mxu1 %v21142_v10  ;;  %v21185_v11 = vld [vmem:[#allocation8 + $0xaf0] ss:$24 sps:$4 sm:$0xff]   ;;  %v21190_v10 = vld [vmem:[#allocation8 + $0x162c] ss:$24 sps:$4 sm:$0xff]  }
 0x81a   :  { %17065 = vmatprep.subr.bf16.mxu0 %v21145_v28  ;;  %v21193_v28 = vld [vmem:[#allocation8 + $0xb24] ss:$24 sps:$4 sm:$0xff]  }
 0x81c   :  { %16701 = vmatpush1.bf16.msra.mxu1 %v21140_v0  ;;  %v21188_v0 = vld [vmem:[#allocation8 + $0x1628] ss:$24 sps:$4 sm:$0xff]  }
 0x81d   :  { %17066 = vmatpush1.bf16.msra.mxu0 %v21143_v5  ;;  %16702 = vmatprep.subr.bf16.mxu1 %v21148_v29  ;;  %v21191_v5 = vld [vmem:[#allocation8 + $0xb20] ss:$24 sps:$4 sm:$0xff]   ;;  %v21196_v29 = vld [vmem:[#allocation8 + $0x165c] ss:$24 sps:$4 sm:$0xff]  }
 0x81e   :  { %17067 = vmatprep.subr.bf16.mxu0 %v21151_v26  ;;  %v21199_v26 = vld [vmem:[#allocation8 + $0xb54] ss:$24 sps:$4 sm:$0xff]  }
 0x820   :  { %16703 = vmatpush1.bf16.msra.mxu1 %v21146_v35  ;;  %v21194_v35 = vld [vmem:[#allocation8 + $0x1658] ss:$24 sps:$4 sm:$0xff]  }
 0x821   :  { %17068 = vmatpush1.bf16.msra.mxu0 %v21149_v40  ;;  %16715 = vmatprep.subr.bf16.mxu1 %v21154_v34  ;;  %v21197_v40 = vld [vmem:[#allocation8 + $0xb50] ss:$24 sps:$4 sm:$0xff]   ;;  %v21205_v34 = vld [vmem:[#allocation8 + $0xb84] ss:$24 sps:$4 sm:$0xff]  }
 0x822   :  { %17069 = vmatprep.subr.bf16.mxu0 %v21157_v56  ;;  %v21200_v56 = vld [vmem:[#allocation8 + $0x1688] ss:$24 sps:$4 sm:$0xff]  }
 0x823   :  { %v16405_v7 = vpop.f32.mrb[16].mxu0  ;;  %16705 = vmatmul.mubr.bf16.vlgmr.msra.gmra.mrb[32].mxu1 %v22352_v13 }
 0x824   :  { %v19829_v4 = vadd.f32 %v16405_v7, %v10111_v57  ;;  %v16407_v48 = vpop.f32.mrb[17].mxu0  ;;  %16716 = vmatpush1.bf16.msra.mxu1 %v21152_v33  ;;  %16747 = vmatprep.mubr.bf16.mxu1 %v22505_v14  ;;  %v21208_v33 = vld [vmem:[#allocation8 + $0x16bc] ss:$24 sps:$4 sm:$0xff]  }
 0x825   :  { %v19830_v51 = vadd.f32 %v16407_v48, %v10115_v6  ;;  %17070 = vmatpush1.bf16.msra.mxu0 %v21155_v20  ;;  %v16409_v59 = vpop.f32.mrb[18].mxu0  ;;  %16717 = vmatprep.subr.bf16.mxu1 %v21160_v58  ;;  %v21211_v20 = vld [vmem:[#allocation8 + $0xbb4] ss:$24 sps:$4 sm:$0xff]   ;;  %v21209_v58 = vld [vmem:[#allocation8 + $0xbb0] ss:$24 sps:$4 sm:$0xff]  }
 0x826   :  { %17446 = vst [vmem:[#allocation11] sm:$0xff] %v19829_v4  ;;  %v19831_v61 = vadd.f32 %v16409_v59, %v10111_v57  ;;  %v16411_v17 = vpop.f32.mrb[19].mxu0  ;;  %17071 = vmatprep.subr.bf16.mxu0 %v21163_v49  ;;  %v21203_v57 = vld [vmem:[#allocation8 + $0xb80] ss:$24 sps:$4 sm:$0xff]   ;;  %v21214_v49 = vld [vmem:[#allocation8 + $0x16ec] ss:$24 sps:$4 sm:$0xff]  }
 0x827   :  { %17447 = vst [vmem:[#allocation11 + $0x8] sm:$0xff] %v19830_v51  ;;  %v19832_v25 = vadd.f32 %v16411_v17, %v10115_v6  ;;  %v21206_v6 = vld [vmem:[#allocation8 + $0x16b8] ss:$24 sps:$4 sm:$0xff]   ;;  %v21217_v7 = vld [vmem:[#allocation8 + $0xbe4] ss:$24 sps:$4 sm:$0xff]  }
 0x828   :  { %17452 = vst [vmem:[#allocation11 + $0x30] sm:$0xff] %v19831_v61  ;;  %16718 = vmatpush1.bf16.msra.mxu1 %v21158_v8  ;;  %v21212_v4 = vld [vmem:[#allocation8 + $0x16e8] ss:$24 sps:$4 sm:$0xff]   ;;  %v21220_v8 = vld [vmem:[#allocation8 + $0x171c] ss:$24 sps:$4 sm:$0xff]  }
 0x829   :  { %17453 = vst [vmem:[#allocation11 + $0x38] sm:$0xff] %v19832_v25  ;;  %17072 = vmatpush1.bf16.msra.mxu0 %v21161_v30  ;;  %16719 = vmatprep.subr.bf16.mxu1 %v21166_v39  ;;  %v21215_v48 = vld [vmem:[#allocation8 + $0xbe0] ss:$24 sps:$4 sm:$0xff]   ;;  %v21223_v51 = vld [vmem:[#allocation8 + $0xc14] ss:$24 sps:$4 sm:$0xff]  }
 0x82a   :  { %17073 = vmatprep.subr.bf16.mxu0 %v21169_v23  ;;  %v21218_v59 = vld [vmem:[#allocation8 + $0x1718] ss:$24 sps:$4 sm:$0xff]   ;;  %v21226_v39 = vld [vmem:[#allocation8 + $0x174c] ss:$24 sps:$4 sm:$0xff]   ;;  %v21224_v17 = vld [vmem:[#allocation8 + $0x1748] ss:$24 sps:$4 sm:$0xff]  }
 0x82b   :  { %v21221_v30 = vld [vmem:[#allocation8 + $0xc10] ss:$24 sps:$4 sm:$0xff]   ;;  %v21229_v61 = vld [vmem:[#allocation8 + $0xc44] ss:$24 sps:$4 sm:$0xff]   ;;  %v21227_v23 = vld [vmem:[#allocation8 + $0xc40] ss:$24 sps:$4 sm:$0xff]  }
 0x82c   :  { %16720 = vmatpush1.bf16.msra.mxu1 %v21164_v12  ;;  %v21232_v25 = vld [vmem:[#allocation8 + $0x177c] ss:$24 sps:$4 sm:$0xff]  }
 0x82d   :  { %17074 = vmatpush1.bf16.msra.mxu0 %v21167_v31  ;;  %16721 = vmatprep.subr.bf16.mxu1 %v21172_v63  ;;  %v21235_v12 = vld [vmem:[#allocation8 + $0xc74] ss:$24 sps:$4 sm:$0xff]   ;;  %v21230_v31 = vld [vmem:[#allocation8 + $0x1778] ss:$24 sps:$4 sm:$0xff]  }
 0x82e   :  { %17075 = vmatprep.subr.bf16.mxu0 %v21175_v2  ;;  %v21233_v63 = vld [vmem:[#allocation8 + $0xc70] ss:$24 sps:$4 sm:$0xff]   ;;  %v21238_v2 = vld [vmem:[#allocation8 + $0x17ac] ss:$24 sps:$4 sm:$0xff]  }
 0x830   :  { %16722 = vmatpush1.bf16.msra.mxu1 %v21170_v36  ;;  %v21241_v36 = vld [vmem:[#allocation8 + $0xca4] ss:$24 sps:$4 sm:$0xff]  }
 0x831   :  { %17076 = vmatpush1.bf16.msra.mxu0 %v21173_v22  ;;  %16723 = vmatprep.subr.bf16.mxu1 %v21178_v19  ;;  %v21239_v22 = vld [vmem:[#allocation8 + $0xca0] ss:$24 sps:$4 sm:$0xff]   ;;  %v21244_v19 = vld [vmem:[#allocation8 + $0x17dc] ss:$24 sps:$4 sm:$0xff]  }
 0x832   :  { %17077 = vmatprep.subr.bf16.mxu0 %v21181_v52  ;;  %v21242_v52 = vld [vmem:[#allocation8 + $0x17d8] ss:$24 sps:$4 sm:$0xff]  }
 0x834   :  { %16724 = vmatpush1.bf16.msra.mxu1 %v21176_v46  ;;  %v21245_v46 = vld [vmem:[#allocation8 + $0xcd0] ss:$24 sps:$4 sm:$0xff]  }
 0x835   :  { %17078 = vmatpush1.bf16.msra.mxu0 %v21179_v62  ;;  %16725 = vmatprep.subr.bf16.mxu1 %v21184_v37  ;;  %v21250_v62 = vld [vmem:[#allocation8 + $0x180c] ss:$24 sps:$4 sm:$0xff]  }
 0x836   :  { %17079 = vmatprep.subr.bf16.mxu0 %v21187_v54  ;;  %v21253_v37 = vld [vmem:[#allocation8 + $0xd04] ss:$24 sps:$4 sm:$0xff]   ;;  %v21248_v54 = vld [vmem:[#allocation8 + $0x1808] ss:$24 sps:$4 sm:$0xff]  }
 0x838   :  { %16726 = vmatpush1.bf16.msra.mxu1 %v21182_v41  ;;  %v21251_v41 = vld [vmem:[#allocation8 + $0xd00] ss:$24 sps:$4 sm:$0xff]  }
 0x839   :  { %17080 = vmatpush1.bf16.msra.mxu0 %v21185_v11  ;;  %16727 = vmatprep.subr.bf16.mxu1 %v21190_v10  ;;  %v21256_v11 = vld [vmem:[#allocation8 + $0x183c] ss:$24 sps:$4 sm:$0xff]  }
 0x83a   :  { %17081 = vmatprep.subr.bf16.mxu0 %v21193_v28  ;;  %v21259_v10 = vld [vmem:[#allocation8 + $0xd34] ss:$24 sps:$4 sm:$0xff]   ;;  %v21254_v28 = vld [vmem:[#allocation8 + $0x1838] ss:$24 sps:$4 sm:$0xff]  }
 0x83c   :  { %16728 = vmatpush1.bf16.msra.mxu1 %v21188_v0  ;;  %v21257_v0 = vld [vmem:[#allocation8 + $0xd30] ss:$24 sps:$4 sm:$0xff]  }
 0x83d   :  { %17082 = vmatpush1.bf16.msra.mxu0 %v21191_v5  ;;  %16729 = vmatprep.subr.bf16.mxu1 %v21196_v29  ;;  %v21262_v5 = vld [vmem:[#allocation8 + $0x186c] ss:$24 sps:$4 sm:$0xff]  }
 0x83e   :  { %17083 = vmatprep.subr.bf16.mxu0 %v21199_v26  ;;  %v21265_v29 = vld [vmem:[#allocation8 + $0xd64] ss:$24 sps:$4 sm:$0xff]   ;;  %v21260_v26 = vld [vmem:[#allocation8 + $0x1868] ss:$24 sps:$4 sm:$0xff]  }
 0x840   :  { %16730 = vmatpush1.bf16.msra.mxu1 %v21194_v35  ;;  %v21263_v35 = vld [vmem:[#allocation8 + $0xd60] ss:$24 sps:$4 sm:$0xff]  }
 0x841   :  { %17084 = vmatpush1.bf16.msra.mxu0 %v21197_v40  ;;  %16731 = vmatprep.subr.bf16.mxu1 %v21202_v32  ;;  %v21268_v40 = vld [vmem:[#allocation8 + $0x189c] ss:$24 sps:$4 sm:$0xff]  }
 0x842   :  { %17085 = vmatprep.subr.bf16.mxu0 %v21205_v34  ;;  %v21271_v32 = vld [vmem:[#allocation8 + $0xd94] ss:$24 sps:$4 sm:$0xff]   ;;  %v21266_v34 = vld [vmem:[#allocation8 + $0x1898] ss:$24 sps:$4 sm:$0xff]  }
 0x844   :  { %16732 = vmatpush1.bf16.msra.mxu1 %v21200_v56  ;;  %v21269_v56 = vld [vmem:[#allocation8 + $0xd90] ss:$24 sps:$4 sm:$0xff]  }
 0x845   :  { %17086 = vmatpush1.bf16.msra.mxu0 %v21203_v57  ;;  %16733 = vmatprep.subr.bf16.mxu1 %v21208_v33  ;;  %v21274_v57 = vld [vmem:[#allocation8 + $0x18cc] ss:$24 sps:$4 sm:$0xff]  }
 0x846   :  { %17087 = vmatprep.subr.bf16.mxu0 %v21211_v20  ;;  %v21277_v33 = vld [vmem:[#allocation8 + $0xdc4] ss:$24 sps:$4 sm:$0xff]   ;;  %v21272_v20 = vld [vmem:[#allocation8 + $0x18c8] ss:$24 sps:$4 sm:$0xff]  }
 0x848   :  { %16734 = vmatpush1.bf16.msra.mxu1 %v21206_v6  ;;  %v21275_v6 = vld [vmem:[#allocation8 + $0xdc0] ss:$24 sps:$4 sm:$0xff]  }
 0x849   :  { %17088 = vmatpush1.bf16.msra.mxu0 %v21209_v58  ;;  %16735 = vmatprep.subr.bf16.mxu1 %v21214_v49  ;;  %v21280_v58 = vld [vmem:[#allocation8 + $0x18fc] ss:$24 sps:$4 sm:$0xff]  }
 0x84a   :  { %17089 = vmatprep.subr.bf16.mxu0 %v21217_v7  ;;  %v21283_v49 = vld [vmem:[#allocation8 + $0xdf4] ss:$24 sps:$4 sm:$0xff]   ;;  %v21278_v7 = vld [vmem:[#allocation8 + $0x18f8] ss:$24 sps:$4 sm:$0xff]  }
 0x84c   :  { %16736 = vmatpush1.bf16.msra.mxu1 %v21212_v4  ;;  %v21281_v4 = vld [vmem:[#allocation8 + $0xdf0] ss:$24 sps:$4 sm:$0xff]  }
 0x84d   :  { %17090 = vmatpush1.bf16.msra.mxu0 %v21215_v48  ;;  %16737 = vmatprep.subr.bf16.mxu1 %v21220_v8  ;;  %v21286_v48 = vld [vmem:[#allocation8 + $0x192c] ss:$24 sps:$4 sm:$0xff]  }
 0x84e   :  { %17102 = vmatprep.subr.bf16.mxu0 %v21223_v51  ;;  %v21289_v8 = vld [vmem:[#allocation8 + $0xe24] ss:$24 sps:$4 sm:$0xff]   ;;  %v21284_v51 = vld [vmem:[#allocation8 + $0x1928] ss:$24 sps:$4 sm:$0xff]  }
 0x850   :  { %17092 = vmatmul.mubr.bf16.vlgmr.msra.gmra.mrb[20].mxu0 %v22460_v18  ;;  %16738 = vmatpush1.bf16.msra.mxu1 %v21218_v59  ;;  %v21236_v18 = vld [vmem:[#allocation8 + $0x17a8] ss:$24 sps:$4 sm:$0xff]  }
 0x851   :  { %17103 = vmatpush1.bf16.msra.mxu0 %v21221_v30  ;;  %17134 = vmatprep.mubr.bf16.mxu0 %v22266_v24  ;;  %v21247_v24 = vld [vmem:[#allocation8 + $0xcd4] ss:$24 sps:$4 sm:$0xff]   ;;  %v21287_v59 = vld [vmem:[#allocation8 + $0xe20] ss:$24 sps:$4 sm:$0xff]  }
 0x852   :  { %16739 = vmatprep.subr.bf16.mxu1 %v21226_v39  ;;  %17104 = vmatprep.subr.bf16.mxu0 %v21229_v61  ;;  %v21292_v30 = vld [vmem:[#allocation8 + $0x195c] ss:$24 sps:$4 sm:$0xff]   ;;  %v21290_v61 = vld [vmem:[#allocation8 + $0x1958] ss:$24 sps:$4 sm:$0xff]  }
 0x853   :  { %v21295_v39 = vld [vmem:[#allocation8 + $0xe54] ss:$24 sps:$4 sm:$0xff]  }
 0x854   :  { %16740 = vmatpush1.bf16.msra.mxu1 %v21224_v17  ;;  %v21293_v17 = vld [vmem:[#allocation8 + $0xe50] ss:$24 sps:$4 sm:$0xff]  }
 0x855   :  { %17105 = vmatpush1.bf16.msra.mxu0 %v21227_v23  ;;  %16741 = vmatprep.subr.bf16.mxu1 %v21232_v25  ;;  %v21298_v23 = vld [vmem:[#allocation8 + $0x198c] ss:$24 sps:$4 sm:$0xff]  }
 0x856   :  { %17106 = vmatprep.subr.bf16.mxu0 %v21235_v12  ;;  %v21301_v25 = vld [vmem:[#allocation8 + $0xe84] ss:$24 sps:$4 sm:$0xff]   ;;  %v21296_v12 = vld [vmem:[#allocation8 + $0x1988] ss:$24 sps:$4 sm:$0xff]  }
 0x858   :  { %16742 = vmatpush1.bf16.msra.mxu1 %v21230_v31  ;;  %v21299_v31 = vld [vmem:[#allocation8 + $0xe80] ss:$24 sps:$4 sm:$0xff]  }
 0x859   :  { %17107 = vmatpush1.bf16.msra.mxu0 %v21233_v63  ;;  %16743 = vmatprep.subr.bf16.mxu1 %v21238_v2  ;;  %v21304_v63 = vld [vmem:[#allocation8 + $0x19bc] ss:$24 sps:$4 sm:$0xff]  }
 0x85a   :  { %17108 = vmatprep.subr.bf16.mxu0 %v21241_v36  ;;  %v21307_v2 = vld [vmem:[#allocation8 + $0xeb4] ss:$24 sps:$4 sm:$0xff]   ;;  %v21302_v36 = vld [vmem:[#allocation8 + $0x19b8] ss:$24 sps:$4 sm:$0xff]  }
 0x85c   :  { %16744 = vmatpush1.bf16.msra.mxu1 %v21236_v18  ;;  %v21305_v18 = vld [vmem:[#allocation8 + $0xeb0] ss:$24 sps:$4 sm:$0xff]  }
 0x85d   :  { %17109 = vmatpush1.bf16.msra.mxu0 %v21239_v22  ;;  %16745 = vmatprep.subr.bf16.mxu1 %v21244_v19  ;;  %v21310_v22 = vld [vmem:[#allocation8 + $0x19ec] ss:$24 sps:$4 sm:$0xff]  }
 0x85e   :  { %17110 = vmatprep.subr.bf16.mxu0 %v21247_v24  ;;  %v21313_v19 = vld [vmem:[#allocation8 + $0xee4] ss:$24 sps:$4 sm:$0xff]   ;;  %v21308_v24 = vld [vmem:[#allocation8 + $0x19e8] ss:$24 sps:$4 sm:$0xff]  }
 0x860   :  { %16746 = vmatpush1.bf16.msra.mxu1 %v21242_v52  ;;  %v21311_v52 = vld [vmem:[#allocation8 + $0xee0] ss:$24 sps:$4 sm:$0xff]  }
 0x861   :  { %17111 = vmatpush1.bf16.msra.mxu0 %v21245_v46  ;;  %16758 = vmatprep.subr.bf16.mxu1 %v21250_v62  ;;  %v21316_v46 = vld [vmem:[#allocation8 + $0x1a1c] ss:$24 sps:$4 sm:$0xff]  }
 0x862   :  { %17112 = vmatprep.subr.bf16.mxu0 %v21253_v37  ;;  %v21319_v62 = vld [vmem:[#allocation8 + $0xf14] ss:$24 sps:$4 sm:$0xff]   ;;  %v21314_v37 = vld [vmem:[#allocation8 + $0x1a18] ss:$24 sps:$4 sm:$0xff]  }
 0x863   :  { %16748 = vmatmul.mubr.bf16.vlgmr.msra.gmra.mrb[32].mxu1 %v22503_v47 }
 0x864   :  { %16759 = vmatpush1.bf16.msra.mxu1 %v21248_v54  ;;  %16790 = vmatprep.mubr.bf16.mxu1 %v22406_v27  ;;  %v21317_v54 = vld [vmem:[#allocation8 + $0xf10] ss:$24 sps:$4 sm:$0xff]  }
 0x865   :  { %17113 = vmatpush1.bf16.msra.mxu0 %v21251_v41  ;;  %16760 = vmatprep.subr.bf16.mxu1 %v21256_v11  ;;  %v21322_v41 = vld [vmem:[#allocation8 + $0x1a4c] ss:$24 sps:$4 sm:$0xff]  }
 0x866   :  { %17114 = vmatprep.subr.bf16.mxu0 %v21259_v10  ;;  %v21325_v11 = vld [vmem:[#allocation8 + $0xf44] ss:$24 sps:$4 sm:$0xff]   ;;  %v21320_v10 = vld [vmem:[#allocation8 + $0x1a48] ss:$24 sps:$4 sm:$0xff]  }
 0x868   :  { %16761 = vmatpush1.bf16.msra.mxu1 %v21254_v28  ;;  %v21323_v28 = vld [vmem:[#allocation8 + $0xf40] ss:$24 sps:$4 sm:$0xff]  }
 0x869   :  { %17115 = vmatpush1.bf16.msra.mxu0 %v21257_v0  ;;  %16762 = vmatprep.subr.bf16.mxu1 %v21262_v5  ;;  %v21328_v0 = vld [vmem:[#allocation8 + $0x1a7c] ss:$24 sps:$4 sm:$0xff]  }
 0x86a   :  { %17116 = vmatprep.subr.bf16.mxu0 %v21265_v29  ;;  %v21331_v5 = vld [vmem:[#allocation8 + $0xf74] ss:$24 sps:$4 sm:$0xff]   ;;  %v21326_v29 = vld [vmem:[#allocation8 + $0x1a78] ss:$24 sps:$4 sm:$0xff]  }
 0x86c   :  { %16763 = vmatpush1.bf16.msra.mxu1 %v21260_v26  ;;  %v21329_v26 = vld [vmem:[#allocation8 + $0xf70] ss:$24 sps:$4 sm:$0xff]  }
 0x86d   :  { %17117 = vmatpush1.bf16.msra.mxu0 %v21263_v35  ;;  %16764 = vmatprep.subr.bf16.mxu1 %v21268_v40  ;;  %v21334_v35 = vld [vmem:[#allocation8 + $0x1aac] ss:$24 sps:$4 sm:$0xff]  }
 0x86e   :  { %17118 = vmatprep.subr.bf16.mxu0 %v21271_v32  ;;  %v21337_v40 = vld [vmem:[#allocation8 + $0xfa4] ss:$24 sps:$4 sm:$0xff]   ;;  %v21335_v32 = vld [vmem:[#allocation8 + $0xfa0] ss:$24 sps:$4 sm:$0xff]  }
 0x870   :  { %16765 = vmatpush1.bf16.msra.mxu1 %v21266_v34  ;;  %v21340_v34 = vld [vmem:[#allocation8 + $0x1adc] ss:$24 sps:$4 sm:$0xff]  }
 0x871   :  { %17119 = vmatpush1.bf16.msra.mxu0 %v21269_v56  ;;  %16766 = vmatprep.subr.bf16.mxu1 %v21274_v57  ;;  %v21338_v56 = vld [vmem:[#allocation8 + $0x1ad8] ss:$24 sps:$4 sm:$0xff]  }
 0x872   :  { %17120 = vmatprep.subr.bf16.mxu0 %v21277_v33  ;;  %v21341_v57 = vld [vmem:[#allocation8 + $0xfd0] ss:$24 sps:$4 sm:$0xff]   ;;  %v21346_v33 = vld [vmem:[#allocation8 + $0x1b0c] ss:$24 sps:$4 sm:$0xff]  }
 0x874   :  { %16767 = vmatpush1.bf16.msra.mxu1 %v21272_v20  ;;  %v21349_v20 = vld [vmem:[#allocation8 + $0x1004] ss:$24 sps:$4 sm:$0xff]  }
 0x875   :  { %17121 = vmatpush1.bf16.msra.mxu0 %v21275_v6  ;;  %16768 = vmatprep.subr.bf16.mxu1 %v21280_v58  ;;  %v21344_v6 = vld [vmem:[#allocation8 + $0x1b08] ss:$24 sps:$4 sm:$0xff]  }
 0x876   :  { %17122 = vmatprep.subr.bf16.mxu0 %v21283_v49  ;;  %v21347_v58 = vld [vmem:[#allocation8 + $0x1000] ss:$24 sps:$4 sm:$0xff]   ;;  %v21352_v49 = vld [vmem:[#allocation8 + $0x1b3c] ss:$24 sps:$4 sm:$0xff]  }
 0x878   :  { %16769 = vmatpush1.bf16.msra.mxu1 %v21278_v7  ;;  %v21355_v7 = vld [vmem:[#allocation8 + $0x1034] ss:$24 sps:$4 sm:$0xff]  }
 0x879   :  { %17123 = vmatpush1.bf16.msra.mxu0 %v21281_v4  ;;  %16770 = vmatprep.subr.bf16.mxu1 %v21286_v48  ;;  %v21350_v4 = vld [vmem:[#allocation8 + $0x1b38] ss:$24 sps:$4 sm:$0xff]  }
 0x87a   :  { %17124 = vmatprep.subr.bf16.mxu0 %v21289_v8  ;;  %v21353_v48 = vld [vmem:[#allocation8 + $0x1030] ss:$24 sps:$4 sm:$0xff]   ;;  %v21358_v8 = vld [vmem:[#allocation8 + $0x1b6c] ss:$24 sps:$4 sm:$0xff]  }
 0x87c   :  { %16771 = vmatpush1.bf16.msra.mxu1 %v21284_v51  ;;  %v21361_v51 = vld [vmem:[#allocation8 + $0x1064] ss:$24 sps:$4 sm:$0xff]  }
 0x87d   :  { %17125 = vmatpush1.bf16.msra.mxu0 %v21287_v59  ;;  %16772 = vmatprep.subr.bf16.mxu1 %v21292_v30  ;;  %v21356_v59 = vld [vmem:[#allocation8 + $0x1b68] ss:$24 sps:$4 sm:$0xff]  }
 0x87e   :  { %17126 = vmatprep.subr.bf16.mxu0 %v21295_v39  ;;  %v21359_v30 = vld [vmem:[#allocation8 + $0x1060] ss:$24 sps:$4 sm:$0xff]   ;;  %v21364_v39 = vld [vmem:[#allocation8 + $0x1b9c] ss:$24 sps:$4 sm:$0xff]  }
 0x880   :  { %16773 = vmatpush1.bf16.msra.mxu1 %v21290_v61  ;;  %v21367_v61 = vld [vmem:[#allocation8 + $0x1094] ss:$24 sps:$4 sm:$0xff]  }
 0x881   :  { %17127 = vmatpush1.bf16.msra.mxu0 %v21293_v17  ;;  %16774 = vmatprep.subr.bf16.mxu1 %v21298_v23  ;;  %v21362_v17 = vld [vmem:[#allocation8 + $0x1b98] ss:$24 sps:$4 sm:$0xff]  }
 0x882   :  { %17128 = vmatprep.subr.bf16.mxu0 %v21301_v25  ;;  %v21365_v23 = vld [vmem:[#allocation8 + $0x1090] ss:$24 sps:$4 sm:$0xff]   ;;  %v21370_v25 = vld [vmem:[#allocation8 + $0x1bcc] ss:$24 sps:$4 sm:$0xff]  }
 0x884   :  { %16775 = vmatpush1.bf16.msra.mxu1 %v21296_v12  ;;  %v21373_v12 = vld [vmem:[#allocation8 + $0x10c4] ss:$24 sps:$4 sm:$0xff]  }
 0x885   :  { %17129 = vmatpush1.bf16.msra.mxu0 %v21299_v31  ;;  %16776 = vmatprep.subr.bf16.mxu1 %v21304_v63  ;;  %v21368_v31 = vld [vmem:[#allocation8 + $0x1bc8] ss:$24 sps:$4 sm:$0xff]  }
 0x886   :  { %17130 = vmatprep.subr.bf16.mxu0 %v21307_v2  ;;  %v21371_v63 = vld [vmem:[#allocation8 + $0x10c0] ss:$24 sps:$4 sm:$0xff]   ;;  %v21376_v2 = vld [vmem:[#allocation8 + $0x1bfc] ss:$24 sps:$4 sm:$0xff]  }
 0x888   :  { %16777 = vmatpush1.bf16.msra.mxu1 %v21302_v36  ;;  %v21379_v36 = vld [vmem:[#allocation8 + $0x10f4] ss:$24 sps:$4 sm:$0xff]  }
 0x889   :  { %17131 = vmatpush1.bf16.msra.mxu0 %v21305_v18  ;;  %16778 = vmatprep.subr.bf16.mxu1 %v21310_v22  ;;  %v21374_v18 = vld [vmem:[#allocation8 + $0x1bf8] ss:$24 sps:$4 sm:$0xff]  }
 0x88a   :  { %17132 = vmatprep.subr.bf16.mxu0 %v21313_v19  ;;  %v21377_v22 = vld [vmem:[#allocation8 + $0x10f0] ss:$24 sps:$4 sm:$0xff]   ;;  %v21382_v19 = vld [vmem:[#allocation8 + $0x1c2c] ss:$24 sps:$4 sm:$0xff]  }
 0x88c   :  { %16779 = vmatpush1.bf16.msra.mxu1 %v21308_v24  ;;  %v21385_v24 = vld [vmem:[#allocation8 + $0x1124] ss:$24 sps:$4 sm:$0xff]  }
 0x88d   :  { %17133 = vmatpush1.bf16.msra.mxu0 %v21311_v52  ;;  %16780 = vmatprep.subr.bf16.mxu1 %v21316_v46  ;;  %v21380_v52 = vld [vmem:[#allocation8 + $0x1c28] ss:$24 sps:$4 sm:$0xff]  }
 0x88e   :  { %17145 = vmatprep.subr.bf16.mxu0 %v21319_v62  ;;  %v21383_v46 = vld [vmem:[#allocation8 + $0x1120] ss:$24 sps:$4 sm:$0xff]   ;;  %v21388_v62 = vld [vmem:[#allocation8 + $0x1c5c] ss:$24 sps:$4 sm:$0xff]  }
 0x890   :  { %17135 = vmatmul.mubr.bf16.vlgmr.msra.gmra.mrb[20].mxu0 %v22264_v16  ;;  %16781 = vmatpush1.bf16.msra.mxu1 %v21314_v37  ;;  %v21332_v16 = vld [vmem:[#allocation8 + $0x1aa8] ss:$24 sps:$4 sm:$0xff]   ;;  %v21391_v37 = vld [vmem:[#allocation8 + $0x1154] ss:$24 sps:$4 sm:$0xff]  }
 0x891   :  { %17146 = vmatpush1.bf16.msra.mxu0 %v21317_v54  ;;  %17177 = vmatprep.mubr.bf16.mxu0 %v22487_v3  ;;  %v21343_v3 = vld [vmem:[#allocation8 + $0xfd4] ss:$24 sps:$4 sm:$0xff]   ;;  %v21386_v54 = vld [vmem:[#allocation8 + $0x1c58] ss:$24 sps:$4 sm:$0xff]  }
 0x892   :  { %16782 = vmatprep.subr.bf16.mxu1 %v21322_v41  ;;  %17147 = vmatprep.subr.bf16.mxu0 %v21325_v11  ;;  %v21389_v41 = vld [vmem:[#allocation8 + $0x1150] ss:$24 sps:$4 sm:$0xff]   ;;  %v21394_v11 = vld [vmem:[#allocation8 + $0x1c8c] ss:$24 sps:$4 sm:$0xff]  }
 0x894   :  { %16783 = vmatpush1.bf16.msra.mxu1 %v21320_v10  ;;  %v21397_v10 = vld [vmem:[#allocation8 + $0x1184] ss:$24 sps:$4 sm:$0xff]  }
 0x895   :  { %17148 = vmatpush1.bf16.msra.mxu0 %v21323_v28  ;;  %16784 = vmatprep.subr.bf16.mxu1 %v21328_v0  ;;  %v21392_v28 = vld [vmem:[#allocation8 + $0x1c88] ss:$24 sps:$4 sm:$0xff]  }
 0x896   :  { %17149 = vmatprep.subr.bf16.mxu0 %v21331_v5  ;;  %v21395_v0 = vld [vmem:[#allocation8 + $0x1180] ss:$24 sps:$4 sm:$0xff]   ;;  %v21400_v5 = vld [vmem:[#allocation8 + $0x1cbc] ss:$24 sps:$4 sm:$0xff]  }
 0x898   :  { %16785 = vmatpush1.bf16.msra.mxu1 %v21326_v29  ;;  %v21403_v29 = vld [vmem:[#allocation8 + $0x11b4] ss:$24 sps:$4 sm:$0xff]  }
 0x899   :  { %17150 = vmatpush1.bf16.msra.mxu0 %v21329_v26  ;;  %16786 = vmatprep.subr.bf16.mxu1 %v21334_v35  ;;  %v21398_v26 = vld [vmem:[#allocation8 + $0x1cb8] ss:$24 sps:$4 sm:$0xff]  }
 0x89a   :  { %17151 = vmatprep.subr.bf16.mxu0 %v21337_v40  ;;  %v21401_v35 = vld [vmem:[#allocation8 + $0x11b0] ss:$24 sps:$4 sm:$0xff]   ;;  %v21406_v40 = vld [vmem:[#allocation8 + $0x1cec] ss:$24 sps:$4 sm:$0xff]  }
 0x89c   :  { %16787 = vmatpush1.bf16.msra.mxu1 %v21332_v16  ;;  %v21409_v16 = vld [vmem:[#allocation8 + $0x11e4] ss:$24 sps:$4 sm:$0xff]  }
 0x89d   :  { %17152 = vmatpush1.bf16.msra.mxu0 %v21335_v32  ;;  %16788 = vmatprep.subr.bf16.mxu1 %v21340_v34  ;;  %v21404_v32 = vld [vmem:[#allocation8 + $0x1ce8] ss:$24 sps:$4 sm:$0xff]  }
 0x89e   :  { %17153 = vmatprep.subr.bf16.mxu0 %v21343_v3  ;;  %v21407_v34 = vld [vmem:[#allocation8 + $0x11e0] ss:$24 sps:$4 sm:$0xff]   ;;  %v21412_v3 = vld [vmem:[#allocation8 + $0x1d1c] ss:$24 sps:$4 sm:$0xff]  }
 0x8a0   :  { %16789 = vmatpush1.bf16.msra.mxu1 %v21338_v56  ;;  %v21415_v56 = vld [vmem:[#allocation8 + $0x1214] ss:$24 sps:$4 sm:$0xff]  }
 0x8a1   :  { %17154 = vmatpush1.bf16.msra.mxu0 %v21341_v57  ;;  %16801 = vmatprep.subr.bf16.mxu1 %v21346_v33  ;;  %v21410_v57 = vld [vmem:[#allocation8 + $0x1d18] ss:$24 sps:$4 sm:$0xff]  }
 0x8a2   :  { %17155 = vmatprep.subr.bf16.mxu0 %v21349_v20  ;;  %v21413_v33 = vld [vmem:[#allocation8 + $0x1210] ss:$24 sps:$4 sm:$0xff]   ;;  %v21418_v20 = vld [vmem:[#allocation8 + $0x1d4c] ss:$24 sps:$4 sm:$0xff]  }
 0x8a3   :  { %16791 = vmatmul.mubr.bf16.vlgmr.msra.gmra.mrb[32].mxu1 %v22404_v53 }
 0x8a4   :  { %16802 = vmatpush1.bf16.msra.mxu1 %v21344_v6  ;;  %16833 = vmatprep.mubr.bf16.mxu1 %v22525_v55  ;;  %v21421_v6 = vld [vmem:[#allocation8 + $0x1244] ss:$24 sps:$4 sm:$0xff]  }
 0x8a5   :  { %17156 = vmatpush1.bf16.msra.mxu0 %v21347_v58  ;;  %16803 = vmatprep.subr.bf16.mxu1 %v21352_v49  ;;  %v21416_v58 = vld [vmem:[#allocation8 + $0x1d48] ss:$24 sps:$4 sm:$0xff]  }
 0x8a6   :  { %17157 = vmatprep.subr.bf16.mxu0 %v21355_v7  ;;  %v21419_v49 = vld [vmem:[#allocation8 + $0x1240] ss:$24 sps:$4 sm:$0xff]   ;;  %v21424_v7 = vld [vmem:[#allocation8 + $0x1d7c] ss:$24 sps:$4 sm:$0xff]  }
 0x8a8   :  { %16804 = vmatpush1.bf16.msra.mxu1 %v21350_v4  ;;  %v21427_v4 = vld [vmem:[#allocation8 + $0x1274] ss:$24 sps:$4 sm:$0xff]  }
 0x8a9   :  { %17158 = vmatpush1.bf16.msra.mxu0 %v21353_v48  ;;  %16805 = vmatprep.subr.bf16.mxu1 %v21358_v8  ;;  %v21422_v48 = vld [vmem:[#allocation8 + $0x1d78] ss:$24 sps:$4 sm:$0xff]  }
 0x8aa   :  { %17159 = vmatprep.subr.bf16.mxu0 %v21361_v51  ;;  %v21425_v8 = vld [vmem:[#allocation8 + $0x1270] ss:$24 sps:$4 sm:$0xff]   ;;  %v21430_v51 = vld [vmem:[#allocation8 + $0x1dac] ss:$24 sps:$4 sm:$0xff]  }
 0x8ac   :  { %16806 = vmatpush1.bf16.msra.mxu1 %v21356_v59  ;;  %v21433_v59 = vld [vmem:[#allocation8 + $0x12a4] ss:$24 sps:$4 sm:$0xff]  }
 0x8ad   :  { %17160 = vmatpush1.bf16.msra.mxu0 %v21359_v30  ;;  %16807 = vmatprep.subr.bf16.mxu1 %v21364_v39  ;;  %v21431_v30 = vld [vmem:[#allocation8 + $0x12a0] ss:$24 sps:$4 sm:$0xff]   ;;  %v21436_v39 = vld [vmem:[#allocation8 + $0x1ddc] ss:$24 sps:$4 sm:$0xff]  }
 0x8ae   :  { %17161 = vmatprep.subr.bf16.mxu0 %v21367_v61  ;;  %v21434_v61 = vld [vmem:[#allocation8 + $0x1dd8] ss:$24 sps:$4 sm:$0xff]  }
 0x8b0   :  { %16808 = vmatpush1.bf16.msra.mxu1 %v21362_v17  ;;  %v21437_v17 = vld [vmem:[#allocation8 + $0x12d0] ss:$24 sps:$4 sm:$0xff]  }
 0x8b1   :  { %17162 = vmatpush1.bf16.msra.mxu0 %v21365_v23  ;;  %16809 = vmatprep.subr.bf16.mxu1 %v21370_v25  ;;  %v21442_v23 = vld [vmem:[#allocation8 + $0x1e0c] ss:$24 sps:$4 sm:$0xff]  }
 0x8b2   :  { %17163 = vmatprep.subr.bf16.mxu0 %v21373_v12  ;;  %v21445_v25 = vld [vmem:[#allocation8 + $0x1304] ss:$24 sps:$4 sm:$0xff]   ;;  %v21440_v12 = vld [vmem:[#allocation8 + $0x1e08] ss:$24 sps:$4 sm:$0xff]  }
 0x8b4   :  { %16810 = vmatpush1.bf16.msra.mxu1 %v21368_v31  ;;  %v21443_v31 = vld [vmem:[#allocation8 + $0x1300] ss:$24 sps:$4 sm:$0xff]  }
 0x8b5   :  { %17164 = vmatpush1.bf16.msra.mxu0 %v21371_v63  ;;  %16811 = vmatprep.subr.bf16.mxu1 %v21376_v2  ;;  %v21448_v63 = vld [vmem:[#allocation8 + $0x1e3c] ss:$24 sps:$4 sm:$0xff]  }
 0x8b6   :  { %17165 = vmatprep.subr.bf16.mxu0 %v21379_v36  ;;  %v21451_v2 = vld [vmem:[#allocation8 + $0x1334] ss:$24 sps:$4 sm:$0xff]   ;;  %v21446_v36 = vld [vmem:[#allocation8 + $0x1e38] ss:$24 sps:$4 sm:$0xff]  }
 0x8b8   :  { %16812 = vmatpush1.bf16.msra.mxu1 %v21374_v18  ;;  %v21449_v18 = vld [vmem:[#allocation8 + $0x1330] ss:$24 sps:$4 sm:$0xff]  }
 0x8b9   :  { %17166 = vmatpush1.bf16.msra.mxu0 %v21377_v22  ;;  %16813 = vmatprep.subr.bf16.mxu1 %v21382_v19  ;;  %v21454_v22 = vld [vmem:[#allocation8 + $0x1e6c] ss:$24 sps:$4 sm:$0xff]  }
 0x8ba   :  { %17167 = vmatprep.subr.bf16.mxu0 %v21385_v24  ;;  %v21457_v19 = vld [vmem:[#allocation8 + $0x1364] ss:$24 sps:$4 sm:$0xff]   ;;  %v21452_v24 = vld [vmem:[#allocation8 + $0x1e68] ss:$24 sps:$4 sm:$0xff]  }
 0x8bc   :  { %16814 = vmatpush1.bf16.msra.mxu1 %v21380_v52  ;;  %v21455_v52 = vld [vmem:[#allocation8 + $0x1360] ss:$24 sps:$4 sm:$0xff]  }
 0x8bd   :  { %17168 = vmatpush1.bf16.msra.mxu0 %v21383_v46  ;;  %16815 = vmatprep.subr.bf16.mxu1 %v21388_v62  ;;  %v21460_v46 = vld [vmem:[#allocation8 + $0x1e9c] ss:$24 sps:$4 sm:$0xff]  }
 0x8be   :  { %17169 = vmatprep.subr.bf16.mxu0 %v21391_v37  ;;  %v21463_v62 = vld [vmem:[#allocation8 + $0x1394] ss:$24 sps:$4 sm:$0xff]   ;;  %v21458_v37 = vld [vmem:[#allocation8 + $0x1e98] ss:$24 sps:$4 sm:$0xff]  }
 0x8c0   :  { %16816 = vmatpush1.bf16.msra.mxu1 %v21386_v54  ;;  %v21461_v54 = vld [vmem:[#allocation8 + $0x1390] ss:$24 sps:$4 sm:$0xff]  }
 0x8c1   :  { %17170 = vmatpush1.bf16.msra.mxu0 %v21389_v41  ;;  %16817 = vmatprep.subr.bf16.mxu1 %v21394_v11  ;;  %v21466_v41 = vld [vmem:[#allocation8 + $0x1ecc] ss:$24 sps:$4 sm:$0xff]  }
 0x8c2   :  { %17171 = vmatprep.subr.bf16.mxu0 %v21397_v10  ;;  %v21469_v11 = vld [vmem:[#allocation8 + $0x13c4] ss:$24 sps:$4 sm:$0xff]   ;;  %v21464_v10 = vld [vmem:[#allocation8 + $0x1ec8] ss:$24 sps:$4 sm:$0xff]  }
 0x8c4   :  { %16818 = vmatpush1.bf16.msra.mxu1 %v21392_v28  ;;  %v21467_v28 = vld [vmem:[#allocation8 + $0x13c0] ss:$24 sps:$4 sm:$0xff]  }
 0x8c5   :  { %17172 = vmatpush1.bf16.msra.mxu0 %v21395_v0  ;;  %16819 = vmatprep.subr.bf16.mxu1 %v21400_v5  ;;  %v21472_v0 = vld [vmem:[#allocation8 + $0x1efc] ss:$24 sps:$4 sm:$0xff]  }
 0x8c6   :  { %17173 = vmatprep.subr.bf16.mxu0 %v21403_v29  ;;  %v21475_v5 = vld [vmem:[#allocation8 + $0x13f4] ss:$24 sps:$4 sm:$0xff]   ;;  %v21470_v29 = vld [vmem:[#allocation8 + $0x1ef8] ss:$24 sps:$4 sm:$0xff]  }
 0x8c8   :  { %16820 = vmatpush1.bf16.msra.mxu1 %v21398_v26  ;;  %v21473_v26 = vld [vmem:[#allocation8 + $0x13f0] ss:$24 sps:$4 sm:$0xff]  }
 0x8c9   :  { %17174 = vmatpush1.bf16.msra.mxu0 %v21401_v35  ;;  %16821 = vmatprep.subr.bf16.mxu1 %v21406_v40  ;;  %v21478_v35 = vld [vmem:[#allocation8 + $0x1f2c] ss:$24 sps:$4 sm:$0xff]  }
 0x8ca   :  { %17175 = vmatprep.subr.bf16.mxu0 %v21409_v16  ;;  %v21481_v40 = vld [vmem:[#allocation8 + $0x1424] ss:$24 sps:$4 sm:$0xff]   ;;  %v21476_v16 = vld [vmem:[#allocation8 + $0x1f28] ss:$24 sps:$4 sm:$0xff]  }
 0x8cc   :  { %16822 = vmatpush1.bf16.msra.mxu1 %v21404_v32  ;;  %v21479_v32 = vld [vmem:[#allocation8 + $0x1420] ss:$24 sps:$4 sm:$0xff]  }
 0x8cd   :  { %17176 = vmatpush1.bf16.msra.mxu0 %v21407_v34  ;;  %16823 = vmatprep.subr.bf16.mxu1 %v21412_v3  ;;  %v21484_v34 = vld [vmem:[#allocation8 + $0x1f5c] ss:$24 sps:$4 sm:$0xff]  }
 0x8ce   :  { %17188 = vmatprep.subr.bf16.mxu0 %v21415_v56  ;;  %v21487_v3 = vld [vmem:[#allocation8 + $0x1454] ss:$24 sps:$4 sm:$0xff]   ;;  %v21482_v56 = vld [vmem:[#allocation8 + $0x1f58] ss:$24 sps:$4 sm:$0xff]  }
 0x8d0   :  { %17178 = vmatmul.mubr.bf16.vlgmr.msra.gmra.mrb[20].mxu0 %v22485_v1  ;;  %16824 = vmatpush1.bf16.msra.mxu1 %v21410_v57  ;;  %v21428_v1 = vld [vmem:[#allocation8 + $0x1da8] ss:$24 sps:$4 sm:$0xff]  }
 0x8d1   :  { %17189 = vmatpush1.bf16.msra.mxu0 %v21413_v33  ;;  %17220 = vmatprep.mubr.bf16.mxu0 %v22354_v45  ;;  %v21439_v45 = vld [vmem:[#allocation8 + $0x12d4] ss:$24 sps:$4 sm:$0xff]   ;;  %v21485_v57 = vld [vmem:[#allocation8 + $0x1450] ss:$24 sps:$4 sm:$0xff]  }
 0x8d2   :  { %16825 = vmatprep.subr.bf16.mxu1 %v21418_v20  ;;  %17190 = vmatprep.subr.bf16.mxu0 %v21421_v6  ;;  %v21490_v33 = vld [vmem:[#allocation8 + $0x1f8c] ss:$24 sps:$4 sm:$0xff]   ;;  %v21488_v6 = vld [vmem:[#allocation8 + $0x1f88] ss:$24 sps:$4 sm:$0xff]  }
 0x8d3   :  { %v21493_v20 = vld [vmem:[#allocation8 + $0x1484] ss:$24 sps:$4 sm:$0xff]  }
 0x8d4   :  { %16826 = vmatpush1.bf16.msra.mxu1 %v21416_v58  ;;  %v21491_v58 = vld [vmem:[#allocation8 + $0x1480] ss:$24 sps:$4 sm:$0xff]  }
 0x8d5   :  { %17191 = vmatpush1.bf16.msra.mxu0 %v21419_v49  ;;  %16827 = vmatprep.subr.bf16.mxu1 %v21424_v7  ;;  %v21496_v49 = vld [vmem:[#allocation8 + $0x1fbc] ss:$24 sps:$4 sm:$0xff]  }
 0x8d6   :  { %17192 = vmatprep.subr.bf16.mxu0 %v21427_v4  ;;  %v21499_v7 = vld [vmem:[#allocation8 + $0x14b4] ss:$24 sps:$4 sm:$0xff]   ;;  %v21494_v4 = vld [vmem:[#allocation8 + $0x1fb8] ss:$24 sps:$4 sm:$0xff]  }
 0x8d8   :  { %16828 = vmatpush1.bf16.msra.mxu1 %v21422_v48  ;;  %v21497_v48 = vld [vmem:[#allocation8 + $0x14b0] ss:$24 sps:$4 sm:$0xff]  }
 0x8d9   :  { %17193 = vmatpush1.bf16.msra.mxu0 %v21425_v8  ;;  %16829 = vmatprep.subr.bf16.mxu1 %v21430_v51  ;;  %v21502_v8 = vld [vmem:[#allocation8 + $0x1fec] ss:$24 sps:$4 sm:$0xff]  }
 0x8da   :  { %17194 = vmatprep.subr.bf16.mxu0 %v21433_v59  ;;  %v21505_v51 = vld [vmem:[#allocation8 + $0x14e4] ss:$24 sps:$4 sm:$0xff]   ;;  %v21500_v59 = vld [vmem:[#allocation8 + $0x1fe8] ss:$24 sps:$4 sm:$0xff]  }
 0x8dc   :  { %16830 = vmatpush1.bf16.msra.mxu1 %v21428_v1  ;;  %v21503_v1 = vld [vmem:[#allocation8 + $0x14e0] ss:$24 sps:$4 sm:$0xff]  }
 0x8dd   :  { %17195 = vmatpush1.bf16.msra.mxu0 %v21431_v30  ;;  %16831 = vmatprep.subr.bf16.mxu1 %v21436_v39  ;;  %v21508_v30 = vld [vmem:[#allocation8 + $0x201c] ss:$24 sps:$4 sm:$0xff]  }
 0x8de   :  { %17196 = vmatprep.subr.bf16.mxu0 %v21439_v45  ;;  %v21511_v39 = vld [vmem:[#allocation8 + $0x1514] ss:$24 sps:$4 sm:$0xff]   ;;  %v21506_v45 = vld [vmem:[#allocation8 + $0x2018] ss:$24 sps:$4 sm:$0xff]  }
 0x8e0   :  { %16832 = vmatpush1.bf16.msra.mxu1 %v21434_v61  ;;  %v21509_v61 = vld [vmem:[#allocation8 + $0x1510] ss:$24 sps:$4 sm:$0xff]  }
 0x8e1   :  { %17197 = vmatpush1.bf16.msra.mxu0 %v21437_v17  ;;  %16844 = vmatprep.subr.bf16.mxu1 %v21442_v23  ;;  %v21514_v17 = vld [vmem:[#allocation8 + $0x204c] ss:$24 sps:$4 sm:$0xff]  }
 0x8e2   :  { %17198 = vmatprep.subr.bf16.mxu0 %v21445_v25  ;;  %v21517_v23 = vld [vmem:[#allocation8 + $0x1544] ss:$24 sps:$4 sm:$0xff]   ;;  %v21512_v25 = vld [vmem:[#allocation8 + $0x2048] ss:$24 sps:$4 sm:$0xff]  }
 0x8e3   :  { %16834 = vmatmul.mubr.bf16.vlgmr.msra.gmra.mrb[32].mxu1 %v22523_v21 }
 0x8e4   :  { %16845 = vmatpush1.bf16.msra.mxu1 %v21440_v12  ;;  %16876 = vmatprep.mubr.bf16.mxu1 %v22468_v60  ;;  %v21515_v12 = vld [vmem:[#allocation8 + $0x1540] ss:$24 sps:$4 sm:$0xff]  }
 0x8e5   :  { %17199 = vmatpush1.bf16.msra.mxu0 %v21443_v31  ;;  %16846 = vmatprep.subr.bf16.mxu1 %v21448_v63  ;;  %v21520_v31 = vld [vmem:[#allocation8 + $0x207c] ss:$24 sps:$4 sm:$0xff]  }
 0x8e6   :  { %17200 = vmatprep.subr.bf16.mxu0 %v21451_v2  ;;  %v21523_v63 = vld [vmem:[#allocation8 + $0x1574] ss:$24 sps:$4 sm:$0xff]   ;;  %v21518_v2 = vld [vmem:[#allocation8 + $0x2078] ss:$24 sps:$4 sm:$0xff]  }
 0x8e8   :  { %16847 = vmatpush1.bf16.msra.mxu1 %v21446_v36  ;;  %v21521_v36 = vld [vmem:[#allocation8 + $0x1570] ss:$24 sps:$4 sm:$0xff]  }
 0x8e9   :  { %17201 = vmatpush1.bf16.msra.mxu0 %v21449_v18  ;;  %16848 = vmatprep.subr.bf16.mxu1 %v21454_v22  ;;  %v21526_v18 = vld [vmem:[#allocation8 + $0x20ac] ss:$24 sps:$4 sm:$0xff]  }
 0x8ea   :  { %17202 = vmatprep.subr.bf16.mxu0 %v21457_v19  ;;  %v21529_v22 = vld [vmem:[#allocation8 + $0x15a4] ss:$24 sps:$4 sm:$0xff]   ;;  %v21527_v19 = vld [vmem:[#allocation8 + $0x15a0] ss:$24 sps:$4 sm:$0xff]  }
 0x8ec   :  { %16849 = vmatpush1.bf16.msra.mxu1 %v21452_v24  ;;  %v21532_v24 = vld [vmem:[#allocation8 + $0x20dc] ss:$24 sps:$4 sm:$0xff]  }
 0x8ed   :  { %17203 = vmatpush1.bf16.msra.mxu0 %v21455_v52  ;;  %16850 = vmatprep.subr.bf16.mxu1 %v21460_v46  ;;  %v21530_v52 = vld [vmem:[#allocation8 + $0x20d8] ss:$24 sps:$4 sm:$0xff]  }
 0x8ee   :  { %17204 = vmatprep.subr.bf16.mxu0 %v21463_v62  ;;  %v21533_v46 = vld [vmem:[#allocation8 + $0x15d0] ss:$24 sps:$4 sm:$0xff]   ;;  %v21538_v62 = vld [vmem:[#allocation8 + $0x210c] ss:$24 sps:$4 sm:$0xff]  }
 0x8f0   :  { %16851 = vmatpush1.bf16.msra.mxu1 %v21458_v37  ;;  %v21541_v37 = vld [vmem:[#allocation8 + $0x1604] ss:$24 sps:$4 sm:$0xff]  }
 0x8f1   :  { %17205 = vmatpush1.bf16.msra.mxu0 %v21461_v54  ;;  %16852 = vmatprep.subr.bf16.mxu1 %v21466_v41  ;;  %v21536_v54 = vld [vmem:[#allocation8 + $0x2108] ss:$24 sps:$4 sm:$0xff]  }
 0x8f2   :  { %17206 = vmatprep.subr.bf16.mxu0 %v21469_v11  ;;  %v21539_v41 = vld [vmem:[#allocation8 + $0x1600] ss:$24 sps:$4 sm:$0xff]   ;;  %v21544_v11 = vld [vmem:[#allocation8 + $0x213c] ss:$24 sps:$4 sm:$0xff]  }
 0x8f4   :  { %16853 = vmatpush1.bf16.msra.mxu1 %v21464_v10  ;;  %v21547_v10 = vld [vmem:[#allocation8 + $0x1634] ss:$24 sps:$4 sm:$0xff]  }
 0x8f5   :  { %17207 = vmatpush1.bf16.msra.mxu0 %v21467_v28  ;;  %16854 = vmatprep.subr.bf16.mxu1 %v21472_v0  ;;  %v21542_v28 = vld [vmem:[#allocation8 + $0x2138] ss:$24 sps:$4 sm:$0xff]  }
 0x8f6   :  { %17208 = vmatprep.subr.bf16.mxu0 %v21475_v5  ;;  %v21545_v0 = vld [vmem:[#allocation8 + $0x1630] ss:$24 sps:$4 sm:$0xff]   ;;  %v21550_v5 = vld [vmem:[#allocation8 + $0x216c] ss:$24 sps:$4 sm:$0xff]  }
 0x8f8   :  { %16855 = vmatpush1.bf16.msra.mxu1 %v21470_v29  ;;  %v21553_v29 = vld [vmem:[#allocation8 + $0x1664] ss:$24 sps:$4 sm:$0xff]  }
 0x8f9   :  { %17209 = vmatpush1.bf16.msra.mxu0 %v21473_v26  ;;  %16856 = vmatprep.subr.bf16.mxu1 %v21478_v35  ;;  %v21548_v26 = vld [vmem:[#allocation8 + $0x2168] ss:$24 sps:$4 sm:$0xff]  }
 0x8fa   :  { %17210 = vmatprep.subr.bf16.mxu0 %v21481_v40  ;;  %v21551_v35 = vld [vmem:[#allocation8 + $0x1660] ss:$24 sps:$4 sm:$0xff]   ;;  %v21556_v40 = vld [vmem:[#allocation8 + $0x219c] ss:$24 sps:$4 sm:$0xff]  }
 0x8fc   :  { %16857 = vmatpush1.bf16.msra.mxu1 %v21476_v16  ;;  %v21559_v16 = vld [vmem:[#allocation8 + $0x1694] ss:$24 sps:$4 sm:$0xff]  }
 0x8fd   :  { %17211 = vmatpush1.bf16.msra.mxu0 %v21479_v32  ;;  %16858 = vmatprep.subr.bf16.mxu1 %v21484_v34  ;;  %v21554_v32 = vld [vmem:[#allocation8 + $0x2198] ss:$24 sps:$4 sm:$0xff]  }
 0x8fe   :  { %17212 = vmatprep.subr.bf16.mxu0 %v21487_v3  ;;  %v21557_v34 = vld [vmem:[#allocation8 + $0x1690] ss:$24 sps:$4 sm:$0xff]   ;;  %v21562_v3 = vld [vmem:[#allocation8 + $0x21cc] ss:$24 sps:$4 sm:$0xff]  }
 0x900   :  { %16859 = vmatpush1.bf16.msra.mxu1 %v21482_v56  ;;  %v21565_v56 = vld [vmem:[#allocation8 + $0x16c4] ss:$24 sps:$4 sm:$0xff]  }
 0x901   :  { %17213 = vmatpush1.bf16.msra.mxu0 %v21485_v57  ;;  %16860 = vmatprep.subr.bf16.mxu1 %v21490_v33  ;;  %v21560_v57 = vld [vmem:[#allocation8 + $0x21c8] ss:$24 sps:$4 sm:$0xff]  }
 0x902   :  { %17214 = vmatprep.subr.bf16.mxu0 %v21493_v20  ;;  %v21563_v33 = vld [vmem:[#allocation8 + $0x16c0] ss:$24 sps:$4 sm:$0xff]   ;;  %v21568_v20 = vld [vmem:[#allocation8 + $0x21fc] ss:$24 sps:$4 sm:$0xff]  }
 0x904   :  { %16861 = vmatpush1.bf16.msra.mxu1 %v21488_v6  ;;  %v21571_v6 = vld [vmem:[#allocation8 + $0x16f4] ss:$24 sps:$4 sm:$0xff]  }
 0x905   :  { %17215 = vmatpush1.bf16.msra.mxu0 %v21491_v58  ;;  %16862 = vmatprep.subr.bf16.mxu1 %v21496_v49  ;;  %v21566_v58 = vld [vmem:[#allocation8 + $0x21f8] ss:$24 sps:$4 sm:$0xff]  }
 0x906   :  { %17216 = vmatprep.subr.bf16.mxu0 %v21499_v7  ;;  %v21569_v49 = vld [vmem:[#allocation8 + $0x16f0] ss:$24 sps:$4 sm:$0xff]   ;;  %v21574_v7 = vld [vmem:[#allocation8 + $0x222c] ss:$24 sps:$4 sm:$0xff]  }
 0x908   :  { %16863 = vmatpush1.bf16.msra.mxu1 %v21494_v4  ;;  %v21577_v4 = vld [vmem:[#allocation8 + $0x1724] ss:$24 sps:$4 sm:$0xff]  }
 0x909   :  { %17217 = vmatpush1.bf16.msra.mxu0 %v21497_v48  ;;  %16864 = vmatprep.subr.bf16.mxu1 %v21502_v8  ;;  %v21572_v48 = vld [vmem:[#allocation8 + $0x2228] ss:$24 sps:$4 sm:$0xff]  }
 0x90a   :  { %17218 = vmatprep.subr.bf16.mxu0 %v21505_v51  ;;  %v21575_v8 = vld [vmem:[#allocation8 + $0x1720] ss:$24 sps:$4 sm:$0xff]   ;;  %v21580_v51 = vld [vmem:[#allocation8 + $0x225c] ss:$24 sps:$4 sm:$0xff]  }
 0x90c   :  { %16865 = vmatpush1.bf16.msra.mxu1 %v21500_v59  ;;  %v21583_v59 = vld [vmem:[#allocation8 + $0x1754] ss:$24 sps:$4 sm:$0xff]  }
 0x90d   :  { %17219 = vmatpush1.bf16.msra.mxu0 %v21503_v1  ;;  %16866 = vmatprep.subr.bf16.mxu1 %v21508_v30  ;;  %v21578_v1 = vld [vmem:[#allocation8 + $0x2258] ss:$24 sps:$4 sm:$0xff]  }
 0x90e   :  { %17231 = vmatprep.subr.bf16.mxu0 %v21511_v39  ;;  %v21581_v30 = vld [vmem:[#allocation8 + $0x1750] ss:$24 sps:$4 sm:$0xff]   ;;  %v21586_v39 = vld [vmem:[#allocation8 + $0x228c] ss:$24 sps:$4 sm:$0xff]  }
 0x910   :  { %17221 = vmatmul.mubr.bf16.vlgmr.msra.gmra.mrb[20].mxu0 %v22352_v13  ;;  %16867 = vmatpush1.bf16.msra.mxu1 %v21506_v45  ;;  %v21524_v13 = vld [vmem:[#allocation8 + $0x20a8] ss:$24 sps:$4 sm:$0xff]   ;;  %v21589_v45 = vld [vmem:[#allocation8 + $0x1784] ss:$24 sps:$4 sm:$0xff]  }
 0x911   :  { %17232 = vmatpush1.bf16.msra.mxu0 %v21509_v61  ;;  %17263 = vmatprep.mubr.bf16.mxu0 %v22505_v14  ;;  %v21535_v14 = vld [vmem:[#allocation8 + $0x15d4] ss:$24 sps:$4 sm:$0xff]   ;;  %v21584_v61 = vld [vmem:[#allocation8 + $0x2288] ss:$24 sps:$4 sm:$0xff]  }
 0x912   :  { %16868 = vmatprep.subr.bf16.mxu1 %v21514_v17  ;;  %17233 = vmatprep.subr.bf16.mxu0 %v21517_v23  ;;  %v21587_v17 = vld [vmem:[#allocation8 + $0x1780] ss:$24 sps:$4 sm:$0xff]   ;;  %v21592_v23 = vld [vmem:[#allocation8 + $0x22bc] ss:$24 sps:$4 sm:$0xff]  }
 0x914   :  { %16869 = vmatpush1.bf16.msra.mxu1 %v21512_v25  ;;  %v21595_v25 = vld [vmem:[#allocation8 + $0x17b4] ss:$24 sps:$4 sm:$0xff]  }
 0x915   :  { %17234 = vmatpush1.bf16.msra.mxu0 %v21515_v12  ;;  %16870 = vmatprep.subr.bf16.mxu1 %v21520_v31  ;;  %v21590_v12 = vld [vmem:[#allocation8 + $0x22b8] ss:$24 sps:$4 sm:$0xff]  }
 0x916   :  { %17235 = vmatprep.subr.bf16.mxu0 %v21523_v63  ;;  %v21593_v31 = vld [vmem:[#allocation8 + $0x17b0] ss:$24 sps:$4 sm:$0xff]   ;;  %v21598_v63 = vld [vmem:[#allocation8 + $0x22ec] ss:$24 sps:$4 sm:$0xff]  }
 0x918   :  { %16871 = vmatpush1.bf16.msra.mxu1 %v21518_v2  ;;  %v21601_v2 = vld [vmem:[#allocation8 + $0x17e4] ss:$24 sps:$4 sm:$0xff]  }
 0x919   :  { %17236 = vmatpush1.bf16.msra.mxu0 %v21521_v36  ;;  %16872 = vmatprep.subr.bf16.mxu1 %v21526_v18  ;;  %v21596_v36 = vld [vmem:[#allocation8 + $0x22e8] ss:$24 sps:$4 sm:$0xff]  }
 0x91a   :  { %17237 = vmatprep.subr.bf16.mxu0 %v21529_v22  ;;  %v21599_v18 = vld [vmem:[#allocation8 + $0x17e0] ss:$24 sps:$4 sm:$0xff]   ;;  %v21604_v22 = vld [vmem:[#allocation8 + $0x231c] ss:$24 sps:$4 sm:$0xff]  }
 0x91c   :  { %16873 = vmatpush1.bf16.msra.mxu1 %v21524_v13  ;;  %v21607_v13 = vld [vmem:[#allocation8 + $0x1814] ss:$24 sps:$4 sm:$0xff]  }
 0x91d   :  { %17238 = vmatpush1.bf16.msra.mxu0 %v21527_v19  ;;  %16874 = vmatprep.subr.bf16.mxu1 %v21532_v24  ;;  %v21602_v19 = vld [vmem:[#allocation8 + $0x2318] ss:$24 sps:$4 sm:$0xff]  }
 0x91e   :  { %17239 = vmatprep.subr.bf16.mxu0 %v21535_v14  ;;  %v21605_v24 = vld [vmem:[#allocation8 + $0x1810] ss:$24 sps:$4 sm:$0xff]   ;;  %v21610_v14 = vld [vmem:[#allocation8 + $0x234c] ss:$24 sps:$4 sm:$0xff]  }
 0x920   :  { %16875 = vmatpush1.bf16.msra.mxu1 %v21530_v52  ;;  %v21613_v52 = vld [vmem:[#allocation8 + $0x1844] ss:$24 sps:$4 sm:$0xff]  }
 0x921   :  { %17240 = vmatpush1.bf16.msra.mxu0 %v21533_v46  ;;  %16887 = vmatprep.subr.bf16.mxu1 %v21538_v62  ;;  %v21608_v46 = vld [vmem:[#allocation8 + $0x2348] ss:$24 sps:$4 sm:$0xff]  }
 0x922   :  { %17241 = vmatprep.subr.bf16.mxu0 %v21541_v37  ;;  %v21611_v62 = vld [vmem:[#allocation8 + $0x1840] ss:$24 sps:$4 sm:$0xff]   ;;  %v21616_v37 = vld [vmem:[#allocation8 + $0x237c] ss:$24 sps:$4 sm:$0xff]  }
 0x923   :  { %16877 = vmatmul.mubr.bf16.vlgmr.msra.gmra.mrb[32].mxu1 %v22466_v9 }
 0x924   :  { %16888 = vmatpush1.bf16.msra.mxu1 %v21536_v54  ;;  %16919 = vmatprep.mubr.bf16.mxu1 %v22543_v44  ;;  %v21619_v54 = vld [vmem:[#allocation8 + $0x1874] ss:$24 sps:$4 sm:$0xff]  }
 0x925   :  { %17242 = vmatpush1.bf16.msra.mxu0 %v21539_v41  ;;  %16889 = vmatprep.subr.bf16.mxu1 %v21544_v11  ;;  %v21614_v41 = vld [vmem:[#allocation8 + $0x2378] ss:$24 sps:$4 sm:$0xff]  }
 0x926   :  { %17243 = vmatprep.subr.bf16.mxu0 %v21547_v10  ;;  %v21617_v11 = vld [vmem:[#allocation8 + $0x1870] ss:$24 sps:$4 sm:$0xff]   ;;  %v21622_v10 = vld [vmem:[#allocation8 + $0x23ac] ss:$24 sps:$4 sm:$0xff]  }
 0x928   :  { %16890 = vmatpush1.bf16.msra.mxu1 %v21542_v28  ;;  %v21625_v28 = vld [vmem:[#allocation8 + $0x18a4] ss:$24 sps:$4 sm:$0xff]  }
 0x929   :  { %17244 = vmatpush1.bf16.msra.mxu0 %v21545_v0  ;;  %16891 = vmatprep.subr.bf16.mxu1 %v21550_v5  ;;  %v21623_v0 = vld [vmem:[#allocation8 + $0x18a0] ss:$24 sps:$4 sm:$0xff]   ;;  %v21628_v5 = vld [vmem:[#allocation8 + $0x23dc] ss:$24 sps:$4 sm:$0xff]  }
 0x92a   :  { %17245 = vmatprep.subr.bf16.mxu0 %v21553_v29  ;;  %v21626_v29 = vld [vmem:[#allocation8 + $0x23d8] ss:$24 sps:$4 sm:$0xff]  }
 0x92c   :  { %16892 = vmatpush1.bf16.msra.mxu1 %v21548_v26  ;;  %v21629_v26 = vld [vmem:[#allocation8 + $0x18d0] ss:$24 sps:$4 sm:$0xff]  }
 0x92d   :  { %17246 = vmatpush1.bf16.msra.mxu0 %v21551_v35  ;;  %16893 = vmatprep.subr.bf16.mxu1 %v21556_v40  ;;  %v21634_v35 = vld [vmem:[#allocation8 + $0x1904] ss:$24 sps:$4 sm:$0xff]   ;;  %v21632_v40 = vld [vmem:[#allocation8 + $0x1900] ss:$24 sps:$4 sm:$0xff]  }
 0x92e   :  { %17247 = vmatprep.subr.bf16.mxu0 %v21559_v16  ;;  %v21637_v16 = vld [vmem:[#allocation8 + $0x1934] ss:$24 sps:$4 sm:$0xff]  }
 0x930   :  { %16894 = vmatpush1.bf16.msra.mxu1 %v21554_v32  ;;  %v21635_v32 = vld [vmem:[#allocation8 + $0x1930] ss:$24 sps:$4 sm:$0xff]  }
 0x931   :  { %17248 = vmatpush1.bf16.msra.mxu0 %v21557_v34  ;;  %16895 = vmatprep.subr.bf16.mxu1 %v21562_v3  ;;  %v21640_v34 = vld [vmem:[#allocation8 + $0x1964] ss:$24 sps:$4 sm:$0xff]   ;;  %v21638_v3 = vld [vmem:[#allocation8 + $0x1960] ss:$24 sps:$4 sm:$0xff]  }
 0x932   :  { %17249 = vmatprep.subr.bf16.mxu0 %v21565_v56  ;;  %v21643_v56 = vld [vmem:[#allocation8 + $0x1994] ss:$24 sps:$4 sm:$0xff]  }
 0x934   :  { %16896 = vmatpush1.bf16.msra.mxu1 %v21560_v57  ;;  %v21641_v57 = vld [vmem:[#allocation8 + $0x1990] ss:$24 sps:$4 sm:$0xff]  }
 0x935   :  { %17250 = vmatpush1.bf16.msra.mxu0 %v21563_v33  ;;  %16897 = vmatprep.subr.bf16.mxu1 %v21568_v20  ;;  %v21646_v33 = vld [vmem:[#allocation8 + $0x19c4] ss:$24 sps:$4 sm:$0xff]   ;;  %v21644_v20 = vld [vmem:[#allocation8 + $0x19c0] ss:$24 sps:$4 sm:$0xff]  }
 0x936   :  { %17251 = vmatprep.subr.bf16.mxu0 %v21571_v6  ;;  %v21649_v6 = vld [vmem:[#allocation8 + $0x19f4] ss:$24 sps:$4 sm:$0xff]  }
 0x938   :  { %16898 = vmatpush1.bf16.msra.mxu1 %v21566_v58  ;;  %v21647_v58 = vld [vmem:[#allocation8 + $0x19f0] ss:$24 sps:$4 sm:$0xff]  }
 0x939   :  { %17252 = vmatpush1.bf16.msra.mxu0 %v21569_v49  ;;  %16899 = vmatprep.subr.bf16.mxu1 %v21574_v7  ;;  %v21652_v49 = vld [vmem:[#allocation8 + $0x1a24] ss:$24 sps:$4 sm:$0xff]   ;;  %v21650_v7 = vld [vmem:[#allocation8 + $0x1a20] ss:$24 sps:$4 sm:$0xff]  }
 0x93a   :  { %17253 = vmatprep.subr.bf16.mxu0 %v21577_v4  ;;  %v21655_v4 = vld [vmem:[#allocation8 + $0x1a54] ss:$24 sps:$4 sm:$0xff]  }
 0x93c   :  { %16900 = vmatpush1.bf16.msra.mxu1 %v21572_v48  ;;  %v21653_v48 = vld [vmem:[#allocation8 + $0x1a50] ss:$24 sps:$4 sm:$0xff]  }
 0x93d   :  { %17254 = vmatpush1.bf16.msra.mxu0 %v21575_v8  ;;  %16901 = vmatprep.subr.bf16.mxu1 %v21580_v51  ;;  %v21658_v8 = vld [vmem:[#allocation8 + $0x1a84] ss:$24 sps:$4 sm:$0xff]   ;;  %v21656_v51 = vld [vmem:[#allocation8 + $0x1a80] ss:$24 sps:$4 sm:$0xff]  }
 0x93e   :  { %17255 = vmatprep.subr.bf16.mxu0 %v21583_v59  ;;  %v21661_v59 = vld [vmem:[#allocation8 + $0x1ab4] ss:$24 sps:$4 sm:$0xff]  }
 0x940   :  { %16902 = vmatpush1.bf16.msra.mxu1 %v21578_v1  ;;  %v21659_v1 = vld [vmem:[#allocation8 + $0x1ab0] ss:$24 sps:$4 sm:$0xff]  }
 0x941   :  { %17256 = vmatpush1.bf16.msra.mxu0 %v21581_v30  ;;  %16903 = vmatprep.subr.bf16.mxu1 %v21586_v39  ;;  %v21664_v30 = vld [vmem:[#allocation8 + $0x1ae4] ss:$24 sps:$4 sm:$0xff]   ;;  %v21662_v39 = vld [vmem:[#allocation8 + $0x1ae0] ss:$24 sps:$4 sm:$0xff]  }
 0x942   :  { %17257 = vmatprep.subr.bf16.mxu0 %v21589_v45  ;;  %v21667_v45 = vld [vmem:[#allocation8 + $0x1b14] ss:$24 sps:$4 sm:$0xff]  }
 0x944   :  { %16904 = vmatpush1.bf16.msra.mxu1 %v21584_v61  ;;  %v21665_v61 = vld [vmem:[#allocation8 + $0x1b10] ss:$24 sps:$4 sm:$0xff]  }
 0x945   :  { %17258 = vmatpush1.bf16.msra.mxu0 %v21587_v17  ;;  %16905 = vmatprep.subr.bf16.mxu1 %v21592_v23  ;;  %v21670_v17 = vld [vmem:[#allocation8 + $0x1b44] ss:$24 sps:$4 sm:$0xff]   ;;  %v21668_v23 = vld [vmem:[#allocation8 + $0x1b40] ss:$24 sps:$4 sm:$0xff]  }
 0x946   :  { %17259 = vmatprep.subr.bf16.mxu0 %v21595_v25  ;;  %v21673_v25 = vld [vmem:[#allocation8 + $0x1b74] ss:$24 sps:$4 sm:$0xff]  }
 0x948   :  { %16906 = vmatpush1.bf16.msra.mxu1 %v21590_v12  ;;  %v21671_v12 = vld [vmem:[#allocation8 + $0x1b70] ss:$24 sps:$4 sm:$0xff]  }
 0x949   :  { %17260 = vmatpush1.bf16.msra.mxu0 %v21593_v31  ;;  %16907 = vmatprep.subr.bf16.mxu1 %v21598_v63  ;;  %v21676_v31 = vld [vmem:[#allocation8 + $0x1ba4] ss:$24 sps:$4 sm:$0xff]   ;;  %v21674_v63 = vld [vmem:[#allocation8 + $0x1ba0] ss:$24 sps:$4 sm:$0xff]  }
 0x94a   :  { %17261 = vmatprep.subr.bf16.mxu0 %v21601_v2  ;;  %v21679_v2 = vld [vmem:[#allocation8 + $0x1bd4] ss:$24 sps:$4 sm:$0xff]  }
 0x94c   :  { %16908 = vmatpush1.bf16.msra.mxu1 %v21596_v36  ;;  %v21677_v36 = vld [vmem:[#allocation8 + $0x1bd0] ss:$24 sps:$4 sm:$0xff]  }
 0x94d   :  { %17262 = vmatpush1.bf16.msra.mxu0 %v21599_v18  ;;  %16909 = vmatprep.subr.bf16.mxu1 %v21604_v22  ;;  %v21682_v18 = vld [vmem:[#allocation8 + $0x1c04] ss:$24 sps:$4 sm:$0xff]   ;;  %v21685_v22 = vld [vmem:[#allocation8 + $0x1c34] ss:$24 sps:$4 sm:$0xff]  }
 0x94e   :  { %17274 = vmatprep.subr.bf16.mxu0 %v21607_v13  ;;  %v21688_v13 = vld [vmem:[#allocation8 + $0x1c64] ss:$24 sps:$4 sm:$0xff]  }
 0x950   :  { %17264 = vmatmul.mubr.bf16.vlgmr.msra.gmra.mrb[20].mxu0 %v22503_v47  ;;  %16910 = vmatpush1.bf16.msra.mxu1 %v21602_v19  ;;  %v21620_v47 = vld [vmem:[#allocation8 + $0x23a8] ss:$24 sps:$4 sm:$0xff]  }
 0x951   :  { %17275 = vmatpush1.bf16.msra.mxu0 %v21605_v24  ;;  %17306 = vmatprep.mubr.bf16.mxu0 %v22406_v27  ;;  %v21631_v27 = vld [vmem:[#allocation8 + $0x18d4] ss:$24 sps:$4 sm:$0xff]   ;;  %v21686_v19 = vld [vmem:[#allocation8 + $0x1c60] ss:$24 sps:$4 sm:$0xff]  }
 0x952   :  { %16911 = vmatprep.subr.bf16.mxu1 %v21610_v14  ;;  %17276 = vmatprep.subr.bf16.mxu0 %v21613_v52  ;;  %v21691_v24 = vld [vmem:[#allocation8 + $0x1c94] ss:$24 sps:$4 sm:$0xff]   ;;  %v21689_v14 = vld [vmem:[#allocation8 + $0x1c90] ss:$24 sps:$4 sm:$0xff]   ;;  %v21694_v52 = vld [vmem:[#allocation8 + $0x1cc4] ss:$24 sps:$4 sm:$0xff]  }
 0x954   :  { %16912 = vmatpush1.bf16.msra.mxu1 %v21608_v46  ;;  %v21692_v46 = vld [vmem:[#allocation8 + $0x1cc0] ss:$24 sps:$4 sm:$0xff]  }
 0x955   :  { %17277 = vmatpush1.bf16.msra.mxu0 %v21611_v62  ;;  %16913 = vmatprep.subr.bf16.mxu1 %v21616_v37  ;;  %v21697_v62 = vld [vmem:[#allocation8 + $0x1cf4] ss:$24 sps:$4 sm:$0xff]   ;;  %v21695_v37 = vld [vmem:[#allocation8 + $0x1cf0] ss:$24 sps:$4 sm:$0xff]  }
 0x956   :  { %17278 = vmatprep.subr.bf16.mxu0 %v21619_v54  ;;  %v21700_v54 = vld [vmem:[#allocation8 + $0x1d24] ss:$24 sps:$4 sm:$0xff]  }
 0x958   :  { %16914 = vmatpush1.bf16.msra.mxu1 %v21614_v41  ;;  %v21698_v41 = vld [vmem:[#allocation8 + $0x1d20] ss:$24 sps:$4 sm:$0xff]  }
 0x959   :  { %17279 = vmatpush1.bf16.msra.mxu0 %v21617_v11  ;;  %16915 = vmatprep.subr.bf16.mxu1 %v21622_v10  ;;  %v21703_v11 = vld [vmem:[#allocation8 + $0x1d54] ss:$24 sps:$4 sm:$0xff]   ;;  %v21701_v10 = vld [vmem:[#allocation8 + $0x1d50] ss:$24 sps:$4 sm:$0xff]  }
 0x95a   :  { %17280 = vmatprep.subr.bf16.mxu0 %v21625_v28  ;;  %v21706_v28 = vld [vmem:[#allocation8 + $0x1d84] ss:$24 sps:$4 sm:$0xff]  }
 0x95c   :  { %16916 = vmatpush1.bf16.msra.mxu1 %v21620_v47  ;;  %v21704_v47 = vld [vmem:[#allocation8 + $0x1d80] ss:$24 sps:$4 sm:$0xff]  }
 0x95d   :  { %17281 = vmatpush1.bf16.msra.mxu0 %v21623_v0  ;;  %16917 = vmatprep.subr.bf16.mxu1 %v21628_v5  ;;  %v21709_v0 = vld [vmem:[#allocation8 + $0x1db4] ss:$24 sps:$4 sm:$0xff]   ;;  %v21707_v5 = vld [vmem:[#allocation8 + $0x1db0] ss:$24 sps:$4 sm:$0xff]  }
 0x95e   :  { %17282 = vmatprep.subr.bf16.mxu0 %v21631_v27  ;;  %v21712_v27 = vld [vmem:[#allocation8 + $0x1de4] ss:$24 sps:$4 sm:$0xff]  }
 0x960   :  { %16918 = vmatpush1.bf16.msra.mxu1 %v21626_v29  ;;  %v21710_v29 = vld [vmem:[#allocation8 + $0x1de0] ss:$24 sps:$4 sm:$0xff]  }
 0x961   :  { %17283 = vmatpush1.bf16.msra.mxu0 %v21629_v26  ;;  %v21715_v26 = vld [vmem:[#allocation8 + $0x1e14] ss:$24 sps:$4 sm:$0xff]  }
 0x962   :  { %17284 = vmatprep.subr.bf16.mxu0 %v21634_v35  ;;  %v21713_v35 = vld [vmem:[#allocation8 + $0x1e10] ss:$24 sps:$4 sm:$0xff]  }
 0x963   :  { %16920 = vmatmul.mubr.bf16.vlgmr.msra.gmra.mrb[32].mxu1 %v22541_v15 }
 0x965   :  { %17285 = vmatpush1.bf16.msra.mxu0 %v21632_v40  ;;  %v21718_v40 = vld [vmem:[#allocation8 + $0x1e44] ss:$24 sps:$4 sm:$0xff]  }
 0x966   :  { %17286 = vmatprep.subr.bf16.mxu0 %v21637_v16  ;;  %v21716_v16 = vld [vmem:[#allocation8 + $0x1e40] ss:$24 sps:$4 sm:$0xff]  }
 0x969   :  { %17287 = vmatpush1.bf16.msra.mxu0 %v21635_v32  ;;  %v21721_v32 = vld [vmem:[#allocation8 + $0x1e74] ss:$24 sps:$4 sm:$0xff]  }
 0x96a   :  { %17288 = vmatprep.subr.bf16.mxu0 %v21640_v34  ;;  %v21719_v34 = vld [vmem:[#allocation8 + $0x1e70] ss:$24 sps:$4 sm:$0xff]  }
 0x96d   :  { %17289 = vmatpush1.bf16.msra.mxu0 %v21638_v3  ;;  %v21724_v3 = vld [vmem:[#allocation8 + $0x1ea4] ss:$24 sps:$4 sm:$0xff]  }
 0x96e   :  { %17290 = vmatprep.subr.bf16.mxu0 %v21643_v56  ;;  %v21722_v56 = vld [vmem:[#allocation8 + $0x1ea0] ss:$24 sps:$4 sm:$0xff]  }
 0x971   :  { %17291 = vmatpush1.bf16.msra.mxu0 %v21641_v57  ;;  %v21727_v57 = vld [vmem:[#allocation8 + $0x1ed4] ss:$24 sps:$4 sm:$0xff]  }
 0x972   :  { %17292 = vmatprep.subr.bf16.mxu0 %v21646_v33  ;;  %v21725_v33 = vld [vmem:[#allocation8 + $0x1ed0] ss:$24 sps:$4 sm:$0xff]  }
 0x975   :  { %17293 = vmatpush1.bf16.msra.mxu0 %v21644_v20  ;;  %v21730_v20 = vld [vmem:[#allocation8 + $0x1f04] ss:$24 sps:$4 sm:$0xff]  }
 0x976   :  { %17294 = vmatprep.subr.bf16.mxu0 %v21649_v6  ;;  %v21733_v6 = vld [vmem:[#allocation8 + $0x1f34] ss:$24 sps:$4 sm:$0xff]  }
 0x979   :  { %17295 = vmatpush1.bf16.msra.mxu0 %v21647_v58  ;;  %v21736_v58 = vld [vmem:[#allocation8 + $0x1f64] ss:$24 sps:$4 sm:$0xff]  }
 0x97a   :  { %17296 = vmatprep.subr.bf16.mxu0 %v21652_v49  ;;  %v21734_v49 = vld [vmem:[#allocation8 + $0x1f60] ss:$24 sps:$4 sm:$0xff]  }
 0x97d   :  { %17297 = vmatpush1.bf16.msra.mxu0 %v21650_v7  ;;  %v21739_v7 = vld [vmem:[#allocation8 + $0x1f94] ss:$24 sps:$4 sm:$0xff]  }
 0x97e   :  { %17298 = vmatprep.subr.bf16.mxu0 %v21655_v4  ;;  %v21737_v4 = vld [vmem:[#allocation8 + $0x1f90] ss:$24 sps:$4 sm:$0xff]  }
 0x981   :  { %17299 = vmatpush1.bf16.msra.mxu0 %v21653_v48  ;;  %v21742_v48 = vld [vmem:[#allocation8 + $0x1fc4] ss:$24 sps:$4 sm:$0xff]  }
 0x982   :  { %17300 = vmatprep.subr.bf16.mxu0 %v21658_v8  ;;  %v21740_v8 = vld [vmem:[#allocation8 + $0x1fc0] ss:$24 sps:$4 sm:$0xff]  }
 0x985   :  { %17301 = vmatpush1.bf16.msra.mxu0 %v21656_v51  ;;  %v21745_v51 = vld [vmem:[#allocation8 + $0x1ff4] ss:$24 sps:$4 sm:$0xff]  }
 0x986   :  { %17302 = vmatprep.subr.bf16.mxu0 %v21661_v59  ;;  %v21743_v59 = vld [vmem:[#allocation8 + $0x1ff0] ss:$24 sps:$4 sm:$0xff]  }
 0x989   :  { %17303 = vmatpush1.bf16.msra.mxu0 %v21659_v1  ;;  %v21748_v1 = vld [vmem:[#allocation8 + $0x2024] ss:$24 sps:$4 sm:$0xff]  }
 0x98a   :  { %17304 = vmatprep.subr.bf16.mxu0 %v21664_v30  ;;  %v21746_v30 = vld [vmem:[#allocation8 + $0x2020] ss:$24 sps:$4 sm:$0xff]  }
 0x98d   :  { %17305 = vmatpush1.bf16.msra.mxu0 %v21662_v39  ;;  %v21751_v39 = vld [vmem:[#allocation8 + $0x2054] ss:$24 sps:$4 sm:$0xff]  }
 0x98e   :  { %17317 = vmatprep.subr.bf16.mxu0 %v21667_v45  ;;  %v21749_v45 = vld [vmem:[#allocation8 + $0x2050] ss:$24 sps:$4 sm:$0xff]  }
 0x990   :  { %17307 = vmatmul.mubr.bf16.vlgmr.msra.gmra.mrb[20].mxu0 %v22404_v53  ;;  %v21680_v53 = vld [vmem:[#allocation8 + $0x1c00] ss:$24 sps:$4 sm:$0xff]  }
 0x991   :  { %17318 = vmatpush1.bf16.msra.mxu0 %v21665_v61  ;;  %17349 = vmatprep.mubr.bf16.mxu0 %v22525_v55  ;;  %v21683_v55 = vld [vmem:[#allocation8 + $0x1c30] ss:$24 sps:$4 sm:$0xff]   ;;  %v21754_v61 = vld [vmem:[#allocation8 + $0x2084] ss:$24 sps:$4 sm:$0xff]  }
 0x992   :  { %17319 = vmatprep.subr.bf16.mxu0 %v21670_v17  ;;  %v21752_v17 = vld [vmem:[#allocation8 + $0x2080] ss:$24 sps:$4 sm:$0xff]  }
 0x995   :  { %17320 = vmatpush1.bf16.msra.mxu0 %v21668_v23  ;;  %v21757_v23 = vld [vmem:[#allocation8 + $0x20b4] ss:$24 sps:$4 sm:$0xff]  }
 0x996   :  { %17321 = vmatprep.subr.bf16.mxu0 %v21673_v25  ;;  %v21755_v25 = vld [vmem:[#allocation8 + $0x20b0] ss:$24 sps:$4 sm:$0xff]  }
 0x999   :  { %17322 = vmatpush1.bf16.msra.mxu0 %v21671_v12  ;;  %v21760_v12 = vld [vmem:[#allocation8 + $0x20e4] ss:$24 sps:$4 sm:$0xff]  }
 0x99a   :  { %17323 = vmatprep.subr.bf16.mxu0 %v21676_v31  ;;  %v21758_v31 = vld [vmem:[#allocation8 + $0x20e0] ss:$24 sps:$4 sm:$0xff]  }
 0x99d   :  { %17324 = vmatpush1.bf16.msra.mxu0 %v21674_v63  ;;  %v21763_v63 = vld [vmem:[#allocation8 + $0x2114] ss:$24 sps:$4 sm:$0xff]  }
 0x99e   :  { %17325 = vmatprep.subr.bf16.mxu0 %v21679_v2  ;;  %v21761_v2 = vld [vmem:[#allocation8 + $0x2110] ss:$24 sps:$4 sm:$0xff]  }
 0x9a1   :  { %17326 = vmatpush1.bf16.msra.mxu0 %v21677_v36  ;;  %v21766_v36 = vld [vmem:[#allocation8 + $0x2144] ss:$24 sps:$4 sm:$0xff]  }
 0x9a2   :  { %17327 = vmatprep.subr.bf16.mxu0 %v21682_v18  ;;  %v21764_v18 = vld [vmem:[#allocation8 + $0x2140] ss:$24 sps:$4 sm:$0xff]  }
 0x9a5   :  { %17328 = vmatpush1.bf16.msra.mxu0 %v21680_v53  ;;  %v21769_v53 = vld [vmem:[#allocation8 + $0x2174] ss:$24 sps:$4 sm:$0xff]  }
 0x9a6   :  { %17329 = vmatprep.subr.bf16.mxu0 %v21685_v22  ;;  %v21767_v22 = vld [vmem:[#allocation8 + $0x2170] ss:$24 sps:$4 sm:$0xff]  }
 0x9a9   :  { %17330 = vmatpush1.bf16.msra.mxu0 %v21683_v55  ;;  %v21772_v55 = vld [vmem:[#allocation8 + $0x21a4] ss:$24 sps:$4 sm:$0xff]  }
 0x9aa   :  { %17331 = vmatprep.subr.bf16.mxu0 %v21688_v13  ;;  %v21770_v13 = vld [vmem:[#allocation8 + $0x21a0] ss:$24 sps:$4 sm:$0xff]  }
 0x9ad   :  { %17332 = vmatpush1.bf16.msra.mxu0 %v21686_v19  ;;  %v21775_v19 = vld [vmem:[#allocation8 + $0x21d4] ss:$24 sps:$4 sm:$0xff]  }
 0x9ae   :  { %17333 = vmatprep.subr.bf16.mxu0 %v21691_v24  ;;  %v21773_v24 = vld [vmem:[#allocation8 + $0x21d0] ss:$24 sps:$4 sm:$0xff]  }
 0x9b1   :  { %17334 = vmatpush1.bf16.msra.mxu0 %v21689_v14  ;;  %v21778_v14 = vld [vmem:[#allocation8 + $0x2204] ss:$24 sps:$4 sm:$0xff]  }
 0x9b2   :  { %17335 = vmatprep.subr.bf16.mxu0 %v21694_v52  ;;  %v21781_v52 = vld [vmem:[#allocation8 + $0x2234] ss:$24 sps:$4 sm:$0xff]  }
 0x9b5   :  { %17336 = vmatpush1.bf16.msra.mxu0 %v21692_v46  ;;  %v21784_v46 = vld [vmem:[#allocation8 + $0x2264] ss:$24 sps:$4 sm:$0xff]  }
 0x9b6   :  { %17337 = vmatprep.subr.bf16.mxu0 %v21697_v62  ;;  %v21782_v62 = vld [vmem:[#allocation8 + $0x2260] ss:$24 sps:$4 sm:$0xff]  }
 0x9b9   :  { %17338 = vmatpush1.bf16.msra.mxu0 %v21695_v37  ;;  %v21787_v37 = vld [vmem:[#allocation8 + $0x2294] ss:$24 sps:$4 sm:$0xff]  }
 0x9ba   :  { %17339 = vmatprep.subr.bf16.mxu0 %v21700_v54  ;;  %v21785_v54 = vld [vmem:[#allocation8 + $0x2290] ss:$24 sps:$4 sm:$0xff]  }
 0x9bd   :  { %17340 = vmatpush1.bf16.msra.mxu0 %v21698_v41  ;;  %v21790_v41 = vld [vmem:[#allocation8 + $0x22c4] ss:$24 sps:$4 sm:$0xff]  }
 0x9be   :  { %17341 = vmatprep.subr.bf16.mxu0 %v21703_v11  ;;  %v21788_v11 = vld [vmem:[#allocation8 + $0x22c0] ss:$24 sps:$4 sm:$0xff]  }
 0x9c1   :  { %17342 = vmatpush1.bf16.msra.mxu0 %v21701_v10  ;;  %v21793_v10 = vld [vmem:[#allocation8 + $0x22f4] ss:$24 sps:$4 sm:$0xff]  }
 0x9c2   :  { %17343 = vmatprep.subr.bf16.mxu0 %v21706_v28  ;;  %v21912_v28 = vld [vmem:[#allocation10] sm:$0x3f] }
 0x9c5   :  { %17344 = vmatpush1.bf16.msra.mxu0 %v21704_v47  ;;  %v10119_v47 = vrot.slane %v21912_v28, %v22281_v38  ;;  %v21799_v38 = vld [vmem:[#allocation8 + $0x2354] ss:$24 sps:$4 sm:$0xff]  }
 0x9c6   :  { %17345 = vmatprep.subr.bf16.mxu0 %v21709_v0  ;;  %v10123_v0 = vrot.slane %v21912_v28, %v22284_v42  ;;  %v21797_v42 = vld [vmem:[#allocation8 + $0x2350] ss:$24 sps:$4 sm:$0xff]  }
 0x9c9   :  { %17346 = vmatpush1.bf16.msra.mxu0 %v21707_v5  ;;  %v21791_v5 = vld [vmem:[#allocation8 + $0x22f0] ss:$24 sps:$4 sm:$0xff]  }
 0x9ca   :  { %17347 = vmatprep.subr.bf16.mxu0 %v21712_v27 }
 0x9cd   :  { %17348 = vmatpush1.bf16.msra.mxu0 %v21710_v29  ;;  %v21796_v29 = vld [vmem:[#allocation8 + $0x2324] ss:$24 sps:$4 sm:$0xff]  }
 0x9ce   :  { %17360 = vmatprep.subr.bf16.mxu0 %v21715_v26 }
 0x9d0   :  { %17350 = vmatmul.mubr.bf16.vlgmr.msra.gmra.mrb[20].mxu0 %v22523_v21  ;;  %v21728_v21 = vld [vmem:[#allocation8 + $0x1f00] ss:$24 sps:$4 sm:$0xff]  }
 0x9d1   :  { %17361 = vmatpush1.bf16.msra.mxu0 %v21713_v35  ;;  %17392 = vmatprep.mubr.bf16.mxu0 %v22468_v60  ;;  %v21731_v60 = vld [vmem:[#allocation8 + $0x1f30] ss:$24 sps:$4 sm:$0xff]  }
 0x9d2   :  { %17362 = vmatprep.subr.bf16.mxu0 %v21718_v40 }
 0x9d5   :  { %17363 = vmatpush1.bf16.msra.mxu0 %v21716_v16 }
 0x9d6   :  { %17364 = vmatprep.subr.bf16.mxu0 %v21721_v32 }
 0x9d9   :  { %17365 = vmatpush1.bf16.msra.mxu0 %v21719_v34 }
 0x9da   :  { %17366 = vmatprep.subr.bf16.mxu0 %v21724_v3  ;;  %v21794_v3 = vld [vmem:[#allocation8 + $0x2320] ss:$24 sps:$4 sm:$0xff]  }
 0x9dd   :  { %17367 = vmatpush1.bf16.msra.mxu0 %v21722_v56 }
 0x9de   :  { %17368 = vmatprep.subr.bf16.mxu0 %v21727_v57  ;;  %v21802_v57 = vld [vmem:[#allocation8 + $0x2384] ss:$24 sps:$4 sm:$0xff]  }
 0x9e1   :  { %17369 = vmatpush1.bf16.msra.mxu0 %v21725_v33  ;;  %v21800_v33 = vld [vmem:[#allocation8 + $0x2380] ss:$24 sps:$4 sm:$0xff]  }
 0x9e2   :  { %17370 = vmatprep.subr.bf16.mxu0 %v21730_v20  ;;  %v21805_v20 = vld [vmem:[#allocation8 + $0x23b4] ss:$24 sps:$4 sm:$0xff]  }
 0x9e5   :  { %17371 = vmatpush1.bf16.msra.mxu0 %v21728_v21  ;;  %v21803_v21 = vld [vmem:[#allocation8 + $0x23b0] ss:$24 sps:$4 sm:$0xff]  }
 0x9e6   :  { %17372 = vmatprep.subr.bf16.mxu0 %v21733_v6  ;;  %v21808_v6 = vld [vmem:[#allocation8 + $0x23e4] ss:$24 sps:$4 sm:$0xff]  }
 0x9e9   :  { %17373 = vmatpush1.bf16.msra.mxu0 %v21731_v60  ;;  %v21806_v60 = vld [vmem:[#allocation8 + $0x23e0] ss:$24 sps:$4 sm:$0xff]  }
 0x9ea   :  { %17374 = vmatprep.subr.bf16.mxu0 %v21736_v58  ;;  %v10127_v58 = vrot.slane %v21912_v28, %v22287_v43 }
 0x9ed   :  { %17375 = vmatpush1.bf16.msra.mxu0 %v21734_v49  ;;  %v10131_v49 = vrot.slane %v21912_v28, %v22290_v50 }
 0x9ee   :  { %17376 = vmatprep.subr.bf16.mxu0 %v21739_v7 }
 0x9f1   :  { %17377 = vmatpush1.bf16.msra.mxu0 %v21737_v4 }
 0x9f2   :  { %17378 = vmatprep.subr.bf16.mxu0 %v21742_v48 }
 0x9f5   :  { %17379 = vmatpush1.bf16.msra.mxu0 %v21740_v8 }
 0x9f6   :  { %17380 = vmatprep.subr.bf16.mxu0 %v21745_v51 }
 0x9f9   :  { %17381 = vmatpush1.bf16.msra.mxu0 %v21743_v59 }
 0x9fa   :  { %17382 = vmatprep.subr.bf16.mxu0 %v21748_v1 }
 0x9fd   :  { %17383 = vmatpush1.bf16.msra.mxu0 %v21746_v30 }
 0x9fe   :  { %17384 = vmatprep.subr.bf16.mxu0 %v21751_v39 }
 0xa01   :  { %17385 = vmatpush1.bf16.msra.mxu0 %v21749_v45 }
 0xa02   :  { %17386 = vmatprep.subr.bf16.mxu0 %v21754_v61 }
 0xa05   :  { %17387 = vmatpush1.bf16.msra.mxu0 %v21752_v17 }
 0xa06   :  { %17388 = vmatprep.subr.bf16.mxu0 %v21757_v23 }
 0xa09   :  { %17389 = vmatpush1.bf16.msra.mxu0 %v21755_v25 }
 0xa0a   :  { %17390 = vmatprep.subr.bf16.mxu0 %v21760_v12 }
 0xa0d   :  { %17391 = vmatpush1.bf16.msra.mxu0 %v21758_v31 }
 0xa0e   :  { %17403 = vmatprep.subr.bf16.mxu0 %v21763_v63 }
 0xa10   :  { %17393 = vmatmul.mubr.bf16.vlgmr.msra.gmra.mrb[20].mxu0 %v22466_v9  ;;  %v21776_v9 = vld [vmem:[#allocation8 + $0x2200] ss:$24 sps:$4 sm:$0xff]  }
 0xa11   :  { %17404 = vmatpush1.bf16.msra.mxu0 %v21761_v2  ;;  %17435 = vmatprep.mubr.bf16.mxu0 %v22543_v44  ;;  %v21779_v44 = vld [vmem:[#allocation8 + $0x2230] ss:$24 sps:$4 sm:$0xff]  }
 0xa12   :  { %17405 = vmatprep.subr.bf16.mxu0 %v21766_v36 }
 0xa15   :  { %17406 = vmatpush1.bf16.msra.mxu0 %v21764_v18 }
 0xa16   :  { %17407 = vmatprep.subr.bf16.mxu0 %v21769_v53 }
 0xa19   :  { %17408 = vmatpush1.bf16.msra.mxu0 %v21767_v22 }
 0xa1a   :  { %17409 = vmatprep.subr.bf16.mxu0 %v21772_v55 }
 0xa1d   :  { %17410 = vmatpush1.bf16.msra.mxu0 %v21770_v13 }
 0xa1e   :  { %17411 = vmatprep.subr.bf16.mxu0 %v21775_v19 }
 0xa21   :  { %17412 = vmatpush1.bf16.msra.mxu0 %v21773_v24 }
 0xa22   :  { %17413 = vmatprep.subr.bf16.mxu0 %v21778_v14 }
 0xa25   :  { %17414 = vmatpush1.bf16.msra.mxu0 %v21776_v9 }
 0xa26   :  { %17415 = vmatprep.subr.bf16.mxu0 %v21781_v52 }
 0xa29   :  { %17416 = vmatpush1.bf16.msra.mxu0 %v21779_v44 }
 0xa2a   :  { %17417 = vmatprep.subr.bf16.mxu0 %v21784_v46 }
 0xa2d   :  { %17418 = vmatpush1.bf16.msra.mxu0 %v21782_v62 }
 0xa2e   :  { %17419 = vmatprep.subr.bf16.mxu0 %v21787_v37 }
 0xa31   :  { %17420 = vmatpush1.bf16.msra.mxu0 %v21785_v54 }
 0xa32   :  { %17421 = vmatprep.subr.bf16.mxu0 %v21790_v41 }
 0xa35   :  { %17422 = vmatpush1.bf16.msra.mxu0 %v21788_v11 }
 0xa36   :  { %v16921_v27 = vpop.f32.mrb[32].mxu1  ;;  %17423 = vmatprep.subr.bf16.mxu0 %v21793_v10 }
 0xa37   :  { %v19833_v26 = vadd.f32 %v16921_v27, %v10119_v47  ;;  %v16923_v35 = vpop.f32.mrb[33].mxu1 }
 0xa38   :  { %v19834_v40 = vadd.f32 %v16923_v35, %v10123_v0  ;;  %v16925_v16 = vpop.f32.mrb[34].mxu1 }
 0xa39   :  { %17448 = vst [vmem:[#allocation11 + $0x10] sm:$0xff] %v19833_v26  ;;  %v19835_v32 = vadd.f32 %v16925_v16, %v10119_v47  ;;  %17424 = vmatpush1.bf16.msra.mxu0 %v21791_v5  ;;  %v16927_v34 = vpop.f32.mrb[35].mxu1 }
 0xa3a   :  { %17449 = vst [vmem:[#allocation11 + $0x18] sm:$0xff] %v19834_v40  ;;  %v19836_v56 = vadd.f32 %v16927_v34, %v10123_v0  ;;  %17425 = vmatprep.subr.bf16.mxu0 %v21796_v29 }
 0xa3b   :  { %17454 = vst [vmem:[#allocation11 + $0x40] sm:$0xff] %v19835_v32 }
 0xa3c   :  { %17455 = vst [vmem:[#allocation11 + $0x48] sm:$0xff] %v19836_v56 }
 0xa3d   :  { %17426 = vmatpush1.bf16.msra.mxu0 %v21794_v3 }
 0xa3e   :  { %17427 = vmatprep.subr.bf16.mxu0 %v21799_v38 }
 0xa41   :  { %17428 = vmatpush1.bf16.msra.mxu0 %v21797_v42 }
 0xa42   :  { %17429 = vmatprep.subr.bf16.mxu0 %v21802_v57 }
 0xa45   :  { %17430 = vmatpush1.bf16.msra.mxu0 %v21800_v33 }
 0xa46   :  { %17431 = vmatprep.subr.bf16.mxu0 %v21805_v20 }
 0xa49   :  { %17432 = vmatpush1.bf16.msra.mxu0 %v21803_v21 }
 0xa4a   :  { %17433 = vmatprep.subr.bf16.mxu0 %v21808_v6 }
 0xa4d   :  { %17434 = vmatpush1.bf16.msra.mxu0 %v21806_v60 }
 0xa50   :  { %17436 = vmatmul.mubr.bf16.vlgmr.msra.gmra.mrb[20].mxu0 %v22541_v15 }
 0xb23   :  { %v17437_v7 = vpop.f32.mrb[20].mxu0 }
 0xb24   :  { %v19837_v4 = vadd.f32 %v17437_v7, %v10127_v58  ;;  %v17439_v48 = vpop.f32.mrb[21].mxu0 }
 0xb25   :  { %v19838_v8 = vadd.f32 %v17439_v48, %v10131_v49  ;;  %v17441_v51 = vpop.f32.mrb[22].mxu0 }
 0xb26   :  { %17450 = vst [vmem:[#allocation11 + $0x20] sm:$0xff] %v19837_v4  ;;  %v19839_v59 = vadd.f32 %v17441_v51, %v10127_v58  ;;  %v17443_v1 = vpop.f32.mrb[23].mxu0 }
 0xb27   :  { %17451 = vst [vmem:[#allocation11 + $0x28] sm:$0xff] %v19838_v8  ;;  %v19840_v30 = vadd.f32 %v17443_v1, %v10131_v49 }
 0xb28   :  { %17456 = vst [vmem:[#allocation11 + $0x50] sm:$0xff] %v19839_v59 }
 0xb29   :  { %17457 = vst [vmem:[#allocation11 + $0x58] sm:$0xff] %v19840_v30 }
 0xb2a   :  { %22034 = shalt.err (!%p22031_p2)
}
 0xb2b   :  { %s22035_s9 = scalar_lea.hbm %s22614_s5, 1536 }
 0xb2c   :  { %p22036_p3 = scmp.ne.s32.totalorder %s22614_s5, %s22035_s9  ;;  %p22039_p4 = scmp.lt.u32.totalorder %s22035_s9, %s22614_s5 }
 0xb2e   :  { %p22041_p5 = pnand %p22039_p4, %p22036_p3 }
 0xb30   :  { %22044 = shalt.err (!%p22041_p5)
}
 0xb31   :  { %17469 = dma.vmem_to_hbm [thread:$0]  %s17464_s29, 1536, %s22614_s5, [#allocation4], %s22060_s3, %s22060_s3, %s22061_s30  }
 0xb32   :  { %22051 = dma.done.wait [#allocation4], 1536  }
 0xb33   :  { %22052 = vsyncadd [#allocation4], 4294965760 }
 0xb34   :  { %17473 = vsyncpa [#allocation3], 1 }
 0xb35   :  { %17474 = vsyncpa [#allocation6], 1 }
 0xb36   :  { %17475 = vsyncpa [#allocation9], 1 }
 0xb37   :  { %17476 = vsyncpa [#allocation4], 1 }

</bundles_post_ra>
